<compile_context>
chip_gen: v7x
topology: tpu7x:2x2x1
jax: 0.10.0
libtpu: 0.0.40
codegen_flags: <defaults>
</compile_context>

<pallas_src>
import numpy as np
import jax
import jax.numpy as jnp
from jax.experimental import pallas as pl
from jax.experimental.pallas import tpu as pltpu

SIZE_OF_IMG = 16
S1 = SIZE_OF_IMG            # conv1 spatial size
S2 = SIZE_OF_IMG // 2       # conv2 spatial size (after pool1)
S3 = SIZE_OF_IMG // 4       # spatial size after pool2
C0, C1, C2 = 3, 6, 12       # channel counts
FC1, FC2 = 8 * 16, 32       # fc hidden sizes
FC3P = 8                    # fc3 out_features padded 1 -> 8 (full sublane tile)

D_IN = C0 * S1 * S1         # 768: flattened (cin, i, j) input pixels per image
G1 = C1 * (S1 // 2) ** 2    # 384: conv1 rows per pool-window group
G2 = C2 * (S2 // 2) ** 2    # 192: conv2 rows per pool-window group (== fc1 in_features)

BLOCK_B = 128               # images per grid step == lane width


# ---------------------------------------------------------------------------
# Fused forward kernel: one grid step == one block of BLOCK_B images (batch in lanes)
# ---------------------------------------------------------------------------
def s2cnn_kernel(x_ref, w1_ref, b1_ref, w2_ref, b2_ref,
                 wf1_ref, bf1_ref, wf2_ref, bf2_ref, wf3_ref, bf3_ref, o_ref):
    x = x_ref[...]                                                       # (768, B) bf16

    # conv1: dense-unrolled 5x5 'same' conv, rows pre-grouped as (win, cout, pooled-pix)
    y1 = jnp.dot(w1_ref[...], x, preferred_element_type=jnp.float32)    # (1536, B) f32
    # 2x2/2 maxpool == max over the 4 contiguous row groups; then bias + ReLU (f32 VPU)
    p1 = jnp.maximum(jnp.maximum(y1[0 * G1:1 * G1], y1[1 * G1:2 * G1]),
                     jnp.maximum(y1[2 * G1:3 * G1], y1[3 * G1:4 * G1]))
    z1 = jnp.maximum(p1 + b1_ref[...], 0.0).astype(jnp.bfloat16)         # (384, B)

    # conv2: same construction (K = 384); pool2 over the 4 row groups.
    y2 = jnp.dot(w2_ref[...], z1, preferred_element_type=jnp.float32)   # (768, B) f32
    p2 = jnp.maximum(jnp.maximum(y2[0 * G2:1 * G2], y2[1 * G2:2 * G2]),
                     jnp.maximum(y2[2 * G2:3 * G2], y2[3 * G2:4 * G2]))
    z2 = jnp.maximum(p2 + b2_ref[...], 0.0).astype(jnp.bfloat16)         # (192, B)
    # z2 rows are (cout2, i, j) == torch.flatten(x, 1) order -> fc1 is a plain matmul.

    # TODO(synk): nn.Dropout(p=0.2) is an inference-mode identity here (no RNG mask).
    a1 = jnp.maximum(jnp.dot(wf1_ref[...], z2, preferred_element_type=jnp.float32)
                     + bf1_ref[...], 0.0).astype(jnp.bfloat16)           # (128, B)
    a2 = jnp.maximum(jnp.dot(wf2_ref[...], a1, preferred_element_type=jnp.float32)
                     + bf2_ref[...], 0.0).astype(jnp.bfloat16)           # (32, B)
    o_ref[...] = (jnp.dot(wf3_ref[...], a2, preferred_element_type=jnp.float32)
                  + bf3_ref[...])                                        # (8, B) f32


# ---------------------------------------------------------------------------
# Wrapper-side weight unrolling (pure layout/plumbing, done once per call)
# ---------------------------------------------------------------------------
def _conv_pool_dense(w, h):
    """Unroll a 5x5 'same' conv into a dense matrix with pool-grouped output rows.

    w: (cout, cin, 5, 5).  Returns (4*cout*(h//2)**2, cin*h*h) where row
    (win*cout + o)*(h//2)**2 + q is conv output channel o at pixel
    (2*(q // (h//2)) + win//2, 2*(q % (h//2)) + win%2), and columns are the flattened
    (cin, i, j) conv input.  Out-of-bounds taps ('same' zero padding) stay zero, so
    conv == one matmul and 2x2 maxpool == max over the 4 'win' row groups.
    """
    cout, cin = w.shape[0], w.shape[1]
    oh = h // 2
    nq = oh * oh
    sel = np.zeros((4, nq, 25, h * h), np.float32)      # static one-hot gather
    for win in range(4):
        di, dj = win // 2, win % 2
        for i2 in range(oh):
            for j2 in range(oh):
                q = i2 * oh + j2
                ci, cj = 2 * i2 + di, 2 * j2 + dj       # conv output pixel
                for kh in range(5):
                    for kw in range(5):
                        si, sj = ci + kh - 2, cj + kw - 2
                        if 0 <= si < h and 0 <= sj < h:
                            sel[win, q, kh * 5 + kw, si * h + sj] = 1.0
    wr = w.reshape(cout, cin, 25)
    dense = jnp.einsum('oct,wqtp->woqcp', wr, jnp.asarray(sel))
    return dense.reshape(4 * cout * nq, cin * h * h)


def _const_spec(arr):
    zero = (0,) * arr.ndim
    return pl.BlockSpec(arr.shape, lambda i, _z=zero: _z)


def s2cnn_forward(params, img, block_b=BLOCK_B):
    n = img.shape[0]
    n_blocks = pl.cdiv(n, block_b)
    n_pad = n_blocks * block_b

    # Batch-in-lanes input slab: (cin*h*w, N) bf16, lane dim padded to a block multiple.
    x_t = img.reshape(n, D_IN).T.astype(jnp.bfloat16)
    x_t = jnp.pad(x_t, ((0, 0), (0, n_pad - n)))

    # Kernel-ready weights (bf16 MXU operands; biases stay f32 column vectors).
    w1d = _conv_pool_dense(params["c1_w"], S1).astype(jnp.bfloat16)       # (1536, 768)
    w2d = _conv_pool_dense(params["c2_w"], S2).astype(jnp.bfloat16)       # (768, 384)
    b1c = jnp.repeat(params["c1_b"], (S1 // 2) ** 2).reshape(G1, 1)       # (384, 1)
    b2c = jnp.repeat(params["c2_b"], (S2 // 2) ** 2).reshape(G2, 1)       # (192, 1)
    wf1 = params["fc1_w"].astype(jnp.bfloat16)                            # (128, 192)
    wf2 = params["fc2_w"].astype(jnp.bfloat16)                            # (32, 128)
    wf3 = jnp.pad(params["fc3_w"], ((0, FC3P - 1), (0, 0))).astype(jnp.bfloat16)  # (8, 32)
    bf1 = params["fc1_b"].reshape(FC1, 1)
    bf2 = params["fc2_b"].reshape(FC2, 1)
    bf3 = jnp.pad(params["fc3_b"], (0, FC3P - 1)).reshape(FC3P, 1)

    out = pl.pallas_call(
        s2cnn_kernel,
        out_shape=jax.ShapeDtypeStruct((FC3P, n_pad), jnp.float32),
        grid=(n_blocks,),
        in_specs=[
            pl.BlockSpec((D_IN, block_b), lambda i: (0, i)),
            _const_spec(w1d), _const_spec(b1c),
            _const_spec(w2d), _const_spec(b2c),
            _const_spec(wf1), _const_spec(bf1),
            _const_spec(wf2), _const_spec(bf2),
            _const_spec(wf3), _const_spec(bf3),
        ],
        out_specs=pl.BlockSpec((FC3P, block_b), lambda i: (0, i)),
        compiler_params=pltpu.CompilerParams(dimension_semantics=("parallel",)),
    )(x_t, w1d, b1c, w2d, b2c, wf1, bf1, wf2, bf2, wf3, bf3)

    return out[0, :n].reshape(n, 1)                                       # (n, 1) f32


# ---------------------------------------------------------------------------
# Pure-JAX reference (f32) for a tolerance check, param init, demo
# ---------------------------------------------------------------------------
def s2cnn_reference(params, img):
    dn = ("NCHW", "OIHW", "NCHW")
    x = jax.lax.conv_general_dilated(img, params["c1_w"], (1, 1), "SAME",
                                     dimension_numbers=dn)
    x = x + params["c1_b"][None, :, None, None]
    x = jax.nn.relu(jax.lax.reduce_window(x, -jnp.inf, jax.lax.max,
                                          (1, 1, 2, 2), (1, 1, 2, 2), "VALID"))
    x = jax.lax.conv_general_dilated(x, params["c2_w"], (1, 1), "SAME",
                                     dimension_numbers=dn)
    x = x + params["c2_b"][None, :, None, None]
    x = jax.nn.relu(jax.lax.reduce_window(x, -jnp.inf, jax.lax.max,
                                          (1, 1, 2, 2), (1, 1, 2, 2), "VALID"))
    x = x.reshape(x.shape[0], -1)
    x = jax.nn.relu(x @ params["fc1_w"].T + params["fc1_b"])
    x = jax.nn.relu(x @ params["fc2_w"].T + params["fc2_b"])
    return x @ params["fc3_w"].T + params["fc3_b"]


def init_params(key):
    ks = jax.random.split(key, 10)

    def u(k, shape, fan_in):
        bound = 1.0 / jnp.sqrt(fan_in)
        return jax.random.uniform(k, shape, jnp.float32, -bound, bound)

    fin1 = C2 * S3 * S3
    return {
        "c1_w": u(ks[0], (C1, C0, 5, 5), C0 * 25),
        "c1_b": u(ks[1], (C1,), C0 * 25),
        "c2_w": u(ks[2], (C2, C1, 5, 5), C1 * 25),
        "c2_b": u(ks[3], (C2,), C1 * 25),
        "fc1_w": u(ks[4], (FC1, fin1), fin1),      # torch Linear layout (out, in)
        "fc1_b": u(ks[5], (FC1,), fin1),
        "fc2_w": u(ks[6], (FC2, FC1), FC1),
        "fc2_b": u(ks[7], (FC2,), FC1),
        "fc3_w": u(ks[8], (1, FC2), FC2),
        "fc3_b": u(ks[9], (1,), FC2),
    }


if __name__ == "__main__":
    key = jax.random.PRNGKey(0)
    k_img, k_param = jax.random.split(key)
    img = jax.random.normal(k_img, (2, C0, SIZE_OF_IMG, SIZE_OF_IMG), jnp.float32)
    params = init_params(k_param)

    out = jax.jit(s2cnn_forward)(params, img)
    out = jax.block_until_ready(out)
    assert out.shape == (2, 1), out.shape
    assert out.dtype == jnp.float32
    assert bool(jnp.all(jnp.isfinite(out)))

    ref = s2cnn_reference(params, img)
    assert bool(jnp.allclose(out, ref, rtol=3e-2, atol=3e-2)), (out, ref)
    print("KERNEL_OK")
</pallas_src>

<mosaic_0001>
module attributes {stable_mosaic.version = 11 : i64} {
  func.func @s2cnn_kernel(%arg0: i32, %arg1: memref<768x128xbf16, #tpu.memory_space<vmem>>, %arg2: memref<1536x768xbf16, #tpu.memory_space<vmem>>, %arg3: memref<384x1xf32, #tpu.memory_space<vmem>>, %arg4: memref<768x384xbf16, #tpu.memory_space<vmem>>, %arg5: memref<192x1xf32, #tpu.memory_space<vmem>>, %arg6: memref<128x192xbf16, #tpu.memory_space<vmem>>, %arg7: memref<128x1xf32, #tpu.memory_space<vmem>>, %arg8: memref<32x128xbf16, #tpu.memory_space<vmem>>, %arg9: memref<32x1xf32, #tpu.memory_space<vmem>>, %arg10: memref<8x32xbf16, #tpu.memory_space<vmem>>, %arg11: memref<8x1xf32, #tpu.memory_space<vmem>>, %arg12: memref<8x128xf32, #tpu.memory_space<vmem>>) attributes {dimension_semantics = [#tpu.dimension_semantics<parallel>], iteration_bounds = array<i64: 1>, scalar_prefetch = 0 : i64, scratch_operands = 0 : i64, tpu.core_type = #tpu.core_type<tc>, window_params = [{transform_indices = @transform_0, window_bounds = array<i64: 768, 128>}, {pipeline_mode = #tpu.pipeline_mode<synchronous>, transform_indices = @transform_1, window_bounds = array<i64: 1536, 768>}, {pipeline_mode = #tpu.pipeline_mode<synchronous>, transform_indices = @transform_2, window_bounds = array<i64: 384, 1>}, {pipeline_mode = #tpu.pipeline_mode<synchronous>, transform_indices = @transform_3, window_bounds = array<i64: 768, 384>}, {pipeline_mode = #tpu.pipeline_mode<synchronous>, transform_indices = @transform_4, window_bounds = array<i64: 192, 1>}, {pipeline_mode = #tpu.pipeline_mode<synchronous>, transform_indices = @transform_5, window_bounds = array<i64: 128, 192>}, {pipeline_mode = #tpu.pipeline_mode<synchronous>, transform_indices = @transform_6, window_bounds = array<i64: 128, 1>}, {pipeline_mode = #tpu.pipeline_mode<synchronous>, transform_indices = @transform_7, window_bounds = array<i64: 32, 128>}, {pipeline_mode = #tpu.pipeline_mode<synchronous>, transform_indices = @transform_8, window_bounds = array<i64: 32, 1>}, {pipeline_mode = #tpu.pipeline_mode<synchronous>, transform_indices = @transform_9, window_bounds = array<i64: 8, 32>}, {pipeline_mode = #tpu.pipeline_mode<synchronous>, transform_indices = @transform_10, window_bounds = array<i64: 8, 1>}, {transform_indices = @transform_11, window_bounds = array<i64: 8, 128>}]} {
    %c0 = arith.constant 0 : index
    %c0_0 = arith.constant 0 : index
    %0 = vector.load %arg1[%c0, %c0_0] : memref<768x128xbf16, #tpu.memory_space<vmem>>, vector<768x128xbf16>
    %c0_1 = arith.constant 0 : index
    %c0_2 = arith.constant 0 : index
    %1 = vector.load %arg2[%c0_1, %c0_2] : memref<1536x768xbf16, #tpu.memory_space<vmem>>, vector<1536x768xbf16>
    %cst = arith.constant dense<0.000000e+00> : vector<1536x128xf32>
    %2 = tpu.matmul %1, %0, %cst {dimension_numbers = #tpu.dot_dimension_numbers<[1], [0], [0], [1], [0, 0, 1, 1], [], []>} : vector<1536x768xbf16>, vector<768x128xbf16>, vector<1536x128xf32> -> vector<1536x128xf32>
    %3 = vector.extract_strided_slice %2 {offsets = [0, 0], sizes = [384, 128], strides = [1, 1]} : vector<1536x128xf32> to vector<384x128xf32>
    %4 = vector.extract_strided_slice %2 {offsets = [384, 0], sizes = [384, 128], strides = [1, 1]} : vector<1536x128xf32> to vector<384x128xf32>
    %5 = arith.maximumf %3, %4 : vector<384x128xf32>
    %6 = vector.extract_strided_slice %2 {offsets = [768, 0], sizes = [384, 128], strides = [1, 1]} : vector<1536x128xf32> to vector<384x128xf32>
    %7 = vector.extract_strided_slice %2 {offsets = [1152, 0], sizes = [384, 128], strides = [1, 1]} : vector<1536x128xf32> to vector<384x128xf32>
    %8 = arith.maximumf %6, %7 : vector<384x128xf32>
    %9 = arith.maximumf %5, %8 : vector<384x128xf32>
    %c0_3 = arith.constant 0 : index
    %c0_4 = arith.constant 0 : index
    %10 = vector.load %arg3[%c0_3, %c0_4] : memref<384x1xf32, #tpu.memory_space<vmem>>, vector<384x1xf32>
    %11 = vector.broadcast %10 : vector<384x1xf32> to vector<384x128xf32>
    %12 = arith.addf %9, %11 : vector<384x128xf32>
    %cst_5 = arith.constant 0.000000e+00 : f32
    %13 = vector.broadcast %cst_5 : f32 to vector<384x128xf32>
    %14 = arith.maximumf %12, %13 : vector<384x128xf32>
    %15 = arith.truncf %14 : vector<384x128xf32> to vector<384x128xbf16>
    %c0_6 = arith.constant 0 : index
    %c0_7 = arith.constant 0 : index
    %16 = vector.load %arg4[%c0_6, %c0_7] : memref<768x384xbf16, #tpu.memory_space<vmem>>, vector<768x384xbf16>
    %cst_8 = arith.constant dense<0.000000e+00> : vector<768x128xf32>
    %17 = tpu.matmul %16, %15, %cst_8 {dimension_numbers = #tpu.dot_dimension_numbers<[1], [0], [0], [1], [0, 0, 1, 1], [], []>} : vector<768x384xbf16>, vector<384x128xbf16>, vector<768x128xf32> -> vector<768x128xf32>
    %18 = vector.extract_strided_slice %17 {offsets = [0, 0], sizes = [192, 128], strides = [1, 1]} : vector<768x128xf32> to vector<192x128xf32>
    %19 = vector.extract_strided_slice %17 {offsets = [192, 0], sizes = [192, 128], strides = [1, 1]} : vector<768x128xf32> to vector<192x128xf32>
    %20 = arith.maximumf %18, %19 : vector<192x128xf32>
    %21 = vector.extract_strided_slice %17 {offsets = [384, 0], sizes = [192, 128], strides = [1, 1]} : vector<768x128xf32> to vector<192x128xf32>
    %22 = vector.extract_strided_slice %17 {offsets = [576, 0], sizes = [192, 128], strides = [1, 1]} : vector<768x128xf32> to vector<192x128xf32>
    %23 = arith.maximumf %21, %22 : vector<192x128xf32>
    %24 = arith.maximumf %20, %23 : vector<192x128xf32>
    %c0_9 = arith.constant 0 : index
    %c0_10 = arith.constant 0 : index
    %25 = vector.load %arg5[%c0_9, %c0_10] : memref<192x1xf32, #tpu.memory_space<vmem>>, vector<192x1xf32>
    %26 = vector.broadcast %25 : vector<192x1xf32> to vector<192x128xf32>
    %27 = arith.addf %24, %26 : vector<192x128xf32>
    %cst_11 = arith.constant 0.000000e+00 : f32
    %28 = vector.broadcast %cst_11 : f32 to vector<192x128xf32>
    %29 = arith.maximumf %27, %28 : vector<192x128xf32>
    %30 = arith.truncf %29 : vector<192x128xf32> to vector<192x128xbf16>
    %c0_12 = arith.constant 0 : index
    %c0_13 = arith.constant 0 : index
    %31 = vector.load %arg6[%c0_12, %c0_13] : memref<128x192xbf16, #tpu.memory_space<vmem>>, vector<128x192xbf16>
    %cst_14 = arith.constant dense<0.000000e+00> : vector<128x128xf32>
    %32 = tpu.matmul %31, %30, %cst_14 {dimension_numbers = #tpu.dot_dimension_numbers<[1], [0], [0], [1], [0, 0, 1, 1], [], []>} : vector<128x192xbf16>, vector<192x128xbf16>, vector<128x128xf32> -> vector<128x128xf32>
    %c0_15 = arith.constant 0 : index
    %c0_16 = arith.constant 0 : index
    %33 = vector.load %arg7[%c0_15, %c0_16] : memref<128x1xf32, #tpu.memory_space<vmem>>, vector<128x1xf32>
    %34 = vector.broadcast %33 : vector<128x1xf32> to vector<128x128xf32>
    %35 = arith.addf %32, %34 : vector<128x128xf32>
    %cst_17 = arith.constant 0.000000e+00 : f32
    %36 = vector.broadcast %cst_17 : f32 to vector<128x128xf32>
    %37 = arith.maximumf %35, %36 : vector<128x128xf32>
    %38 = arith.truncf %37 : vector<128x128xf32> to vector<128x128xbf16>
    %c0_18 = arith.constant 0 : index
    %c0_19 = arith.constant 0 : index
    %39 = vector.load %arg8[%c0_18, %c0_19] : memref<32x128xbf16, #tpu.memory_space<vmem>>, vector<32x128xbf16>
    %cst_20 = arith.constant dense<0.000000e+00> : vector<32x128xf32>
    %40 = tpu.matmul %39, %38, %cst_20 {dimension_numbers = #tpu.dot_dimension_numbers<[1], [0], [0], [1], [0, 0, 1, 1], [], []>} : vector<32x128xbf16>, vector<128x128xbf16>, vector<32x128xf32> -> vector<32x128xf32>
    %c0_21 = arith.constant 0 : index
    %c0_22 = arith.constant 0 : index
    %41 = vector.load %arg9[%c0_21, %c0_22] : memref<32x1xf32, #tpu.memory_space<vmem>>, vector<32x1xf32>
    %42 = vector.broadcast %41 : vector<32x1xf32> to vector<32x128xf32>
    %43 = arith.addf %40, %42 : vector<32x128xf32>
    %cst_23 = arith.constant 0.000000e+00 : f32
    %44 = vector.broadcast %cst_23 : f32 to vector<32x128xf32>
    %45 = arith.maximumf %43, %44 : vector<32x128xf32>
    %46 = arith.truncf %45 : vector<32x128xf32> to vector<32x128xbf16>
    %c0_24 = arith.constant 0 : index
    %c0_25 = arith.constant 0 : index
    %47 = vector.load %arg10[%c0_24, %c0_25] : memref<8x32xbf16, #tpu.memory_space<vmem>>, vector<8x32xbf16>
    %cst_26 = arith.constant dense<0.000000e+00> : vector<8x128xf32>
    %48 = tpu.matmul %47, %46, %cst_26 {dimension_numbers = #tpu.dot_dimension_numbers<[1], [0], [0], [1], [0, 0, 1, 1], [], []>} : vector<8x32xbf16>, vector<32x128xbf16>, vector<8x128xf32> -> vector<8x128xf32>
    %c0_27 = arith.constant 0 : index
    %c0_28 = arith.constant 0 : index
    %49 = vector.load %arg11[%c0_27, %c0_28] : memref<8x1xf32, #tpu.memory_space<vmem>>, vector<8x1xf32>
    %50 = vector.broadcast %49 : vector<8x1xf32> to vector<8x128xf32>
    %51 = arith.addf %48, %50 : vector<8x128xf32>
    %c0_29 = arith.constant 0 : index
    %c0_30 = arith.constant 0 : index
    %52 = vector.load %arg12[%c0_29, %c0_30] : memref<8x128xf32, #tpu.memory_space<vmem>>, vector<8x128xf32>
    tpu.vector_store %arg12[%c0_29, %c0_30], %51 {strides = array<i32>} : memref<8x128xf32, #tpu.memory_space<vmem>>, vector<8x128xf32>,
    return
  }
  func.func @transform_0(%arg0: i32) -> (i32, i32) {
    %c0_i32 = arith.constant 0 : i32
    %c0_i32_0 = arith.constant 0 : i32
    return %c0_i32, %arg0 : i32, i32
  }
  func.func @transform_1(%arg0: i32) -> (i32, i32) {
    %c0_i32 = arith.constant 0 : i32
    %c0_i32_0 = arith.constant 0 : i32
    %c0_i32_1 = arith.constant 0 : i32
    return %c0_i32, %c0_i32_0 : i32, i32
  }
  func.func @transform_2(%arg0: i32) -> (i32, i32) {
    %c0_i32 = arith.constant 0 : i32
    %c0_i32_0 = arith.constant 0 : i32
    %c0_i32_1 = arith.constant 0 : i32
    return %c0_i32, %c0_i32_0 : i32, i32
  }
  func.func @transform_3(%arg0: i32) -> (i32, i32) {
    %c0_i32 = arith.constant 0 : i32
    %c0_i32_0 = arith.constant 0 : i32
    %c0_i32_1 = arith.constant 0 : i32
    return %c0_i32, %c0_i32_0 : i32, i32
  }
  func.func @transform_4(%arg0: i32) -> (i32, i32) {
    %c0_i32 = arith.constant 0 : i32
    %c0_i32_0 = arith.constant 0 : i32
    %c0_i32_1 = arith.constant 0 : i32
    return %c0_i32, %c0_i32_0 : i32, i32
  }
  func.func @transform_5(%arg0: i32) -> (i32, i32) {
    %c0_i32 = arith.constant 0 : i32
    %c0_i32_0 = arith.constant 0 : i32
    %c0_i32_1 = arith.constant 0 : i32
    return %c0_i32, %c0_i32_0 : i32, i32
  }
  func.func @transform_6(%arg0: i32) -> (i32, i32) {
    %c0_i32 = arith.constant 0 : i32
    %c0_i32_0 = arith.constant 0 : i32
    %c0_i32_1 = arith.constant 0 : i32
    return %c0_i32, %c0_i32_0 : i32, i32
  }
  func.func @transform_7(%arg0: i32) -> (i32, i32) {
    %c0_i32 = arith.constant 0 : i32
    %c0_i32_0 = arith.constant 0 : i32
    %c0_i32_1 = arith.constant 0 : i32
    return %c0_i32, %c0_i32_0 : i32, i32
  }
  func.func @transform_8(%arg0: i32) -> (i32, i32) {
    %c0_i32 = arith.constant 0 : i32
    %c0_i32_0 = arith.constant 0 : i32
    %c0_i32_1 = arith.constant 0 : i32
    return %c0_i32, %c0_i32_0 : i32, i32
  }
  func.func @transform_9(%arg0: i32) -> (i32, i32) {
    %c0_i32 = arith.constant 0 : i32
    %c0_i32_0 = arith.constant 0 : i32
    %c0_i32_1 = arith.constant 0 : i32
    return %c0_i32, %c0_i32_0 : i32, i32
  }
  func.func @transform_10(%arg0: i32) -> (i32, i32) {
    %c0_i32 = arith.constant 0 : i32
    %c0_i32_0 = arith.constant 0 : i32
    %c0_i32_1 = arith.constant 0 : i32
    return %c0_i32, %c0_i32_0 : i32, i32
  }
  func.func @transform_11(%arg0: i32) -> (i32, i32) {
    %c0_i32 = arith.constant 0 : i32
    %c0_i32_0 = arith.constant 0 : i32
    return %c0_i32, %arg0 : i32, i32
  }
}

</mosaic_0001>

<bundles_post_ra>
// kernel: s2cnn_forward.1
= control target key start
LH: loop header
LB: loop body
LE: loop exit
PB: predicated region body
PF: predicated region fallthrough
CT: control target
= control target key end

     0   :  { %v16583_v0 = vmov 0   ;;  %vm9088_vm0 = vcmask 523264   ;;  %vm12038_vm1 = vmmov 0   ;;  %vm9336_vm2 = vcmask 261120   ;;  %s16571_s0 = inlined_call_operand.vmem [shape: bf16[768,128], index: 0, kind: input, shape index: {}]   ;;  %s16572_s1 = inlined_call_operand.vmem [shape: bf16[1536,768], index: 1, kind: input, shape index: {}]   ;;  %s16573_s2 = inlined_call_operand.vmem [shape: f32[384,1], index: 2, kind: input, shape index: {}]   ;;  %s16574_s4 = inlined_call_operand.vmem [shape: f32[192,1], index: 4, kind: input, shape index: {}]   ;;  %s16575_s6 = inlined_call_operand.vmem [shape: f32[128,1], index: 6, kind: input, shape index: {}]   ;;  %s16576_s8 = inlined_call_operand.vmem [shape: f32[32,1], index: 8, kind: input, shape index: {}]   ;;  %s16577_s10 = inlined_call_operand.vmem [shape: f32[8,1], index: 10, kind: input, shape index: {}]   ;;  %s16578_s3 = inlined_call_operand.vmem [shape: bf16[768,384], index: 3, kind: input, shape index: {}]   ;;  %s16579_s5 = inlined_call_operand.vmem [shape: bf16[128,192], index: 5, kind: input, shape index: {}]   ;;  %s16580_s7 = inlined_call_operand.vmem [shape: bf16[32,128], index: 7, kind: input, shape index: {}]   ;;  %s16581_s9 = inlined_call_operand.vmem [shape: bf16[8,32], index: 9, kind: input, shape index: {}]   ;;  %s16582_s11 = inlined_call_operand.vmem [shape: f32[8,128], index: 11, kind: output, shape index: {}]  }
   0x1   :  { %3879 = vmatprep.subr.bf16.mxu1 %v16583_v0  ;;  %4680 = vmatprep.subr.bf16.mxu0 %v16583_v0  ;;  %v10906_v1 = vld [vmem:[%s16571_s0] sm:$0xff]   ;;  %v10908_v3 = vld [vmem:[%s16571_s0 + $0x8] sm:$0xff]   ;;  %v10910_v5 = vld [vmem:[%s16571_s0 + $0x10] sm:$0xff]  }
   0x2   :  { %v10907_v2 = vld [vmem:[%s16571_s0 + $0x80] sm:$0xff]   ;;  %10904 = vset.pattern.permute.xlu0 %v16583_v0  ;;  %10905 = vset.pattern.permute.xlu1 %v16583_v0  ;;  %v10909_v4 = vld [vmem:[%s16571_s0 + $0x88] sm:$0xff]   ;;  %v10911_v6 = vld [vmem:[%s16571_s0 + $0x90] sm:$0xff]  }
   0x3   :  { %3880 = vmatpush1.bf16.msra.mxu1 %v10906_v1  ;;  %4681 = vmatpush1.bf16.msra.mxu0 %v10907_v2  ;;  %v10912_v7 = vld [vmem:[%s16571_s0 + $0x18] sm:$0xff]   ;;  %v10914_v9 = vld [vmem:[%s16571_s0 + $0x20] sm:$0xff]   ;;  %v10916_v11 = vld [vmem:[%s16571_s0 + $0x28] sm:$0xff]  }
   0x4   :  { %3881 = vmatprep.subr.bf16.mxu1 %v16583_v0  ;;  %4682 = vmatprep.subr.bf16.mxu0 %v16583_v0  ;;  %v10913_v8 = vld [vmem:[%s16571_s0 + $0x98] sm:$0xff]   ;;  %v10915_v10 = vld [vmem:[%s16571_s0 + $0xa0] sm:$0xff]   ;;  %v10917_v12 = vld [vmem:[%s16571_s0 + $0xa8] sm:$0xff]  }
   0x5   :  { %v10918_v13 = vld [vmem:[%s16571_s0 + $0x30] sm:$0xff]   ;;  %v10920_v15 = vld [vmem:[%s16571_s0 + $0x38] sm:$0xff]   ;;  %v10922_v17 = vld [vmem:[%s16571_s0 + $0x40] sm:$0xff]  }
   0x6   :  { %v10919_v14 = vld [vmem:[%s16571_s0 + $0xb0] sm:$0xff]   ;;  %v10921_v16 = vld [vmem:[%s16571_s0 + $0xb8] sm:$0xff]   ;;  %v10923_v18 = vld [vmem:[%s16571_s0 + $0xc0] sm:$0xff]  }
   0x7   :  { %3882 = vmatpush1.bf16.msra.mxu1 %v10908_v3  ;;  %4683 = vmatpush1.bf16.msra.mxu0 %v10909_v4  ;;  %v10940_v19 = vld [vmem:[%s16572_s1 + $0x4] ss:$24 sps:$4 sm:$0xff]   ;;  %v10924_v20 = vld [vmem:[%s16571_s0 + $0x48] sm:$0xff]   ;;  %v10926_v23 = vld [vmem:[%s16571_s0 + $0x50] sm:$0xff]  }
   0x8   :  { %3883 = vmatprep.subr.bf16.mxu1 %v16583_v0  ;;  %4684 = vmatprep.subr.bf16.mxu0 %v16583_v0  ;;  %v10943_v21 = vld [vmem:[%s16572_s1 + $0xc] ss:$24 sps:$4 sm:$0xff]   ;;  %v10927_v24 = vld [vmem:[%s16571_s0 + $0xd0] sm:$0xff]   ;;  %v10928_v25 = vld [vmem:[%s16571_s0 + $0x58] sm:$0xff]  }
   0x9   :  { %v10925_v22 = vld [vmem:[%s16571_s0 + $0xc8] sm:$0xff]   ;;  %3911 = vmatprep.mubr.bf16.mxu1 %v10940_v19  ;;  %4712 = vmatprep.mubr.bf16.mxu0 %v10943_v21  ;;  %v10929_v26 = vld [vmem:[%s16571_s0 + $0xd8] sm:$0xff]   ;;  %v10930_v27 = vld [vmem:[%s16571_s0 + $0x60] sm:$0xff]  }
   0xa   :  { %v10931_v28 = vld [vmem:[%s16571_s0 + $0xe0] sm:$0xff]   ;;  %v10932_v29 = vld [vmem:[%s16571_s0 + $0x68] sm:$0xff]   ;;  %v10934_v31 = vld [vmem:[%s16571_s0 + $0x70] sm:$0xff]  }
   0xb   :  { %3884 = vmatpush1.bf16.msra.mxu1 %v10910_v5  ;;  %4685 = vmatpush1.bf16.msra.mxu0 %v10911_v6  ;;  %v10933_v30 = vld [vmem:[%s16571_s0 + $0xe8] sm:$0xff]   ;;  %v10935_v32 = vld [vmem:[%s16571_s0 + $0xf0] sm:$0xff]   ;;  %v10936_v33 = vld [vmem:[%s16571_s0 + $0x78] sm:$0xff]  }
   0xc   :  { %3885 = vmatprep.subr.bf16.mxu1 %v16583_v0  ;;  %4686 = vmatprep.subr.bf16.mxu0 %v16583_v0  ;;  %v10937_v34 = vld [vmem:[%s16571_s0 + $0xf8] sm:$0xff]   ;;  %v10941_v36 = vld [vmem:[%s16572_s1 + $0x8] ss:$24 sps:$4 sm:$0xff]   ;;  %v10944_v37 = vld [vmem:[%s16572_s1 + $0x34] ss:$24 sps:$4 sm:$0xff]  }
   0xd   :  { %v10938_v35 = vld [vmem:[%s16572_s1] ss:$24 sps:$4 sm:$0xff]   ;;  %v10946_v38 = vld [vmem:[%s16572_s1 + $0x3c] ss:$24 sps:$4 sm:$0xff]   ;;  %v10948_v39 = vld [vmem:[%s16572_s1 + $0x30] ss:$24 sps:$4 sm:$0xff]  }
   0xe   :  { %v10949_v40 = vld [vmem:[%s16572_s1 + $0x38] ss:$24 sps:$4 sm:$0xff]   ;;  %v10950_v41 = vld [vmem:[%s16572_s1 + $0x64] ss:$24 sps:$4 sm:$0xff]   ;;  %v10955_v44 = vld [vmem:[%s16572_s1 + $0x68] ss:$24 sps:$4 sm:$0xff]  }
   0xf   :  { %3886 = vmatpush1.bf16.msra.mxu1 %v10912_v7  ;;  %4687 = vmatpush1.bf16.msra.mxu0 %v10913_v8  ;;  %v10952_v42 = vld [vmem:[%s16572_s1 + $0x6c] ss:$24 sps:$4 sm:$0xff]   ;;  %v10954_v43 = vld [vmem:[%s16572_s1 + $0x60] ss:$24 sps:$4 sm:$0xff]   ;;  %v10958_v46 = vld [vmem:[%s16572_s1 + $0x9c] ss:$24 sps:$4 sm:$0xff]  }
  0x10   :  { %3887 = vmatprep.subr.bf16.mxu1 %v16583_v0  ;;  %4688 = vmatprep.subr.bf16.mxu0 %v16583_v0  ;;  %v10956_v45 = vld [vmem:[%s16572_s1 + $0x94] ss:$24 sps:$4 sm:$0xff]   ;;  %v10960_v47 = vld [vmem:[%s16572_s1 + $0x90] ss:$24 sps:$4 sm:$0xff]   ;;  %v10962_v49 = vld [vmem:[%s16572_s1 + $0xc4] ss:$24 sps:$4 sm:$0xff]  }
  0x11   :  { %v10961_v48 = vld [vmem:[%s16572_s1 + $0x98] ss:$24 sps:$4 sm:$0xff]   ;;  %v10964_v50 = vld [vmem:[%s16572_s1 + $0xcc] ss:$24 sps:$4 sm:$0xff]   ;;  %v10967_v52 = vld [vmem:[%s16572_s1 + $0xc8] ss:$24 sps:$4 sm:$0xff]  }
  0x12   :  { %v10966_v51 = vld [vmem:[%s16572_s1 + $0xc0] ss:$24 sps:$4 sm:$0xff]   ;;  %v10968_v53 = vld [vmem:[%s16572_s1 + $0xf4] ss:$24 sps:$4 sm:$0xff]   ;;  %v10972_v55 = vld [vmem:[%s16572_s1 + $0xf0] ss:$24 sps:$4 sm:$0xff]  }
  0x13   :  { %3888 = vmatpush1.bf16.msra.mxu1 %v10914_v9  ;;  %4689 = vmatpush1.bf16.msra.mxu0 %v10915_v10  ;;  %v10970_v54 = vld [vmem:[%s16572_s1 + $0xfc] ss:$24 sps:$4 sm:$0xff]   ;;  %v10973_v56 = vld [vmem:[%s16572_s1 + $0xf8] ss:$24 sps:$4 sm:$0xff]   ;;  %v10976_v58 = vld [vmem:[%s16572_s1 + $0x12c] ss:$24 sps:$4 sm:$0xff]  }
  0x14   :  { %3889 = vmatprep.subr.bf16.mxu1 %v16583_v0  ;;  %4690 = vmatprep.subr.bf16.mxu0 %v16583_v0  ;;  %v10974_v57 = vld [vmem:[%s16572_s1 + $0x124] ss:$24 sps:$4 sm:$0xff]   ;;  %v10978_v59 = vld [vmem:[%s16572_s1 + $0x120] ss:$24 sps:$4 sm:$0xff]   ;;  %v10980_v61 = vld [vmem:[%s16572_s1 + $0x154] ss:$24 sps:$4 sm:$0xff]  }
  0x15   :  { %v10979_v60 = vld [vmem:[%s16572_s1 + $0x128] ss:$24 sps:$4 sm:$0xff]   ;;  %v10982_v62 = vld [vmem:[%s16572_s1 + $0x15c] ss:$24 sps:$4 sm:$0xff]   ;;  %v10985_v1 = vld [vmem:[%s16572_s1 + $0x158] ss:$24 sps:$4 sm:$0xff]  }
  0x16   :  { %v10984_v63 = vld [vmem:[%s16572_s1 + $0x150] ss:$24 sps:$4 sm:$0xff]   ;;  %v10986_v2 = vld [vmem:[%s16572_s1 + $0x184] ss:$24 sps:$4 sm:$0xff]   ;;  %v10990_v4 = vld [vmem:[%s16572_s1 + $0x180] ss:$24 sps:$4 sm:$0xff]  }
  0x17   :  { %3890 = vmatpush1.bf16.msra.mxu1 %v10916_v11  ;;  %4691 = vmatpush1.bf16.msra.mxu0 %v10917_v12  ;;  %v10988_v3 = vld [vmem:[%s16572_s1 + $0x18c] ss:$24 sps:$4 sm:$0xff]   ;;  %v10991_v5 = vld [vmem:[%s16572_s1 + $0x188] ss:$24 sps:$4 sm:$0xff]   ;;  %v10994_v7 = vld [vmem:[%s16572_s1 + $0x1bc] ss:$24 sps:$4 sm:$0xff]  }
  0x18   :  { %3891 = vmatprep.subr.bf16.mxu1 %v16583_v0  ;;  %4692 = vmatprep.subr.bf16.mxu0 %v16583_v0  ;;  %v10992_v6 = vld [vmem:[%s16572_s1 + $0x1b4] ss:$24 sps:$4 sm:$0xff]   ;;  %v10996_v8 = vld [vmem:[%s16572_s1 + $0x1b0] ss:$24 sps:$4 sm:$0xff]   ;;  %v10998_v10 = vld [vmem:[%s16572_s1 + $0x1e4] ss:$24 sps:$4 sm:$0xff]  }
  0x19   :  { %v10997_v9 = vld [vmem:[%s16572_s1 + $0x1b8] ss:$24 sps:$4 sm:$0xff]   ;;  %v11000_v11 = vld [vmem:[%s16572_s1 + $0x1ec] ss:$24 sps:$4 sm:$0xff]   ;;  %v11015_v21 = vld [vmem:[%s16572_s1 + $0x248] ss:$24 sps:$4 sm:$0xff]  }
  0x1a   :  { %v11002_v12 = vld [vmem:[%s16572_s1 + $0x1e0] ss:$24 sps:$4 sm:$0xff]   ;;  %v11012_v19 = vld [vmem:[%s16572_s1 + $0x24c] ss:$24 sps:$4 sm:$0xff]  }
  0x1b   :  { %3892 = vmatpush1.bf16.msra.mxu1 %v10918_v13  ;;  %4693 = vmatpush1.bf16.msra.mxu0 %v10919_v14  ;;  %v11003_v13 = vld [vmem:[%s16572_s1 + $0x1e8] ss:$24 sps:$4 sm:$0xff]   ;;  %v11004_v14 = vld [vmem:[%s16572_s1 + $0x214] ss:$24 sps:$4 sm:$0xff]  }
  0x1c   :  { %3893 = vmatprep.subr.bf16.mxu1 %v16583_v0  ;;  %4694 = vmatprep.subr.bf16.mxu0 %v16583_v0 }
  0x1f   :  { %3894 = vmatpush1.bf16.msra.mxu1 %v10920_v15  ;;  %4695 = vmatpush1.bf16.msra.mxu0 %v10921_v16  ;;  %v11006_v15 = vld [vmem:[%s16572_s1 + $0x21c] ss:$24 sps:$4 sm:$0xff]   ;;  %v11008_v16 = vld [vmem:[%s16572_s1 + $0x210] ss:$24 sps:$4 sm:$0xff]  }
  0x20   :  { %3895 = vmatprep.subr.bf16.mxu1 %v16583_v0  ;;  %4696 = vmatprep.subr.bf16.mxu0 %v16583_v0 }
  0x23   :  { %3896 = vmatpush1.bf16.msra.mxu1 %v10922_v17  ;;  %4697 = vmatpush1.bf16.msra.mxu0 %v10923_v18  ;;  %v11009_v17 = vld [vmem:[%s16572_s1 + $0x218] ss:$24 sps:$4 sm:$0xff]   ;;  %v11010_v18 = vld [vmem:[%s16572_s1 + $0x244] ss:$24 sps:$4 sm:$0xff]  }
  0x24   :  { %3897 = vmatprep.subr.bf16.mxu1 %v16583_v0  ;;  %4698 = vmatprep.subr.bf16.mxu0 %v16583_v0 }
  0x27   :  { %3898 = vmatpush1.bf16.msra.mxu1 %v10924_v20  ;;  %4699 = vmatpush1.bf16.msra.mxu0 %v10925_v22  ;;  %v11014_v20 = vld [vmem:[%s16572_s1 + $0x240] ss:$24 sps:$4 sm:$0xff]   ;;  %v11016_v22 = vld [vmem:[%s16572_s1 + $0x274] ss:$24 sps:$4 sm:$0xff]  }
  0x28   :  { %3899 = vmatprep.subr.bf16.mxu1 %v16583_v0  ;;  %4700 = vmatprep.subr.bf16.mxu0 %v16583_v0 }
  0x2b   :  { %3900 = vmatpush1.bf16.msra.mxu1 %v10926_v23  ;;  %4701 = vmatpush1.bf16.msra.mxu0 %v10927_v24  ;;  %v11018_v23 = vld [vmem:[%s16572_s1 + $0x27c] ss:$24 sps:$4 sm:$0xff]   ;;  %v11020_v24 = vld [vmem:[%s16572_s1 + $0x270] ss:$24 sps:$4 sm:$0xff]  }
  0x2c   :  { %3901 = vmatprep.subr.bf16.mxu1 %v16583_v0  ;;  %4702 = vmatprep.subr.bf16.mxu0 %v16583_v0 }
  0x2f   :  { %3902 = vmatpush1.bf16.msra.mxu1 %v10928_v25  ;;  %4703 = vmatpush1.bf16.msra.mxu0 %v10929_v26  ;;  %v11021_v25 = vld [vmem:[%s16572_s1 + $0x278] ss:$24 sps:$4 sm:$0xff]   ;;  %v11022_v26 = vld [vmem:[%s16572_s1 + $0x2a4] ss:$24 sps:$4 sm:$0xff]  }
  0x30   :  { %3903 = vmatprep.subr.bf16.mxu1 %v16583_v0  ;;  %4704 = vmatprep.subr.bf16.mxu0 %v16583_v0 }
  0x33   :  { %3904 = vmatpush1.bf16.msra.mxu1 %v10930_v27  ;;  %4705 = vmatpush1.bf16.msra.mxu0 %v10931_v28  ;;  %v11024_v27 = vld [vmem:[%s16572_s1 + $0x2ac] ss:$24 sps:$4 sm:$0xff]   ;;  %v11026_v28 = vld [vmem:[%s16572_s1 + $0x2a0] ss:$24 sps:$4 sm:$0xff]  }
  0x34   :  { %3905 = vmatprep.subr.bf16.mxu1 %v16583_v0  ;;  %4706 = vmatprep.subr.bf16.mxu0 %v16583_v0 }
  0x37   :  { %3906 = vmatpush1.bf16.msra.mxu1 %v10932_v29  ;;  %4707 = vmatpush1.bf16.msra.mxu0 %v10933_v30  ;;  %v11027_v29 = vld [vmem:[%s16572_s1 + $0x2a8] ss:$24 sps:$4 sm:$0xff]   ;;  %v11028_v30 = vld [vmem:[%s16572_s1 + $0x2d4] ss:$24 sps:$4 sm:$0xff]  }
  0x38   :  { %3907 = vmatprep.subr.bf16.mxu1 %v16583_v0  ;;  %4708 = vmatprep.subr.bf16.mxu0 %v16583_v0 }
  0x3b   :  { %3908 = vmatpush1.bf16.msra.mxu1 %v10934_v31  ;;  %4709 = vmatpush1.bf16.msra.mxu0 %v10935_v32  ;;  %v11030_v31 = vld [vmem:[%s16572_s1 + $0x2dc] ss:$24 sps:$4 sm:$0xff]   ;;  %v11032_v32 = vld [vmem:[%s16572_s1 + $0x2d0] ss:$24 sps:$4 sm:$0xff]  }
  0x3c   :  { %3909 = vmatprep.subr.bf16.mxu1 %v16583_v0  ;;  %4710 = vmatprep.subr.bf16.mxu0 %v16583_v0 }
  0x3f   :  { %3910 = vmatpush1.bf16.msra.mxu1 %v10936_v33  ;;  %4711 = vmatpush1.bf16.msra.mxu0 %v10937_v34  ;;  %v11033_v33 = vld [vmem:[%s16572_s1 + $0x2d8] ss:$24 sps:$4 sm:$0xff]   ;;  %v11034_v34 = vld [vmem:[%s16572_s1 + $0x304] ss:$24 sps:$4 sm:$0xff]  }
  0x40   :  { %7794 = vmatprep.subr.bf16.mxu1 %v16583_v0  ;;  %5481 = vmatprep.subr.bf16.mxu0 %v16583_v0  ;;  %v11268_v0 = vld [vmem:[%s16572_s1 + $0xa54] ss:$24 sps:$4 sm:$0xff]  }
  0x42   :  { %3912 = vmatmul.mubr.bf16.vlgmr.msra.gmra.mrb[0].mxu1 %v10938_v35  ;;  %4713 = vmatmul.mubr.bf16.vlgmr.msra.gmra.mrb[0].mxu0 %v10941_v36  ;;  %v11036_v35 = vld [vmem:[%s16572_s1 + $0x30c] ss:$24 sps:$4 sm:$0xff]   ;;  %v11038_v36 = vld [vmem:[%s16572_s1 + $0x300] ss:$24 sps:$4 sm:$0xff]  }
  0x43   :  { %3919 = vmatprep.mubr.bf16.mxu1 %v10944_v37  ;;  %4720 = vmatprep.mubr.bf16.mxu0 %v10946_v38  ;;  %v11039_v37 = vld [vmem:[%s16572_s1 + $0x308] ss:$24 sps:$4 sm:$0xff]   ;;  %v11040_v38 = vld [vmem:[%s16572_s1 + $0x334] ss:$24 sps:$4 sm:$0xff]  }
  0x4a   :  { %3920 = vmatmul.mubr.bf16.gmra.mrb[4].mxu1 %v10948_v39  ;;  %4721 = vmatmul.mubr.bf16.gmra.mrb[4].mxu0 %v10949_v40  ;;  %v11042_v39 = vld [vmem:[%s16572_s1 + $0x33c] ss:$24 sps:$4 sm:$0xff]   ;;  %v11044_v40 = vld [vmem:[%s16572_s1 + $0x330] ss:$24 sps:$4 sm:$0xff]  }
  0x4b   :  { %3927 = vmatprep.mubr.bf16.mxu1 %v10950_v41  ;;  %4728 = vmatprep.mubr.bf16.mxu0 %v10952_v42  ;;  %v11045_v41 = vld [vmem:[%s16572_s1 + $0x338] ss:$24 sps:$4 sm:$0xff]   ;;  %v11046_v42 = vld [vmem:[%s16572_s1 + $0x364] ss:$24 sps:$4 sm:$0xff]  }
  0x52   :  { %3928 = vmatmul.mubr.bf16.gmra.mrb[8].mxu1 %v10954_v43  ;;  %4729 = vmatmul.mubr.bf16.gmra.mrb[8].mxu0 %v10955_v44  ;;  %v11048_v43 = vld [vmem:[%s16572_s1 + $0x36c] ss:$24 sps:$4 sm:$0xff]   ;;  %v11050_v44 = vld [vmem:[%s16572_s1 + $0x360] ss:$24 sps:$4 sm:$0xff]  }
  0x53   :  { %3935 = vmatprep.mubr.bf16.mxu1 %v10956_v45  ;;  %4736 = vmatprep.mubr.bf16.mxu0 %v10958_v46  ;;  %v11051_v45 = vld [vmem:[%s16572_s1 + $0x368] ss:$24 sps:$4 sm:$0xff]   ;;  %v11052_v46 = vld [vmem:[%s16572_s1 + $0x394] ss:$24 sps:$4 sm:$0xff]  }
  0x5a   :  { %3936 = vmatmul.mubr.bf16.gmra.mrb[12].mxu1 %v10960_v47  ;;  %4737 = vmatmul.mubr.bf16.gmra.mrb[12].mxu0 %v10961_v48  ;;  %v11054_v47 = vld [vmem:[%s16572_s1 + $0x39c] ss:$24 sps:$4 sm:$0xff]   ;;  %v11056_v48 = vld [vmem:[%s16572_s1 + $0x390] ss:$24 sps:$4 sm:$0xff]  }
  0x5b   :  { %3943 = vmatprep.mubr.bf16.mxu1 %v10962_v49  ;;  %4744 = vmatprep.mubr.bf16.mxu0 %v10964_v50  ;;  %v11057_v49 = vld [vmem:[%s16572_s1 + $0x398] ss:$24 sps:$4 sm:$0xff]   ;;  %v11058_v50 = vld [vmem:[%s16572_s1 + $0x3c4] ss:$24 sps:$4 sm:$0xff]  }
  0x62   :  { %3944 = vmatmul.mubr.bf16.gmra.mrb[16].mxu1 %v10966_v51  ;;  %4745 = vmatmul.mubr.bf16.gmra.mrb[16].mxu0 %v10967_v52  ;;  %v11060_v51 = vld [vmem:[%s16572_s1 + $0x3cc] ss:$24 sps:$4 sm:$0xff]   ;;  %v11062_v52 = vld [vmem:[%s16572_s1 + $0x3c0] ss:$24 sps:$4 sm:$0xff]  }
  0x63   :  { %3951 = vmatprep.mubr.bf16.mxu1 %v10968_v53  ;;  %4752 = vmatprep.mubr.bf16.mxu0 %v10970_v54  ;;  %v11063_v53 = vld [vmem:[%s16572_s1 + $0x3c8] ss:$24 sps:$4 sm:$0xff]   ;;  %v11064_v54 = vld [vmem:[%s16572_s1 + $0x3f4] ss:$24 sps:$4 sm:$0xff]  }
  0x6a   :  { %3952 = vmatmul.mubr.bf16.gmra.mrb[20].mxu1 %v10972_v55  ;;  %4753 = vmatmul.mubr.bf16.gmra.mrb[20].mxu0 %v10973_v56  ;;  %v11066_v55 = vld [vmem:[%s16572_s1 + $0x3fc] ss:$24 sps:$4 sm:$0xff]   ;;  %v11068_v56 = vld [vmem:[%s16572_s1 + $0x3f0] ss:$24 sps:$4 sm:$0xff]  }
  0x6b   :  { %3959 = vmatprep.mubr.bf16.mxu1 %v10974_v57  ;;  %4760 = vmatprep.mubr.bf16.mxu0 %v10976_v58  ;;  %v11069_v57 = vld [vmem:[%s16572_s1 + $0x3f8] ss:$24 sps:$4 sm:$0xff]   ;;  %v11070_v58 = vld [vmem:[%s16572_s1 + $0x424] ss:$24 sps:$4 sm:$0xff]  }
  0x72   :  { %3960 = vmatmul.mubr.bf16.gmra.mrb[24].mxu1 %v10978_v59  ;;  %4761 = vmatmul.mubr.bf16.gmra.mrb[24].mxu0 %v10979_v60  ;;  %v11072_v59 = vld [vmem:[%s16572_s1 + $0x42c] ss:$24 sps:$4 sm:$0xff]   ;;  %v11074_v60 = vld [vmem:[%s16572_s1 + $0x420] ss:$24 sps:$4 sm:$0xff]  }
  0x73   :  { %3967 = vmatprep.mubr.bf16.mxu1 %v10980_v61  ;;  %4768 = vmatprep.mubr.bf16.mxu0 %v10982_v62  ;;  %v11075_v61 = vld [vmem:[%s16572_s1 + $0x428] ss:$24 sps:$4 sm:$0xff]   ;;  %v11076_v62 = vld [vmem:[%s16572_s1 + $0x454] ss:$24 sps:$4 sm:$0xff]  }
  0x7a   :  { %3968 = vmatmul.mubr.bf16.gmra.mrb[28].mxu1 %v10984_v63  ;;  %4769 = vmatmul.mubr.bf16.gmra.mrb[28].mxu0 %v10985_v1  ;;  %v11078_v63 = vld [vmem:[%s16572_s1 + $0x45c] ss:$24 sps:$4 sm:$0xff]   ;;  %v11080_v1 = vld [vmem:[%s16572_s1 + $0x450] ss:$24 sps:$4 sm:$0xff]  }
  0x7b   :  { %3975 = vmatprep.mubr.bf16.mxu1 %v10986_v2  ;;  %4776 = vmatprep.mubr.bf16.mxu0 %v10988_v3  ;;  %v11081_v2 = vld [vmem:[%s16572_s1 + $0x458] ss:$24 sps:$4 sm:$0xff]   ;;  %v11082_v3 = vld [vmem:[%s16572_s1 + $0x484] ss:$24 sps:$4 sm:$0xff]  }
  0x82   :  { %3976 = vmatmul.mubr.bf16.gmra.mrb[32].mxu1 %v10990_v4  ;;  %4777 = vmatmul.mubr.bf16.gmra.mrb[32].mxu0 %v10991_v5  ;;  %v11084_v4 = vld [vmem:[%s16572_s1 + $0x48c] ss:$24 sps:$4 sm:$0xff]   ;;  %v11086_v5 = vld [vmem:[%s16572_s1 + $0x480] ss:$24 sps:$4 sm:$0xff]  }
  0x83   :  { %3983 = vmatprep.mubr.bf16.mxu1 %v10992_v6  ;;  %4784 = vmatprep.mubr.bf16.mxu0 %v10994_v7  ;;  %v11087_v6 = vld [vmem:[%s16572_s1 + $0x488] ss:$24 sps:$4 sm:$0xff]   ;;  %v11088_v7 = vld [vmem:[%s16572_s1 + $0x4b4] ss:$24 sps:$4 sm:$0xff]  }
  0x8a   :  { %3984 = vmatmul.mubr.bf16.gmra.mrb[36].mxu1 %v10996_v8  ;;  %4785 = vmatmul.mubr.bf16.gmra.mrb[36].mxu0 %v10997_v9  ;;  %v11090_v8 = vld [vmem:[%s16572_s1 + $0x4bc] ss:$24 sps:$4 sm:$0xff]   ;;  %v11092_v9 = vld [vmem:[%s16572_s1 + $0x4b0] ss:$24 sps:$4 sm:$0xff]  }
  0x8b   :  { %3991 = vmatprep.mubr.bf16.mxu1 %v10998_v10  ;;  %4792 = vmatprep.mubr.bf16.mxu0 %v11000_v11  ;;  %v11093_v10 = vld [vmem:[%s16572_s1 + $0x4b8] ss:$24 sps:$4 sm:$0xff]   ;;  %v11094_v11 = vld [vmem:[%s16572_s1 + $0x4e4] ss:$24 sps:$4 sm:$0xff]  }
  0x92   :  { %3992 = vmatmul.mubr.bf16.gmra.mrb[40].mxu1 %v11002_v12  ;;  %4793 = vmatmul.mubr.bf16.gmra.mrb[40].mxu0 %v11003_v13  ;;  %v11096_v12 = vld [vmem:[%s16572_s1 + $0x4ec] ss:$24 sps:$4 sm:$0xff]   ;;  %v11098_v13 = vld [vmem:[%s16572_s1 + $0x4e0] ss:$24 sps:$4 sm:$0xff]  }
  0x93   :  { %3999 = vmatprep.mubr.bf16.mxu1 %v11004_v14  ;;  %4800 = vmatprep.mubr.bf16.mxu0 %v11006_v15  ;;  %v11099_v14 = vld [vmem:[%s16572_s1 + $0x4e8] ss:$24 sps:$4 sm:$0xff]   ;;  %v11100_v15 = vld [vmem:[%s16572_s1 + $0x514] ss:$24 sps:$4 sm:$0xff]  }
  0x9a   :  { %4000 = vmatmul.mubr.bf16.gmra.mrb[44].mxu1 %v11008_v16  ;;  %4801 = vmatmul.mubr.bf16.gmra.mrb[44].mxu0 %v11009_v17  ;;  %v11102_v16 = vld [vmem:[%s16572_s1 + $0x51c] ss:$24 sps:$4 sm:$0xff]   ;;  %v11104_v17 = vld [vmem:[%s16572_s1 + $0x510] ss:$24 sps:$4 sm:$0xff]  }
  0x9b   :  { %4007 = vmatprep.mubr.bf16.mxu1 %v11010_v18  ;;  %4808 = vmatprep.mubr.bf16.mxu0 %v11012_v19  ;;  %v11105_v18 = vld [vmem:[%s16572_s1 + $0x518] ss:$24 sps:$4 sm:$0xff]   ;;  %v11106_v19 = vld [vmem:[%s16572_s1 + $0x544] ss:$24 sps:$4 sm:$0xff]  }
  0xa2   :  { %4008 = vmatmul.mubr.bf16.gmra.mrb[48].mxu1 %v11014_v20  ;;  %4809 = vmatmul.mubr.bf16.gmra.mrb[48].mxu0 %v11015_v21  ;;  %v11108_v20 = vld [vmem:[%s16572_s1 + $0x54c] ss:$24 sps:$4 sm:$0xff]   ;;  %v11110_v21 = vld [vmem:[%s16572_s1 + $0x540] ss:$24 sps:$4 sm:$0xff]  }
  0xa3   :  { %4015 = vmatprep.mubr.bf16.mxu1 %v11016_v22  ;;  %4816 = vmatprep.mubr.bf16.mxu0 %v11018_v23  ;;  %v11111_v22 = vld [vmem:[%s16572_s1 + $0x548] ss:$24 sps:$4 sm:$0xff]   ;;  %v11112_v23 = vld [vmem:[%s16572_s1 + $0x574] ss:$24 sps:$4 sm:$0xff]  }
  0xaa   :  { %4016 = vmatmul.mubr.bf16.gmra.mrb[52].mxu1 %v11020_v24  ;;  %4817 = vmatmul.mubr.bf16.gmra.mrb[52].mxu0 %v11021_v25  ;;  %v11114_v24 = vld [vmem:[%s16572_s1 + $0x57c] ss:$24 sps:$4 sm:$0xff]  }
  0xab   :  { %4023 = vmatprep.mubr.bf16.mxu1 %v11022_v26  ;;  %4824 = vmatprep.mubr.bf16.mxu0 %v11024_v27  ;;  %v11116_v26 = vld [vmem:[%s16572_s1 + $0x570] ss:$24 sps:$4 sm:$0xff]  }
  0xb2   :  { %4024 = vmatmul.mubr.bf16.gmra.mrb[56].mxu1 %v11026_v28  ;;  %4825 = vmatmul.mubr.bf16.gmra.mrb[56].mxu0 %v11027_v29  ;;  %v11117_v28 = vld [vmem:[%s16572_s1 + $0x578] ss:$24 sps:$4 sm:$0xff]   ;;  %v11118_v29 = vld [vmem:[%s16572_s1 + $0x5a4] ss:$24 sps:$4 sm:$0xff]  }
  0xb3   :  { %4031 = vmatprep.mubr.bf16.mxu1 %v11028_v30  ;;  %4832 = vmatprep.mubr.bf16.mxu0 %v11030_v31  ;;  %v11120_v30 = vld [vmem:[%s16572_s1 + $0x5ac] ss:$24 sps:$4 sm:$0xff]  }
  0xba   :  { %4032 = vmatmul.mubr.bf16.gmra.mrb[60].mxu1 %v11032_v32  ;;  %4833 = vmatmul.mubr.bf16.gmra.mrb[60].mxu0 %v11033_v33 }
  0xbb   :  { %4039 = vmatprep.mubr.bf16.mxu1 %v11034_v34  ;;  %4840 = vmatprep.mubr.bf16.mxu0 %v11036_v35  ;;  %v11122_v34 = vld [vmem:[%s16572_s1 + $0x5a0] ss:$24 sps:$4 sm:$0xff]  }
  0xc2   :  { %4040 = vmatmul.mubr.bf16.gmra.mrb[64].mxu1 %v11038_v36  ;;  %4841 = vmatmul.mubr.bf16.gmra.mrb[64].mxu0 %v11039_v37  ;;  %v11123_v36 = vld [vmem:[%s16572_s1 + $0x5a8] ss:$24 sps:$4 sm:$0xff]   ;;  %v11124_v37 = vld [vmem:[%s16572_s1 + $0x5d4] ss:$24 sps:$4 sm:$0xff]  }
  0xc3   :  { %4047 = vmatprep.mubr.bf16.mxu1 %v11040_v38  ;;  %4848 = vmatprep.mubr.bf16.mxu0 %v11042_v39  ;;  %v11126_v39 = vld [vmem:[%s16572_s1 + $0x5dc] ss:$24 sps:$4 sm:$0xff]  }
  0xca   :  { %4048 = vmatmul.mubr.bf16.gmra.mrb[68].mxu1 %v11044_v40  ;;  %4849 = vmatmul.mubr.bf16.gmra.mrb[68].mxu0 %v11045_v41 }
  0xcb   :  { %4055 = vmatprep.mubr.bf16.mxu1 %v11046_v42  ;;  %4856 = vmatprep.mubr.bf16.mxu0 %v11048_v43 }
  0xd2   :  { %4056 = vmatmul.mubr.bf16.gmra.mrb[72].mxu1 %v11050_v44  ;;  %4857 = vmatmul.mubr.bf16.gmra.mrb[72].mxu0 %v11051_v45 }
  0xd3   :  { %4063 = vmatprep.mubr.bf16.mxu1 %v11052_v46  ;;  %4864 = vmatprep.mubr.bf16.mxu0 %v11054_v47  ;;  %v11128_v46 = vld [vmem:[%s16572_s1 + $0x5d0] ss:$24 sps:$4 sm:$0xff]  }
  0xda   :  { %4064 = vmatmul.mubr.bf16.gmra.mrb[76].mxu1 %v11056_v48  ;;  %4865 = vmatmul.mubr.bf16.gmra.mrb[76].mxu0 %v11057_v49  ;;  %v11129_v48 = vld [vmem:[%s16572_s1 + $0x5d8] ss:$24 sps:$4 sm:$0xff]   ;;  %v11130_v49 = vld [vmem:[%s16572_s1 + $0x604] ss:$24 sps:$4 sm:$0xff]  }
  0xdb   :  { %4071 = vmatprep.mubr.bf16.mxu1 %v11058_v50  ;;  %4872 = vmatprep.mubr.bf16.mxu0 %v11060_v51  ;;  %v11132_v51 = vld [vmem:[%s16572_s1 + $0x60c] ss:$24 sps:$4 sm:$0xff]  }
  0xe2   :  { %4072 = vmatmul.mubr.bf16.gmra.mrb[80].mxu1 %v11062_v52  ;;  %4873 = vmatmul.mubr.bf16.gmra.mrb[80].mxu0 %v11063_v53 }
  0xe3   :  { %4079 = vmatprep.mubr.bf16.mxu1 %v11064_v54  ;;  %4880 = vmatprep.mubr.bf16.mxu0 %v11066_v55 }
  0xea   :  { %4080 = vmatmul.mubr.bf16.gmra.mrb[84].mxu1 %v11068_v56  ;;  %4881 = vmatmul.mubr.bf16.gmra.mrb[84].mxu0 %v11069_v57 }
  0xeb   :  { %4087 = vmatprep.mubr.bf16.mxu1 %v11070_v58  ;;  %4888 = vmatprep.mubr.bf16.mxu0 %v11072_v59  ;;  %v11134_v58 = vld [vmem:[%s16572_s1 + $0x600] ss:$24 sps:$4 sm:$0xff]  }
  0xf2   :  { %4088 = vmatmul.mubr.bf16.gmra.mrb[88].mxu1 %v11074_v60  ;;  %4889 = vmatmul.mubr.bf16.gmra.mrb[88].mxu0 %v11075_v61  ;;  %v11135_v60 = vld [vmem:[%s16572_s1 + $0x608] ss:$24 sps:$4 sm:$0xff]   ;;  %v11136_v61 = vld [vmem:[%s16572_s1 + $0x634] ss:$24 sps:$4 sm:$0xff]  }
  0xf3   :  { %4095 = vmatprep.mubr.bf16.mxu1 %v11076_v62  ;;  %4896 = vmatprep.mubr.bf16.mxu0 %v11078_v63  ;;  %v11138_v63 = vld [vmem:[%s16572_s1 + $0x63c] ss:$24 sps:$4 sm:$0xff]  }
  0xfa   :  { %4096 = vmatmul.mubr.bf16.gmra.mrb[92].mxu1 %v11080_v1  ;;  %4897 = vmatmul.mubr.bf16.gmra.mrb[92].mxu0 %v11081_v2 }
  0xfb   :  { %4103 = vmatprep.mubr.bf16.mxu1 %v11082_v3  ;;  %4904 = vmatprep.mubr.bf16.mxu0 %v11084_v4  ;;  %v11140_v3 = vld [vmem:[%s16572_s1 + $0x630] ss:$24 sps:$4 sm:$0xff]  }
 0x102   :  { %4104 = vmatmul.mubr.bf16.gmra.mrb[96].mxu1 %v11086_v5  ;;  %4905 = vmatmul.mubr.bf16.gmra.mrb[96].mxu0 %v11087_v6  ;;  %v11141_v5 = vld [vmem:[%s16572_s1 + $0x638] ss:$24 sps:$4 sm:$0xff]   ;;  %v11142_v6 = vld [vmem:[%s16572_s1 + $0x664] ss:$24 sps:$4 sm:$0xff]  }
 0x103   :  { %4111 = vmatprep.mubr.bf16.mxu1 %v11088_v7  ;;  %4912 = vmatprep.mubr.bf16.mxu0 %v11090_v8  ;;  %v11144_v8 = vld [vmem:[%s16572_s1 + $0x66c] ss:$24 sps:$4 sm:$0xff]  }
 0x10a   :  { %4112 = vmatmul.mubr.bf16.gmra.mrb[100].mxu1 %v11092_v9  ;;  %4913 = vmatmul.mubr.bf16.gmra.mrb[100].mxu0 %v11093_v10 }
 0x10b   :  { %4119 = vmatprep.mubr.bf16.mxu1 %v11094_v11  ;;  %4920 = vmatprep.mubr.bf16.mxu0 %v11096_v12  ;;  %v11146_v11 = vld [vmem:[%s16572_s1 + $0x660] ss:$24 sps:$4 sm:$0xff]  }
 0x112   :  { %4120 = vmatmul.mubr.bf16.gmra.mrb[104].mxu1 %v11098_v13  ;;  %4921 = vmatmul.mubr.bf16.gmra.mrb[104].mxu0 %v11099_v14  ;;  %v11147_v13 = vld [vmem:[%s16572_s1 + $0x668] ss:$24 sps:$4 sm:$0xff]   ;;  %v11148_v14 = vld [vmem:[%s16572_s1 + $0x694] ss:$24 sps:$4 sm:$0xff]  }
 0x113   :  { %4127 = vmatprep.mubr.bf16.mxu1 %v11100_v15  ;;  %4928 = vmatprep.mubr.bf16.mxu0 %v11102_v16  ;;  %v11150_v16 = vld [vmem:[%s16572_s1 + $0x69c] ss:$24 sps:$4 sm:$0xff]  }
 0x115   :  { %v12585_v25 = vpop.f32.mrb[0].mxu1 }
 0x116   :  { %v3915_v27 = vpop.f32.mrb[1].mxu1 }
 0x117   :  { %v12599_v31 = vpop.f32.mrb[2].mxu1 }
 0x118   :  { %v3918_v32 = vpop.f32.mrb[3].mxu1 }
 0x119   :  { %v11160_v32 = vld [vmem:[%s16572_s1 + $0x6f4] ss:$24 sps:$4 sm:$0xff]  }
 0x11a   :  { %4128 = vmatmul.mubr.bf16.gmra.mrb[108].mxu1 %v11104_v17  ;;  %4929 = vmatmul.mubr.bf16.gmra.mrb[108].mxu0 %v11105_v18 }
 0x11b   :  { %4135 = vmatprep.mubr.bf16.mxu1 %v11106_v19  ;;  %4936 = vmatprep.mubr.bf16.mxu0 %v11108_v20  ;;  %v11152_v19 = vld [vmem:[%s16572_s1 + $0x690] ss:$24 sps:$4 sm:$0xff]  }
 0x11d   :  { %v12601_v33 = vpop.f32.mrb[4].mxu1 }
 0x11e   :  { %v3923_v35 = vpop.f32.mrb[5].mxu1 }
 0x11f   :  { %v12612_v38 = vpop.f32.mrb[6].mxu1  ;;  %v11162_v35 = vld [vmem:[%s16572_s1 + $0x6fc] ss:$24 sps:$4 sm:$0xff]  }
 0x120   :  { %v3926_v40 = vpop.f32.mrb[7].mxu1 }
 0x122   :  { %4136 = vmatmul.mubr.bf16.gmra.mrb[112].mxu1 %v11110_v21  ;;  %4937 = vmatmul.mubr.bf16.gmra.mrb[112].mxu0 %v11111_v22  ;;  %v11153_v21 = vld [vmem:[%s16572_s1 + $0x698] ss:$24 sps:$4 sm:$0xff]   ;;  %v11154_v22 = vld [vmem:[%s16572_s1 + $0x6c4] ss:$24 sps:$4 sm:$0xff]  }
 0x123   :  { %4143 = vmatprep.mubr.bf16.mxu1 %v11112_v23  ;;  %4944 = vmatprep.mubr.bf16.mxu0 %v11114_v24  ;;  %v11156_v24 = vld [vmem:[%s16572_s1 + $0x6cc] ss:$24 sps:$4 sm:$0xff]  }
 0x125   :  { %v12617_v41 = vpop.f32.mrb[8].mxu1 }
 0x126   :  { %v3931_v42 = vpop.f32.mrb[9].mxu1 }
 0x127   :  { %v12619_v43 = vpop.f32.mrb[10].mxu1  ;;  %v11165_v42 = vld [vmem:[%s16572_s1 + $0x6f8] ss:$24 sps:$4 sm:$0xff]  }
 0x128   :  { %v3934_v44 = vpop.f32.mrb[11].mxu1 }
 0x129   :  { %v11166_v44 = vld [vmem:[%s16572_s1 + $0x724] ss:$24 sps:$4 sm:$0xff]  }
 0x12a   :  { %4144 = vmatmul.mubr.bf16.gmra.mrb[116].mxu1 %v11116_v26  ;;  %4945 = vmatmul.mubr.bf16.gmra.mrb[116].mxu0 %v11117_v28  ;;  %v11158_v28 = vld [vmem:[%s16572_s1 + $0x6c0] ss:$24 sps:$4 sm:$0xff]  }
 0x12b   :  { %4151 = vmatprep.mubr.bf16.mxu1 %v11118_v29  ;;  %4952 = vmatprep.mubr.bf16.mxu0 %v11120_v30  ;;  %v11159_v30 = vld [vmem:[%s16572_s1 + $0x6c8] ss:$24 sps:$4 sm:$0xff]  }
 0x12d   :  { %v12621_v45 = vpop.f32.mrb[12].mxu1 }
 0x12e   :  { %v3939_v47 = vpop.f32.mrb[13].mxu1 }
 0x12f   :  { %v12632_v50 = vpop.f32.mrb[14].mxu1  ;;  %v11168_v47 = vld [vmem:[%s16572_s1 + $0x72c] ss:$24 sps:$4 sm:$0xff]  }
 0x130   :  { %v3942_v52 = vpop.f32.mrb[15].mxu1 }
 0x132   :  { %4152 = vmatmul.mubr.bf16.gmra.mrb[120].mxu1 %v11122_v34  ;;  %4953 = vmatmul.mubr.bf16.gmra.mrb[120].mxu0 %v11123_v36 }
 0x133   :  { %4159 = vmatprep.mubr.bf16.mxu1 %v11124_v37  ;;  %4960 = vmatprep.mubr.bf16.mxu0 %v11126_v39  ;;  %v11164_v39 = vld [vmem:[%s16572_s1 + $0x6f0] ss:$24 sps:$4 sm:$0xff]  }
 0x135   :  { %v12637_v53 = vpop.f32.mrb[16].mxu1 }
 0x136   :  { %v3947_v54 = vpop.f32.mrb[17].mxu1 }
 0x137   :  { %v12639_v55 = vpop.f32.mrb[18].mxu1  ;;  %v11171_v54 = vld [vmem:[%s16572_s1 + $0x728] ss:$24 sps:$4 sm:$0xff]  }
 0x138   :  { %v3950_v56 = vpop.f32.mrb[19].mxu1 }
 0x139   :  { %v11172_v56 = vld [vmem:[%s16572_s1 + $0x754] ss:$24 sps:$4 sm:$0xff]  }
 0x13a   :  { %4160 = vmatmul.mubr.bf16.gmra.mrb[124].mxu1 %v11128_v46  ;;  %4961 = vmatmul.mubr.bf16.gmra.mrb[124].mxu0 %v11129_v48 }
 0x13b   :  { %4167 = vmatprep.mubr.bf16.mxu1 %v11130_v49  ;;  %4968 = vmatprep.mubr.bf16.mxu0 %v11132_v51  ;;  %v11170_v51 = vld [vmem:[%s16572_s1 + $0x720] ss:$24 sps:$4 sm:$0xff]  }
 0x13d   :  { %v12641_v57 = vpop.f32.mrb[20].mxu1 }
 0x13e   :  { %v3955_v59 = vpop.f32.mrb[21].mxu1 }
 0x13f   :  { %v12652_v62 = vpop.f32.mrb[22].mxu1  ;;  %v11174_v59 = vld [vmem:[%s16572_s1 + $0x75c] ss:$24 sps:$4 sm:$0xff]  }
 0x140   :  { %v3958_v1 = vpop.f32.mrb[23].mxu1 }
 0x142   :  { %4168 = vmatmul.mubr.bf16.gmra.mrb[128].mxu1 %v11134_v58  ;;  %4969 = vmatmul.mubr.bf16.gmra.mrb[128].mxu0 %v11135_v60 }
 0x143   :  { %4175 = vmatprep.mubr.bf16.mxu1 %v11136_v61  ;;  %4976 = vmatprep.mubr.bf16.mxu0 %v11138_v63  ;;  %v11176_v63 = vld [vmem:[%s16572_s1 + $0x750] ss:$24 sps:$4 sm:$0xff]  }
 0x145   :  { %v12657_v2 = vpop.f32.mrb[24].mxu1 }
 0x146   :  { %v3963_v4 = vpop.f32.mrb[25].mxu1 }
 0x147   :  { %v12668_v7 = vpop.f32.mrb[26].mxu1  ;;  %v11178_v4 = vld [vmem:[%s16572_s1 + $0x784] ss:$24 sps:$4 sm:$0xff]  }
 0x148   :  { %v3966_v9 = vpop.f32.mrb[27].mxu1 }
 0x14a   :  { %4176 = vmatmul.mubr.bf16.gmra.mrb[132].mxu1 %v11140_v3  ;;  %4977 = vmatmul.mubr.bf16.gmra.mrb[132].mxu0 %v11141_v5  ;;  %v11177_v3 = vld [vmem:[%s16572_s1 + $0x758] ss:$24 sps:$4 sm:$0xff]  }
 0x14b   :  { %4183 = vmatprep.mubr.bf16.mxu1 %v11142_v6  ;;  %4984 = vmatprep.mubr.bf16.mxu0 %v11144_v8  ;;  %v11180_v6 = vld [vmem:[%s16572_s1 + $0x78c] ss:$24 sps:$4 sm:$0xff]  }
 0x14d   :  { %v12673_v10 = vpop.f32.mrb[28].mxu1 }
 0x14e   :  { %v3971_v12 = vpop.f32.mrb[29].mxu1 }
 0x14f   :  { %v12684_v15 = vpop.f32.mrb[30].mxu1 }
 0x150   :  { %v3974_v17 = vpop.f32.mrb[31].mxu1 }
 0x151   :  { %v11186_v17 = vld [vmem:[%s16572_s1 + $0x7bc] ss:$24 sps:$4 sm:$0xff]  }
 0x152   :  { %4184 = vmatmul.mubr.bf16.gmra.mrb[136].mxu1 %v11146_v11  ;;  %4985 = vmatmul.mubr.bf16.gmra.mrb[136].mxu0 %v11147_v13  ;;  %v11182_v11 = vld [vmem:[%s16572_s1 + $0x780] ss:$24 sps:$4 sm:$0xff]  }
 0x153   :  { %4191 = vmatprep.mubr.bf16.mxu1 %v11148_v14  ;;  %4992 = vmatprep.mubr.bf16.mxu0 %v11150_v16  ;;  %v11183_v13 = vld [vmem:[%s16572_s1 + $0x788] ss:$24 sps:$4 sm:$0xff]   ;;  %v11184_v14 = vld [vmem:[%s16572_s1 + $0x7b4] ss:$24 sps:$4 sm:$0xff]  }
 0x155   :  { %v12689_v18 = vpop.f32.mrb[32].mxu1 }
 0x156   :  { %v3979_v20 = vpop.f32.mrb[33].mxu1 }
 0x157   :  { %v12700_v23 = vpop.f32.mrb[34].mxu1 }
 0x158   :  { %v3982_v26 = vpop.f32.mrb[35].mxu1 }
 0x159   :  { %v11190_v26 = vld [vmem:[%s16572_s1 + $0x7e4] ss:$24 sps:$4 sm:$0xff]  }
 0x15a   :  { %4192 = vmatmul.mubr.bf16.gmra.mrb[140].mxu1 %v11152_v19  ;;  %4993 = vmatmul.mubr.bf16.gmra.mrb[140].mxu0 %v11153_v21  ;;  %v11188_v21 = vld [vmem:[%s16572_s1 + $0x7b0] ss:$24 sps:$4 sm:$0xff]  }
 0x15b   :  { %4199 = vmatprep.mubr.bf16.mxu1 %v11154_v22  ;;  %5000 = vmatprep.mubr.bf16.mxu0 %v11156_v24  ;;  %v11189_v24 = vld [vmem:[%s16572_s1 + $0x7b8] ss:$24 sps:$4 sm:$0xff]  }
 0x15d   :  { %v12705_v27 = vpop.f32.mrb[36].mxu1 }
 0x15e   :  { %v3987_v29 = vpop.f32.mrb[37].mxu1 }
 0x15f   :  { %v12716_v34 = vpop.f32.mrb[38].mxu1  ;;  %v11192_v29 = vld [vmem:[%s16572_s1 + $0x7ec] ss:$24 sps:$4 sm:$0xff]  }
 0x160   :  { %v3990_v36 = vpop.f32.mrb[39].mxu1 }
 0x162   :  { %4200 = vmatmul.mubr.bf16.gmra.mrb[144].mxu1 %v11158_v28  ;;  %5001 = vmatmul.mubr.bf16.gmra.mrb[144].mxu0 %v11159_v30 }
 0x163   :  { %4207 = vmatprep.mubr.bf16.mxu1 %v11160_v32  ;;  %5008 = vmatprep.mubr.bf16.mxu0 %v11162_v35  ;;  %v11194_v35 = vld [vmem:[%s16572_s1 + $0x7e0] ss:$24 sps:$4 sm:$0xff]  }
 0x165   :  { %v12721_v37 = vpop.f32.mrb[40].mxu1 }
 0x166   :  { %v3995_v40 = vpop.f32.mrb[41].mxu1 }
 0x167   :  { %v12732_v46 = vpop.f32.mrb[42].mxu1  ;;  %v11196_v40 = vld [vmem:[%s16572_s1 + $0x814] ss:$24 sps:$4 sm:$0xff]  }
 0x168   :  { %v3998_v48 = vpop.f32.mrb[43].mxu1 }
 0x16a   :  { %4208 = vmatmul.mubr.bf16.gmra.mrb[148].mxu1 %v11164_v39  ;;  %5009 = vmatmul.mubr.bf16.gmra.mrb[148].mxu0 %v11165_v42  ;;  %v11195_v39 = vld [vmem:[%s16572_s1 + $0x7e8] ss:$24 sps:$4 sm:$0xff]  }
 0x16b   :  { %4215 = vmatprep.mubr.bf16.mxu1 %v11166_v44  ;;  %5016 = vmatprep.mubr.bf16.mxu0 %v11168_v47  ;;  %v11198_v44 = vld [vmem:[%s16572_s1 + $0x81c] ss:$24 sps:$4 sm:$0xff]  }
 0x16d   :  { %v12737_v49 = vpop.f32.mrb[44].mxu1 }
 0x16e   :  { %v4003_v52 = vpop.f32.mrb[45].mxu1 }
 0x16f   :  { %v12748_v58 = vpop.f32.mrb[46].mxu1 }
 0x170   :  { %v4006_v60 = vpop.f32.mrb[47].mxu1 }
 0x171   :  { %v11204_v60 = vld [vmem:[%s16572_s1 + $0x84c] ss:$24 sps:$4 sm:$0xff]  }
 0x172   :  { %4216 = vmatmul.mubr.bf16.gmra.mrb[152].mxu1 %v11170_v51  ;;  %5017 = vmatmul.mubr.bf16.gmra.mrb[152].mxu0 %v11171_v54  ;;  %v11200_v51 = vld [vmem:[%s16572_s1 + $0x810] ss:$24 sps:$4 sm:$0xff]  }
 0x173   :  { %4223 = vmatprep.mubr.bf16.mxu1 %v11172_v56  ;;  %5024 = vmatprep.mubr.bf16.mxu0 %v11174_v59  ;;  %v11201_v54 = vld [vmem:[%s16572_s1 + $0x818] ss:$24 sps:$4 sm:$0xff]   ;;  %v11202_v56 = vld [vmem:[%s16572_s1 + $0x844] ss:$24 sps:$4 sm:$0xff]  }
 0x175   :  { %v12753_v61 = vpop.f32.mrb[48].mxu1 }
 0x176   :  { %v4011_v1 = vpop.f32.mrb[49].mxu1 }
 0x177   :  { %v12764_v5 = vpop.f32.mrb[50].mxu1 }
 0x178   :  { %v4014_v8 = vpop.f32.mrb[51].mxu1 }
 0x179   :  { %v11208_v8 = vld [vmem:[%s16572_s1 + $0x874] ss:$24 sps:$4 sm:$0xff]  }
 0x17a   :  { %4224 = vmatmul.mubr.bf16.gmra.mrb[156].mxu1 %v11176_v63  ;;  %5025 = vmatmul.mubr.bf16.gmra.mrb[156].mxu0 %v11177_v3  ;;  %v11206_v3 = vld [vmem:[%s16572_s1 + $0x840] ss:$24 sps:$4 sm:$0xff]  }
 0x17b   :  { %4231 = vmatprep.mubr.bf16.mxu1 %v11178_v4  ;;  %5032 = vmatprep.mubr.bf16.mxu0 %v11180_v6  ;;  %v11207_v6 = vld [vmem:[%s16572_s1 + $0x848] ss:$24 sps:$4 sm:$0xff]  }
 0x17d   :  { %v12769_v9 = vpop.f32.mrb[52].mxu1 }
 0x17e   :  { %v4019_v12 = vpop.f32.mrb[53].mxu1 }
 0x17f   :  { %v12780_v16 = vpop.f32.mrb[54].mxu1  ;;  %v11210_v12 = vld [vmem:[%s16572_s1 + $0x87c] ss:$24 sps:$4 sm:$0xff]  }
 0x180   :  { %v4022_v19 = vpop.f32.mrb[55].mxu1 }
 0x182   :  { %4232 = vmatmul.mubr.bf16.gmra.mrb[160].mxu1 %v11182_v11  ;;  %5033 = vmatmul.mubr.bf16.gmra.mrb[160].mxu0 %v11183_v13 }
 0x183   :  { %4239 = vmatprep.mubr.bf16.mxu1 %v11184_v14  ;;  %5040 = vmatprep.mubr.bf16.mxu0 %v11186_v17  ;;  %v11212_v17 = vld [vmem:[%s16572_s1 + $0x870] ss:$24 sps:$4 sm:$0xff]  }
 0x185   :  { %v12785_v20 = vpop.f32.mrb[56].mxu1 }
 0x186   :  { %v4027_v22 = vpop.f32.mrb[57].mxu1 }
 0x187   :  { %v12796_v28 = vpop.f32.mrb[58].mxu1  ;;  %v11214_v22 = vld [vmem:[%s16572_s1 + $0x8a4] ss:$24 sps:$4 sm:$0xff]  }
 0x188   :  { %v4030_v30 = vpop.f32.mrb[59].mxu1 }
 0x18a   :  { %4240 = vmatmul.mubr.bf16.gmra.mrb[164].mxu1 %v11188_v21  ;;  %5041 = vmatmul.mubr.bf16.gmra.mrb[164].mxu0 %v11189_v24  ;;  %v11213_v21 = vld [vmem:[%s16572_s1 + $0x878] ss:$24 sps:$4 sm:$0xff]  }
 0x18b   :  { %4247 = vmatprep.mubr.bf16.mxu1 %v11190_v26  ;;  %5048 = vmatprep.mubr.bf16.mxu0 %v11192_v29  ;;  %v11216_v26 = vld [vmem:[%s16572_s1 + $0x8ac] ss:$24 sps:$4 sm:$0xff]  }
 0x18d   :  { %v12801_v32 = vpop.f32.mrb[60].mxu1 }
 0x18e   :  { %v4035_v36 = vpop.f32.mrb[61].mxu1 }
 0x18f   :  { %v12812_v42 = vpop.f32.mrb[62].mxu1 }
 0x190   :  { %v4038_v47 = vpop.f32.mrb[63].mxu1 }
 0x191   :  { %v11222_v47 = vld [vmem:[%s16572_s1 + $0x8dc] ss:$24 sps:$4 sm:$0xff]  }
 0x192   :  { %4248 = vmatmul.mubr.bf16.gmra.mrb[168].mxu1 %v11194_v35  ;;  %5049 = vmatmul.mubr.bf16.gmra.mrb[168].mxu0 %v11195_v39  ;;  %v11218_v35 = vld [vmem:[%s16572_s1 + $0x8a0] ss:$24 sps:$4 sm:$0xff]  }
 0x193   :  { %4255 = vmatprep.mubr.bf16.mxu1 %v11196_v40  ;;  %5056 = vmatprep.mubr.bf16.mxu0 %v11198_v44  ;;  %v11219_v39 = vld [vmem:[%s16572_s1 + $0x8a8] ss:$24 sps:$4 sm:$0xff]   ;;  %v11220_v40 = vld [vmem:[%s16572_s1 + $0x8d4] ss:$24 sps:$4 sm:$0xff]  }
 0x195   :  { %v12817_v48 = vpop.f32.mrb[64].mxu1 }
 0x196   :  { %v4043_v52 = vpop.f32.mrb[65].mxu1 }
 0x197   :  { %v12828_v59 = vpop.f32.mrb[66].mxu1 }
 0x198   :  { %v4046_v63 = vpop.f32.mrb[67].mxu1 }
 0x199   :  { %v11226_v63 = vld [vmem:[%s16572_s1 + $0x904] ss:$24 sps:$4 sm:$0xff]  }
 0x19a   :  { %4256 = vmatmul.mubr.bf16.gmra.mrb[172].mxu1 %v11200_v51  ;;  %5057 = vmatmul.mubr.bf16.gmra.mrb[172].mxu0 %v11201_v54  ;;  %v11224_v54 = vld [vmem:[%s16572_s1 + $0x8d0] ss:$24 sps:$4 sm:$0xff]  }
 0x19b   :  { %4263 = vmatprep.mubr.bf16.mxu1 %v11202_v56  ;;  %5064 = vmatprep.mubr.bf16.mxu0 %v11204_v60  ;;  %v11225_v60 = vld [vmem:[%s16572_s1 + $0x8d8] ss:$24 sps:$4 sm:$0xff]  }
 0x19d   :  { %v12833_v1 = vpop.f32.mrb[68].mxu1 }
 0x19e   :  { %v4051_v4 = vpop.f32.mrb[69].mxu1 }
 0x19f   :  { %v12844_v11 = vpop.f32.mrb[70].mxu1  ;;  %v11228_v4 = vld [vmem:[%s16572_s1 + $0x90c] ss:$24 sps:$4 sm:$0xff]  }
 0x1a0   :  { %v4054_v13 = vpop.f32.mrb[71].mxu1 }
 0x1a2   :  { %4264 = vmatmul.mubr.bf16.gmra.mrb[176].mxu1 %v11206_v3  ;;  %5065 = vmatmul.mubr.bf16.gmra.mrb[176].mxu0 %v11207_v6 }
 0x1a3   :  { %4271 = vmatprep.mubr.bf16.mxu1 %v11208_v8  ;;  %5072 = vmatprep.mubr.bf16.mxu0 %v11210_v12  ;;  %v11230_v12 = vld [vmem:[%s16572_s1 + $0x900] ss:$24 sps:$4 sm:$0xff]  }
 0x1a5   :  { %v12849_v14 = vpop.f32.mrb[72].mxu1 }
 0x1a6   :  { %v4059_v19 = vpop.f32.mrb[73].mxu1 }
 0x1a7   :  { %v12860_v24 = vpop.f32.mrb[74].mxu1  ;;  %v11232_v19 = vld [vmem:[%s16572_s1 + $0x934] ss:$24 sps:$4 sm:$0xff]  }
 0x1a8   :  { %v4062_v29 = vpop.f32.mrb[75].mxu1 }
 0x1aa   :  { %4272 = vmatmul.mubr.bf16.gmra.mrb[180].mxu1 %v11212_v17  ;;  %5073 = vmatmul.mubr.bf16.gmra.mrb[180].mxu0 %v11213_v21  ;;  %v11231_v17 = vld [vmem:[%s16572_s1 + $0x908] ss:$24 sps:$4 sm:$0xff]  }
 0x1ab   :  { %4279 = vmatprep.mubr.bf16.mxu1 %v11214_v22  ;;  %5080 = vmatprep.mubr.bf16.mxu0 %v11216_v26  ;;  %v11234_v22 = vld [vmem:[%s16572_s1 + $0x93c] ss:$24 sps:$4 sm:$0xff]  }
 0x1ad   :  { %v12865_v30 = vpop.f32.mrb[76].mxu1 }
 0x1ae   :  { %v4067_v36 = vpop.f32.mrb[77].mxu1 }
 0x1af   :  { %v12876_v44 = vpop.f32.mrb[78].mxu1 }
 0x1b0   :  { %v4070_v51 = vpop.f32.mrb[79].mxu1 }
 0x1b1   :  { %v11240_v51 = vld [vmem:[%s16572_s1 + $0x96c] ss:$24 sps:$4 sm:$0xff]  }
 0x1b2   :  { %4280 = vmatmul.mubr.bf16.gmra.mrb[184].mxu1 %v11218_v35  ;;  %5081 = vmatmul.mubr.bf16.gmra.mrb[184].mxu0 %v11219_v39  ;;  %v11236_v35 = vld [vmem:[%s16572_s1 + $0x930] ss:$24 sps:$4 sm:$0xff]  }
 0x1b3   :  { %4287 = vmatprep.mubr.bf16.mxu1 %v11220_v40  ;;  %5088 = vmatprep.mubr.bf16.mxu0 %v11222_v47  ;;  %v11237_v39 = vld [vmem:[%s16572_s1 + $0x938] ss:$24 sps:$4 sm:$0xff]   ;;  %v11238_v40 = vld [vmem:[%s16572_s1 + $0x964] ss:$24 sps:$4 sm:$0xff]  }
 0x1b5   :  { %v12881_v52 = vpop.f32.mrb[80].mxu1 }
 0x1b6   :  { %v4075_v56 = vpop.f32.mrb[81].mxu1 }
 0x1b7   :  { %v12892_v3 = vpop.f32.mrb[82].mxu1 }
 0x1b8   :  { %v4078_v6 = vpop.f32.mrb[83].mxu1 }
 0x1b9   :  { %v11244_v6 = vld [vmem:[%s16572_s1 + $0x994] ss:$24 sps:$4 sm:$0xff]  }
 0x1ba   :  { %4288 = vmatmul.mubr.bf16.gmra.mrb[188].mxu1 %v11224_v54  ;;  %5089 = vmatmul.mubr.bf16.gmra.mrb[188].mxu0 %v11225_v60  ;;  %v11242_v60 = vld [vmem:[%s16572_s1 + $0x960] ss:$24 sps:$4 sm:$0xff]  }
 0x1bb   :  { %4295 = vmatprep.mubr.bf16.mxu1 %v11226_v63  ;;  %5096 = vmatprep.mubr.bf16.mxu0 %v11228_v4  ;;  %v11243_v4 = vld [vmem:[%s16572_s1 + $0x968] ss:$24 sps:$4 sm:$0xff]  }
 0x1bd   :  { %v12897_v8 = vpop.f32.mrb[84].mxu1 }
 0x1be   :  { %v4083_v13 = vpop.f32.mrb[85].mxu1 }
 0x1bf   :  { %v12908_v21 = vpop.f32.mrb[86].mxu1  ;;  %v11246_v13 = vld [vmem:[%s16572_s1 + $0x99c] ss:$24 sps:$4 sm:$0xff]  }
 0x1c0   :  { %v4086_v26 = vpop.f32.mrb[87].mxu1 }
 0x1c2   :  { %4296 = vmatmul.mubr.bf16.gmra.mrb[192].mxu1 %v11230_v12  ;;  %5097 = vmatmul.mubr.bf16.gmra.mrb[192].mxu0 %v11231_v17 }
 0x1c3   :  { %4303 = vmatprep.mubr.bf16.mxu1 %v11232_v19  ;;  %5104 = vmatprep.mubr.bf16.mxu0 %v11234_v22  ;;  %v11248_v22 = vld [vmem:[%s16572_s1 + $0x990] ss:$24 sps:$4 sm:$0xff]  }
 0x1c5   :  { %v12913_v29 = vpop.f32.mrb[88].mxu1 }
 0x1c6   :  { %v4091_v36 = vpop.f32.mrb[89].mxu1 }
 0x1c7   :  { %v12924_v47 = vpop.f32.mrb[90].mxu1  ;;  %v11250_v36 = vld [vmem:[%s16572_s1 + $0x9c4] ss:$24 sps:$4 sm:$0xff]  }
 0x1c8   :  { %v4094_v54 = vpop.f32.mrb[91].mxu1 }
 0x1ca   :  { %4304 = vmatmul.mubr.bf16.gmra.mrb[196].mxu1 %v11236_v35  ;;  %5105 = vmatmul.mubr.bf16.gmra.mrb[196].mxu0 %v11237_v39  ;;  %v11249_v35 = vld [vmem:[%s16572_s1 + $0x998] ss:$24 sps:$4 sm:$0xff]  }
 0x1cb   :  { %4311 = vmatprep.mubr.bf16.mxu1 %v11238_v40  ;;  %5112 = vmatprep.mubr.bf16.mxu0 %v11240_v51  ;;  %v11252_v40 = vld [vmem:[%s16572_s1 + $0x9cc] ss:$24 sps:$4 sm:$0xff]  }
 0x1cd   :  { %v12929_v56 = vpop.f32.mrb[92].mxu1 }
 0x1ce   :  { %v4099_v63 = vpop.f32.mrb[93].mxu1 }
 0x1cf   :  { %v12940_v12 = vpop.f32.mrb[94].mxu1 }
 0x1d0   :  { %16693 = vst [vmem:[#allocation2_spill] sm:$0xff] %v12940_v12  ;;  %v4102_v17 = vpop.f32.mrb[95].mxu1 }
 0x1d1   :  { %v11258_v17 = vld [vmem:[%s16572_s1 + $0x9fc] ss:$24 sps:$4 sm:$0xff]  }
 0x1d2   :  { %4312 = vmatmul.mubr.bf16.gmra.mrb[200].mxu1 %v11242_v60  ;;  %5113 = vmatmul.mubr.bf16.gmra.mrb[200].mxu0 %v11243_v4  ;;  %v11254_v60 = vld [vmem:[%s16572_s1 + $0x9c0] ss:$24 sps:$4 sm:$0xff]  }
 0x1d3   :  { %4319 = vmatprep.mubr.bf16.mxu1 %v11244_v6  ;;  %5120 = vmatprep.mubr.bf16.mxu0 %v11246_v13  ;;  %v11255_v4 = vld [vmem:[%s16572_s1 + $0x9c8] ss:$24 sps:$4 sm:$0xff]   ;;  %v11256_v6 = vld [vmem:[%s16572_s1 + $0x9f4] ss:$24 sps:$4 sm:$0xff]  }
 0x1d5   :  { %v12945_v19 = vpop.f32.mrb[96].mxu1 }
 0x1d6   :  { %16694 = vst [vmem:[#allocation3_spill] sm:$0xff] %v12945_v19  ;;  %v4107_v26 = vpop.f32.mrb[97].mxu1 }
 0x1d7   :  { %v12956_v39 = vpop.f32.mrb[98].mxu1 }
 0x1d8   :  { %16695 = vst [vmem:[#allocation4_spill] sm:$0xff] %v12956_v39  ;;  %v4110_v51 = vpop.f32.mrb[99].mxu1 }
 0x1d9   :  { %v11262_v51 = vld [vmem:[%s16572_s1 + $0xa24] ss:$24 sps:$4 sm:$0xff]  }
 0x1da   :  { %4320 = vmatmul.mubr.bf16.gmra.mrb[204].mxu1 %v11248_v22  ;;  %5121 = vmatmul.mubr.bf16.gmra.mrb[204].mxu0 %v11249_v35  ;;  %v11260_v35 = vld [vmem:[%s16572_s1 + $0x9f0] ss:$24 sps:$4 sm:$0xff]  }
 0x1db   :  { %4327 = vmatprep.mubr.bf16.mxu1 %v11250_v36  ;;  %5128 = vmatprep.mubr.bf16.mxu0 %v11252_v40  ;;  %v11261_v40 = vld [vmem:[%s16572_s1 + $0x9f8] ss:$24 sps:$4 sm:$0xff]  }
 0x1dd   :  { %v12961_v54 = vpop.f32.mrb[100].mxu1 }
 0x1de   :  { %16696 = vst [vmem:[#allocation5_spill] sm:$0xff] %v12961_v54  ;;  %v4115_v63 = vpop.f32.mrb[101].mxu1 }
 0x1df   :  { %v12972_v13 = vpop.f32.mrb[102].mxu1 }
 0x1e0   :  { %16697 = vst [vmem:[#allocation6_spill] sm:$0xff] %v12972_v13  ;;  %v4118_v22 = vpop.f32.mrb[103].mxu1 }
 0x1e2   :  { %4328 = vmatmul.mubr.bf16.gmra.mrb[208].mxu1 %v11254_v60  ;;  %5129 = vmatmul.mubr.bf16.gmra.mrb[208].mxu0 %v11255_v4  ;;  %v11264_v60 = vld [vmem:[%s16572_s1 + $0xa2c] ss:$24 sps:$4 sm:$0xff]  }
 0x1e3   :  { %4335 = vmatprep.mubr.bf16.mxu1 %v11256_v6  ;;  %5136 = vmatprep.mubr.bf16.mxu0 %v11258_v17  ;;  %v11266_v17 = vld [vmem:[%s16572_s1 + $0xa20] ss:$24 sps:$4 sm:$0xff]  }
 0x1e5   :  { %v12977_v26 = vpop.f32.mrb[104].mxu1 }
 0x1e6   :  { %16698 = vst [vmem:[#allocation7_spill] sm:$0xff] %v12977_v26  ;;  %v4123_v36 = vpop.f32.mrb[105].mxu1 }
 0x1e7   :  { %v12988_v63 = vpop.f32.mrb[106].mxu1  ;;  %v11267_v36 = vld [vmem:[%s16572_s1 + $0xa28] ss:$24 sps:$4 sm:$0xff]  }
 0x1e8   :  { %16699 = vst [vmem:[#allocation8_spill] sm:$0xff] %v12988_v63  ;;  %v4126_v4 = vpop.f32.mrb[107].mxu1 }
 0x1ea   :  { %4336 = vmatmul.mubr.bf16.gmra.mrb[212].mxu1 %v11260_v35  ;;  %5137 = vmatmul.mubr.bf16.gmra.mrb[212].mxu0 %v11261_v40  ;;  %v11270_v35 = vld [vmem:[%s16572_s1 + $0xa5c] ss:$24 sps:$4 sm:$0xff]  }
 0x1eb   :  { %4343 = vmatprep.mubr.bf16.mxu1 %v11262_v51  ;;  %5144 = vmatprep.mubr.bf16.mxu0 %v11264_v60  ;;  %v11272_v60 = vld [vmem:[%s16572_s1 + $0xa50] ss:$24 sps:$4 sm:$0xff]  }
 0x1ed   :  { %v12993_v6 = vpop.f32.mrb[108].mxu1 }
 0x1ee   :  { %16700 = vst [vmem:[#allocation9_spill] sm:$0xff] %v12993_v6  ;;  %v4131_v22 = vpop.f32.mrb[109].mxu1  ;;  %v11274_v6 = vld [vmem:[%s16572_s1 + $0xa84] ss:$24 sps:$4 sm:$0xff]  }
 0x1ef   :  { %v13004_v4 = vpop.f32.mrb[110].mxu1 }
 0x1f0   :  { %16701 = vst [vmem:[#allocation10_spill] sm:$0xff] %v13004_v4  ;;  %v4134_v40 = vpop.f32.mrb[111].mxu1  ;;  %v11273_v4 = vld [vmem:[%s16572_s1 + $0xa58] ss:$24 sps:$4 sm:$0xff]  }
 0x1f2   :  { %4344 = vmatmul.mubr.bf16.gmra.mrb[216].mxu1 %v11266_v17  ;;  %5145 = vmatmul.mubr.bf16.gmra.mrb[216].mxu0 %v11267_v36 }
 0x1f3   :  { %4351 = vmatprep.mubr.bf16.mxu1 %v11268_v0  ;;  %5152 = vmatprep.mubr.bf16.mxu0 %v11270_v35  ;;  %v11276_v0 = vld [vmem:[%s16572_s1 + $0xa8c] ss:$24 sps:$4 sm:$0xff]   ;;  %v11278_v35 = vld [vmem:[%s16572_s1 + $0xa80] ss:$24 sps:$4 sm:$0xff]  }
 0x1f5   :  { %v13009_v51 = vpop.f32.mrb[112].mxu1 }
 0x1f6   :  { %16702 = vst [vmem:[#allocation11_spill] sm:$0xff] %v13009_v51  ;;  %v4139_v22 = vpop.f32.mrb[113].mxu1  ;;  %v11280_v51 = vld [vmem:[%s16572_s1 + $0xab4] ss:$24 sps:$4 sm:$0xff]  }
 0x1f7   :  { %v13020_v40 = vpop.f32.mrb[114].mxu1 }
 0x1f8   :  { %16703 = vst [vmem:[#allocation12_spill] sm:$0xff] %v13020_v40  ;;  %v4142_v17 = vpop.f32.mrb[115].mxu1  ;;  %v11279_v40 = vld [vmem:[%s16572_s1 + $0xa88] ss:$24 sps:$4 sm:$0xff]  }
 0x1fa   :  { %4352 = vmatmul.mubr.bf16.gmra.mrb[220].mxu1 %v11272_v60  ;;  %5153 = vmatmul.mubr.bf16.gmra.mrb[220].mxu0 %v11273_v4 }
 0x1fb   :  { %4359 = vmatprep.mubr.bf16.mxu1 %v11274_v6  ;;  %5160 = vmatprep.mubr.bf16.mxu0 %v11276_v0  ;;  %v11282_v6 = vld [vmem:[%s16572_s1 + $0xabc] ss:$24 sps:$4 sm:$0xff]   ;;  %v11284_v0 = vld [vmem:[%s16572_s1 + $0xab0] ss:$24 sps:$4 sm:$0xff]  }
 0x1fd   :  { %v13025_v36 = vpop.f32.mrb[116].mxu1 }
 0x1fe   :  { %16704 = vst [vmem:[#allocation13_spill] sm:$0xff] %v13025_v36  ;;  %v4147_v22 = vpop.f32.mrb[117].mxu1  ;;  %v11286_v36 = vld [vmem:[%s16572_s1 + $0xae4] ss:$24 sps:$4 sm:$0xff]  }
 0x1ff   :  { %v13036_v17 = vpop.f32.mrb[118].mxu1 }
 0x200   :  { %16705 = vst [vmem:[#allocation14_spill] sm:$0xff] %v13036_v17  ;;  %v4150_v4 = vpop.f32.mrb[119].mxu1  ;;  %v11285_v17 = vld [vmem:[%s16572_s1 + $0xab8] ss:$24 sps:$4 sm:$0xff]  }
 0x202   :  { %4360 = vmatmul.mubr.bf16.gmra.mrb[224].mxu1 %v11278_v35  ;;  %5161 = vmatmul.mubr.bf16.gmra.mrb[224].mxu0 %v11279_v40 }
 0x203   :  { %4367 = vmatprep.mubr.bf16.mxu1 %v11280_v51  ;;  %5168 = vmatprep.mubr.bf16.mxu0 %v11282_v6  ;;  %v11288_v51 = vld [vmem:[%s16572_s1 + $0xaec] ss:$24 sps:$4 sm:$0xff]   ;;  %v11290_v6 = vld [vmem:[%s16572_s1 + $0xae0] ss:$24 sps:$4 sm:$0xff]  }
 0x205   :  { %v13041_v60 = vpop.f32.mrb[120].mxu1 }
 0x206   :  { %16706 = vst [vmem:[#allocation15_spill] sm:$0xff] %v13041_v60  ;;  %v4155_v22 = vpop.f32.mrb[121].mxu1  ;;  %v11292_v60 = vld [vmem:[%s16572_s1 + $0xb14] ss:$24 sps:$4 sm:$0xff]  }
 0x207   :  { %v13052_v4 = vpop.f32.mrb[122].mxu1 }
 0x208   :  { %16707 = vst [vmem:[#allocation16_spill] sm:$0xff] %v13052_v4  ;;  %v4158_v40 = vpop.f32.mrb[123].mxu1  ;;  %v11291_v4 = vld [vmem:[%s16572_s1 + $0xae8] ss:$24 sps:$4 sm:$0xff]  }
 0x20a   :  { %4368 = vmatmul.mubr.bf16.gmra.mrb[228].mxu1 %v11284_v0  ;;  %5169 = vmatmul.mubr.bf16.gmra.mrb[228].mxu0 %v11285_v17 }
 0x20b   :  { %4375 = vmatprep.mubr.bf16.mxu1 %v11286_v36  ;;  %5176 = vmatprep.mubr.bf16.mxu0 %v11288_v51  ;;  %v11294_v36 = vld [vmem:[%s16572_s1 + $0xb1c] ss:$24 sps:$4 sm:$0xff]   ;;  %v11296_v51 = vld [vmem:[%s16572_s1 + $0xb10] ss:$24 sps:$4 sm:$0xff]  }
 0x20d   :  { %v13057_v35 = vpop.f32.mrb[124].mxu1 }
 0x20e   :  { %16708 = vst [vmem:[#allocation17_spill] sm:$0xff] %v13057_v35  ;;  %v4163_v22 = vpop.f32.mrb[125].mxu1  ;;  %v11298_v35 = vld [vmem:[%s16572_s1 + $0xb44] ss:$24 sps:$4 sm:$0xff]  }
 0x20f   :  { %v13068_v40 = vpop.f32.mrb[126].mxu1 }
 0x210   :  { %16709 = vst [vmem:[#allocation18_spill] sm:$0xff] %v13068_v40  ;;  %v4166_v17 = vpop.f32.mrb[127].mxu1  ;;  %v11297_v40 = vld [vmem:[%s16572_s1 + $0xb18] ss:$24 sps:$4 sm:$0xff]  }
 0x212   :  { %4376 = vmatmul.mubr.bf16.gmra.mrb[232].mxu1 %v11290_v6  ;;  %5177 = vmatmul.mubr.bf16.gmra.mrb[232].mxu0 %v11291_v4 }
 0x213   :  { %4383 = vmatprep.mubr.bf16.mxu1 %v11292_v60  ;;  %5184 = vmatprep.mubr.bf16.mxu0 %v11294_v36  ;;  %v11300_v60 = vld [vmem:[%s16572_s1 + $0xb4c] ss:$24 sps:$4 sm:$0xff]   ;;  %v11302_v36 = vld [vmem:[%s16572_s1 + $0xb40] ss:$24 sps:$4 sm:$0xff]  }
 0x215   :  { %v13073_v0 = vpop.f32.mrb[128].mxu1 }
 0x216   :  { %16710 = vst [vmem:[#allocation19_spill] sm:$0xff] %v13073_v0  ;;  %v4171_v22 = vpop.f32.mrb[129].mxu1  ;;  %v11304_v0 = vld [vmem:[%s16572_s1 + $0xb74] ss:$24 sps:$4 sm:$0xff]  }
 0x217   :  { %v13084_v17 = vpop.f32.mrb[130].mxu1 }
 0x218   :  { %16711 = vst [vmem:[#allocation20_spill] sm:$0xff] %v13084_v17  ;;  %v4174_v4 = vpop.f32.mrb[131].mxu1  ;;  %v11303_v17 = vld [vmem:[%s16572_s1 + $0xb48] ss:$24 sps:$4 sm:$0xff]  }
 0x21a   :  { %4384 = vmatmul.mubr.bf16.gmra.mrb[236].mxu1 %v11296_v51  ;;  %5185 = vmatmul.mubr.bf16.gmra.mrb[236].mxu0 %v11297_v40 }
 0x21b   :  { %4391 = vmatprep.mubr.bf16.mxu1 %v11298_v35  ;;  %5192 = vmatprep.mubr.bf16.mxu0 %v11300_v60  ;;  %v11306_v35 = vld [vmem:[%s16572_s1 + $0xb7c] ss:$24 sps:$4 sm:$0xff]   ;;  %v11308_v60 = vld [vmem:[%s16572_s1 + $0xb70] ss:$24 sps:$4 sm:$0xff]  }
 0x21d   :  { %v13089_v6 = vpop.f32.mrb[132].mxu1 }
 0x21e   :  { %16712 = vst [vmem:[#allocation21_spill] sm:$0xff] %v13089_v6  ;;  %v4179_v22 = vpop.f32.mrb[133].mxu1  ;;  %v11310_v6 = vld [vmem:[%s16572_s1 + $0xba4] ss:$24 sps:$4 sm:$0xff]  }
 0x21f   :  { %v13100_v4 = vpop.f32.mrb[134].mxu1 }
 0x220   :  { %16713 = vst [vmem:[#allocation22_spill] sm:$0xff] %v13100_v4  ;;  %v4182_v40 = vpop.f32.mrb[135].mxu1  ;;  %v11309_v4 = vld [vmem:[%s16572_s1 + $0xb78] ss:$24 sps:$4 sm:$0xff]  }
 0x222   :  { %4392 = vmatmul.mubr.bf16.gmra.mrb[240].mxu1 %v11302_v36  ;;  %5193 = vmatmul.mubr.bf16.gmra.mrb[240].mxu0 %v11303_v17 }
 0x223   :  { %4399 = vmatprep.mubr.bf16.mxu1 %v11304_v0  ;;  %5200 = vmatprep.mubr.bf16.mxu0 %v11306_v35  ;;  %v11312_v0 = vld [vmem:[%s16572_s1 + $0xbac] ss:$24 sps:$4 sm:$0xff]   ;;  %v11314_v35 = vld [vmem:[%s16572_s1 + $0xba0] ss:$24 sps:$4 sm:$0xff]  }
 0x225   :  { %v13105_v51 = vpop.f32.mrb[136].mxu1 }
 0x226   :  { %16714 = vst [vmem:[#allocation23_spill] sm:$0xff] %v13105_v51  ;;  %v4187_v22 = vpop.f32.mrb[137].mxu1 }
 0x227   :  { %v13116_v40 = vpop.f32.mrb[138].mxu1 }
 0x228   :  { %16715 = vst [vmem:[#allocation24_spill] sm:$0xff] %v13116_v40  ;;  %v4190_v17 = vpop.f32.mrb[139].mxu1  ;;  %v11315_v40 = vld [vmem:[%s16572_s1 + $0xba8] ss:$24 sps:$4 sm:$0xff]  }
 0x22a   :  { %4400 = vmatmul.mubr.bf16.gmra.mrb[244].mxu1 %v11308_v60  ;;  %5201 = vmatmul.mubr.bf16.gmra.mrb[244].mxu0 %v11309_v4  ;;  %v11316_v60 = vld [vmem:[%s16572_s1 + $0xbd4] ss:$24 sps:$4 sm:$0xff]  }
 0x22b   :  { %4407 = vmatprep.mubr.bf16.mxu1 %v11310_v6  ;;  %5208 = vmatprep.mubr.bf16.mxu0 %v11312_v0  ;;  %v11318_v6 = vld [vmem:[%s16572_s1 + $0xbdc] ss:$24 sps:$4 sm:$0xff]  }
 0x22d   :  { %v13121_v36 = vpop.f32.mrb[140].mxu1 }
 0x22e   :  { %16716 = vst [vmem:[#allocation25_spill] sm:$0xff] %v13121_v36  ;;  %v4195_v22 = vpop.f32.mrb[141].mxu1 }
 0x22f   :  { %v13129_v51 = vpop.f32.mrb[142].mxu1  ;;  %v11320_v22 = vld [vmem:[%s16572_s1 + $0xbd0] ss:$24 sps:$4 sm:$0xff]  }
 0x230   :  { %16717 = vst [vmem:[#allocation26_spill] sm:$0xff] %v13129_v51  ;;  %v4198_v4 = vpop.f32.mrb[143].mxu1  ;;  %v11321_v51 = vld [vmem:[%s16572_s1 + $0xbd8] ss:$24 sps:$4 sm:$0xff]  }
 0x232   :  { %4408 = vmatmul.mubr.bf16.gmra.mrb[248].mxu1 %v11314_v35  ;;  %5209 = vmatmul.mubr.bf16.gmra.mrb[248].mxu0 %v11315_v40  ;;  %v11324_v35 = vld [vmem:[%s16572_s1 + $0xc04] ss:$24 sps:$4 sm:$0xff]  }
 0x233   :  { %4415 = vmatprep.mubr.bf16.mxu1 %v11316_v60  ;;  %5216 = vmatprep.mubr.bf16.mxu0 %v11318_v6  ;;  %v11327_v60 = vld [vmem:[%s16572_s1 + $0xc0c] ss:$24 sps:$4 sm:$0xff]  }
 0x235   :  { %v13137_v0 = vpop.f32.mrb[144].mxu1 }
 0x236   :  { %16718 = vst [vmem:[#allocation27_spill] sm:$0xff] %v13137_v0  ;;  %v4203_v17 = vpop.f32.mrb[145].mxu1 }
 0x237   :  { %v13145_v4 = vpop.f32.mrb[146].mxu1 }
 0x238   :  { %16719 = vst [vmem:[#allocation28_spill] sm:$0xff] %v13145_v4  ;;  %v4206_v40 = vpop.f32.mrb[147].mxu1  ;;  %v11322_v4 = vld [vmem:[%s16572_s1 + $0xc00] ss:$24 sps:$4 sm:$0xff]  }
 0x239   :  { %v11325_v40 = vld [vmem:[%s16572_s1 + $0xc08] ss:$24 sps:$4 sm:$0xff]  }
 0x23a   :  { %4416 = vmatmul.mubr.bf16.gmra.mrb[252].mxu1 %v11320_v22  ;;  %5217 = vmatmul.mubr.bf16.gmra.mrb[252].mxu0 %v11321_v51  ;;  %v11330_v22 = vld [vmem:[%s16572_s1 + $0xc34] ss:$24 sps:$4 sm:$0xff]  }
 0x23b   :  { %4423 = vmatprep.mubr.bf16.mxu1 %v11324_v35  ;;  %5224 = vmatprep.mubr.bf16.mxu0 %v11327_v60 }
 0x23d   :  { %v4209_v6 = vpop.f32.mrb[148].mxu1  ;;  %v5010_v17 = vpop.f32.mrb[148].mxu0 }
 0x23e   :  { %v4211_v0 = vpop.f32.mrb[149].mxu1  ;;  %v5012_v36 = vpop.f32.mrb[149].mxu0  ;;  %v13162_v51 = vadd.f32 %v5010_v17, %v4209_v6  ;;  %v11328_v6 = vld [vmem:[%s16572_s1 + $0xc30] ss:$24 sps:$4 sm:$0xff]  }
 0x23f   :  { %v4212_v63 = vpop.f32.mrb[150].mxu1  ;;  %v5013_v35 = vpop.f32.mrb[150].mxu0  ;;  %v11333_v0 = vld [vmem:[%s16572_s1 + $0xc3c] ss:$24 sps:$4 sm:$0xff]  }
 0x240   :  { %16720 = vst [vmem:[#allocation29_spill] sm:$0xff] %v13162_v51  ;;  %v4214_v60 = vpop.f32.mrb[151].mxu1  ;;  %v5015_v26 = vpop.f32.mrb[151].mxu0  ;;  %v13167_v13 = vadd.f32 %v5013_v35, %v4212_v63  ;;  %v11331_v51 = vld [vmem:[%s16572_s1 + $0xc38] ss:$24 sps:$4 sm:$0xff]  }
 0x241   :  { %v11336_v26 = vld [vmem:[%s16572_s1 + $0xc64] ss:$24 sps:$4 sm:$0xff]  }
 0x242   :  { %16721 = vst [vmem:[#allocation30_spill] sm:$0xff] %v13167_v13  ;;  %4424 = vmatmul.mubr.bf16.gmra.mrb[148].mxu1 %v11322_v4  ;;  %5225 = vmatmul.mubr.bf16.gmra.mrb[148].mxu0 %v11325_v40 }
 0x243   :  { %4431 = vmatprep.mubr.bf16.mxu1 %v11330_v22  ;;  %5232 = vmatprep.mubr.bf16.mxu0 %v11333_v0  ;;  %v11388_v22 = vld [vmem:[%s16571_s0 + $0x100] sm:$0xff]  }
 0x244   :  { %5482 = vmatpush1.bf16.msra.mxu0 %v11388_v22 }
 0x245   :  { %v4217_v36 = vpop.f32.mrb[152].mxu1  ;;  %v5018_v54 = vpop.f32.mrb[152].mxu0 }
 0x246   :  { %v4219_v39 = vpop.f32.mrb[153].mxu1  ;;  %v5020_v17 = vpop.f32.mrb[153].mxu0  ;;  %v13178_v63 = vadd.f32 %v5018_v54, %v4217_v36  ;;  %v16724_v54 = vmov 0  }
 0x247   :  { %v4220_v60 = vpop.f32.mrb[154].mxu1  ;;  %v5021_v4 = vpop.f32.mrb[154].mxu0  ;;  %v11339_v39 = vld [vmem:[%s16572_s1 + $0xc6c] ss:$24 sps:$4 sm:$0xff]   ;;  %5483 = vmatprep.subr.bf16.mxu0 %v16724_v54 }
 0x248   :  { %16722 = vst [vmem:[#allocation31_spill] sm:$0xff] %v13178_v63  ;;  %v4222_v40 = vpop.f32.mrb[155].mxu1  ;;  %v5023_v35 = vpop.f32.mrb[155].mxu0  ;;  %v13186_v0 = vadd.f32 %v5021_v4, %v4220_v60  ;;  %v11334_v63 = vld [vmem:[%s16572_s1 + $0xc60] ss:$24 sps:$4 sm:$0xff]  }
 0x249   :  { %v11337_v60 = vld [vmem:[%s16572_s1 + $0xc68] ss:$24 sps:$4 sm:$0xff]  }
 0x24a   :  { %16723 = vst [vmem:[#allocation32_spill] sm:$0xff] %v13186_v0  ;;  %4432 = vmatmul.mubr.bf16.gmra.mrb[152].mxu1 %v11328_v6  ;;  %5233 = vmatmul.mubr.bf16.gmra.mrb[152].mxu0 %v11331_v51  ;;  %v11342_v51 = vld [vmem:[%s16572_s1 + $0xc94] ss:$24 sps:$4 sm:$0xff]  }
 0x24b   :  { %4439 = vmatprep.mubr.bf16.mxu1 %v11336_v26  ;;  %5240 = vmatprep.mubr.bf16.mxu0 %v11339_v39  ;;  %v11345_v39 = vld [vmem:[%s16572_s1 + $0xc9c] ss:$24 sps:$4 sm:$0xff]  }
 0x24d   :  { %v4225_v36 = vpop.f32.mrb[156].mxu1  ;;  %v5026_v17 = vpop.f32.mrb[156].mxu0 }
 0x24e   :  { %v4227_v40 = vpop.f32.mrb[157].mxu1  ;;  %v5028_v13 = vpop.f32.mrb[157].mxu0  ;;  %v13198_v6 = vadd.f32 %v5026_v17, %v4225_v36  ;;  %v11340_v36 = vld [vmem:[%s16572_s1 + $0xc90] ss:$24 sps:$4 sm:$0xff]  }
 0x24f   :  { %v4228_v19 = vpop.f32.mrb[158].mxu1  ;;  %v5029_v26 = vpop.f32.mrb[158].mxu0 }
 0x250   :  { %16725 = vst [vmem:[#allocation33_spill] sm:$0xff] %v13198_v6  ;;  %v4230_v4 = vpop.f32.mrb[159].mxu1  ;;  %v5031_v22 = vpop.f32.mrb[159].mxu0  ;;  %v13203_v35 = vadd.f32 %v5029_v26, %v4228_v19  ;;  %v11343_v6 = vld [vmem:[%s16572_s1 + $0xc98] ss:$24 sps:$4 sm:$0xff]  }
 0x251   :  { %v11348_v19 = vld [vmem:[%s16572_s1 + $0xcc4] ss:$24 sps:$4 sm:$0xff]  }
 0x252   :  { %16726 = vst [vmem:[#allocation34_spill] sm:$0xff] %v13203_v35  ;;  %4440 = vmatmul.mubr.bf16.gmra.mrb[156].mxu1 %v11334_v63  ;;  %5241 = vmatmul.mubr.bf16.gmra.mrb[156].mxu0 %v11337_v60 }
 0x253   :  { %4447 = vmatprep.mubr.bf16.mxu1 %v11342_v51  ;;  %5248 = vmatprep.mubr.bf16.mxu0 %v11345_v39 }
 0x255   :  { %v4233_v13 = vpop.f32.mrb[160].mxu1  ;;  %v5034_v40 = vpop.f32.mrb[160].mxu0 }
 0x256   :  { %v4235_v0 = vpop.f32.mrb[161].mxu1  ;;  %v5036_v17 = vpop.f32.mrb[161].mxu0  ;;  %v13214_v63 = vadd.f32 %v5034_v40, %v4233_v13  ;;  %v11346_v13 = vld [vmem:[%s16572_s1 + $0xcc0] ss:$24 sps:$4 sm:$0xff]  }
 0x257   :  { %v4236_v4 = vpop.f32.mrb[162].mxu1  ;;  %v5037_v60 = vpop.f32.mrb[162].mxu0  ;;  %v11351_v0 = vld [vmem:[%s16572_s1 + $0xccc] ss:$24 sps:$4 sm:$0xff]  }
 0x258   :  { %16727 = vst [vmem:[#allocation35_spill] sm:$0xff] %v13214_v63  ;;  %v4238_v51 = vpop.f32.mrb[163].mxu1  ;;  %v5039_v26 = vpop.f32.mrb[163].mxu0  ;;  %v13219_v39 = vadd.f32 %v5037_v60, %v4236_v4  ;;  %v11349_v63 = vld [vmem:[%s16572_s1 + $0xcc8] ss:$24 sps:$4 sm:$0xff]  }
 0x25a   :  { %16728 = vst [vmem:[#allocation36_spill] sm:$0xff] %v13219_v39  ;;  %4448 = vmatmul.mubr.bf16.gmra.mrb[160].mxu1 %v11340_v36  ;;  %5249 = vmatmul.mubr.bf16.gmra.mrb[160].mxu0 %v11343_v6  ;;  %v11354_v6 = vld [vmem:[%s16572_s1 + $0xcfc] ss:$24 sps:$4 sm:$0xff]  }
 0x25b   :  { %4455 = vmatprep.mubr.bf16.mxu1 %v11348_v19  ;;  %5256 = vmatprep.mubr.bf16.mxu0 %v11351_v0 }
 0x25d   :  { %v4241_v22 = vpop.f32.mrb[164].mxu1  ;;  %v5042_v17 = vpop.f32.mrb[164].mxu0 }
 0x25e   :  { %v4243_v35 = vpop.f32.mrb[165].mxu1  ;;  %v5044_v40 = vpop.f32.mrb[165].mxu0  ;;  %v13227_v26 = vadd.f32 %v5042_v17, %v4241_v22  ;;  %v11352_v22 = vld [vmem:[%s16572_s1 + $0xcf8] ss:$24 sps:$4 sm:$0xff]  }
 0x25f   :  { %v4244_v51 = vpop.f32.mrb[166].mxu1  ;;  %v5045_v4 = vpop.f32.mrb[166].mxu0 }
 0x260   :  { %16729 = vst [vmem:[#allocation37_spill] sm:$0xff] %v13227_v26  ;;  %v4246_v36 = vpop.f32.mrb[167].mxu1  ;;  %v5047_v19 = vpop.f32.mrb[167].mxu0  ;;  %v13232_v35 = vadd.f32 %v5045_v4, %v4244_v51  ;;  %v11357_v51 = vld [vmem:[%s16572_s1 + $0xd2c] ss:$24 sps:$4 sm:$0xff]  }
 0x262   :  { %4456 = vmatmul.mubr.bf16.gmra.mrb[164].mxu1 %v11346_v13  ;;  %5257 = vmatmul.mubr.bf16.gmra.mrb[164].mxu0 %v11349_v63 }
 0x263   :  { %5264 = vmatprep.mubr.bf16.mxu0 %v11354_v6 }
 0x265   :  { %v4249_v60 = vpop.f32.mrb[168].mxu1  ;;  %v5050_v0 = vpop.f32.mrb[168].mxu0 }
 0x266   :  { %v4251_v40 = vpop.f32.mrb[169].mxu1  ;;  %v5052_v39 = vpop.f32.mrb[169].mxu0  ;;  %v13237_v17 = vadd.f32 %v5050_v0, %v4249_v60  ;;  %v11355_v60 = vld [vmem:[%s16572_s1 + $0xd28] ss:$24 sps:$4 sm:$0xff]  }
 0x267   :  { %v4252_v12 = vpop.f32.mrb[170].mxu1  ;;  %v5053_v36 = vpop.f32.mrb[170].mxu0 }
 0x268   :  { %16730 = vst [vmem:[#allocation38_spill] sm:$0xff] %v13237_v17  ;;  %v4254_v26 = vpop.f32.mrb[171].mxu1  ;;  %v5055_v13 = vpop.f32.mrb[171].mxu0  ;;  %v13242_v63 = vadd.f32 %v5053_v36, %v4252_v12  ;;  %v11360_v12 = vld [vmem:[%s16572_s1 + $0xd5c] ss:$24 sps:$4 sm:$0xff]  }
 0x26a   :  { %16731 = vst [vmem:[#allocation39_spill] sm:$0xff] %v13242_v63  ;;  %5265 = vmatmul.mubr.bf16.gmra.mrb[168].mxu0 %v11352_v22 }
 0x26b   :  { %5272 = vmatprep.mubr.bf16.mxu0 %v11357_v51 }
 0x26d   :  { %v4257_v4 = vpop.f32.mrb[172].mxu1  ;;  %v5058_v39 = vpop.f32.mrb[172].mxu0 }
 0x26e   :  { %v4259_v6 = vpop.f32.mrb[173].mxu1  ;;  %v5060_v19 = vpop.f32.mrb[173].mxu0  ;;  %v13247_v0 = vadd.f32 %v5058_v39, %v4257_v4  ;;  %v11358_v4 = vld [vmem:[%s16572_s1 + $0xd58] ss:$24 sps:$4 sm:$0xff]  }
 0x26f   :  { %v4260_v40 = vpop.f32.mrb[174].mxu1  ;;  %v5061_v26 = vpop.f32.mrb[174].mxu0 }
 0x270   :  { %16732 = vst [vmem:[#allocation40_spill] sm:$0xff] %v13247_v0  ;;  %v4262_v17 = vpop.f32.mrb[175].mxu1  ;;  %v5063_v36 = vpop.f32.mrb[175].mxu0  ;;  %v13252_v22 = vadd.f32 %v5061_v26, %v4260_v40  ;;  %v11363_v40 = vld [vmem:[%s16572_s1 + $0xd8c] ss:$24 sps:$4 sm:$0xff]  }
 0x272   :  { %16733 = vst [vmem:[#allocation41_spill] sm:$0xff] %v13252_v22  ;;  %5273 = vmatmul.mubr.bf16.gmra.mrb[172].mxu0 %v11355_v60  ;;  %v11407_v60 = vld [vmem:[%s16571_s0 + $0x108] sm:$0xff]  }
 0x273   :  { %5280 = vmatprep.mubr.bf16.mxu0 %v11360_v12  ;;  %5484 = vmatpush1.bf16.msra.mxu0 %v11407_v60 }
 0x274   :  { %5485 = vmatprep.subr.bf16.mxu0 %v16724_v54 }
 0x275   :  { %v4265_v51 = vpop.f32.mrb[176].mxu1  ;;  %v5066_v13 = vpop.f32.mrb[176].mxu0 }
 0x276   :  { %v4267_v6 = vpop.f32.mrb[177].mxu1  ;;  %v5068_v19 = vpop.f32.mrb[177].mxu0  ;;  %v13257_v39 = vadd.f32 %v5066_v13, %v4265_v51 }
 0x277   :  { %v4268_v63 = vpop.f32.mrb[178].mxu1  ;;  %v5069_v17 = vpop.f32.mrb[178].mxu0  ;;  %v11361_v19 = vld [vmem:[%s16572_s1 + $0xd88] ss:$24 sps:$4 sm:$0xff]  }
 0x278   :  { %16734 = vst [vmem:[#allocation42_spill] sm:$0xff] %v13257_v39  ;;  %v4270_v0 = vpop.f32.mrb[179].mxu1  ;;  %v5071_v26 = vpop.f32.mrb[179].mxu0  ;;  %v13265_v12 = vadd.f32 %v5069_v17, %v4268_v63  ;;  %v11366_v63 = vld [vmem:[%s16572_s1 + $0xdbc] ss:$24 sps:$4 sm:$0xff]  }
 0x27a   :  { %16735 = vst [vmem:[#allocation43_spill] sm:$0xff] %v13265_v12  ;;  %5281 = vmatmul.mubr.bf16.gmra.mrb[176].mxu0 %v11358_v4 }
 0x27b   :  { %5288 = vmatprep.mubr.bf16.mxu0 %v11363_v40 }
 0x27d   :  { %v4273_v36 = vpop.f32.mrb[180].mxu1  ;;  %v5074_v51 = vpop.f32.mrb[180].mxu0 }
 0x27e   :  { %v4275_v13 = vpop.f32.mrb[181].mxu1  ;;  %v5076_v0 = vpop.f32.mrb[181].mxu0  ;;  %v13271_v39 = vadd.f32 %v5074_v51, %v4273_v36  ;;  %v11364_v36 = vld [vmem:[%s16572_s1 + $0xdb8] ss:$24 sps:$4 sm:$0xff]  }
 0x27f   :  { %v4276_v6 = vpop.f32.mrb[182].mxu1  ;;  %v5077_v22 = vpop.f32.mrb[182].mxu0 }
 0x280   :  { %16736 = vst [vmem:[#allocation44_spill] sm:$0xff] %v13271_v39  ;;  %v4278_v26 = vpop.f32.mrb[183].mxu1  ;;  %v5079_v4 = vpop.f32.mrb[183].mxu0  ;;  %v13276_v17 = vadd.f32 %v5077_v22, %v4276_v6  ;;  %v11369_v22 = vld [vmem:[%s16572_s1 + $0xdec] ss:$24 sps:$4 sm:$0xff]  }
 0x282   :  { %16737 = vst [vmem:[#allocation45_spill] sm:$0xff] %v13276_v17  ;;  %5289 = vmatmul.mubr.bf16.gmra.mrb[180].mxu0 %v11361_v19 }
 0x283   :  { %5296 = vmatprep.mubr.bf16.mxu0 %v11366_v63  ;;  %v11417_v63 = vld [vmem:[%s16571_s0 + $0x110] sm:$0xff]  }
 0x284   :  { %5486 = vmatpush1.bf16.msra.mxu0 %v11417_v63 }
 0x285   :  { %v4281_v40 = vpop.f32.mrb[184].mxu1  ;;  %v5082_v60 = vpop.f32.mrb[184].mxu0  ;;  %5487 = vmatprep.subr.bf16.mxu0 %v16724_v54 }
 0x286   :  { %v4283_v13 = vpop.f32.mrb[185].mxu1  ;;  %v5084_v0 = vpop.f32.mrb[185].mxu0  ;;  %v13281_v51 = vadd.f32 %v5082_v60, %v4281_v40 }
 0x287   :  { %v4284_v12 = vpop.f32.mrb[186].mxu1  ;;  %v5085_v26 = vpop.f32.mrb[186].mxu0 }
 0x288   :  { %16738 = vst [vmem:[#allocation46_spill] sm:$0xff] %v13281_v51  ;;  %v4286_v39 = vpop.f32.mrb[187].mxu1  ;;  %v5087_v6 = vpop.f32.mrb[187].mxu0  ;;  %v13286_v19 = vadd.f32 %v5085_v26, %v4284_v12  ;;  %v11367_v12 = vld [vmem:[%s16572_s1 + $0xde8] ss:$24 sps:$4 sm:$0xff]  }
 0x289   :  { %v11418_v39 = vld [vmem:[%s16571_s0 + $0x118] sm:$0xff]  }
 0x28a   :  { %16739 = vst [vmem:[#allocation47_spill] sm:$0xff] %v13286_v19  ;;  %5297 = vmatmul.mubr.bf16.gmra.mrb[184].mxu0 %v11364_v36  ;;  %v11372_v6 = vld [vmem:[%s16572_s1 + $0xe1c] ss:$24 sps:$4 sm:$0xff]  }
 0x28b   :  { %5304 = vmatprep.mubr.bf16.mxu0 %v11369_v22  ;;  %5488 = vmatpush1.bf16.msra.mxu0 %v11418_v39  ;;  %v11423_v39 = vld [vmem:[%s16571_s0 + $0x128] sm:$0xff]  }
 0x28c   :  { %5489 = vmatprep.subr.bf16.mxu0 %v16724_v54 }
 0x28d   :  { %v4289_v4 = vpop.f32.mrb[188].mxu1  ;;  %v5090_v40 = vpop.f32.mrb[188].mxu0 }
 0x28e   :  { %v4291_v60 = vpop.f32.mrb[189].mxu1  ;;  %v5092_v13 = vpop.f32.mrb[189].mxu0  ;;  %v13298_v26 = vadd.f32 %v5090_v40, %v4289_v4 }
 0x28f   :  { %v4292_v0 = vpop.f32.mrb[190].mxu1  ;;  %v5093_v36 = vpop.f32.mrb[190].mxu0  ;;  %v11422_v13 = vld [vmem:[%s16571_s0 + $0x120] sm:$0xff]  }
 0x290   :  { %16740 = vst [vmem:[#allocation48_spill] sm:$0xff] %v13298_v26  ;;  %v4294_v22 = vpop.f32.mrb[191].mxu1  ;;  %v5095_v63 = vpop.f32.mrb[191].mxu0  ;;  %v13304_v60 = vadd.f32 %v5093_v36, %v4292_v0  ;;  %5490 = vmatpush1.bf16.msra.mxu0 %v11422_v13  ;;  %v11370_v0 = vld [vmem:[%s16572_s1 + $0xe18] ss:$24 sps:$4 sm:$0xff]  }
 0x291   :  { %5491 = vmatprep.subr.bf16.mxu0 %v16724_v54  ;;  %v11375_v13 = vld [vmem:[%s16572_s1 + $0xe4c] ss:$24 sps:$4 sm:$0xff]  }
 0x292   :  { %16741 = vst [vmem:[#allocation49_spill] sm:$0xff] %v13304_v60  ;;  %5305 = vmatmul.mubr.bf16.gmra.mrb[188].mxu0 %v11367_v12 }
 0x293   :  { %5312 = vmatprep.mubr.bf16.mxu0 %v11372_v6 }
 0x294   :  { %5492 = vmatpush1.bf16.msra.mxu0 %v11423_v39  ;;  %v11428_v39 = vld [vmem:[%s16571_s0 + $0x138] sm:$0xff]  }
 0x295   :  { %v4297_v4 = vpop.f32.mrb[192].mxu1  ;;  %v5098_v40 = vpop.f32.mrb[192].mxu0  ;;  %5493 = vmatprep.subr.bf16.mxu0 %v16724_v54 }
 0x296   :  { %v4299_v22 = vpop.f32.mrb[193].mxu1  ;;  %v5100_v63 = vpop.f32.mrb[193].mxu0  ;;  %v13316_v36 = vadd.f32 %v5098_v40, %v4297_v4 }
 0x297   :  { %v4300_v26 = vpop.f32.mrb[194].mxu1  ;;  %v5101_v12 = vpop.f32.mrb[194].mxu0  ;;  %v11427_v63 = vld [vmem:[%s16571_s0 + $0x130] sm:$0xff]  }
 0x298   :  { %16742 = vst [vmem:[#allocation50_spill] sm:$0xff] %v13316_v36  ;;  %v4302_v6 = vpop.f32.mrb[195].mxu1  ;;  %v5103_v22 = vpop.f32.mrb[195].mxu0  ;;  %v13322_v60 = vadd.f32 %v5101_v12, %v4300_v26  ;;  %5494 = vmatpush1.bf16.msra.mxu0 %v11427_v63  ;;  %v11373_v26 = vld [vmem:[%s16572_s1 + $0xe48] ss:$24 sps:$4 sm:$0xff]  }
 0x299   :  { %5495 = vmatprep.subr.bf16.mxu0 %v16724_v54  ;;  %v11378_v63 = vld [vmem:[%s16572_s1 + $0xe7c] ss:$24 sps:$4 sm:$0xff]  }
 0x29a   :  { %16743 = vst [vmem:[#allocation51_spill] sm:$0xff] %v13322_v60  ;;  %5313 = vmatmul.mubr.bf16.gmra.mrb[192].mxu0 %v11370_v0 }
 0x29b   :  { %5320 = vmatprep.mubr.bf16.mxu0 %v11375_v13 }
 0x29c   :  { %5496 = vmatpush1.bf16.msra.mxu0 %v11428_v39  ;;  %v11433_v39 = vld [vmem:[%s16571_s0 + $0x148] sm:$0xff]  }
 0x29d   :  { %v4305_v4 = vpop.f32.mrb[196].mxu1  ;;  %v5106_v40 = vpop.f32.mrb[196].mxu0  ;;  %5497 = vmatprep.subr.bf16.mxu0 %v16724_v54 }
 0x29e   :  { %v4307_v6 = vpop.f32.mrb[197].mxu1  ;;  %v5108_v22 = vpop.f32.mrb[197].mxu0  ;;  %v13334_v12 = vadd.f32 %v5106_v40, %v4305_v4 }
 0x29f   :  { %v4308_v36 = vpop.f32.mrb[198].mxu1  ;;  %v5109_v0 = vpop.f32.mrb[198].mxu0  ;;  %v11432_v22 = vld [vmem:[%s16571_s0 + $0x140] sm:$0xff]  }
 0x2a0   :  { %16744 = vst [vmem:[#allocation52_spill] sm:$0xff] %v13334_v12  ;;  %v4310_v13 = vpop.f32.mrb[199].mxu1  ;;  %v5111_v6 = vpop.f32.mrb[199].mxu0  ;;  %v13340_v60 = vadd.f32 %v5109_v0, %v4308_v36  ;;  %5498 = vmatpush1.bf16.msra.mxu0 %v11432_v22  ;;  %v11376_v36 = vld [vmem:[%s16572_s1 + $0xe78] ss:$24 sps:$4 sm:$0xff]  }
 0x2a1   :  { %5499 = vmatprep.subr.bf16.mxu0 %v16724_v54  ;;  %v11381_v22 = vld [vmem:[%s16572_s1 + $0xeac] ss:$24 sps:$4 sm:$0xff]  }
 0x2a2   :  { %16745 = vst [vmem:[#allocation53_spill] sm:$0xff] %v13340_v60  ;;  %5321 = vmatmul.mubr.bf16.gmra.mrb[196].mxu0 %v11373_v26 }
 0x2a3   :  { %5328 = vmatprep.mubr.bf16.mxu0 %v11378_v63 }
 0x2a4   :  { %5500 = vmatpush1.bf16.msra.mxu0 %v11433_v39  ;;  %v11438_v39 = vld [vmem:[%s16571_s0 + $0x158] sm:$0xff]  }
 0x2a5   :  { %v4313_v4 = vpop.f32.mrb[200].mxu1  ;;  %v5114_v40 = vpop.f32.mrb[200].mxu0  ;;  %5501 = vmatprep.subr.bf16.mxu0 %v16724_v54 }
 0x2a6   :  { %v4315_v13 = vpop.f32.mrb[201].mxu1  ;;  %v5116_v6 = vpop.f32.mrb[201].mxu0  ;;  %v13352_v0 = vadd.f32 %v5114_v40, %v4313_v4 }
 0x2a7   :  { %v4316_v12 = vpop.f32.mrb[202].mxu1  ;;  %v5117_v26 = vpop.f32.mrb[202].mxu0  ;;  %v11437_v6 = vld [vmem:[%s16571_s0 + $0x150] sm:$0xff]  }
 0x2a8   :  { %16746 = vst [vmem:[#allocation54_spill] sm:$0xff] %v13352_v0  ;;  %v4318_v63 = vpop.f32.mrb[203].mxu1  ;;  %v5119_v13 = vpop.f32.mrb[203].mxu0  ;;  %v13358_v60 = vadd.f32 %v5117_v26, %v4316_v12  ;;  %5502 = vmatpush1.bf16.msra.mxu0 %v11437_v6  ;;  %v11379_v12 = vld [vmem:[%s16572_s1 + $0xea8] ss:$24 sps:$4 sm:$0xff]  }
 0x2a9   :  { %5503 = vmatprep.subr.bf16.mxu0 %v16724_v54  ;;  %v11384_v6 = vld [vmem:[%s16572_s1 + $0xedc] ss:$24 sps:$4 sm:$0xff]  }
 0x2aa   :  { %16747 = vst [vmem:[#allocation55_spill] sm:$0xff] %v13358_v60  ;;  %5329 = vmatmul.mubr.bf16.gmra.mrb[200].mxu0 %v11376_v36 }
 0x2ab   :  { %5336 = vmatprep.mubr.bf16.mxu0 %v11381_v22 }
 0x2ac   :  { %5504 = vmatpush1.bf16.msra.mxu0 %v11438_v39  ;;  %v11443_v39 = vld [vmem:[%s16571_s0 + $0x168] sm:$0xff]  }
 0x2ad   :  { %v4321_v4 = vpop.f32.mrb[204].mxu1  ;;  %v5122_v40 = vpop.f32.mrb[204].mxu0  ;;  %5505 = vmatprep.subr.bf16.mxu0 %v16724_v54 }
 0x2ae   :  { %v4323_v63 = vpop.f32.mrb[205].mxu1  ;;  %v5124_v13 = vpop.f32.mrb[205].mxu0  ;;  %v13370_v26 = vadd.f32 %v5122_v40, %v4321_v4 }
 0x2af   :  { %v4324_v0 = vpop.f32.mrb[206].mxu1  ;;  %v5125_v36 = vpop.f32.mrb[206].mxu0  ;;  %v11442_v13 = vld [vmem:[%s16571_s0 + $0x160] sm:$0xff]  }
 0x2b0   :  { %16748 = vst [vmem:[#allocation56_spill] sm:$0xff] %v13370_v26  ;;  %v4326_v22 = vpop.f32.mrb[207].mxu1  ;;  %v5127_v63 = vpop.f32.mrb[207].mxu0  ;;  %v13376_v60 = vadd.f32 %v5125_v36, %v4324_v0  ;;  %5506 = vmatpush1.bf16.msra.mxu0 %v11442_v13  ;;  %v11382_v0 = vld [vmem:[%s16572_s1 + $0xed8] ss:$24 sps:$4 sm:$0xff]  }
 0x2b1   :  { %5507 = vmatprep.subr.bf16.mxu0 %v16724_v54  ;;  %v11387_v13 = vld [vmem:[%s16572_s1 + $0xf0c] ss:$24 sps:$4 sm:$0xff]  }
 0x2b2   :  { %16749 = vst [vmem:[#allocation57_spill] sm:$0xff] %v13376_v60  ;;  %5337 = vmatmul.mubr.bf16.gmra.mrb[204].mxu0 %v11379_v12 }
 0x2b3   :  { %5344 = vmatprep.mubr.bf16.mxu0 %v11384_v6 }
 0x2b4   :  { %5508 = vmatpush1.bf16.msra.mxu0 %v11443_v39 }
 0x2b5   :  { %v4329_v4 = vpop.f32.mrb[208].mxu1  ;;  %v5130_v40 = vpop.f32.mrb[208].mxu0  ;;  %5509 = vmatprep.subr.bf16.mxu0 %v16724_v54 }
 0x2b6   :  { %v4331_v22 = vpop.f32.mrb[209].mxu1  ;;  %v5132_v63 = vpop.f32.mrb[209].mxu0  ;;  %v13388_v36 = vadd.f32 %v5130_v40, %v4329_v4  ;;  %v11448_v4 = vld [vmem:[%s16571_s0 + $0x178] sm:$0xff]  }
 0x2b7   :  { %v4332_v26 = vpop.f32.mrb[210].mxu1  ;;  %v5133_v12 = vpop.f32.mrb[210].mxu0  ;;  %v11447_v63 = vld [vmem:[%s16571_s0 + $0x170] sm:$0xff]  }
 0x2b8   :  { %16750 = vst [vmem:[#allocation58_spill] sm:$0xff] %v13388_v36  ;;  %v4334_v6 = vpop.f32.mrb[211].mxu1  ;;  %v5135_v22 = vpop.f32.mrb[211].mxu0  ;;  %v13394_v60 = vadd.f32 %v5133_v12, %v4332_v26  ;;  %5510 = vmatpush1.bf16.msra.mxu0 %v11447_v63  ;;  %v11385_v26 = vld [vmem:[%s16572_s1 + $0xf08] ss:$24 sps:$4 sm:$0xff]  }
 0x2b9   :  { %5511 = vmatprep.subr.bf16.mxu0 %v16724_v54  ;;  %v11391_v63 = vld [vmem:[%s16572_s1 + $0xf3c] ss:$24 sps:$4 sm:$0xff]  }
 0x2ba   :  { %16751 = vst [vmem:[#allocation59_spill] sm:$0xff] %v13394_v60  ;;  %5345 = vmatmul.mubr.bf16.gmra.mrb[208].mxu0 %v11382_v0 }
 0x2bb   :  { %5352 = vmatprep.mubr.bf16.mxu0 %v11387_v13 }
 0x2bc   :  { %5512 = vmatpush1.bf16.msra.mxu0 %v11448_v4 }
 0x2bd   :  { %v4337_v40 = vpop.f32.mrb[212].mxu1  ;;  %v5138_v39 = vpop.f32.mrb[212].mxu0 }
 0x2be   :  { %v4339_v6 = vpop.f32.mrb[213].mxu1  ;;  %v5140_v22 = vpop.f32.mrb[213].mxu0  ;;  %v13406_v12 = vadd.f32 %v5138_v39, %v4337_v40  ;;  %v11389_v40 = vld [vmem:[%s16572_s1 + $0xf38] ss:$24 sps:$4 sm:$0xff]  }
 0x2bf   :  { %v4340_v36 = vpop.f32.mrb[214].mxu1  ;;  %v5141_v0 = vpop.f32.mrb[214].mxu0 }
 0x2c0   :  { %16752 = vst [vmem:[#allocation60_spill] sm:$0xff] %v13406_v12  ;;  %v4342_v13 = vpop.f32.mrb[215].mxu1  ;;  %v5143_v60 = vpop.f32.mrb[215].mxu0  ;;  %v13411_v19 = vadd.f32 %v5141_v0, %v4340_v36 }
 0x2c1   :  { %v11394_v60 = vld [vmem:[%s16572_s1 + $0xf6c] ss:$24 sps:$4 sm:$0xff]  }
 0x2c2   :  { %5353 = vmatmul.mubr.bf16.gmra.mrb[212].mxu0 %v11385_v26 }
 0x2c3   :  { %5360 = vmatprep.mubr.bf16.mxu0 %v11391_v63 }
 0x2c5   :  { %v4345_v6 = vpop.f32.mrb[216].mxu1  ;;  %v5146_v22 = vpop.f32.mrb[216].mxu0 }
 0x2c6   :  { %v4347_v54 = vpop.f32.mrb[217].mxu1  ;;  %v5148_v51 = vpop.f32.mrb[217].mxu0  ;;  %v13416_v39 = vadd.f32 %v5146_v22, %v4345_v6  ;;  %v11392_v6 = vld [vmem:[%s16572_s1 + $0xf68] ss:$24 sps:$4 sm:$0xff]  }
 0x2c7   :  { %v4348_v17 = vpop.f32.mrb[218].mxu1  ;;  %v5149_v13 = vpop.f32.mrb[218].mxu0 }
 0x2c8   :  { %16753 = vst [vmem:[#allocation61_spill] sm:$0xff] %v13416_v39  ;;  %v4350_v12 = vpop.f32.mrb[219].mxu1  ;;  %v5151_v36 = vpop.f32.mrb[219].mxu0  ;;  %v13421_v4 = vadd.f32 %v5149_v13, %v4348_v17  ;;  %v11397_v17 = vld [vmem:[%s16572_s1 + $0xf9c] ss:$24 sps:$4 sm:$0xff]  }
 0x2ca   :  { %16754 = vst [vmem:[#allocation62_spill] sm:$0xff] %v13421_v4  ;;  %5361 = vmatmul.mubr.bf16.gmra.mrb[216].mxu0 %v11389_v40 }
 0x2cb   :  { %5368 = vmatprep.mubr.bf16.mxu0 %v11394_v60 }
 0x2cd   :  { %v4353_v54 = vpop.f32.mrb[220].mxu1  ;;  %v5154_v51 = vpop.f32.mrb[220].mxu0 }
 0x2ce   :  { %v4355_v26 = vpop.f32.mrb[221].mxu1  ;;  %v5156_v0 = vpop.f32.mrb[221].mxu0  ;;  %v13426_v22 = vadd.f32 %v5154_v51, %v4353_v54  ;;  %v11395_v54 = vld [vmem:[%s16572_s1 + $0xf98] ss:$24 sps:$4 sm:$0xff]  }
 0x2cf   :  { %v4356_v63 = vpop.f32.mrb[222].mxu1  ;;  %v5157_v12 = vpop.f32.mrb[222].mxu0 }
 0x2d0   :  { %16755 = vst [vmem:[#allocation63_spill] sm:$0xff] %v13426_v22  ;;  %v4358_v39 = vpop.f32.mrb[223].mxu1  ;;  %v5159_v13 = vpop.f32.mrb[223].mxu0  ;;  %v13431_v40 = vadd.f32 %v5157_v12, %v4356_v63  ;;  %v11400_v63 = vld [vmem:[%s16572_s1 + $0xfcc] ss:$24 sps:$4 sm:$0xff]  }
 0x2d2   :  { %16756 = vst [vmem:[#allocation64_spill] sm:$0xff] %v13431_v40  ;;  %5369 = vmatmul.mubr.bf16.gmra.mrb[220].mxu0 %v11392_v6 }
 0x2d3   :  { %5376 = vmatprep.mubr.bf16.mxu0 %v11397_v17 }
 0x2d5   :  { %v4361_v60 = vpop.f32.mrb[224].mxu1  ;;  %v5162_v36 = vpop.f32.mrb[224].mxu0 }
 0x2d6   :  { %v4363_v26 = vpop.f32.mrb[225].mxu1  ;;  %v5164_v0 = vpop.f32.mrb[225].mxu0  ;;  %v13436_v51 = vadd.f32 %v5162_v36, %v4361_v60  ;;  %v11398_v60 = vld [vmem:[%s16572_s1 + $0xfc8] ss:$24 sps:$4 sm:$0xff]  }
 0x2d7   :  { %v4364_v4 = vpop.f32.mrb[226].mxu1  ;;  %v5165_v39 = vpop.f32.mrb[226].mxu0 }
 0x2d8   :  { %16757 = vst [vmem:[#allocation65_spill] sm:$0xff] %v13436_v51  ;;  %v4366_v22 = vpop.f32.mrb[227].mxu1  ;;  %v5167_v12 = vpop.f32.mrb[227].mxu0  ;;  %v13441_v6 = vadd.f32 %v5165_v39, %v4364_v4  ;;  %v11403_v4 = vld [vmem:[%s16572_s1 + $0xffc] ss:$24 sps:$4 sm:$0xff]  }
 0x2da   :  { %16758 = vst [vmem:[#allocation66_spill] sm:$0xff] %v13441_v6  ;;  %5377 = vmatmul.mubr.bf16.gmra.mrb[224].mxu0 %v11395_v54 }
 0x2db   :  { %5384 = vmatprep.mubr.bf16.mxu0 %v11400_v63 }
 0x2dd   :  { %v4369_v17 = vpop.f32.mrb[228].mxu1  ;;  %v5170_v13 = vpop.f32.mrb[228].mxu0 }
 0x2de   :  { %v4371_v26 = vpop.f32.mrb[229].mxu1  ;;  %v5172_v0 = vpop.f32.mrb[229].mxu0  ;;  %v13446_v36 = vadd.f32 %v5170_v13, %v4369_v17  ;;  %v11401_v17 = vld [vmem:[%s16572_s1 + $0xff8] ss:$24 sps:$4 sm:$0xff]  }
 0x2df   :  { %v4372_v40 = vpop.f32.mrb[230].mxu1  ;;  %v5173_v22 = vpop.f32.mrb[230].mxu0 }
 0x2e0   :  { %16759 = vst [vmem:[#allocation67_spill] sm:$0xff] %v13446_v36  ;;  %v4374_v51 = vpop.f32.mrb[231].mxu1  ;;  %v5175_v39 = vpop.f32.mrb[231].mxu0  ;;  %v13451_v54 = vadd.f32 %v5173_v22, %v4372_v40  ;;  %v11406_v40 = vld [vmem:[%s16572_s1 + $0x102c] ss:$24 sps:$4 sm:$0xff]  }
 0x2e2   :  { %16760 = vst [vmem:[#allocation68_spill] sm:$0xff] %v13451_v54  ;;  %5385 = vmatmul.mubr.bf16.gmra.mrb[228].mxu0 %v11398_v60 }
 0x2e3   :  { %5392 = vmatprep.mubr.bf16.mxu0 %v11403_v4 }
 0x2e5   :  { %v4377_v63 = vpop.f32.mrb[232].mxu1  ;;  %v5178_v12 = vpop.f32.mrb[232].mxu0 }
 0x2e6   :  { %v4379_v26 = vpop.f32.mrb[233].mxu1  ;;  %v5180_v0 = vpop.f32.mrb[233].mxu0  ;;  %v13456_v13 = vadd.f32 %v5178_v12, %v4377_v63  ;;  %v11404_v63 = vld [vmem:[%s16572_s1 + $0x1028] ss:$24 sps:$4 sm:$0xff]  }
 0x2e7   :  { %v4380_v6 = vpop.f32.mrb[234].mxu1  ;;  %v5181_v51 = vpop.f32.mrb[234].mxu0 }
 0x2e8   :  { %16761 = vst [vmem:[#allocation69_spill] sm:$0xff] %v13456_v13  ;;  %v4382_v36 = vpop.f32.mrb[235].mxu1  ;;  %v5183_v22 = vpop.f32.mrb[235].mxu0  ;;  %v13461_v60 = vadd.f32 %v5181_v51, %v4380_v6  ;;  %v11410_v6 = vld [vmem:[%s16572_s1 + $0x105c] ss:$24 sps:$4 sm:$0xff]  }
 0x2ea   :  { %16762 = vst [vmem:[#allocation70_spill] sm:$0xff] %v13461_v60  ;;  %5393 = vmatmul.mubr.bf16.gmra.mrb[232].mxu0 %v11401_v17 }
 0x2eb   :  { %5400 = vmatprep.mubr.bf16.mxu0 %v11406_v40 }
 0x2ed   :  { %v4385_v4 = vpop.f32.mrb[236].mxu1  ;;  %v5186_v39 = vpop.f32.mrb[236].mxu0 }
 0x2ee   :  { %v4387_v26 = vpop.f32.mrb[237].mxu1  ;;  %v5188_v0 = vpop.f32.mrb[237].mxu0  ;;  %v13466_v12 = vadd.f32 %v5186_v39, %v4385_v4  ;;  %v11408_v4 = vld [vmem:[%s16572_s1 + $0x1058] ss:$24 sps:$4 sm:$0xff]  }
 0x2ef   :  { %v4388_v54 = vpop.f32.mrb[238].mxu1  ;;  %v5189_v36 = vpop.f32.mrb[238].mxu0 }
 0x2f0   :  { %16763 = vst [vmem:[#allocation71_spill] sm:$0xff] %v13466_v12  ;;  %v4390_v13 = vpop.f32.mrb[239].mxu1  ;;  %v5191_v51 = vpop.f32.mrb[239].mxu0  ;;  %v13471_v17 = vadd.f32 %v5189_v36, %v4388_v54  ;;  %v11413_v54 = vld [vmem:[%s16572_s1 + $0x108c] ss:$24 sps:$4 sm:$0xff]  }
 0x2f2   :  { %16764 = vst [vmem:[#allocation72_spill] sm:$0xff] %v13471_v17  ;;  %5401 = vmatmul.mubr.bf16.gmra.mrb[236].mxu0 %v11404_v63 }
 0x2f3   :  { %5408 = vmatprep.mubr.bf16.mxu0 %v11410_v6 }
 0x2f5   :  { %v4393_v40 = vpop.f32.mrb[240].mxu1  ;;  %v5194_v22 = vpop.f32.mrb[240].mxu0 }
 0x2f6   :  { %v4395_v26 = vpop.f32.mrb[241].mxu1  ;;  %v5196_v0 = vpop.f32.mrb[241].mxu0  ;;  %v13476_v39 = vadd.f32 %v5194_v22, %v4393_v40  ;;  %v11411_v40 = vld [vmem:[%s16572_s1 + $0x1088] ss:$24 sps:$4 sm:$0xff]  }
 0x2f7   :  { %v4396_v60 = vpop.f32.mrb[242].mxu1  ;;  %v5197_v13 = vpop.f32.mrb[242].mxu0 }
 0x2f8   :  { %16765 = vst [vmem:[#allocation73_spill] sm:$0xff] %v13476_v39  ;;  %v4398_v12 = vpop.f32.mrb[243].mxu1  ;;  %v5199_v36 = vpop.f32.mrb[243].mxu0  ;;  %v13481_v63 = vadd.f32 %v5197_v13, %v4396_v60  ;;  %v11416_v60 = vld [vmem:[%s16572_s1 + $0x10bc] ss:$24 sps:$4 sm:$0xff]  }
 0x2fa   :  { %16766 = vst [vmem:[#allocation74_spill] sm:$0xff] %v13481_v63  ;;  %5409 = vmatmul.mubr.bf16.gmra.mrb[240].mxu0 %v11408_v4 }
 0x2fb   :  { %5416 = vmatprep.mubr.bf16.mxu0 %v11413_v54 }
 0x2fd   :  { %v4401_v6 = vpop.f32.mrb[244].mxu1  ;;  %v5202_v51 = vpop.f32.mrb[244].mxu0 }
 0x2fe   :  { %v4403_v26 = vpop.f32.mrb[245].mxu1  ;;  %v5204_v0 = vpop.f32.mrb[245].mxu0  ;;  %v13486_v22 = vadd.f32 %v5202_v51, %v4401_v6  ;;  %v11414_v6 = vld [vmem:[%s16572_s1 + $0x10b8] ss:$24 sps:$4 sm:$0xff]  }
 0x2ff   :  { %v4404_v17 = vpop.f32.mrb[246].mxu1  ;;  %v5205_v12 = vpop.f32.mrb[246].mxu0 }
 0x300   :  { %16767 = vst [vmem:[#allocation75_spill] sm:$0xff] %v13486_v22  ;;  %v4406_v39 = vpop.f32.mrb[247].mxu1  ;;  %v5207_v13 = vpop.f32.mrb[247].mxu0  ;;  %v13491_v4 = vadd.f32 %v5205_v12, %v4404_v17  ;;  %v11421_v17 = vld [vmem:[%s16572_s1 + $0x10ec] ss:$24 sps:$4 sm:$0xff]  }
 0x302   :  { %16768 = vst [vmem:[#allocation76_spill] sm:$0xff] %v13491_v4  ;;  %5417 = vmatmul.mubr.bf16.gmra.mrb[244].mxu0 %v11411_v40 }
 0x303   :  { %5424 = vmatprep.mubr.bf16.mxu0 %v11416_v60 }
 0x305   :  { %v4409_v54 = vpop.f32.mrb[248].mxu1  ;;  %v5210_v36 = vpop.f32.mrb[248].mxu0 }
 0x306   :  { %v4411_v26 = vpop.f32.mrb[249].mxu1  ;;  %v5212_v0 = vpop.f32.mrb[249].mxu0  ;;  %v13496_v51 = vadd.f32 %v5210_v36, %v4409_v54  ;;  %v11419_v54 = vld [vmem:[%s16572_s1 + $0x10e8] ss:$24 sps:$4 sm:$0xff]  }
 0x307   :  { %v4412_v63 = vpop.f32.mrb[250].mxu1  ;;  %v5213_v39 = vpop.f32.mrb[250].mxu0 }
 0x308   :  { %16769 = vst [vmem:[#allocation77_spill] sm:$0xff] %v13496_v51  ;;  %v4414_v22 = vpop.f32.mrb[251].mxu1  ;;  %v5215_v12 = vpop.f32.mrb[251].mxu0  ;;  %v13501_v40 = vadd.f32 %v5213_v39, %v4412_v63  ;;  %v11426_v63 = vld [vmem:[%s16572_s1 + $0x111c] ss:$24 sps:$4 sm:$0xff]  }
 0x30a   :  { %16770 = vst [vmem:[#allocation78_spill] sm:$0xff] %v13501_v40  ;;  %5425 = vmatmul.mubr.bf16.gmra.mrb[248].mxu0 %v11414_v6 }
 0x30b   :  { %5432 = vmatprep.mubr.bf16.mxu0 %v11421_v17 }
 0x30d   :  { %v4417_v60 = vpop.f32.mrb[252].mxu1  ;;  %v5218_v13 = vpop.f32.mrb[252].mxu0 }
 0x30e   :  { %v4419_v26 = vpop.f32.mrb[253].mxu1  ;;  %v5220_v0 = vpop.f32.mrb[253].mxu0  ;;  %v13506_v36 = vadd.f32 %v5218_v13, %v4417_v60  ;;  %v11424_v60 = vld [vmem:[%s16572_s1 + $0x1118] ss:$24 sps:$4 sm:$0xff]  }
 0x30f   :  { %v4420_v4 = vpop.f32.mrb[254].mxu1  ;;  %v5221_v22 = vpop.f32.mrb[254].mxu0 }
 0x310   :  { %16771 = vst [vmem:[#allocation79_spill] sm:$0xff] %v13506_v36  ;;  %v4422_v51 = vpop.f32.mrb[255].mxu1  ;;  %v5223_v39 = vpop.f32.mrb[255].mxu0  ;;  %v13511_v6 = vadd.f32 %v5221_v22, %v4420_v4  ;;  %v11431_v4 = vld [vmem:[%s16572_s1 + $0x114c] ss:$24 sps:$4 sm:$0xff]  }
 0x312   :  { %16772 = vst [vmem:[#allocation80_spill] sm:$0xff] %v13511_v6  ;;  %5433 = vmatmul.mubr.bf16.gmra.mrb[252].mxu0 %v11419_v54 }
 0x313   :  { %5440 = vmatprep.mubr.bf16.mxu0 %v11426_v63 }
 0x315   :  { %v4425_v17 = vpop.f32.mrb[148].mxu1  ;;  %v5226_v12 = vpop.f32.mrb[148].mxu0 }
 0x316   :  { %v4427_v26 = vpop.f32.mrb[149].mxu1  ;;  %v5228_v0 = vpop.f32.mrb[149].mxu0  ;;  %v13516_v13 = vadd.f32 %v5226_v12, %v4425_v17  ;;  %v11429_v17 = vld [vmem:[%s16572_s1 + $0x1148] ss:$24 sps:$4 sm:$0xff]  }
 0x317   :  { %v4428_v40 = vpop.f32.mrb[150].mxu1  ;;  %v5229_v51 = vpop.f32.mrb[150].mxu0 }
 0x318   :  { %16773 = vst [vmem:[#allocation81_spill] sm:$0xff] %v13516_v13  ;;  %v4430_v36 = vpop.f32.mrb[151].mxu1  ;;  %v5231_v22 = vpop.f32.mrb[151].mxu0  ;;  %v13521_v54 = vadd.f32 %v5229_v51, %v4428_v40  ;;  %v11436_v40 = vld [vmem:[%s16572_s1 + $0x117c] ss:$24 sps:$4 sm:$0xff]  }
 0x31a   :  { %16774 = vst [vmem:[#allocation82_spill] sm:$0xff] %v13521_v54  ;;  %5441 = vmatmul.mubr.bf16.gmra.mrb[148].mxu0 %v11424_v60 }
 0x31b   :  { %5448 = vmatprep.mubr.bf16.mxu0 %v11431_v4 }
 0x31d   :  { %v4433_v63 = vpop.f32.mrb[152].mxu1  ;;  %v5234_v39 = vpop.f32.mrb[152].mxu0 }
 0x31e   :  { %v4435_v26 = vpop.f32.mrb[153].mxu1  ;;  %v5236_v0 = vpop.f32.mrb[153].mxu0  ;;  %v13526_v12 = vadd.f32 %v5234_v39, %v4433_v63  ;;  %v11434_v63 = vld [vmem:[%s16572_s1 + $0x1178] ss:$24 sps:$4 sm:$0xff]  }
 0x31f   :  { %v4436_v6 = vpop.f32.mrb[154].mxu1  ;;  %v5237_v36 = vpop.f32.mrb[154].mxu0 }
 0x320   :  { %16775 = vst [vmem:[#allocation83_spill] sm:$0xff] %v13526_v12  ;;  %v4438_v13 = vpop.f32.mrb[155].mxu1  ;;  %v5239_v51 = vpop.f32.mrb[155].mxu0  ;;  %v13531_v60 = vadd.f32 %v5237_v36, %v4436_v6  ;;  %v11441_v6 = vld [vmem:[%s16572_s1 + $0x11ac] ss:$24 sps:$4 sm:$0xff]  }
 0x322   :  { %16776 = vst [vmem:[#allocation84_spill] sm:$0xff] %v13531_v60  ;;  %5449 = vmatmul.mubr.bf16.gmra.mrb[152].mxu0 %v11429_v17 }
 0x323   :  { %5456 = vmatprep.mubr.bf16.mxu0 %v11436_v40 }
 0x325   :  { %v4441_v4 = vpop.f32.mrb[156].mxu1  ;;  %v5242_v22 = vpop.f32.mrb[156].mxu0 }
 0x326   :  { %v4443_v26 = vpop.f32.mrb[157].mxu1  ;;  %v5244_v0 = vpop.f32.mrb[157].mxu0  ;;  %v13536_v39 = vadd.f32 %v5242_v22, %v4441_v4  ;;  %v11439_v4 = vld [vmem:[%s16572_s1 + $0x11a8] ss:$24 sps:$4 sm:$0xff]  }
 0x327   :  { %v4444_v54 = vpop.f32.mrb[158].mxu1  ;;  %v5245_v13 = vpop.f32.mrb[158].mxu0 }
 0x328   :  { %16777 = vst [vmem:[#allocation85_spill] sm:$0xff] %v13536_v39  ;;  %v4446_v12 = vpop.f32.mrb[159].mxu1  ;;  %v5247_v36 = vpop.f32.mrb[159].mxu0  ;;  %v13541_v17 = vadd.f32 %v5245_v13, %v4444_v54  ;;  %v11446_v54 = vld [vmem:[%s16572_s1 + $0x11dc] ss:$24 sps:$4 sm:$0xff]  }
 0x32a   :  { %16778 = vst [vmem:[#allocation86_spill] sm:$0xff] %v13541_v17  ;;  %5457 = vmatmul.mubr.bf16.gmra.mrb[156].mxu0 %v11434_v63 }
 0x32b   :  { %5464 = vmatprep.mubr.bf16.mxu0 %v11441_v6 }
 0x32d   :  { %v4449_v40 = vpop.f32.mrb[160].mxu1  ;;  %v5250_v51 = vpop.f32.mrb[160].mxu0 }
 0x32e   :  { %v4451_v26 = vpop.f32.mrb[161].mxu1  ;;  %v5252_v0 = vpop.f32.mrb[161].mxu0  ;;  %v13546_v22 = vadd.f32 %v5250_v51, %v4449_v40  ;;  %v11444_v40 = vld [vmem:[%s16572_s1 + $0x11d8] ss:$24 sps:$4 sm:$0xff]  }
 0x32f   :  { %v4452_v60 = vpop.f32.mrb[162].mxu1  ;;  %v5253_v12 = vpop.f32.mrb[162].mxu0 }
 0x330   :  { %v4454_v39 = vpop.f32.mrb[163].mxu1  ;;  %v5255_v13 = vpop.f32.mrb[163].mxu0  ;;  %v13551_v63 = vadd.f32 %v5253_v12, %v4452_v60 }
 0x331   :  { %v11451_v13 = vld [vmem:[%s16572_s1 + $0x14] ss:$24 sps:$4 sm:$0xff]  }
 0x332   :  { %5465 = vmatmul.mubr.bf16.gmra.mrb[160].mxu0 %v11439_v4 }
 0x333   :  { %5472 = vmatprep.mubr.bf16.mxu0 %v11446_v54  ;;  %v11449_v54 = vld [vmem:[%s16572_s1 + $0x10] ss:$24 sps:$4 sm:$0xff]  }
 0x335   :  { %v4457_v6 = vpop.f32.mrb[164].mxu1  ;;  %v5258_v36 = vpop.f32.mrb[164].mxu0 }
 0x336   :  { %v4459_v26 = vpop.f32.mrb[165].mxu1  ;;  %v5260_v0 = vpop.f32.mrb[165].mxu0  ;;  %v13556_v51 = vadd.f32 %v5258_v36, %v4457_v6  ;;  %v11452_v6 = vld [vmem:[%s16572_s1 + $0x44] ss:$24 sps:$4 sm:$0xff]   ;;  %v11454_v36 = vld [vmem:[%s16572_s1 + $0x40] ss:$24 sps:$4 sm:$0xff]  }
 0x337   :  { %v4460_v17 = vpop.f32.mrb[166].mxu1  ;;  %v5261_v39 = vpop.f32.mrb[166].mxu0  ;;  %v11457_v26 = vld [vmem:[%s16572_s1 + $0x70] ss:$24 sps:$4 sm:$0xff]   ;;  %v11458_v0 = vld [vmem:[%s16572_s1 + $0xa4] ss:$24 sps:$4 sm:$0xff]  }
 0x338   :  { %v4462_v60 = vpop.f32.mrb[167].mxu1  ;;  %v5263_v12 = vpop.f32.mrb[167].mxu0  ;;  %v13561_v4 = vadd.f32 %v5261_v39, %v4460_v17  ;;  %v11455_v17 = vld [vmem:[%s16572_s1 + $0x74] ss:$24 sps:$4 sm:$0xff]  }
 0x339   :  { %v11461_v39 = vld [vmem:[%s16572_s1 + $0xd4] ss:$24 sps:$4 sm:$0xff]   ;;  %v11464_v60 = vld [vmem:[%s16572_s1 + $0x104] ss:$24 sps:$4 sm:$0xff]   ;;  %v11466_v12 = vld [vmem:[%s16572_s1 + $0x100] ss:$24 sps:$4 sm:$0xff]  }
 0x33a   :  { %16779 = vst [vmem:[#allocation87_spill] sm:$0xff] %v13561_v4  ;;  %5473 = vmatmul.mubr.bf16.gmra.mrb[164].mxu0 %v11444_v40  ;;  %v11460_v40 = vld [vmem:[%s16572_s1 + $0xa0] ss:$24 sps:$4 sm:$0xff]  }
 0x33b   :  { %5513 = vmatprep.mubr.bf16.mxu0 %v11451_v13  ;;  %v11463_v13 = vld [vmem:[%s16572_s1 + $0xd0] ss:$24 sps:$4 sm:$0xff]  }
 0x342   :  { %5514 = vmatmul.mubr.bf16.vlgmr.msra.gmra.mrb[0].mxu0 %v11449_v54  ;;  %v11467_v54 = vld [vmem:[%s16572_s1 + $0x134] ss:$24 sps:$4 sm:$0xff]  }
 0x343   :  { %5521 = vmatprep.mubr.bf16.mxu0 %v11452_v6  ;;  %v11469_v6 = vld [vmem:[%s16572_s1 + $0x130] ss:$24 sps:$4 sm:$0xff]  }
 0x34a   :  { %5522 = vmatmul.mubr.bf16.gmra.mrb[4].mxu0 %v11454_v36  ;;  %v11470_v36 = vld [vmem:[%s16572_s1 + $0x164] ss:$24 sps:$4 sm:$0xff]  }
 0x34b   :  { %5529 = vmatprep.mubr.bf16.mxu0 %v11455_v17  ;;  %v11472_v17 = vld [vmem:[%s16572_s1 + $0x160] ss:$24 sps:$4 sm:$0xff]  }
 0x352   :  { %5530 = vmatmul.mubr.bf16.gmra.mrb[8].mxu0 %v11457_v26  ;;  %v11473_v26 = vld [vmem:[%s16572_s1 + $0x194] ss:$24 sps:$4 sm:$0xff]  }
 0x353   :  { %5537 = vmatprep.mubr.bf16.mxu0 %v11458_v0  ;;  %v11475_v0 = vld [vmem:[%s16572_s1 + $0x190] ss:$24 sps:$4 sm:$0xff]  }
 0x35a   :  { %5538 = vmatmul.mubr.bf16.gmra.mrb[12].mxu0 %v11460_v40  ;;  %v11476_v40 = vld [vmem:[%s16572_s1 + $0x1c4] ss:$24 sps:$4 sm:$0xff]  }
 0x35b   :  { %5545 = vmatprep.mubr.bf16.mxu0 %v11461_v39  ;;  %v11478_v39 = vld [vmem:[%s16572_s1 + $0x1c0] ss:$24 sps:$4 sm:$0xff]  }
 0x362   :  { %5546 = vmatmul.mubr.bf16.gmra.mrb[16].mxu0 %v11463_v13  ;;  %v11479_v13 = vld [vmem:[%s16572_s1 + $0x1f4] ss:$24 sps:$4 sm:$0xff]  }
 0x363   :  { %5553 = vmatprep.mubr.bf16.mxu0 %v11464_v60  ;;  %v11481_v60 = vld [vmem:[%s16572_s1 + $0x1f0] ss:$24 sps:$4 sm:$0xff]  }
 0x36a   :  { %5554 = vmatmul.mubr.bf16.gmra.mrb[20].mxu0 %v11466_v12  ;;  %v11482_v12 = vld [vmem:[%s16572_s1 + $0x224] ss:$24 sps:$4 sm:$0xff]  }
 0x36b   :  { %5561 = vmatprep.mubr.bf16.mxu0 %v11467_v54  ;;  %v11484_v54 = vld [vmem:[%s16572_s1 + $0x220] ss:$24 sps:$4 sm:$0xff]  }
 0x372   :  { %5562 = vmatmul.mubr.bf16.gmra.mrb[24].mxu0 %v11469_v6  ;;  %v11485_v6 = vld [vmem:[%s16572_s1 + $0x254] ss:$24 sps:$4 sm:$0xff]  }
 0x373   :  { %5569 = vmatprep.mubr.bf16.mxu0 %v11470_v36  ;;  %v11487_v36 = vld [vmem:[%s16572_s1 + $0x250] ss:$24 sps:$4 sm:$0xff]  }
 0x37a   :  { %5570 = vmatmul.mubr.bf16.gmra.mrb[28].mxu0 %v11472_v17  ;;  %v11488_v17 = vld [vmem:[%s16572_s1 + $0x284] ss:$24 sps:$4 sm:$0xff]  }
 0x37b   :  { %5577 = vmatprep.mubr.bf16.mxu0 %v11473_v26  ;;  %v11490_v26 = vld [vmem:[%s16572_s1 + $0x280] ss:$24 sps:$4 sm:$0xff]  }
 0x382   :  { %5578 = vmatmul.mubr.bf16.gmra.mrb[32].mxu0 %v11475_v0  ;;  %v11491_v0 = vld [vmem:[%s16572_s1 + $0x2b4] ss:$24 sps:$4 sm:$0xff]  }
 0x383   :  { %5585 = vmatprep.mubr.bf16.mxu0 %v11476_v40  ;;  %v11493_v40 = vld [vmem:[%s16572_s1 + $0x2b0] ss:$24 sps:$4 sm:$0xff]  }
 0x38a   :  { %5586 = vmatmul.mubr.bf16.gmra.mrb[36].mxu0 %v11478_v39  ;;  %v11494_v39 = vld [vmem:[%s16572_s1 + $0x2e4] ss:$24 sps:$4 sm:$0xff]  }
 0x38b   :  { %5593 = vmatprep.mubr.bf16.mxu0 %v11479_v13  ;;  %v11496_v13 = vld [vmem:[%s16572_s1 + $0x2e0] ss:$24 sps:$4 sm:$0xff]  }
 0x392   :  { %5594 = vmatmul.mubr.bf16.gmra.mrb[40].mxu0 %v11481_v60  ;;  %v11497_v60 = vld [vmem:[%s16572_s1 + $0x314] ss:$24 sps:$4 sm:$0xff]  }
 0x393   :  { %5601 = vmatprep.mubr.bf16.mxu0 %v11482_v12  ;;  %v11499_v12 = vld [vmem:[%s16572_s1 + $0x310] ss:$24 sps:$4 sm:$0xff]  }
 0x39a   :  { %5602 = vmatmul.mubr.bf16.gmra.mrb[44].mxu0 %v11484_v54  ;;  %v11500_v54 = vld [vmem:[%s16572_s1 + $0x344] ss:$24 sps:$4 sm:$0xff]  }
 0x39b   :  { %5609 = vmatprep.mubr.bf16.mxu0 %v11485_v6  ;;  %v11502_v6 = vld [vmem:[%s16572_s1 + $0x340] ss:$24 sps:$4 sm:$0xff]  }
 0x3a2   :  { %5610 = vmatmul.mubr.bf16.gmra.mrb[48].mxu0 %v11487_v36  ;;  %v11503_v36 = vld [vmem:[%s16572_s1 + $0x374] ss:$24 sps:$4 sm:$0xff]  }
 0x3a3   :  { %5617 = vmatprep.mubr.bf16.mxu0 %v11488_v17  ;;  %v11505_v17 = vld [vmem:[%s16572_s1 + $0x370] ss:$24 sps:$4 sm:$0xff]  }
 0x3aa   :  { %5618 = vmatmul.mubr.bf16.gmra.mrb[52].mxu0 %v11490_v26  ;;  %v11506_v26 = vld [vmem:[%s16572_s1 + $0x3a4] ss:$24 sps:$4 sm:$0xff]  }
 0x3ab   :  { %5625 = vmatprep.mubr.bf16.mxu0 %v11491_v0  ;;  %v11508_v0 = vld [vmem:[%s16572_s1 + $0x3a0] ss:$24 sps:$4 sm:$0xff]  }
 0x3b2   :  { %5626 = vmatmul.mubr.bf16.gmra.mrb[56].mxu0 %v11493_v40  ;;  %v11509_v40 = vld [vmem:[%s16572_s1 + $0x3d4] ss:$24 sps:$4 sm:$0xff]  }
 0x3b3   :  { %5633 = vmatprep.mubr.bf16.mxu0 %v11494_v39  ;;  %v11511_v39 = vld [vmem:[%s16572_s1 + $0x3d0] ss:$24 sps:$4 sm:$0xff]  }
 0x3ba   :  { %5634 = vmatmul.mubr.bf16.gmra.mrb[60].mxu0 %v11496_v13  ;;  %v11512_v13 = vld [vmem:[%s16572_s1 + $0x404] ss:$24 sps:$4 sm:$0xff]  }
 0x3bb   :  { %5641 = vmatprep.mubr.bf16.mxu0 %v11497_v60  ;;  %v11514_v60 = vld [vmem:[%s16572_s1 + $0x400] ss:$24 sps:$4 sm:$0xff]  }
 0x3c2   :  { %5642 = vmatmul.mubr.bf16.gmra.mrb[64].mxu0 %v11499_v12  ;;  %v11515_v12 = vld [vmem:[%s16572_s1 + $0x434] ss:$24 sps:$4 sm:$0xff]  }
 0x3c3   :  { %5649 = vmatprep.mubr.bf16.mxu0 %v11500_v54  ;;  %v11517_v54 = vld [vmem:[%s16572_s1 + $0x430] ss:$24 sps:$4 sm:$0xff]  }
 0x3ca   :  { %5650 = vmatmul.mubr.bf16.gmra.mrb[68].mxu0 %v11502_v6  ;;  %v11518_v6 = vld [vmem:[%s16572_s1 + $0x464] ss:$24 sps:$4 sm:$0xff]  }
 0x3cb   :  { %5657 = vmatprep.mubr.bf16.mxu0 %v11503_v36  ;;  %v11520_v36 = vld [vmem:[%s16572_s1 + $0x460] ss:$24 sps:$4 sm:$0xff]  }
 0x3d2   :  { %5658 = vmatmul.mubr.bf16.gmra.mrb[72].mxu0 %v11505_v17  ;;  %v11521_v17 = vld [vmem:[%s16572_s1 + $0x494] ss:$24 sps:$4 sm:$0xff]  }
 0x3d3   :  { %5665 = vmatprep.mubr.bf16.mxu0 %v11506_v26  ;;  %v11523_v26 = vld [vmem:[%s16572_s1 + $0x490] ss:$24 sps:$4 sm:$0xff]  }
 0x3da   :  { %5666 = vmatmul.mubr.bf16.gmra.mrb[76].mxu0 %v11508_v0  ;;  %v11524_v0 = vld [vmem:[%s16572_s1 + $0x4c4] ss:$24 sps:$4 sm:$0xff]  }
 0x3db   :  { %5673 = vmatprep.mubr.bf16.mxu0 %v11509_v40  ;;  %v11526_v40 = vld [vmem:[%s16572_s1 + $0x4c0] ss:$24 sps:$4 sm:$0xff]  }
 0x3e2   :  { %5674 = vmatmul.mubr.bf16.gmra.mrb[80].mxu0 %v11511_v39  ;;  %v11527_v39 = vld [vmem:[%s16572_s1 + $0x4f4] ss:$24 sps:$4 sm:$0xff]  }
 0x3e3   :  { %5681 = vmatprep.mubr.bf16.mxu0 %v11512_v13  ;;  %v11529_v13 = vld [vmem:[%s16572_s1 + $0x4f0] ss:$24 sps:$4 sm:$0xff]  }
 0x3ea   :  { %5682 = vmatmul.mubr.bf16.gmra.mrb[84].mxu0 %v11514_v60  ;;  %v11530_v60 = vld [vmem:[%s16572_s1 + $0x524] ss:$24 sps:$4 sm:$0xff]  }
 0x3eb   :  { %5689 = vmatprep.mubr.bf16.mxu0 %v11515_v12 }
 0x3f2   :  { %5690 = vmatmul.mubr.bf16.gmra.mrb[88].mxu0 %v11517_v54 }
 0x3f3   :  { %5697 = vmatprep.mubr.bf16.mxu0 %v11518_v6 }
 0x3fa   :  { %5698 = vmatmul.mubr.bf16.gmra.mrb[92].mxu0 %v11520_v36  ;;  %v11532_v36 = vld [vmem:[%s16572_s1 + $0x520] ss:$24 sps:$4 sm:$0xff]  }
 0x3fb   :  { %5705 = vmatprep.mubr.bf16.mxu0 %v11521_v17 }
 0x402   :  { %5706 = vmatmul.mubr.bf16.gmra.mrb[96].mxu0 %v11523_v26  ;;  %v11533_v26 = vld [vmem:[%s16572_s1 + $0x554] ss:$24 sps:$4 sm:$0xff]  }
 0x403   :  { %5713 = vmatprep.mubr.bf16.mxu0 %v11524_v0 }
 0x40a   :  { %5714 = vmatmul.mubr.bf16.gmra.mrb[100].mxu0 %v11526_v40 }
 0x40b   :  { %5721 = vmatprep.mubr.bf16.mxu0 %v11527_v39 }
 0x412   :  { %5722 = vmatmul.mubr.bf16.gmra.mrb[104].mxu0 %v11529_v13 }
 0x413   :  { %5729 = vmatprep.mubr.bf16.mxu0 %v11530_v60  ;;  %v11535_v60 = vld [vmem:[%s16572_s1 + $0x550] ss:$24 sps:$4 sm:$0xff]  }
 0x415   :  { %v5515_v12 = vpop.f32.mrb[0].mxu0 }
 0x416   :  { %v13726_v54 = vadd.f32 %v5515_v12, %v12585_v25  ;;  %v5517_v6 = vpop.f32.mrb[1].mxu0 }
 0x417   :  { %v5518_v17 = vpop.f32.mrb[2].mxu0  ;;  %v11536_v6 = vld [vmem:[%s16572_s1 + $0x584] ss:$24 sps:$4 sm:$0xff]  }
 0x418   :  { %v13735_v0 = vadd.f32 %v5518_v17, %v12599_v31  ;;  %v5520_v40 = vpop.f32.mrb[3].mxu0 }
 0x419   :  { %v11538_v40 = vld [vmem:[%s16572_s1 + $0x580] ss:$24 sps:$4 sm:$0xff]  }
 0x41a   :  { %16780 = vst [vmem:[#allocation88_spill] sm:$0xff] %v13735_v0  ;;  %5730 = vmatmul.mubr.bf16.gmra.mrb[108].mxu0 %v11532_v36 }
 0x41b   :  { %5737 = vmatprep.mubr.bf16.mxu0 %v11533_v26 }
 0x41d   :  { %v5523_v39 = vpop.f32.mrb[4].mxu0 }
 0x41e   :  { %v13738_v25 = vadd.f32 %v5523_v39, %v12601_v33  ;;  %v5525_v13 = vpop.f32.mrb[5].mxu0 }
 0x41f   :  { %v5526_v12 = vpop.f32.mrb[6].mxu0  ;;  %v11539_v13 = vld [vmem:[%s16572_s1 + $0x5b4] ss:$24 sps:$4 sm:$0xff]  }
 0x420   :  { %v13747_v31 = vadd.f32 %v5526_v12, %v12612_v38  ;;  %v5528_v17 = vpop.f32.mrb[7].mxu0 }
 0x421   :  { %v11541_v17 = vld [vmem:[%s16572_s1 + $0x5b0] ss:$24 sps:$4 sm:$0xff]  }
 0x422   :  { %16781 = vst [vmem:[#allocation89_spill] sm:$0xff] %v13747_v31  ;;  %5738 = vmatmul.mubr.bf16.gmra.mrb[112].mxu0 %v11535_v60 }
 0x423   :  { %5745 = vmatprep.mubr.bf16.mxu0 %v11536_v6 }
 0x425   :  { %v5531_v36 = vpop.f32.mrb[8].mxu0 }
 0x426   :  { %v13750_v33 = vadd.f32 %v5531_v36, %v12617_v41  ;;  %v5533_v26 = vpop.f32.mrb[9].mxu0 }
 0x427   :  { %v5534_v39 = vpop.f32.mrb[10].mxu0  ;;  %v11542_v26 = vld [vmem:[%s16572_s1 + $0x5e4] ss:$24 sps:$4 sm:$0xff]  }
 0x428   :  { %v13759_v38 = vadd.f32 %v5534_v39, %v12619_v43  ;;  %v5536_v12 = vpop.f32.mrb[11].mxu0 }
 0x429   :  { %v11544_v12 = vld [vmem:[%s16572_s1 + $0x5e0] ss:$24 sps:$4 sm:$0xff]  }
 0x42a   :  { %16782 = vst [vmem:[#allocation90_spill] sm:$0xff] %v13759_v38  ;;  %5746 = vmatmul.mubr.bf16.gmra.mrb[116].mxu0 %v11538_v40 }
 0x42b   :  { %5753 = vmatprep.mubr.bf16.mxu0 %v11539_v13 }
 0x42d   :  { %v5539_v60 = vpop.f32.mrb[12].mxu0 }
 0x42e   :  { %v13762_v41 = vadd.f32 %v5539_v60, %v12621_v45  ;;  %v5541_v6 = vpop.f32.mrb[13].mxu0 }
 0x42f   :  { %v5542_v36 = vpop.f32.mrb[14].mxu0  ;;  %v11545_v6 = vld [vmem:[%s16572_s1 + $0x614] ss:$24 sps:$4 sm:$0xff]  }
 0x430   :  { %v13771_v43 = vadd.f32 %v5542_v36, %v12632_v50  ;;  %v5544_v39 = vpop.f32.mrb[15].mxu0 }
 0x431   :  { %v11547_v39 = vld [vmem:[%s16572_s1 + $0x610] ss:$24 sps:$4 sm:$0xff]  }
 0x432   :  { %16783 = vst [vmem:[#allocation91_spill] sm:$0xff] %v13771_v43  ;;  %5754 = vmatmul.mubr.bf16.gmra.mrb[120].mxu0 %v11541_v17 }
 0x433   :  { %5761 = vmatprep.mubr.bf16.mxu0 %v11542_v26 }
 0x435   :  { %v5547_v40 = vpop.f32.mrb[16].mxu0 }
 0x436   :  { %v13774_v45 = vadd.f32 %v5547_v40, %v12637_v53  ;;  %v5549_v13 = vpop.f32.mrb[17].mxu0 }
 0x437   :  { %v5550_v60 = vpop.f32.mrb[18].mxu0  ;;  %v11548_v13 = vld [vmem:[%s16572_s1 + $0x644] ss:$24 sps:$4 sm:$0xff]  }
 0x438   :  { %v13783_v50 = vadd.f32 %v5550_v60, %v12639_v55  ;;  %v5552_v36 = vpop.f32.mrb[19].mxu0 }
 0x439   :  { %v11550_v36 = vld [vmem:[%s16572_s1 + $0x640] ss:$24 sps:$4 sm:$0xff]  }
 0x43a   :  { %16784 = vst [vmem:[#allocation92_spill] sm:$0xff] %v13783_v50  ;;  %5762 = vmatmul.mubr.bf16.gmra.mrb[124].mxu0 %v11544_v12 }
 0x43b   :  { %5769 = vmatprep.mubr.bf16.mxu0 %v11545_v6 }
 0x43d   :  { %v5555_v17 = vpop.f32.mrb[20].mxu0 }
 0x43e   :  { %v13786_v53 = vadd.f32 %v5555_v17, %v12641_v57  ;;  %v5557_v26 = vpop.f32.mrb[21].mxu0 }
 0x43f   :  { %v5558_v40 = vpop.f32.mrb[22].mxu0  ;;  %v11551_v26 = vld [vmem:[%s16572_s1 + $0x674] ss:$24 sps:$4 sm:$0xff]  }
 0x440   :  { %v13795_v55 = vadd.f32 %v5558_v40, %v12652_v62  ;;  %v5560_v60 = vpop.f32.mrb[23].mxu0 }
 0x441   :  { %v11553_v60 = vld [vmem:[%s16572_s1 + $0x670] ss:$24 sps:$4 sm:$0xff]  }
 0x442   :  { %16785 = vst [vmem:[#allocation93_spill] sm:$0xff] %v13795_v55  ;;  %5770 = vmatmul.mubr.bf16.gmra.mrb[128].mxu0 %v11547_v39 }
 0x443   :  { %5777 = vmatprep.mubr.bf16.mxu0 %v11548_v13 }
 0x445   :  { %v5563_v12 = vpop.f32.mrb[24].mxu0 }
 0x446   :  { %v13798_v57 = vadd.f32 %v5563_v12, %v12657_v2  ;;  %v5565_v6 = vpop.f32.mrb[25].mxu0 }
 0x447   :  { %v5566_v17 = vpop.f32.mrb[26].mxu0  ;;  %v11554_v6 = vld [vmem:[%s16572_s1 + $0x6a4] ss:$24 sps:$4 sm:$0xff]  }
 0x448   :  { %v13807_v62 = vadd.f32 %v5566_v17, %v12668_v7  ;;  %v5568_v40 = vpop.f32.mrb[27].mxu0 }
 0x449   :  { %v11556_v40 = vld [vmem:[%s16572_s1 + $0x6a0] ss:$24 sps:$4 sm:$0xff]  }
 0x44a   :  { %16786 = vst [vmem:[#allocation94_spill] sm:$0xff] %v13807_v62  ;;  %5778 = vmatmul.mubr.bf16.gmra.mrb[132].mxu0 %v11550_v36 }
 0x44b   :  { %5785 = vmatprep.mubr.bf16.mxu0 %v11551_v26 }
 0x44d   :  { %v5571_v39 = vpop.f32.mrb[28].mxu0 }
 0x44e   :  { %v13810_v2 = vadd.f32 %v5571_v39, %v12673_v10  ;;  %v5573_v13 = vpop.f32.mrb[29].mxu0 }
 0x44f   :  { %v5574_v12 = vpop.f32.mrb[30].mxu0  ;;  %v11557_v13 = vld [vmem:[%s16572_s1 + $0x6d4] ss:$24 sps:$4 sm:$0xff]  }
 0x450   :  { %16787 = vst [vmem:[#allocation95_spill] sm:$0xff] %v13810_v2  ;;  %v13819_v7 = vadd.f32 %v5574_v12, %v12684_v15  ;;  %v5576_v17 = vpop.f32.mrb[31].mxu0  ;;  %v11779_v2 = vld [vmem:[%s16572_s1 + $0x10c0] ss:$24 sps:$4 sm:$0xff]  }
 0x451   :  { %v11559_v17 = vld [vmem:[%s16572_s1 + $0x6d0] ss:$24 sps:$4 sm:$0xff]  }
 0x452   :  { %16788 = vst [vmem:[#allocation96_spill] sm:$0xff] %v13819_v7  ;;  %5786 = vmatmul.mubr.bf16.gmra.mrb[136].mxu0 %v11553_v60 }
 0x453   :  { %5793 = vmatprep.mubr.bf16.mxu0 %v11554_v6 }
 0x455   :  { %v5579_v36 = vpop.f32.mrb[32].mxu0 }
 0x456   :  { %v13822_v10 = vadd.f32 %v5579_v36, %v12689_v18  ;;  %v5581_v26 = vpop.f32.mrb[33].mxu0 }
 0x457   :  { %v5582_v39 = vpop.f32.mrb[34].mxu0  ;;  %v11562_v26 = vld [vmem:[%s16572_s1 + $0x704] ss:$24 sps:$4 sm:$0xff]  }
 0x458   :  { %16789 = vst [vmem:[#allocation97_spill] sm:$0xff] %v13822_v10  ;;  %v13831_v15 = vadd.f32 %v5582_v39, %v12700_v23  ;;  %v5584_v12 = vpop.f32.mrb[35].mxu0 }
 0x459   :  { %v11560_v12 = vld [vmem:[%s16572_s1 + $0x700] ss:$24 sps:$4 sm:$0xff]  }
 0x45a   :  { %16790 = vst [vmem:[#allocation98_spill] sm:$0xff] %v13831_v15  ;;  %5794 = vmatmul.mubr.bf16.gmra.mrb[140].mxu0 %v11556_v40  ;;  %v11632_v15 = vld [vmem:[%s16572_s1 + $0xb80] ss:$24 sps:$4 sm:$0xff]  }
 0x45b   :  { %5801 = vmatprep.mubr.bf16.mxu0 %v11557_v13 }
 0x45d   :  { %v5587_v60 = vpop.f32.mrb[36].mxu0 }
 0x45e   :  { %v13834_v18 = vadd.f32 %v5587_v60, %v12705_v27  ;;  %v5589_v6 = vpop.f32.mrb[37].mxu0 }
 0x45f   :  { %v5590_v36 = vpop.f32.mrb[38].mxu0  ;;  %v11565_v6 = vld [vmem:[%s16572_s1 + $0x734] ss:$24 sps:$4 sm:$0xff]  }
 0x460   :  { %16791 = vst [vmem:[#allocation99_spill] sm:$0xff] %v13834_v18  ;;  %v13843_v23 = vadd.f32 %v5590_v36, %v12716_v34  ;;  %v5592_v39 = vpop.f32.mrb[39].mxu0 }
 0x461   :  { %v11563_v39 = vld [vmem:[%s16572_s1 + $0x730] ss:$24 sps:$4 sm:$0xff]  }
 0x462   :  { %16792 = vst [vmem:[#allocation100_spill] sm:$0xff] %v13843_v23  ;;  %5802 = vmatmul.mubr.bf16.gmra.mrb[144].mxu0 %v11559_v17  ;;  %v11635_v23 = vld [vmem:[%s16572_s1 + $0xbb0] ss:$24 sps:$4 sm:$0xff]  }
 0x463   :  { %5809 = vmatprep.mubr.bf16.mxu0 %v11562_v26 }
 0x465   :  { %v5595_v40 = vpop.f32.mrb[40].mxu0 }
 0x466   :  { %v13846_v27 = vadd.f32 %v5595_v40, %v12721_v37  ;;  %v5597_v13 = vpop.f32.mrb[41].mxu0 }
 0x467   :  { %v5598_v60 = vpop.f32.mrb[42].mxu0  ;;  %v11568_v13 = vld [vmem:[%s16572_s1 + $0x764] ss:$24 sps:$4 sm:$0xff]  }
 0x468   :  { %16793 = vst [vmem:[#allocation101_spill] sm:$0xff] %v13846_v27  ;;  %v13855_v34 = vadd.f32 %v5598_v60, %v12732_v46  ;;  %v5600_v36 = vpop.f32.mrb[43].mxu0 }
 0x469   :  { %v11566_v36 = vld [vmem:[%s16572_s1 + $0x760] ss:$24 sps:$4 sm:$0xff]  }
 0x46a   :  { %16794 = vst [vmem:[#allocation102_spill] sm:$0xff] %v13855_v34  ;;  %5810 = vmatmul.mubr.bf16.gmra.mrb[0].mxu0 %v11560_v12  ;;  %v11638_v34 = vld [vmem:[%s16572_s1 + $0xbe0] ss:$24 sps:$4 sm:$0xff]  }
 0x46b   :  { %5817 = vmatprep.mubr.bf16.mxu0 %v11565_v6 }
 0x46d   :  { %v5603_v17 = vpop.f32.mrb[44].mxu0 }
 0x46e   :  { %v13858_v37 = vadd.f32 %v5603_v17, %v12737_v49  ;;  %v5605_v26 = vpop.f32.mrb[45].mxu0 }
 0x46f   :  { %v5606_v40 = vpop.f32.mrb[46].mxu0  ;;  %v11571_v26 = vld [vmem:[%s16572_s1 + $0x794] ss:$24 sps:$4 sm:$0xff]  }
 0x470   :  { %16795 = vst [vmem:[#allocation103_spill] sm:$0xff] %v13858_v37  ;;  %v13867_v46 = vadd.f32 %v5606_v40, %v12748_v58  ;;  %v5608_v60 = vpop.f32.mrb[47].mxu0  ;;  %v16937_v37 = vld [vmem:[#allocation69_spill] sm:$0xff] }
 0x471   :  { %v11569_v60 = vld [vmem:[%s16572_s1 + $0x790] ss:$24 sps:$4 sm:$0xff]  }
 0x472   :  { %16796 = vst [vmem:[#allocation104_spill] sm:$0xff] %v13867_v46  ;;  %5818 = vmatmul.mubr.bf16.gmra.mrb[4].mxu0 %v11563_v39  ;;  %v11641_v46 = vld [vmem:[%s16572_s1 + $0xc10] ss:$24 sps:$4 sm:$0xff]  }
 0x473   :  { %5825 = vmatprep.mubr.bf16.mxu0 %v11568_v13 }
 0x475   :  { %v5611_v12 = vpop.f32.mrb[48].mxu0 }
 0x476   :  { %v13870_v49 = vadd.f32 %v5611_v12, %v12753_v61  ;;  %v5613_v6 = vpop.f32.mrb[49].mxu0 }
 0x477   :  { %v5614_v17 = vpop.f32.mrb[50].mxu0  ;;  %v11574_v6 = vld [vmem:[%s16572_s1 + $0x7c4] ss:$24 sps:$4 sm:$0xff]  }
 0x478   :  { %16797 = vst [vmem:[#allocation105_spill] sm:$0xff] %v13870_v49  ;;  %v13879_v58 = vadd.f32 %v5614_v17, %v12764_v5  ;;  %v5616_v40 = vpop.f32.mrb[51].mxu0 }
 0x479   :  { %v11572_v40 = vld [vmem:[%s16572_s1 + $0x7c0] ss:$24 sps:$4 sm:$0xff]  }
 0x47a   :  { %16798 = vst [vmem:[#allocation106_spill] sm:$0xff] %v13879_v58  ;;  %5826 = vmatmul.mubr.bf16.gmra.mrb[8].mxu0 %v11566_v36  ;;  %v11644_v58 = vld [vmem:[%s16572_s1 + $0xc40] ss:$24 sps:$4 sm:$0xff]  }
 0x47b   :  { %5833 = vmatprep.mubr.bf16.mxu0 %v11571_v26 }
 0x47d   :  { %v5619_v39 = vpop.f32.mrb[52].mxu0 }
 0x47e   :  { %v13882_v61 = vadd.f32 %v5619_v39, %v12769_v9  ;;  %v5621_v13 = vpop.f32.mrb[53].mxu0 }
 0x47f   :  { %v5622_v12 = vpop.f32.mrb[54].mxu0  ;;  %v11577_v13 = vld [vmem:[%s16572_s1 + $0x7f4] ss:$24 sps:$4 sm:$0xff]  }
 0x480   :  { %16799 = vst [vmem:[#allocation107_spill] sm:$0xff] %v13882_v61  ;;  %v13891_v5 = vadd.f32 %v5622_v12, %v12780_v16  ;;  %v5624_v17 = vpop.f32.mrb[55].mxu0 }
 0x481   :  { %v11575_v17 = vld [vmem:[%s16572_s1 + $0x7f0] ss:$24 sps:$4 sm:$0xff]  }
 0x482   :  { %16800 = vst [vmem:[#allocation108_spill] sm:$0xff] %v13891_v5  ;;  %5834 = vmatmul.mubr.bf16.gmra.mrb[12].mxu0 %v11569_v60  ;;  %v11647_v5 = vld [vmem:[%s16572_s1 + $0xc70] ss:$24 sps:$4 sm:$0xff]  }
 0x483   :  { %5841 = vmatprep.mubr.bf16.mxu0 %v11574_v6 }
 0x485   :  { %v5627_v36 = vpop.f32.mrb[56].mxu0 }
 0x486   :  { %v13894_v9 = vadd.f32 %v5627_v36, %v12785_v20  ;;  %v5629_v26 = vpop.f32.mrb[57].mxu0 }
 0x487   :  { %v5630_v39 = vpop.f32.mrb[58].mxu0  ;;  %v11580_v26 = vld [vmem:[%s16572_s1 + $0x824] ss:$24 sps:$4 sm:$0xff]  }
 0x488   :  { %16801 = vst [vmem:[#allocation109_spill] sm:$0xff] %v13894_v9  ;;  %v13903_v16 = vadd.f32 %v5630_v39, %v12796_v28  ;;  %v5632_v12 = vpop.f32.mrb[59].mxu0  ;;  %v11743_v9 = vld [vmem:[%s16572_s1 + $0xfa0] ss:$24 sps:$4 sm:$0xff]  }
 0x489   :  { %v11578_v12 = vld [vmem:[%s16572_s1 + $0x820] ss:$24 sps:$4 sm:$0xff]  }
 0x48a   :  { %16802 = vst [vmem:[#allocation110_spill] sm:$0xff] %v13903_v16  ;;  %5842 = vmatmul.mubr.bf16.gmra.mrb[16].mxu0 %v11572_v40  ;;  %v11650_v16 = vld [vmem:[%s16572_s1 + $0xca0] ss:$24 sps:$4 sm:$0xff]  }
 0x48b   :  { %5849 = vmatprep.mubr.bf16.mxu0 %v11577_v13 }
 0x48d   :  { %v5635_v60 = vpop.f32.mrb[60].mxu0 }
 0x48e   :  { %v13906_v20 = vadd.f32 %v5635_v60, %v12801_v32  ;;  %v5637_v6 = vpop.f32.mrb[61].mxu0 }
 0x48f   :  { %v5638_v36 = vpop.f32.mrb[62].mxu0  ;;  %v11583_v6 = vld [vmem:[%s16572_s1 + $0x854] ss:$24 sps:$4 sm:$0xff]  }
 0x490   :  { %16803 = vst [vmem:[#allocation111_spill] sm:$0xff] %v13906_v20  ;;  %v13915_v28 = vadd.f32 %v5638_v36, %v12812_v42  ;;  %v5640_v39 = vpop.f32.mrb[63].mxu0  ;;  %v16929_v20 = vld [vmem:[#allocation65_spill] sm:$0xff] }
 0x491   :  { %v11581_v39 = vld [vmem:[%s16572_s1 + $0x850] ss:$24 sps:$4 sm:$0xff]  }
 0x492   :  { %16804 = vst [vmem:[#allocation112_spill] sm:$0xff] %v13915_v28  ;;  %5850 = vmatmul.mubr.bf16.gmra.mrb[20].mxu0 %v11575_v17  ;;  %v11653_v28 = vld [vmem:[%s16572_s1 + $0xcd0] ss:$24 sps:$4 sm:$0xff]  }
 0x493   :  { %5857 = vmatprep.mubr.bf16.mxu0 %v11580_v26 }
 0x495   :  { %v5643_v40 = vpop.f32.mrb[64].mxu0 }
 0x496   :  { %v13918_v32 = vadd.f32 %v5643_v40, %v12817_v48  ;;  %v5645_v13 = vpop.f32.mrb[65].mxu0 }
 0x497   :  { %v5646_v60 = vpop.f32.mrb[66].mxu0  ;;  %v11586_v13 = vld [vmem:[%s16572_s1 + $0x884] ss:$24 sps:$4 sm:$0xff]  }
 0x498   :  { %16805 = vst [vmem:[#allocation113_spill] sm:$0xff] %v13918_v32  ;;  %v13927_v42 = vadd.f32 %v5646_v60, %v12828_v59  ;;  %v5648_v36 = vpop.f32.mrb[67].mxu0  ;;  %v11737_v32 = vld [vmem:[%s16572_s1 + $0xf70] ss:$24 sps:$4 sm:$0xff]  }
 0x49a   :  { %16806 = vst [vmem:[#allocation114_spill] sm:$0xff] %v13927_v42  ;;  %5858 = vmatmul.mubr.bf16.gmra.mrb[24].mxu0 %v11578_v12  ;;  %v16925_v42 = vld [vmem:[#allocation63_spill] sm:$0xff] }
 0x49b   :  { %5865 = vmatprep.mubr.bf16.mxu0 %v11583_v6 }
 0x49d   :  { %v5651_v17 = vpop.f32.mrb[68].mxu0 }
 0x49e   :  { %v13930_v48 = vadd.f32 %v5651_v17, %v12833_v1  ;;  %v5653_v26 = vpop.f32.mrb[69].mxu0  ;;  %v6426_v1 = vld [vmem:[%s16573_s2] sm:$0xff] }
 0x49f   :  { %v5654_v40 = vpop.f32.mrb[70].mxu0  ;;  %6476 = vperm.xlu0 %10904, %v6426_v1   ;;  %v11584_v17 = vld [vmem:[%s16572_s1 + $0x880] ss:$24 sps:$4 sm:$0xff]  }
 0x4a0   :  { %16807 = vst [vmem:[#allocation115_spill] sm:$0xff] %v13930_v48  ;;  %v13939_v59 = vadd.f32 %v5654_v40, %v12844_v11  ;;  %v5656_v60 = vpop.f32.mrb[71].mxu0  ;;  %v11589_v11 = vld [vmem:[%s16572_s1 + $0x8b4] ss:$24 sps:$4 sm:$0xff]  }
 0x4a2   :  { %16808 = vst [vmem:[#allocation116_spill] sm:$0xff] %v13939_v59  ;;  %5866 = vmatmul.mubr.bf16.gmra.mrb[28].mxu0 %v11581_v39 }
 0x4a3   :  { %5873 = vmatprep.mubr.bf16.mxu0 %v11586_v13  ;;  %v6427_v13 = vld [vmem:[%s16573_s2 + $0x8] sm:$0xff] }
 0x4a4   :  { %6481 = vperm.xlu0 %10904, %v6427_v13  }
 0x4a5   :  { %v5659_v12 = vpop.f32.mrb[72].mxu0 }
 0x4a6   :  { %v13945_v6 = vadd.f32 %v5659_v12, %v12849_v14  ;;  %v5661_v36 = vpop.f32.mrb[73].mxu0  ;;  %v6430_v14 = vld [vmem:[%s16573_s2 + $0x20] sm:$0xff] }
 0x4a7   :  { %v5662_v26 = vpop.f32.mrb[74].mxu0 }
 0x4a8   :  { %16809 = vst [vmem:[#allocation117_spill] sm:$0xff] %v13945_v6  ;;  %v13954_v39 = vadd.f32 %v5662_v26, %v12860_v24  ;;  %v5664_v40 = vpop.f32.mrb[75].mxu0  ;;  %6496 = vperm.xlu0 %10904, %v6430_v14   ;;  %v11587_v24 = vld [vmem:[%s16572_s1 + $0x8b0] ss:$24 sps:$4 sm:$0xff]  }
 0x4aa   :  { %16810 = vst [vmem:[#allocation118_spill] sm:$0xff] %v13954_v39  ;;  %5874 = vmatmul.mubr.bf16.gmra.mrb[32].mxu0 %v11584_v17  ;;  %v11592_v17 = vld [vmem:[%s16572_s1 + $0x8e4] ss:$24 sps:$4 sm:$0xff]  }
 0x4ab   :  { %5881 = vmatprep.mubr.bf16.mxu0 %v11589_v11  ;;  %v6432_v11 = vld [vmem:[%s16573_s2 + $0x30] sm:$0xff] }
 0x4ac   :  { %6506 = vperm.xlu0 %10904, %v6432_v11  }
 0x4ad   :  { %v5667_v60 = vpop.f32.mrb[76].mxu0 }
 0x4ae   :  { %v13963_v1 = vadd.f32 %v5667_v60, %v12865_v30  ;;  %v5669_v12 = vpop.f32.mrb[77].mxu0  ;;  %v6434_v30 = vld [vmem:[%s16573_s2 + $0x40] sm:$0xff] }
 0x4af   :  { %v5670_v36 = vpop.f32.mrb[78].mxu0 }
 0x4b0   :  { %16811 = vst [vmem:[#allocation119_spill] sm:$0xff] %v13963_v1  ;;  %v13972_v26 = vadd.f32 %v5670_v36, %v12876_v44  ;;  %v5672_v40 = vpop.f32.mrb[79].mxu0  ;;  %6516 = vperm.xlu0 %10904, %v6434_v30   ;;  %v11590_v44 = vld [vmem:[%s16572_s1 + $0x8e0] ss:$24 sps:$4 sm:$0xff]  }
 0x4b2   :  { %16812 = vst [vmem:[#allocation120_spill] sm:$0xff] %v13972_v26  ;;  %5882 = vmatmul.mubr.bf16.gmra.mrb[36].mxu0 %v11587_v24  ;;  %v11595_v24 = vld [vmem:[%s16572_s1 + $0x914] ss:$24 sps:$4 sm:$0xff]  }
 0x4b3   :  { %5889 = vmatprep.mubr.bf16.mxu0 %v11592_v17  ;;  %v6436_v17 = vld [vmem:[%s16573_s2 + $0x50] sm:$0xff] }
 0x4b4   :  { %6526 = vperm.xlu0 %10904, %v6436_v17  }
 0x4b5   :  { %v5675_v13 = vpop.f32.mrb[80].mxu0 }
 0x4b6   :  { %v13981_v14 = vadd.f32 %v5675_v13, %v12881_v52  ;;  %v5677_v60 = vpop.f32.mrb[81].mxu0  ;;  %v6438_v52 = vld [vmem:[%s16573_s2 + $0x60] sm:$0xff] }
 0x4b7   :  { %v5678_v12 = vpop.f32.mrb[82].mxu0 }
 0x4b8   :  { %16813 = vst [vmem:[#allocation121_spill] sm:$0xff] %v13981_v14  ;;  %v13990_v36 = vadd.f32 %v5678_v12, %v12892_v3  ;;  %v5680_v40 = vpop.f32.mrb[83].mxu0  ;;  %6536 = vperm.xlu0 %10904, %v6438_v52   ;;  %v11593_v3 = vld [vmem:[%s16572_s1 + $0x910] ss:$24 sps:$4 sm:$0xff]  }
 0x4b9   :  { %v16921_v14 = vld [vmem:[#allocation60_spill] sm:$0xff] }
 0x4ba   :  { %16814 = vst [vmem:[#allocation122_spill] sm:$0xff] %v13990_v36  ;;  %5890 = vmatmul.mubr.bf16.gmra.mrb[40].mxu0 %v11590_v44  ;;  %v11598_v44 = vld [vmem:[%s16572_s1 + $0x944] ss:$24 sps:$4 sm:$0xff]   ;;  %v11719_v36 = vld [vmem:[%s16572_s1 + $0xee0] ss:$24 sps:$4 sm:$0xff]  }
 0x4bb   :  { %5897 = vmatprep.mubr.bf16.mxu0 %v11595_v24  ;;  %v6440_v24 = vld [vmem:[%s16573_s2 + $0x70] sm:$0xff] }
 0x4bc   :  { %6546 = vperm.xlu0 %10904, %v6440_v24  }
 0x4bd   :  { %v5683_v11 = vpop.f32.mrb[84].mxu0 }
 0x4be   :  { %v13999_v30 = vadd.f32 %v5683_v11, %v12897_v8  ;;  %v5685_v13 = vpop.f32.mrb[85].mxu0  ;;  %v6442_v8 = vld [vmem:[%s16573_s2 + $0x80] sm:$0xff] }
 0x4bf   :  { %v5686_v60 = vpop.f32.mrb[86].mxu0 }
 0x4c0   :  { %16815 = vst [vmem:[#allocation123_spill] sm:$0xff] %v13999_v30  ;;  %v14008_v12 = vadd.f32 %v5686_v60, %v12908_v21  ;;  %v5688_v40 = vpop.f32.mrb[87].mxu0  ;;  %6556 = vperm.xlu0 %10904, %v6442_v8   ;;  %v11596_v21 = vld [vmem:[%s16572_s1 + $0x940] ss:$24 sps:$4 sm:$0xff]  }
 0x4c2   :  { %16816 = vst [vmem:[#allocation124_spill] sm:$0xff] %v14008_v12  ;;  %5898 = vmatmul.mubr.bf16.gmra.mrb[44].mxu0 %v11593_v3  ;;  %v11601_v3 = vld [vmem:[%s16572_s1 + $0x974] ss:$24 sps:$4 sm:$0xff]   ;;  %v9241_v12 = vld [vmem:[%s16576_s8 + $0x18] sm:$0xff] }
 0x4c3   :  { %5905 = vmatprep.mubr.bf16.mxu0 %v11598_v44  ;;  %v6444_v44 = vld [vmem:[%s16573_s2 + $0x90] sm:$0xff] }
 0x4c4   :  { %6566 = vperm.xlu0 %10904, %v6444_v44  }
 0x4c5   :  { %v5691_v17 = vpop.f32.mrb[88].mxu0 }
 0x4c6   :  { %v14017_v52 = vadd.f32 %v5691_v17, %v12913_v29  ;;  %v5693_v11 = vpop.f32.mrb[89].mxu0  ;;  %v6446_v29 = vld [vmem:[%s16573_s2 + $0xa0] sm:$0xff] }
 0x4c7   :  { %v5694_v13 = vpop.f32.mrb[90].mxu0 }
 0x4c8   :  { %16817 = vst [vmem:[#allocation125_spill] sm:$0xff] %v14017_v52  ;;  %v14026_v60 = vadd.f32 %v5694_v13, %v12924_v47  ;;  %v5696_v40 = vpop.f32.mrb[91].mxu0  ;;  %6576 = vperm.xlu0 %10904, %v6446_v29   ;;  %v11599_v47 = vld [vmem:[%s16572_s1 + $0x970] ss:$24 sps:$4 sm:$0xff]   ;;  %v16820_v13 = vld [vmem:[#allocation2_spill] sm:$0xff] }
 0x4ca   :  { %16818 = vst [vmem:[#allocation126_spill] sm:$0xff] %v14026_v60  ;;  %5906 = vmatmul.mubr.bf16.gmra.mrb[48].mxu0 %v11596_v21  ;;  %v11604_v21 = vld [vmem:[%s16572_s1 + $0x9a4] ss:$24 sps:$4 sm:$0xff]  }
 0x4cb   :  { %5913 = vmatprep.mubr.bf16.mxu0 %v11601_v3  ;;  %v6448_v3 = vld [vmem:[%s16573_s2 + $0xb0] sm:$0xff]  ;;  %v16911_v60 = vld [vmem:[#allocation50_spill] sm:$0xff] }
 0x4cc   :  { %6586 = vperm.xlu0 %10904, %v6448_v3   ;;  %v16824_v3 = vld [vmem:[#allocation4_spill] sm:$0xff] }
 0x4cd   :  { %v5699_v24 = vpop.f32.mrb[92].mxu0 }
 0x4ce   :  { %v14035_v8 = vadd.f32 %v5699_v24, %v12929_v56  ;;  %v5701_v17 = vpop.f32.mrb[93].mxu0  ;;  %v6450_v56 = vld [vmem:[%s16573_s2 + $0xc0] sm:$0xff]  ;;  %v16822_v24 = vld [vmem:[#allocation3_spill] sm:$0xff] }
 0x4cf   :  { %v5702_v11 = vpop.f32.mrb[94].mxu0 }
 0x4d0   :  { %16819 = vst [vmem:[#allocation127_spill] sm:$0xff] %v14035_v8  ;;  %v14044_v40 = vadd.f32 %v5702_v11, %v16820_v13  ;;  %v5704_v44 = vpop.f32.mrb[95].mxu0  ;;  %6596 = vperm.xlu0 %10904, %v6450_v56   ;;  %v11602_v11 = vld [vmem:[%s16572_s1 + $0x9a0] ss:$24 sps:$4 sm:$0xff]  }
 0x4d1   :  { %v16826_v44 = vld [vmem:[#allocation5_spill] sm:$0xff] }
 0x4d2   :  { %16821 = vst [vmem:[#allocation2_spill] sm:$0xff] %v14044_v40  ;;  %5914 = vmatmul.mubr.bf16.gmra.mrb[52].mxu0 %v11599_v47  ;;  %v11607_v47 = vld [vmem:[%s16572_s1 + $0x9d4] ss:$24 sps:$4 sm:$0xff]   ;;  %v11701_v40 = vld [vmem:[%s16572_s1 + $0xe50] ss:$24 sps:$4 sm:$0xff]  }
 0x4d3   :  { %5921 = vmatprep.mubr.bf16.mxu0 %v11604_v21  ;;  %v11707_v8 = vld [vmem:[%s16572_s1 + $0xe80] ss:$24 sps:$4 sm:$0xff]  }
 0x4d5   :  { %v5707_v29 = vpop.f32.mrb[96].mxu0 }
 0x4d6   :  { %v14053_v17 = vadd.f32 %v5707_v29, %v16822_v24  ;;  %v5709_v4 = vpop.f32.mrb[97].mxu0  ;;  %v6452_v29 = vld [vmem:[%s16573_s2 + $0xd0] sm:$0xff]  ;;  %v11610_v24 = vld [vmem:[%s16572_s1 + $0xa04] ss:$24 sps:$4 sm:$0xff]  }
 0x4d7   :  { %v5710_v13 = vpop.f32.mrb[98].mxu0  ;;  %v6428_v4 = vld [vmem:[%s16573_s2 + $0x10] sm:$0xff]  ;;  %6606 = vperm.xlu0 %10904, %v6452_v29  }
 0x4d8   :  { %16823 = vst [vmem:[#allocation3_spill] sm:$0xff] %v14053_v17  ;;  %v14064_v21 = vadd.f32 %v5710_v13, %v16824_v3  ;;  %v5712_v56 = vpop.f32.mrb[99].mxu0  ;;  %6486 = vperm.xlu1 %10905, %v6428_v4   ;;  %v6429_v13 = vld [vmem:[%s16573_s2 + $0x18] sm:$0xff]  ;;  %v6454_v3 = vld [vmem:[%s16573_s2 + $0xe0] sm:$0xff] }
 0x4da   :  { %16825 = vst [vmem:[#allocation4_spill] sm:$0xff] %v14064_v21  ;;  %5922 = vmatmul.mubr.bf16.gmra.mrb[56].mxu0 %v11602_v11  ;;  %v11605_v11 = vld [vmem:[%s16572_s1 + $0x9d0] ss:$24 sps:$4 sm:$0xff]   ;;  %v11608_v21 = vld [vmem:[%s16572_s1 + $0xa00] ss:$24 sps:$4 sm:$0xff]  }
 0x4db   :  { %5929 = vmatprep.mubr.bf16.mxu0 %v11607_v47  ;;  %6616 = vperm.xlu0 %10904, %v6454_v3   ;;  %v16827_v47 = vld [vmem:[#allocation6_spill] sm:$0xff]  ;;  %v6456_v3 = vld [vmem:[%s16573_s2 + $0xf0] sm:$0xff] }
 0x4dc   :  { %6491 = vperm.xlu1 %10905, %v6429_v13  }
 0x4dd   :  { %v5715_v56 = vpop.f32.mrb[100].mxu0 }
 0x4de   :  { %v14081_v17 = vadd.f32 %v5715_v56, %v16826_v44  ;;  %v5717_v4 = vpop.f32.mrb[101].mxu0  ;;  %v6431_v44 = vld [vmem:[%s16573_s2 + $0x28] sm:$0xff] }
 0x4df   :  { %v5718_v29 = vpop.f32.mrb[102].mxu0  ;;  %6626 = vperm.xlu0 %10904, %v6456_v3   ;;  %v6433_v4 = vld [vmem:[%s16573_s2 + $0x38] sm:$0xff] }
 0x4e0   :  { %v14092_v0 = vadd.f32 %v5718_v29, %v16827_v47  ;;  %v5720_v13 = vpop.f32.mrb[103].mxu0  ;;  %6501 = vperm.xlu1 %10905, %v6431_v44   ;;  %v6458_v29 = vld [vmem:[%s16573_s2 + $0x100] sm:$0xff]  ;;  %v11658_v47 = vld [vmem:[%s16572_s1 + $0xcf4] ss:$24 sps:$4 sm:$0xff]  }
 0x4e1   :  { %v16829_v44 = vld [vmem:[#allocation7_spill] sm:$0xff]  ;;  %4463 = vmatprep.mubr.bf16.mxu1 %v11658_v47  ;;  %v6460_v47 = vld [vmem:[%s16573_s2 + $0x110] sm:$0xff] }
 0x4e2   :  { %16828 = vst [vmem:[#allocation5_spill] sm:$0xff] %v14092_v0  ;;  %5930 = vmatmul.mubr.bf16.gmra.mrb[60].mxu0 %v11605_v11  ;;  %v11656_v11 = vld [vmem:[%s16572_s1 + $0xcf0] ss:$24 sps:$4 sm:$0xff]   ;;  %v11613_v0 = vld [vmem:[%s16572_s1 + $0xa34] ss:$24 sps:$4 sm:$0xff]  }
 0x4e3   :  { %5937 = vmatprep.mubr.bf16.mxu0 %v11610_v24  ;;  %6636 = vperm.xlu0 %10904, %v6458_v29   ;;  %v16830_v29 = vld [vmem:[#allocation8_spill] sm:$0xff] }
 0x4e4   :  { %6511 = vperm.xlu1 %10905, %v6433_v4   ;;  %4464 = vmatmul.mubr.bf16.gmra.mrb[168].mxu1 %v11656_v11  ;;  %v11611_v4 = vld [vmem:[%s16572_s1 + $0xa30] ss:$24 sps:$4 sm:$0xff]  }
 0x4e5   :  { %v5723_v13 = vpop.f32.mrb[104].mxu0 }
 0x4e6   :  { %v14115_v3 = vadd.f32 %v5723_v13, %v16829_v44  ;;  %v5725_v56 = vpop.f32.mrb[105].mxu0  ;;  %v6437_v44 = vld [vmem:[%s16573_s2 + $0x58] sm:$0xff] }
 0x4e7   :  { %v5726_v24 = vpop.f32.mrb[106].mxu0  ;;  %v6435_v56 = vld [vmem:[%s16573_s2 + $0x48] sm:$0xff]  ;;  %6646 = vperm.xlu0 %10904, %v6460_v47  }
 0x4e8   :  { %v14126_v31 = vadd.f32 %v5726_v24, %v16830_v29  ;;  %v5728_v13 = vpop.f32.mrb[107].mxu0  ;;  %6521 = vperm.xlu1 %10905, %v6435_v56   ;;  %v6462_v24 = vld [vmem:[%s16573_s2 + $0x120] sm:$0xff]  ;;  %v16832_v56 = vld [vmem:[#allocation9_spill] sm:$0xff] }
 0x4e9   :  { %v11664_v29 = vld [vmem:[%s16572_s1 + $0xd24] ss:$24 sps:$4 sm:$0xff]  }
 0x4ea   :  { %16831 = vst [vmem:[#allocation6_spill] sm:$0xff] %v14126_v31  ;;  %5938 = vmatmul.mubr.bf16.gmra.mrb[64].mxu0 %v11608_v21  ;;  %v11662_v21 = vld [vmem:[%s16572_s1 + $0xd20] ss:$24 sps:$4 sm:$0xff]   ;;  %4471 = vmatprep.mubr.bf16.mxu1 %v11664_v29  ;;  %v11616_v31 = vld [vmem:[%s16572_s1 + $0xa64] ss:$24 sps:$4 sm:$0xff]   ;;  %v6464_v29 = vld [vmem:[%s16573_s2 + $0x130] sm:$0xff] }
 0x4eb   :  { %5945 = vmatprep.mubr.bf16.mxu0 %v11613_v0  ;;  %6656 = vperm.xlu0 %10904, %v6462_v24   ;;  %v16833_v24 = vld [vmem:[#allocation10_spill] sm:$0xff] }
 0x4ec   :  { %6531 = vperm.xlu1 %10905, %v6437_v44   ;;  %4472 = vmatmul.mubr.bf16.gmra.mrb[172].mxu1 %v11662_v21  ;;  %v11614_v44 = vld [vmem:[%s16572_s1 + $0xa60] ss:$24 sps:$4 sm:$0xff]  }
 0x4ed   :  { %v5731_v13 = vpop.f32.mrb[108].mxu0 }
 0x4ee   :  { %v14149_v47 = vadd.f32 %v5731_v13, %v16832_v56  ;;  %v5733_v11 = vpop.f32.mrb[109].mxu0  ;;  %v6441_v56 = vld [vmem:[%s16573_s2 + $0x78] sm:$0xff] }
 0x4ef   :  { %v5734_v0 = vpop.f32.mrb[110].mxu0  ;;  %v6439_v11 = vld [vmem:[%s16573_s2 + $0x68] sm:$0xff]  ;;  %6666 = vperm.xlu0 %10904, %v6464_v29  }
 0x4f0   :  { %v14160_v38 = vadd.f32 %v5734_v0, %v16833_v24  ;;  %v5736_v13 = vpop.f32.mrb[111].mxu0  ;;  %6541 = vperm.xlu1 %10905, %v6439_v11   ;;  %v6466_v0 = vld [vmem:[%s16573_s2 + $0x140] sm:$0xff]  ;;  %v11670_v24 = vld [vmem:[%s16572_s1 + $0xd54] ss:$24 sps:$4 sm:$0xff]  }
 0x4f1   :  { %v16835_v11 = vld [vmem:[#allocation11_spill] sm:$0xff]  ;;  %4479 = vmatprep.mubr.bf16.mxu1 %v11670_v24  ;;  %v6468_v24 = vld [vmem:[%s16573_s2 + $0x150] sm:$0xff] }
 0x4f2   :  { %16834 = vst [vmem:[#allocation7_spill] sm:$0xff] %v14160_v38  ;;  %5946 = vmatmul.mubr.bf16.gmra.mrb[68].mxu0 %v11611_v4  ;;  %v11668_v4 = vld [vmem:[%s16572_s1 + $0xd50] ss:$24 sps:$4 sm:$0xff]   ;;  %v11619_v38 = vld [vmem:[%s16572_s1 + $0xa94] ss:$24 sps:$4 sm:$0xff]  }
 0x4f3   :  { %5953 = vmatprep.mubr.bf16.mxu0 %v11616_v31  ;;  %6676 = vperm.xlu0 %10904, %v6466_v0   ;;  %v16836_v0 = vld [vmem:[#allocation12_spill] sm:$0xff] }
 0x4f4   :  { %6551 = vperm.xlu1 %10905, %v6441_v56   ;;  %4480 = vmatmul.mubr.bf16.gmra.mrb[176].mxu1 %v11668_v4  ;;  %v11617_v56 = vld [vmem:[%s16572_s1 + $0xa90] ss:$24 sps:$4 sm:$0xff]  }
 0x4f5   :  { %v5739_v13 = vpop.f32.mrb[112].mxu0 }
 0x4f6   :  { %v14183_v29 = vadd.f32 %v5739_v13, %v16835_v11  ;;  %v5741_v21 = vpop.f32.mrb[113].mxu0  ;;  %v6445_v11 = vld [vmem:[%s16573_s2 + $0x98] sm:$0xff] }
 0x4f7   :  { %v5742_v31 = vpop.f32.mrb[114].mxu0  ;;  %v6443_v21 = vld [vmem:[%s16573_s2 + $0x88] sm:$0xff]  ;;  %6686 = vperm.xlu0 %10904, %v6468_v24  }
 0x4f8   :  { %v14194_v43 = vadd.f32 %v5742_v31, %v16836_v0  ;;  %v5744_v13 = vpop.f32.mrb[115].mxu0  ;;  %6561 = vperm.xlu1 %10905, %v6443_v21   ;;  %v6470_v31 = vld [vmem:[%s16573_s2 + $0x160] sm:$0xff]  ;;  %v16838_v21 = vld [vmem:[#allocation13_spill] sm:$0xff] }
 0x4f9   :  { %v11676_v0 = vld [vmem:[%s16572_s1 + $0xd84] ss:$24 sps:$4 sm:$0xff]  }
 0x4fa   :  { %16837 = vst [vmem:[#allocation8_spill] sm:$0xff] %v14194_v43  ;;  %5954 = vmatmul.mubr.bf16.gmra.mrb[72].mxu0 %v11614_v44  ;;  %v11674_v44 = vld [vmem:[%s16572_s1 + $0xd80] ss:$24 sps:$4 sm:$0xff]   ;;  %4487 = vmatprep.mubr.bf16.mxu1 %v11676_v0  ;;  %v11622_v43 = vld [vmem:[%s16572_s1 + $0xac4] ss:$24 sps:$4 sm:$0xff]   ;;  %v6472_v0 = vld [vmem:[%s16573_s2 + $0x170] sm:$0xff] }
 0x4fb   :  { %5961 = vmatprep.mubr.bf16.mxu0 %v11619_v38  ;;  %6696 = vperm.xlu0 %10904, %v6470_v31   ;;  %v16839_v31 = vld [vmem:[#allocation14_spill] sm:$0xff] }
 0x4fc   :  { %6571 = vperm.xlu1 %10905, %v6445_v11   ;;  %4488 = vmatmul.mubr.bf16.gmra.mrb[180].mxu1 %v11674_v44 }
 0x4fd   :  { %v5747_v13 = vpop.f32.mrb[116].mxu0 }
 0x4fe   :  { %v14217_v24 = vadd.f32 %v5747_v13, %v16838_v21  ;;  %v5749_v4 = vpop.f32.mrb[117].mxu0  ;;  %v6449_v21 = vld [vmem:[%s16573_s2 + $0xb8] sm:$0xff] }
 0x4ff   :  { %v5750_v38 = vpop.f32.mrb[118].mxu0  ;;  %v6447_v4 = vld [vmem:[%s16573_s2 + $0xa8] sm:$0xff]  ;;  %6706 = vperm.xlu0 %10904, %v6472_v0  }
 0x500   :  { %v14228_v50 = vadd.f32 %v5750_v38, %v16839_v31  ;;  %v5752_v13 = vpop.f32.mrb[119].mxu0  ;;  %6581 = vperm.xlu1 %10905, %v6447_v4   ;;  %v8700_v38 = vld [vmem:[%s16574_s4] sm:$0xff]  ;;  %v11682_v31 = vld [vmem:[%s16572_s1 + $0xdb4] ss:$24 sps:$4 sm:$0xff]  }
 0x501   :  { %v16841_v4 = vld [vmem:[#allocation15_spill] sm:$0xff]  ;;  %4495 = vmatprep.mubr.bf16.mxu1 %v11682_v31  ;;  %v8702_v31 = vld [vmem:[%s16574_s4 + $0x10] sm:$0xff] }
 0x502   :  { %16840 = vst [vmem:[#allocation9_spill] sm:$0xff] %v14228_v50  ;;  %5962 = vmatmul.mubr.bf16.gmra.mrb[76].mxu0 %v11617_v56  ;;  %v11680_v56 = vld [vmem:[%s16572_s1 + $0xdb0] ss:$24 sps:$4 sm:$0xff]   ;;  %v11625_v50 = vld [vmem:[%s16572_s1 + $0xaf4] ss:$24 sps:$4 sm:$0xff]  }
 0x503   :  { %5969 = vmatprep.mubr.bf16.mxu0 %v11622_v43  ;;  %8726 = vperm.xlu0 %10904, %v8700_v38   ;;  %v11620_v43 = vld [vmem:[%s16572_s1 + $0xac0] ss:$24 sps:$4 sm:$0xff]   ;;  %v16842_v38 = vld [vmem:[#allocation16_spill] sm:$0xff] }
 0x504   :  { %6591 = vperm.xlu1 %10905, %v6449_v21   ;;  %4496 = vmatmul.mubr.bf16.gmra.mrb[184].mxu1 %v11680_v56  ;;  %v11623_v21 = vld [vmem:[%s16572_s1 + $0xaf0] ss:$24 sps:$4 sm:$0xff]  }
 0x505   :  { %v5755_v13 = vpop.f32.mrb[120].mxu0 }
 0x506   :  { %v14251_v0 = vadd.f32 %v5755_v13, %v16841_v4  ;;  %v5757_v44 = vpop.f32.mrb[121].mxu0  ;;  %v8704_v4 = vld [vmem:[%s16574_s4 + $0x20] sm:$0xff] }
 0x507   :  { %v5758_v11 = vpop.f32.mrb[122].mxu0  ;;  %v6451_v44 = vld [vmem:[%s16573_s2 + $0xc8] sm:$0xff]  ;;  %8736 = vperm.xlu0 %10904, %v8702_v31  }
 0x508   :  { %v14262_v55 = vadd.f32 %v5758_v11, %v16842_v38  ;;  %v5760_v13 = vpop.f32.mrb[123].mxu0  ;;  %6601 = vperm.xlu1 %10905, %v6451_v44   ;;  %v6453_v11 = vld [vmem:[%s16573_s2 + $0xd8] sm:$0xff] }
 0x509   :  { %v11688_v38 = vld [vmem:[%s16572_s1 + $0xde4] ss:$24 sps:$4 sm:$0xff]  }
 0x50a   :  { %16843 = vst [vmem:[#allocation10_spill] sm:$0xff] %v14262_v55  ;;  %5970 = vmatmul.mubr.bf16.gmra.mrb[80].mxu0 %v11620_v43  ;;  %v11686_v43 = vld [vmem:[%s16572_s1 + $0xde0] ss:$24 sps:$4 sm:$0xff]   ;;  %4503 = vmatprep.mubr.bf16.mxu1 %v11688_v38  ;;  %v11628_v55 = vld [vmem:[%s16572_s1 + $0xb24] ss:$24 sps:$4 sm:$0xff]   ;;  %v8706_v38 = vld [vmem:[%s16574_s4 + $0x30] sm:$0xff] }
 0x50b   :  { %5977 = vmatprep.mubr.bf16.mxu0 %v11625_v50  ;;  %8746 = vperm.xlu0 %10904, %v8704_v4   ;;  %v16844_v44 = vld [vmem:[#allocation17_spill] sm:$0xff]  ;;  %v16846_v4 = vld [vmem:[#allocation18_spill] sm:$0xff] }
 0x50c   :  { %6611 = vperm.xlu1 %10905, %v6453_v11   ;;  %4504 = vmatmul.mubr.bf16.gmra.mrb[188].mxu1 %v11686_v43  ;;  %v11626_v11 = vld [vmem:[%s16572_s1 + $0xb20] ss:$24 sps:$4 sm:$0xff]  }
 0x50d   :  { %v5763_v13 = vpop.f32.mrb[124].mxu0 }
 0x50e   :  { %v14285_v31 = vadd.f32 %v5763_v13, %v16844_v44  ;;  %v5765_v56 = vpop.f32.mrb[125].mxu0  ;;  %v6457_v44 = vld [vmem:[%s16573_s2 + $0xf8] sm:$0xff] }
 0x50f   :  { %v5766_v50 = vpop.f32.mrb[126].mxu0  ;;  %v6455_v56 = vld [vmem:[%s16573_s2 + $0xe8] sm:$0xff]  ;;  %8756 = vperm.xlu0 %10904, %v8706_v38  }
 0x510   :  { %16845 = vst [vmem:[#allocation11_spill] sm:$0xff] %v14285_v31  ;;  %v14296_v62 = vadd.f32 %v5766_v50, %v16846_v4  ;;  %v5768_v13 = vpop.f32.mrb[127].mxu0  ;;  %6621 = vperm.xlu1 %10905, %v6455_v56   ;;  %v8708_v50 = vld [vmem:[%s16574_s4 + $0x40] sm:$0xff]  ;;  %v11694_v4 = vld [vmem:[%s16572_s1 + $0xe14] ss:$24 sps:$4 sm:$0xff]  }
 0x511   :  { %v16848_v56 = vld [vmem:[#allocation19_spill] sm:$0xff]  ;;  %4511 = vmatprep.mubr.bf16.mxu1 %v11694_v4  ;;  %v6461_v4 = vld [vmem:[%s16573_s2 + $0x118] sm:$0xff] }
 0x512   :  { %16847 = vst [vmem:[#allocation12_spill] sm:$0xff] %v14296_v62  ;;  %5978 = vmatmul.mubr.bf16.gmra.mrb[84].mxu0 %v11623_v21  ;;  %v11692_v21 = vld [vmem:[%s16572_s1 + $0xe10] ss:$24 sps:$4 sm:$0xff]  }
 0x513   :  { %5985 = vmatprep.mubr.bf16.mxu0 %v11628_v55  ;;  %8766 = vperm.xlu0 %10904, %v8708_v50   ;;  %v6459_v55 = vld [vmem:[%s16573_s2 + $0x108] sm:$0xff] }
 0x514   :  { %6631 = vperm.xlu1 %10905, %v6457_v44   ;;  %v8710_v44 = vld [vmem:[%s16574_s4 + $0x50] sm:$0xff]  ;;  %4512 = vmatmul.mubr.bf16.gmra.mrb[192].mxu1 %v11692_v21  ;;  %v8712_v21 = vld [vmem:[%s16574_s4 + $0x60] sm:$0xff] }
 0x515   :  { %v5771_v13 = vpop.f32.mrb[128].mxu0  ;;  %v11629_v31 = vld [vmem:[%s16572_s1 + $0xb50] ss:$24 sps:$4 sm:$0xff]  }
 0x516   :  { %v14319_v38 = vadd.f32 %v5771_v13, %v16848_v56  ;;  %v5773_v43 = vpop.f32.mrb[129].mxu0  ;;  %v11631_v13 = vld [vmem:[%s16572_s1 + $0xb54] ss:$24 sps:$4 sm:$0xff]  }
 0x517   :  { %v5774_v50 = vpop.f32.mrb[130].mxu0  ;;  %v16850_v56 = vld [vmem:[#allocation20_spill] sm:$0xff]  ;;  %8776 = vperm.xlu0 %10904, %v8710_v44  }
 0x518   :  { %16849 = vst [vmem:[#allocation13_spill] sm:$0xff] %v14319_v38  ;;  %v14336_v62 = vadd.f32 %v5774_v50, %v16850_v56  ;;  %v5776_v7 = vpop.f32.mrb[131].mxu0  ;;  %6641 = vperm.xlu1 %10905, %v6459_v55   ;;  %v11700_v50 = vld [vmem:[%s16572_s1 + $0xe44] ss:$24 sps:$4 sm:$0xff]   ;;  %v11767_v38 = vld [vmem:[%s16572_s1 + $0x1060] ss:$24 sps:$4 sm:$0xff]  }
 0x519   :  { %v16852_v55 = vld [vmem:[#allocation21_spill] sm:$0xff]  ;;  %4519 = vmatprep.mubr.bf16.mxu1 %v11700_v50 }
 0x51a   :  { %16851 = vst [vmem:[#allocation14_spill] sm:$0xff] %v14336_v62  ;;  %5986 = vmatmul.mubr.bf16.gmra.mrb[88].mxu0 %v11626_v11  ;;  %v11698_v11 = vld [vmem:[%s16572_s1 + $0xe40] ss:$24 sps:$4 sm:$0xff]  }
 0x51b   :  { %5993 = vmatprep.mubr.bf16.mxu0 %v11631_v13  ;;  %8786 = vperm.xlu0 %10904, %v8712_v21   ;;  %v6463_v13 = vld [vmem:[%s16573_s2 + $0x128] sm:$0xff]  ;;  %v6465_v50 = vld [vmem:[%s16573_s2 + $0x138] sm:$0xff] }
 0x51c   :  { %6651 = vperm.xlu1 %10905, %v6461_v4   ;;  %v8714_v4 = vld [vmem:[%s16574_s4 + $0x70] sm:$0xff]  ;;  %4520 = vmatmul.mubr.bf16.gmra.mrb[196].mxu1 %v11698_v11  ;;  %v8716_v11 = vld [vmem:[%s16574_s4 + $0x80] sm:$0xff] }
 0x51d   :  { %v5779_v7 = vpop.f32.mrb[132].mxu0 }
 0x51e   :  { %v14353_v44 = vadd.f32 %v5779_v7, %v16852_v55  ;;  %v5781_v56 = vpop.f32.mrb[133].mxu0  ;;  %v11634_v7 = vld [vmem:[%s16572_s1 + $0xb84] ss:$24 sps:$4 sm:$0xff]  }
 0x51f   :  { %v5782_v21 = vpop.f32.mrb[134].mxu0  ;;  %v16854_v56 = vld [vmem:[#allocation22_spill] sm:$0xff]  ;;  %8796 = vperm.xlu0 %10904, %v8714_v4  }
 0x520   :  { %16853 = vst [vmem:[#allocation15_spill] sm:$0xff] %v14353_v44  ;;  %v14370_v43 = vadd.f32 %v5782_v21, %v16854_v56  ;;  %v5784_v62 = vpop.f32.mrb[135].mxu0  ;;  %6661 = vperm.xlu1 %10905, %v6463_v13   ;;  %v11706_v21 = vld [vmem:[%s16572_s1 + $0xe74] ss:$24 sps:$4 sm:$0xff]   ;;  %v11755_v44 = vld [vmem:[%s16572_s1 + $0x1000] ss:$24 sps:$4 sm:$0xff]  }
 0x521   :  { %v16856_v13 = vld [vmem:[#allocation23_spill] sm:$0xff]  ;;  %4527 = vmatprep.mubr.bf16.mxu1 %v11706_v21  ;;  %v6469_v21 = vld [vmem:[%s16573_s2 + $0x158] sm:$0xff] }
 0x522   :  { %16855 = vst [vmem:[#allocation16_spill] sm:$0xff] %v14370_v43  ;;  %5994 = vmatmul.mubr.bf16.gmra.mrb[92].mxu0 %v11629_v31  ;;  %v11704_v31 = vld [vmem:[%s16572_s1 + $0xe70] ss:$24 sps:$4 sm:$0xff]  }
 0x523   :  { %6001 = vmatprep.mubr.bf16.mxu0 %v11634_v7  ;;  %8806 = vperm.xlu0 %10904, %v8716_v11   ;;  %v6467_v7 = vld [vmem:[%s16573_s2 + $0x148] sm:$0xff] }
 0x524   :  { %6671 = vperm.xlu1 %10905, %v6465_v50   ;;  %v8718_v50 = vld [vmem:[%s16574_s4 + $0x90] sm:$0xff]  ;;  %4528 = vmatmul.mubr.bf16.gmra.mrb[200].mxu1 %v11704_v31  ;;  %v8720_v31 = vld [vmem:[%s16574_s4 + $0xa0] sm:$0xff] }
 0x525   :  { %v5787_v62 = vpop.f32.mrb[136].mxu0 }
 0x526   :  { %v14387_v4 = vadd.f32 %v5787_v62, %v16856_v13  ;;  %v5789_v56 = vpop.f32.mrb[137].mxu0  ;;  %v11637_v62 = vld [vmem:[%s16572_s1 + $0xbb4] ss:$24 sps:$4 sm:$0xff]  }
 0x527   :  { %v5790_v11 = vpop.f32.mrb[138].mxu0  ;;  %v16858_v56 = vld [vmem:[#allocation24_spill] sm:$0xff]  ;;  %8816 = vperm.xlu0 %10904, %v8718_v50  }
 0x528   :  { %16857 = vst [vmem:[#allocation17_spill] sm:$0xff] %v14387_v4  ;;  %v14404_v55 = vadd.f32 %v5790_v11, %v16858_v56  ;;  %v5792_v43 = vpop.f32.mrb[139].mxu0  ;;  %6681 = vperm.xlu1 %10905, %v6467_v7   ;;  %v11712_v11 = vld [vmem:[%s16572_s1 + $0xea4] ss:$24 sps:$4 sm:$0xff]  }
 0x529   :  { %v16860_v7 = vld [vmem:[#allocation25_spill] sm:$0xff]  ;;  %4535 = vmatprep.mubr.bf16.mxu1 %v11712_v11 }
 0x52a   :  { %16859 = vst [vmem:[#allocation18_spill] sm:$0xff] %v14404_v55  ;;  %6002 = vmatmul.mubr.bf16.gmra.mrb[96].mxu0 %v11632_v15  ;;  %v11710_v15 = vld [vmem:[%s16572_s1 + $0xea0] ss:$24 sps:$4 sm:$0xff]  }
 0x52b   :  { %6009 = vmatprep.mubr.bf16.mxu0 %v11637_v62  ;;  %8826 = vperm.xlu0 %10904, %v8720_v31   ;;  %v6471_v62 = vld [vmem:[%s16573_s2 + $0x168] sm:$0xff]  ;;  %v6473_v11 = vld [vmem:[%s16573_s2 + $0x178] sm:$0xff] }
 0x52c   :  { %6691 = vperm.xlu1 %10905, %v6469_v21   ;;  %v8722_v21 = vld [vmem:[%s16574_s4 + $0xb0] sm:$0xff]  ;;  %4536 = vmatmul.mubr.bf16.gmra.mrb[204].mxu1 %v11710_v15  ;;  %v8920_v15 = vld [vmem:[%s16575_s6] sm:$0xff] }
 0x52d   :  { %v5795_v43 = vpop.f32.mrb[140].mxu0 }
 0x52e   :  { %v14421_v50 = vadd.f32 %v5795_v43, %v16860_v7  ;;  %v5797_v56 = vpop.f32.mrb[141].mxu0  ;;  %v11640_v43 = vld [vmem:[%s16572_s1 + $0xbe4] ss:$24 sps:$4 sm:$0xff]  }
 0x52f   :  { %v5798_v31 = vpop.f32.mrb[142].mxu0  ;;  %v16862_v56 = vld [vmem:[#allocation26_spill] sm:$0xff]  ;;  %8836 = vperm.xlu0 %10904, %v8722_v21  }
 0x530   :  { %16861 = vst [vmem:[#allocation19_spill] sm:$0xff] %v14421_v50  ;;  %v14438_v13 = vadd.f32 %v5798_v31, %v16862_v56  ;;  %v5800_v55 = vpop.f32.mrb[143].mxu0  ;;  %6701 = vperm.xlu1 %10905, %v6471_v62   ;;  %v11718_v31 = vld [vmem:[%s16572_s1 + $0xed4] ss:$24 sps:$4 sm:$0xff]   ;;  %v11749_v50 = vld [vmem:[%s16572_s1 + $0xfd0] ss:$24 sps:$4 sm:$0xff]  }
 0x531   :  { %v16864_v62 = vld [vmem:[#allocation27_spill] sm:$0xff]  ;;  %4543 = vmatprep.mubr.bf16.mxu1 %v11718_v31  ;;  %v8703_v31 = vld [vmem:[%s16574_s4 + $0x18] sm:$0xff] }
 0x532   :  { %16863 = vst [vmem:[#allocation20_spill] sm:$0xff] %v14438_v13  ;;  %6010 = vmatmul.mubr.bf16.gmra.mrb[100].mxu0 %v11635_v23  ;;  %v11716_v23 = vld [vmem:[%s16572_s1 + $0xed0] ss:$24 sps:$4 sm:$0xff]  }
 0x533   :  { %6017 = vmatprep.mubr.bf16.mxu0 %v11640_v43  ;;  %8938 = vperm.xlu0 %10904, %v8920_v15   ;;  %v8701_v43 = vld [vmem:[%s16574_s4 + $0x8] sm:$0xff] }
 0x534   :  { %6711 = vperm.xlu1 %10905, %v6473_v11   ;;  %v8922_v11 = vld [vmem:[%s16575_s6 + $0x10] sm:$0xff]  ;;  %4544 = vmatmul.mubr.bf16.gmra.mrb[208].mxu1 %v11716_v23  ;;  %v8924_v23 = vld [vmem:[%s16575_s6 + $0x20] sm:$0xff] }
 0x535   :  { %v5803_v55 = vpop.f32.mrb[144].mxu0 }
 0x536   :  { %v14455_v21 = vadd.f32 %v5803_v55, %v16864_v62  ;;  %v5805_v56 = vpop.f32.mrb[145].mxu0  ;;  %v11643_v55 = vld [vmem:[%s16572_s1 + $0xc14] ss:$24 sps:$4 sm:$0xff]  }
 0x537   :  { %v5806_v15 = vpop.f32.mrb[146].mxu0  ;;  %v16866_v56 = vld [vmem:[#allocation28_spill] sm:$0xff]  ;;  %8948 = vperm.xlu0 %10904, %v8922_v11  }
 0x538   :  { %16865 = vst [vmem:[#allocation21_spill] sm:$0xff] %v14455_v21  ;;  %v14472_v7 = vadd.f32 %v5806_v15, %v16866_v56  ;;  %v5808_v13 = vpop.f32.mrb[147].mxu0  ;;  %8731 = vperm.xlu1 %10905, %v8701_v43   ;;  %v11724_v15 = vld [vmem:[%s16572_s1 + $0xf04] ss:$24 sps:$4 sm:$0xff]   ;;  %v16933_v21 = vld [vmem:[#allocation67_spill] sm:$0xff] }
 0x539   :  { %v16868_v43 = vld [vmem:[#allocation29_spill] sm:$0xff]  ;;  %4551 = vmatprep.mubr.bf16.mxu1 %v11724_v15 }
 0x53a   :  { %16867 = vst [vmem:[#allocation22_spill] sm:$0xff] %v14472_v7  ;;  %6018 = vmatmul.mubr.bf16.gmra.mrb[104].mxu0 %v11638_v34  ;;  %v11722_v34 = vld [vmem:[%s16572_s1 + $0xf00] ss:$24 sps:$4 sm:$0xff]  }
 0x53b   :  { %6025 = vmatprep.mubr.bf16.mxu0 %v11643_v55  ;;  %8958 = vperm.xlu0 %10904, %v8924_v23   ;;  %v8705_v55 = vld [vmem:[%s16574_s4 + $0x28] sm:$0xff]  ;;  %v8707_v15 = vld [vmem:[%s16574_s4 + $0x38] sm:$0xff] }
 0x53c   :  { %8741 = vperm.xlu1 %10905, %v8703_v31   ;;  %v8926_v31 = vld [vmem:[%s16575_s6 + $0x30] sm:$0xff]  ;;  %4552 = vmatmul.mubr.bf16.gmra.mrb[212].mxu1 %v11722_v34  ;;  %v8928_v34 = vld [vmem:[%s16575_s6 + $0x40] sm:$0xff] }
 0x53d   :  { %v5811_v13 = vpop.f32.mrb[0].mxu0 }
 0x53e   :  { %v14489_v11 = vadd.f32 %v5811_v13, %v16868_v43  ;;  %v5813_v56 = vpop.f32.mrb[1].mxu0  ;;  %v11646_v13 = vld [vmem:[%s16572_s1 + $0xc44] ss:$24 sps:$4 sm:$0xff]  }
 0x53f   :  { %v5814_v23 = vpop.f32.mrb[2].mxu0  ;;  %v16870_v56 = vld [vmem:[#allocation30_spill] sm:$0xff]  ;;  %8968 = vperm.xlu0 %10904, %v8926_v31  }
 0x540   :  { %16869 = vst [vmem:[#allocation23_spill] sm:$0xff] %v14489_v11  ;;  %v14506_v62 = vadd.f32 %v5814_v23, %v16870_v56  ;;  %v5816_v7 = vpop.f32.mrb[3].mxu0  ;;  %8751 = vperm.xlu1 %10905, %v8705_v55   ;;  %v11730_v23 = vld [vmem:[%s16572_s1 + $0xf34] ss:$24 sps:$4 sm:$0xff]  }
 0x541   :  { %v16872_v55 = vld [vmem:[#allocation31_spill] sm:$0xff]  ;;  %4559 = vmatprep.mubr.bf16.mxu1 %v11730_v23  ;;  %v8711_v23 = vld [vmem:[%s16574_s4 + $0x58] sm:$0xff] }
 0x542   :  { %16871 = vst [vmem:[#allocation24_spill] sm:$0xff] %v14506_v62  ;;  %6026 = vmatmul.mubr.bf16.gmra.mrb[108].mxu0 %v11641_v46  ;;  %v11728_v46 = vld [vmem:[%s16572_s1 + $0xf30] ss:$24 sps:$4 sm:$0xff]  }
 0x543   :  { %6033 = vmatprep.mubr.bf16.mxu0 %v11646_v13  ;;  %8978 = vperm.xlu0 %10904, %v8928_v34   ;;  %v8709_v13 = vld [vmem:[%s16574_s4 + $0x48] sm:$0xff] }
 0x544   :  { %8761 = vperm.xlu1 %10905, %v8707_v15   ;;  %v8930_v15 = vld [vmem:[%s16575_s6 + $0x50] sm:$0xff]  ;;  %4560 = vmatmul.mubr.bf16.gmra.mrb[216].mxu1 %v11728_v46  ;;  %v8932_v46 = vld [vmem:[%s16575_s6 + $0x60] sm:$0xff] }
 0x545   :  { %v5819_v7 = vpop.f32.mrb[4].mxu0 }
 0x546   :  { %v14523_v31 = vadd.f32 %v5819_v7, %v16872_v55  ;;  %v5821_v56 = vpop.f32.mrb[5].mxu0  ;;  %v11649_v7 = vld [vmem:[%s16572_s1 + $0xc74] ss:$24 sps:$4 sm:$0xff]  }
 0x547   :  { %v5822_v34 = vpop.f32.mrb[6].mxu0  ;;  %v16874_v56 = vld [vmem:[#allocation32_spill] sm:$0xff]  ;;  %8988 = vperm.xlu0 %10904, %v8930_v15  }
 0x548   :  { %16873 = vst [vmem:[#allocation25_spill] sm:$0xff] %v14523_v31  ;;  %v14540_v43 = vadd.f32 %v5822_v34, %v16874_v56  ;;  %v5824_v62 = vpop.f32.mrb[7].mxu0  ;;  %8771 = vperm.xlu1 %10905, %v8709_v13   ;;  %v11736_v34 = vld [vmem:[%s16572_s1 + $0xf64] ss:$24 sps:$4 sm:$0xff]  }
 0x549   :  { %v16876_v13 = vld [vmem:[#allocation33_spill] sm:$0xff]  ;;  %4567 = vmatprep.mubr.bf16.mxu1 %v11736_v34 }
 0x54a   :  { %16875 = vst [vmem:[#allocation26_spill] sm:$0xff] %v14540_v43  ;;  %6034 = vmatmul.mubr.bf16.gmra.mrb[112].mxu0 %v11644_v58  ;;  %v11734_v58 = vld [vmem:[%s16572_s1 + $0xf60] ss:$24 sps:$4 sm:$0xff]  }
 0x54b   :  { %6041 = vmatprep.mubr.bf16.mxu0 %v11649_v7  ;;  %8998 = vperm.xlu0 %10904, %v8932_v46   ;;  %v8713_v7 = vld [vmem:[%s16574_s4 + $0x68] sm:$0xff]  ;;  %v8715_v34 = vld [vmem:[%s16574_s4 + $0x78] sm:$0xff] }
 0x54c   :  { %8781 = vperm.xlu1 %10905, %v8711_v23   ;;  %v8934_v23 = vld [vmem:[%s16575_s6 + $0x70] sm:$0xff]  ;;  %4568 = vmatmul.mubr.bf16.gmra.mrb[220].mxu1 %v11734_v58  ;;  %v9238_v58 = vld [vmem:[%s16576_s8] sm:$0xff] }
 0x54d   :  { %v5827_v62 = vpop.f32.mrb[8].mxu0 }
 0x54e   :  { %v14557_v15 = vadd.f32 %v5827_v62, %v16876_v13  ;;  %v5829_v56 = vpop.f32.mrb[9].mxu0  ;;  %v11652_v62 = vld [vmem:[%s16572_s1 + $0xca4] ss:$24 sps:$4 sm:$0xff]  }
 0x54f   :  { %v5830_v46 = vpop.f32.mrb[10].mxu0  ;;  %v16878_v56 = vld [vmem:[#allocation34_spill] sm:$0xff]  ;;  %9008 = vperm.xlu0 %10904, %v8934_v23  }
 0x550   :  { %16877 = vst [vmem:[#allocation27_spill] sm:$0xff] %v14557_v15  ;;  %v14574_v55 = vadd.f32 %v5830_v46, %v16878_v56  ;;  %v5832_v43 = vpop.f32.mrb[11].mxu0  ;;  %8791 = vperm.xlu1 %10905, %v8713_v7   ;;  %v11742_v46 = vld [vmem:[%s16572_s1 + $0xf94] ss:$24 sps:$4 sm:$0xff]  }
 0x551   :  { %v16880_v7 = vld [vmem:[#allocation35_spill] sm:$0xff]  ;;  %4575 = vmatprep.mubr.bf16.mxu1 %v11742_v46  ;;  %v8719_v46 = vld [vmem:[%s16574_s4 + $0x98] sm:$0xff] }
 0x552   :  { %16879 = vst [vmem:[#allocation28_spill] sm:$0xff] %v14574_v55  ;;  %6042 = vmatmul.mubr.bf16.gmra.mrb[116].mxu0 %v11647_v5  ;;  %v11740_v5 = vld [vmem:[%s16572_s1 + $0xf90] ss:$24 sps:$4 sm:$0xff]  }
 0x553   :  { %6049 = vmatprep.mubr.bf16.mxu0 %v11652_v62  ;;  %9244 = vperm.xlu0 %10904, %v9238_v58   ;;  %v8717_v62 = vld [vmem:[%s16574_s4 + $0x88] sm:$0xff] }
 0x554   :  { %8801 = vperm.xlu1 %10905, %v8715_v34   ;;  %v9240_v34 = vld [vmem:[%s16576_s8 + $0x10] sm:$0xff]  ;;  %4576 = vmatmul.mubr.bf16.gmra.mrb[224].mxu1 %v11740_v5  ;;  %v9330_v5 = vld [vmem:[%s16577_s10] sm:$0xff] }
 0x555   :  { %v5835_v43 = vpop.f32.mrb[12].mxu0 }
 0x556   :  { %v14591_v23 = vadd.f32 %v5835_v43, %v16880_v7  ;;  %v5837_v56 = vpop.f32.mrb[13].mxu0  ;;  %v11655_v43 = vld [vmem:[%s16572_s1 + $0xcd4] ss:$24 sps:$4 sm:$0xff]  }
 0x557   :  { %v5838_v58 = vpop.f32.mrb[14].mxu0  ;;  %v16882_v56 = vld [vmem:[#allocation36_spill] sm:$0xff]  ;;  %9254 = vperm.xlu0 %10904, %v9240_v34  }
 0x558   :  { %16881 = vst [vmem:[#allocation29_spill] sm:$0xff] %v14591_v23  ;;  %v14608_v13 = vadd.f32 %v5838_v58, %v16882_v56  ;;  %v5840_v55 = vpop.f32.mrb[15].mxu0  ;;  %8811 = vperm.xlu1 %10905, %v8717_v62   ;;  %v11748_v58 = vld [vmem:[%s16572_s1 + $0xfc4] ss:$24 sps:$4 sm:$0xff]  }
 0x559   :  { %v16884_v62 = vld [vmem:[#allocation37_spill] sm:$0xff]  ;;  %4583 = vmatprep.mubr.bf16.mxu1 %v11748_v58 }
 0x55a   :  { %16883 = vst [vmem:[#allocation30_spill] sm:$0xff] %v14608_v13  ;;  %6050 = vmatmul.mubr.bf16.gmra.mrb[120].mxu0 %v11650_v16  ;;  %v11746_v16 = vld [vmem:[%s16572_s1 + $0xfc0] ss:$24 sps:$4 sm:$0xff]  }
 0x55b   :  { %6057 = vmatprep.mubr.bf16.mxu0 %v11655_v43  ;;  %9333 = vperm.xlu0 %10904, %v9330_v5   ;;  %v8721_v43 = vld [vmem:[%s16574_s4 + $0xa8] sm:$0xff]  ;;  %v8723_v58 = vld [vmem:[%s16574_s4 + $0xb8] sm:$0xff] }
 0x55c   :  { %8821 = vperm.xlu1 %10905, %v8719_v46   ;;  %v11661_v46 = vld [vmem:[%s16572_s1 + $0xd04] ss:$24 sps:$4 sm:$0xff]   ;;  %4584 = vmatmul.mubr.bf16.gmra.mrb[228].mxu1 %v11746_v16  ;;  %v11754_v16 = vld [vmem:[%s16572_s1 + $0xff4] ss:$24 sps:$4 sm:$0xff]  }
 0x55d   :  { %v5843_v55 = vpop.f32.mrb[16].mxu0  ;;  %4591 = vmatprep.mubr.bf16.mxu1 %v11754_v16  ;;  %v8923_v16 = vld [vmem:[%s16575_s6 + $0x18] sm:$0xff] }
 0x55e   :  { %v14625_v34 = vadd.f32 %v5843_v55, %v16884_v62  ;;  %v5845_v56 = vpop.f32.mrb[17].mxu0 }
 0x55f   :  { %v5846_v7 = vpop.f32.mrb[18].mxu0 }
 0x560   :  { %16885 = vst [vmem:[#allocation31_spill] sm:$0xff] %v14625_v34  ;;  %v14639_v55 = vadd.f32 %v5846_v7, %v13232_v35  ;;  %v5848_v62 = vpop.f32.mrb[19].mxu0  ;;  %8831 = vperm.xlu1 %10905, %v8721_v43   ;;  %v11752_v35 = vld [vmem:[%s16572_s1 + $0xff0] ss:$24 sps:$4 sm:$0xff]   ;;  %v16887_v7 = vld [vmem:[#allocation38_spill] sm:$0xff] }
 0x561   :  { %v11731_v34 = vld [vmem:[%s16572_s1 + $0xf40] ss:$24 sps:$4 sm:$0xff]  }
 0x562   :  { %16886 = vst [vmem:[#allocation32_spill] sm:$0xff] %v14639_v55  ;;  %6058 = vmatmul.mubr.bf16.gmra.mrb[124].mxu0 %v11653_v28  ;;  %v11659_v28 = vld [vmem:[%s16572_s1 + $0xd00] ss:$24 sps:$4 sm:$0xff]  }
 0x563   :  { %6065 = vmatprep.mubr.bf16.mxu0 %v11661_v46  ;;  %v8921_v46 = vld [vmem:[%s16575_s6 + $0x8] sm:$0xff] }
 0x564   :  { %8841 = vperm.xlu1 %10905, %v8723_v58   ;;  %v11667_v58 = vld [vmem:[%s16572_s1 + $0xd34] ss:$24 sps:$4 sm:$0xff]   ;;  %4592 = vmatmul.mubr.bf16.gmra.mrb[232].mxu1 %v11752_v35  ;;  %v11760_v35 = vld [vmem:[%s16572_s1 + $0x1024] ss:$24 sps:$4 sm:$0xff]  }
 0x565   :  { %v5851_v13 = vpop.f32.mrb[20].mxu0  ;;  %4599 = vmatprep.mubr.bf16.mxu1 %v11760_v35  ;;  %v8927_v35 = vld [vmem:[%s16575_s6 + $0x38] sm:$0xff] }
 0x566   :  { %v14653_v43 = vadd.f32 %v5851_v13, %v16887_v7  ;;  %v5853_v62 = vpop.f32.mrb[21].mxu0  ;;  %v16889_v7 = vld [vmem:[#allocation39_spill] sm:$0xff] }
 0x567   :  { %v5854_v56 = vpop.f32.mrb[22].mxu0 }
 0x568   :  { %16888 = vst [vmem:[#allocation33_spill] sm:$0xff] %v14653_v43  ;;  %v14667_v62 = vadd.f32 %v5854_v56, %v16889_v7  ;;  %v5856_v5 = vpop.f32.mrb[23].mxu0  ;;  %8943 = vperm.xlu1 %10905, %v8921_v46   ;;  %v16891_v56 = vld [vmem:[#allocation40_spill] sm:$0xff] }
 0x569   :  { %v11758_v5 = vld [vmem:[%s16572_s1 + $0x1020] ss:$24 sps:$4 sm:$0xff]  }
 0x56a   :  { %16890 = vst [vmem:[#allocation34_spill] sm:$0xff] %v14667_v62  ;;  %6066 = vmatmul.mubr.bf16.gmra.mrb[168].mxu0 %v11659_v28  ;;  %v11665_v28 = vld [vmem:[%s16572_s1 + $0xd30] ss:$24 sps:$4 sm:$0xff]  }
 0x56b   :  { %6073 = vmatprep.mubr.bf16.mxu0 %v11667_v58  ;;  %v8925_v58 = vld [vmem:[%s16575_s6 + $0x28] sm:$0xff] }
 0x56c   :  { %8953 = vperm.xlu1 %10905, %v8923_v16   ;;  %v11673_v16 = vld [vmem:[%s16572_s1 + $0xd64] ss:$24 sps:$4 sm:$0xff]   ;;  %4600 = vmatmul.mubr.bf16.gmra.mrb[236].mxu1 %v11758_v5  ;;  %v11766_v5 = vld [vmem:[%s16572_s1 + $0x1054] ss:$24 sps:$4 sm:$0xff]  }
 0x56d   :  { %v5859_v59 = vpop.f32.mrb[24].mxu0  ;;  %4607 = vmatprep.mubr.bf16.mxu1 %v11766_v5  ;;  %v8931_v5 = vld [vmem:[%s16575_s6 + $0x58] sm:$0xff] }
 0x56e   :  { %v14681_v46 = vadd.f32 %v5859_v59, %v16891_v56  ;;  %v5861_v7 = vpop.f32.mrb[25].mxu0  ;;  %v16893_v56 = vld [vmem:[#allocation41_spill] sm:$0xff] }
 0x56f   :  { %v5862_v55 = vpop.f32.mrb[26].mxu0 }
 0x570   :  { %16892 = vst [vmem:[#allocation35_spill] sm:$0xff] %v14681_v46  ;;  %v14695_v7 = vadd.f32 %v5862_v55, %v16893_v56  ;;  %v5864_v13 = vpop.f32.mrb[27].mxu0  ;;  %8963 = vperm.xlu1 %10905, %v8925_v58   ;;  %v11764_v55 = vld [vmem:[%s16572_s1 + $0x1050] ss:$24 sps:$4 sm:$0xff]  }
 0x571   :  { %v16895_v13 = vld [vmem:[#allocation42_spill] sm:$0xff] }
 0x572   :  { %16894 = vst [vmem:[#allocation36_spill] sm:$0xff] %v14695_v7  ;;  %6074 = vmatmul.mubr.bf16.gmra.mrb[172].mxu0 %v11665_v28  ;;  %v11671_v28 = vld [vmem:[%s16572_s1 + $0xd60] ss:$24 sps:$4 sm:$0xff]   ;;  %v11776_v7 = vld [vmem:[%s16572_s1 + $0x10b0] ss:$24 sps:$4 sm:$0xff]  }
 0x573   :  { %6081 = vmatprep.mubr.bf16.mxu0 %v11673_v16  ;;  %v8929_v16 = vld [vmem:[%s16575_s6 + $0x48] sm:$0xff] }
 0x574   :  { %8973 = vperm.xlu1 %10905, %v8927_v35   ;;  %v11679_v35 = vld [vmem:[%s16572_s1 + $0xd94] ss:$24 sps:$4 sm:$0xff]   ;;  %4608 = vmatmul.mubr.bf16.gmra.mrb[240].mxu1 %v11764_v55 }
 0x575   :  { %v5867_v39 = vpop.f32.mrb[28].mxu0  ;;  %v16899_v55 = vld [vmem:[#allocation44_spill] sm:$0xff] }
 0x576   :  { %v14709_v58 = vadd.f32 %v5867_v39, %v16895_v13  ;;  %v5869_v56 = vpop.f32.mrb[29].mxu0  ;;  %v16897_v13 = vld [vmem:[#allocation43_spill] sm:$0xff] }
 0x577   :  { %v5870_v62 = vpop.f32.mrb[30].mxu0 }
 0x578   :  { %16896 = vst [vmem:[#allocation37_spill] sm:$0xff] %v14709_v58  ;;  %v14723_v56 = vadd.f32 %v5870_v62, %v16897_v13  ;;  %v5872_v59 = vpop.f32.mrb[31].mxu0  ;;  %8983 = vperm.xlu1 %10905, %v8929_v16   ;;  %v11677_v62 = vld [vmem:[%s16572_s1 + $0xd90] ss:$24 sps:$4 sm:$0xff]   ;;  %v11685_v16 = vld [vmem:[%s16572_s1 + $0xdc4] ss:$24 sps:$4 sm:$0xff]  }
 0x579   :  { %v8933_v59 = vld [vmem:[%s16575_s6 + $0x68] sm:$0xff] }
 0x57a   :  { %16898 = vst [vmem:[#allocation38_spill] sm:$0xff] %v14723_v56  ;;  %6082 = vmatmul.mubr.bf16.gmra.mrb[176].mxu0 %v11671_v28  ;;  %v8935_v56 = vld [vmem:[%s16575_s6 + $0x78] sm:$0xff] }
 0x57b   :  { %6089 = vmatprep.mubr.bf16.mxu0 %v11679_v35  ;;  %v11772_v35 = vld [vmem:[%s16572_s1 + $0x1084] ss:$24 sps:$4 sm:$0xff]  }
 0x57c   :  { %8993 = vperm.xlu1 %10905, %v8931_v5   ;;  %4615 = vmatprep.mubr.bf16.mxu1 %v11772_v35 }
 0x57d   :  { %v5875_v26 = vpop.f32.mrb[32].mxu0 }
 0x57e   :  { %v14731_v46 = vadd.f32 %v5875_v26, %v16899_v55  ;;  %v5877_v39 = vpop.f32.mrb[33].mxu0  ;;  %v11770_v55 = vld [vmem:[%s16572_s1 + $0x1080] ss:$24 sps:$4 sm:$0xff]  }
 0x57f   :  { %v5878_v28 = vpop.f32.mrb[34].mxu0  ;;  %v16901_v39 = vld [vmem:[#allocation45_spill] sm:$0xff]  ;;  %4616 = vmatmul.mubr.bf16.gmra.mrb[244].mxu1 %v11770_v55  ;;  %v11691_v55 = vld [vmem:[%s16572_s1 + $0xdf4] ss:$24 sps:$4 sm:$0xff]  }
 0x580   :  { %16900 = vst [vmem:[#allocation39_spill] sm:$0xff] %v14731_v46  ;;  %v14748_v13 = vadd.f32 %v5878_v28, %v16901_v39  ;;  %v5880_v5 = vpop.f32.mrb[35].mxu0  ;;  %9003 = vperm.xlu1 %10905, %v8933_v59   ;;  %v16903_v28 = vld [vmem:[#allocation46_spill] sm:$0xff]  ;;  %v11713_v46 = vld [vmem:[%s16572_s1 + $0xeb0] ss:$24 sps:$4 sm:$0xff]  }
 0x581   :  { %v11683_v59 = vld [vmem:[%s16572_s1 + $0xdc0] ss:$24 sps:$4 sm:$0xff]  }
 0x582   :  { %16902 = vst [vmem:[#allocation40_spill] sm:$0xff] %v14748_v13  ;;  %6090 = vmatmul.mubr.bf16.gmra.mrb[180].mxu0 %v11677_v62  ;;  %v9239_v62 = vld [vmem:[%s16576_s8 + $0x8] sm:$0xff] }
 0x583   :  { %6097 = vmatprep.mubr.bf16.mxu0 %v11685_v16 }
 0x584   :  { %9013 = vperm.xlu1 %10905, %v8935_v56   ;;  %v11778_v56 = vld [vmem:[%s16572_s1 + $0x10b4] ss:$24 sps:$4 sm:$0xff]  }
 0x585   :  { %v5883_v26 = vpop.f32.mrb[36].mxu0  ;;  %4623 = vmatprep.mubr.bf16.mxu1 %v11778_v56 }
 0x586   :  { %v14759_v39 = vadd.f32 %v5883_v26, %v16903_v28  ;;  %v5885_v5 = vpop.f32.mrb[37].mxu0  ;;  %v16905_v26 = vld [vmem:[#allocation47_spill] sm:$0xff] }
 0x587   :  { %v5886_v35 = vpop.f32.mrb[38].mxu0  ;;  %4624 = vmatmul.mubr.bf16.gmra.mrb[248].mxu1 %v11776_v7  ;;  %v11784_v7 = vld [vmem:[%s16572_s1 + $0x10e4] ss:$24 sps:$4 sm:$0xff]  }
 0x588   :  { %16904 = vst [vmem:[#allocation41_spill] sm:$0xff] %v14759_v39  ;;  %v14776_v28 = vadd.f32 %v5886_v35, %v16905_v26  ;;  %v5888_v5 = vpop.f32.mrb[39].mxu0  ;;  %9249 = vperm.xlu1 %10905, %v9239_v62   ;;  %v16907_v35 = vld [vmem:[#allocation48_spill] sm:$0xff]  ;;  %4631 = vmatprep.mubr.bf16.mxu1 %v11784_v7 }
 0x589   :  { %v11689_v62 = vld [vmem:[%s16572_s1 + $0xdf0] ss:$24 sps:$4 sm:$0xff]   ;;  %v11703_v7 = vld [vmem:[%s16572_s1 + $0xe54] ss:$24 sps:$4 sm:$0xff]  }
 0x58a   :  { %16906 = vst [vmem:[#allocation42_spill] sm:$0xff] %v14776_v28  ;;  %6098 = vmatmul.mubr.bf16.gmra.mrb[184].mxu0 %v11683_v59  ;;  %v11697_v59 = vld [vmem:[%s16572_s1 + $0xe24] ss:$24 sps:$4 sm:$0xff]  }
 0x58b   :  { %6105 = vmatprep.mubr.bf16.mxu0 %v11691_v55  ;;  %v16909_v55 = vld [vmem:[#allocation49_spill] sm:$0xff] }
 0x58c   :  { %9259 = vperm.xlu1 %10905, %v9241_v12  }
 0x58d   :  { %v5891_v16 = vpop.f32.mrb[40].mxu0 }
 0x58e   :  { %v14787_v26 = vadd.f32 %v5891_v16, %v16907_v35  ;;  %v5893_v5 = vpop.f32.mrb[41].mxu0 }
 0x58f   :  { %v5894_v56 = vpop.f32.mrb[42].mxu0  ;;  %v11782_v5 = vld [vmem:[%s16572_s1 + $0x10e0] ss:$24 sps:$4 sm:$0xff]  }
 0x590   :  { %16908 = vst [vmem:[#allocation43_spill] sm:$0xff] %v14787_v26  ;;  %v14801_v16 = vadd.f32 %v5894_v56, %v16909_v55  ;;  %v5896_v35 = vpop.f32.mrb[43].mxu0  ;;  %4632 = vmatmul.mubr.bf16.gmra.mrb[252].mxu1 %v11782_v5  ;;  %v11695_v56 = vld [vmem:[%s16572_s1 + $0xe20] ss:$24 sps:$4 sm:$0xff]  }
 0x591   :  { %v16912_v35 = vld [vmem:[#allocation51_spill] sm:$0xff] }
 0x592   :  { %16910 = vst [vmem:[#allocation44_spill] sm:$0xff] %v14801_v16  ;;  %6106 = vmatmul.mubr.bf16.gmra.mrb[188].mxu0 %v11689_v62  ;;  %v11790_v62 = vld [vmem:[%s16572_s1 + $0x1114] ss:$24 sps:$4 sm:$0xff]  }
 0x593   :  { %6113 = vmatprep.mubr.bf16.mxu0 %v11697_v59  ;;  %4639 = vmatprep.mubr.bf16.mxu1 %v11790_v62  ;;  %v16914_v62 = vld [vmem:[#allocation53_spill] sm:$0xff] }
 0x595   :  { %v5899_v28 = vpop.f32.mrb[44].mxu0 }
 0x596   :  { %v14809_v39 = vadd.f32 %v5899_v28, %v16911_v60  ;;  %v5901_v12 = vpop.f32.mrb[45].mxu0  ;;  %v11788_v60 = vld [vmem:[%s16572_s1 + $0x1110] ss:$24 sps:$4 sm:$0xff]  }
 0x597   :  { %v5902_v55 = vpop.f32.mrb[46].mxu0  ;;  %v16913_v12 = vld [vmem:[#allocation52_spill] sm:$0xff] }
 0x598   :  { %v14821_v59 = vadd.f32 %v5902_v55, %v16912_v35  ;;  %v5904_v5 = vpop.f32.mrb[47].mxu0  ;;  %4640 = vmatmul.mubr.bf16.gmra.mrb[148].mxu1 %v11788_v60  ;;  %v11709_v35 = vld [vmem:[%s16572_s1 + $0xe84] ss:$24 sps:$4 sm:$0xff]  }
 0x59a   :  { %6114 = vmatmul.mubr.bf16.gmra.mrb[192].mxu0 %v11695_v56  ;;  %v11796_v56 = vld [vmem:[%s16572_s1 + $0x1144] ss:$24 sps:$4 sm:$0xff]  }
 0x59b   :  { %6121 = vmatprep.mubr.bf16.mxu0 %v11703_v7  ;;  %4647 = vmatprep.mubr.bf16.mxu1 %v11796_v56  ;;  %v16916_v56 = vld [vmem:[#allocation55_spill] sm:$0xff] }
 0x59d   :  { %v5907_v28 = vpop.f32.mrb[48].mxu0 }
 0x59e   :  { %v14827_v13 = vadd.f32 %v5907_v28, %v16913_v12  ;;  %v5909_v16 = vpop.f32.mrb[49].mxu0  ;;  %v16915_v28 = vld [vmem:[#allocation54_spill] sm:$0xff] }
 0x59f   :  { %v5910_v55 = vpop.f32.mrb[50].mxu0  ;;  %v11794_v16 = vld [vmem:[%s16572_s1 + $0x1140] ss:$24 sps:$4 sm:$0xff]  }
 0x5a0   :  { %v14839_v7 = vadd.f32 %v5910_v55, %v16914_v62  ;;  %v5912_v5 = vpop.f32.mrb[51].mxu0  ;;  %4648 = vmatmul.mubr.bf16.gmra.mrb[152].mxu1 %v11794_v16  ;;  %v11715_v62 = vld [vmem:[%s16572_s1 + $0xeb4] ss:$24 sps:$4 sm:$0xff]  }
 0x5a2   :  { %6122 = vmatmul.mubr.bf16.gmra.mrb[196].mxu0 %v11701_v40  ;;  %v11802_v40 = vld [vmem:[%s16572_s1 + $0x1174] ss:$24 sps:$4 sm:$0xff]  }
 0x5a3   :  { %6129 = vmatprep.mubr.bf16.mxu0 %v11709_v35  ;;  %4655 = vmatprep.mubr.bf16.mxu1 %v11802_v40  ;;  %v16918_v40 = vld [vmem:[#allocation57_spill] sm:$0xff] }
 0x5a5   :  { %v5915_v60 = vpop.f32.mrb[52].mxu0 }
 0x5a6   :  { %v14845_v12 = vadd.f32 %v5915_v60, %v16915_v28  ;;  %v5917_v26 = vpop.f32.mrb[53].mxu0  ;;  %v16917_v60 = vld [vmem:[#allocation56_spill] sm:$0xff] }
 0x5a7   :  { %v5918_v55 = vpop.f32.mrb[54].mxu0  ;;  %v11800_v26 = vld [vmem:[%s16572_s1 + $0x1170] ss:$24 sps:$4 sm:$0xff]  }
 0x5a8   :  { %v14857_v35 = vadd.f32 %v5918_v55, %v16916_v56  ;;  %v5920_v5 = vpop.f32.mrb[55].mxu0  ;;  %4656 = vmatmul.mubr.bf16.gmra.mrb[156].mxu1 %v11800_v26  ;;  %v11721_v56 = vld [vmem:[%s16572_s1 + $0xee4] ss:$24 sps:$4 sm:$0xff]  }
 0x5aa   :  { %6130 = vmatmul.mubr.bf16.gmra.mrb[200].mxu0 %v11707_v8  ;;  %v11808_v8 = vld [vmem:[%s16572_s1 + $0x11a4] ss:$24 sps:$4 sm:$0xff]  }
 0x5ab   :  { %6137 = vmatprep.mubr.bf16.mxu0 %v11715_v62  ;;  %4663 = vmatprep.mubr.bf16.mxu1 %v11808_v8  ;;  %v16920_v8 = vld [vmem:[#allocation59_spill] sm:$0xff] }
 0x5ad   :  { %v5923_v16 = vpop.f32.mrb[56].mxu0 }
 0x5ae   :  { %v14863_v28 = vadd.f32 %v5923_v16, %v16917_v60  ;;  %v5925_v52 = vpop.f32.mrb[57].mxu0  ;;  %v16919_v16 = vld [vmem:[#allocation58_spill] sm:$0xff] }
 0x5af   :  { %v5926_v55 = vpop.f32.mrb[58].mxu0  ;;  %v11806_v52 = vld [vmem:[%s16572_s1 + $0x11a0] ss:$24 sps:$4 sm:$0xff]  }
 0x5b0   :  { %v14875_v62 = vadd.f32 %v5926_v55, %v16918_v40  ;;  %v5928_v5 = vpop.f32.mrb[59].mxu0  ;;  %4664 = vmatmul.mubr.bf16.gmra.mrb[160].mxu1 %v11806_v52  ;;  %v11727_v40 = vld [vmem:[%s16572_s1 + $0xf14] ss:$24 sps:$4 sm:$0xff]  }
 0x5b2   :  { %6138 = vmatmul.mubr.bf16.gmra.mrb[204].mxu0 %v11713_v46  ;;  %v11814_v46 = vld [vmem:[%s16572_s1 + $0x11d4] ss:$24 sps:$4 sm:$0xff]  }
 0x5b3   :  { %6145 = vmatprep.mubr.bf16.mxu0 %v11721_v56  ;;  %4671 = vmatprep.mubr.bf16.mxu1 %v11814_v46 }
 0x5b5   :  { %v5931_v26 = vpop.f32.mrb[60].mxu0 }
 0x5b6   :  { %v14881_v60 = vadd.f32 %v5931_v26, %v16919_v16  ;;  %v5933_v30 = vpop.f32.mrb[61].mxu0 }
 0x5b7   :  { %v5934_v55 = vpop.f32.mrb[62].mxu0  ;;  %v11812_v30 = vld [vmem:[%s16572_s1 + $0x11d0] ss:$24 sps:$4 sm:$0xff]   ;;  %v14898_v52 = vpop.f32.mrb[168].mxu1 }
 0x5b8   :  { %v14893_v56 = vadd.f32 %v5934_v55, %v16920_v8  ;;  %v5936_v5 = vpop.f32.mrb[63].mxu0  ;;  %4672 = vmatmul.mubr.bf16.gmra.mrb[164].mxu1 %v11812_v30  ;;  %v4467_v26 = vpop.f32.mrb[169].mxu1  ;;  %v11725_v8 = vld [vmem:[%s16572_s1 + $0xf10] ss:$24 sps:$4 sm:$0xff]  }
 0x5b9   :  { %v14900_v16 = vpop.f32.mrb[170].mxu1 }
 0x5ba   :  { %6146 = vmatmul.mubr.bf16.gmra.mrb[208].mxu0 %v11719_v36  ;;  %v4470_v5 = vpop.f32.mrb[171].mxu1  ;;  %v11733_v36 = vld [vmem:[%s16572_s1 + $0xf44] ss:$24 sps:$4 sm:$0xff]  }
 0x5bb   :  { %6153 = vmatprep.mubr.bf16.mxu0 %v11727_v40 }
 0x5bd   :  { %v5939_v58 = vpop.f32.mrb[64].mxu0 }
 0x5be   :  { %v14903_v1 = vadd.f32 %v5939_v58, %v16921_v14  ;;  %v5941_v55 = vpop.f32.mrb[65].mxu0 }
 0x5bf   :  { %v5942_v43 = vpop.f32.mrb[66].mxu0  ;;  %v14914_v30 = vpop.f32.mrb[172].mxu1  ;;  %v16922_v55 = vld [vmem:[#allocation61_spill] sm:$0xff] }
 0x5c0   :  { %v14912_v40 = vadd.f32 %v5942_v43, %v13411_v19  ;;  %v5944_v46 = vpop.f32.mrb[67].mxu0  ;;  %v4475_v14 = vpop.f32.mrb[173].mxu1  ;;  %v11739_v43 = vld [vmem:[%s16572_s1 + $0xf74] ss:$24 sps:$4 sm:$0xff]  }
 0x5c1   :  { %v14916_v58 = vpop.f32.mrb[174].mxu1 }
 0x5c2   :  { %6154 = vmatmul.mubr.bf16.gmra.mrb[212].mxu0 %v11725_v8  ;;  %v4478_v48 = vpop.f32.mrb[175].mxu1  ;;  %v16923_v8 = vld [vmem:[#allocation62_spill] sm:$0xff] }
 0x5c3   :  { %6161 = vmatprep.mubr.bf16.mxu0 %v11733_v36 }
 0x5c5   :  { %v5947_v26 = vpop.f32.mrb[68].mxu0 }
 0x5c6   :  { %v14919_v6 = vadd.f32 %v5947_v26, %v16922_v55  ;;  %v5949_v5 = vpop.f32.mrb[69].mxu0 }
 0x5c7   :  { %v5950_v19 = vpop.f32.mrb[70].mxu0  ;;  %v14930_v14 = vpop.f32.mrb[176].mxu1 }
 0x5c8   :  { %v14928_v36 = vadd.f32 %v5950_v19, %v16923_v8  ;;  %v5952_v46 = vpop.f32.mrb[71].mxu0  ;;  %v4483_v26 = vpop.f32.mrb[177].mxu1  ;;  %v16927_v8 = vld [vmem:[#allocation64_spill] sm:$0xff] }
 0x5c9   :  { %v14932_v55 = vpop.f32.mrb[178].mxu1 }
 0x5ca   :  { %16924 = vst [vmem:[#allocation45_spill] sm:$0xff] %v14928_v36  ;;  %6162 = vmatmul.mubr.bf16.gmra.mrb[216].mxu0 %v11731_v34  ;;  %v4486_v15 = vpop.f32.mrb[179].mxu1  ;;  %v11745_v34 = vld [vmem:[%s16572_s1 + $0xfa4] ss:$24 sps:$4 sm:$0xff]   ;;  %v11785_v36 = vld [vmem:[%s16572_s1 + $0x10f0] ss:$24 sps:$4 sm:$0xff]  }
 0x5cb   :  { %6169 = vmatprep.mubr.bf16.mxu0 %v11739_v43 }
 0x5cd   :  { %v5955_v5 = vpop.f32.mrb[72].mxu0 }
 0x5ce   :  { %v14935_v23 = vadd.f32 %v5955_v5, %v16925_v42  ;;  %v5957_v48 = vpop.f32.mrb[73].mxu0 }
 0x5cf   :  { %v5958_v19 = vpop.f32.mrb[74].mxu0  ;;  %v14946_v26 = vpop.f32.mrb[180].mxu1 }
 0x5d0   :  { %16926 = vst [vmem:[#allocation46_spill] sm:$0xff] %v14935_v23  ;;  %v14944_v43 = vadd.f32 %v5958_v19, %v16927_v8  ;;  %v5960_v46 = vpop.f32.mrb[75].mxu0  ;;  %v4491_v42 = vpop.f32.mrb[181].mxu1  ;;  %v16931_v8 = vld [vmem:[#allocation66_spill] sm:$0xff] }
 0x5d1   :  { %v14948_v5 = vpop.f32.mrb[182].mxu1 }
 0x5d2   :  { %16928 = vst [vmem:[#allocation47_spill] sm:$0xff] %v14944_v43  ;;  %6170 = vmatmul.mubr.bf16.gmra.mrb[220].mxu0 %v11737_v32  ;;  %v4494_v11 = vpop.f32.mrb[183].mxu1  ;;  %v11751_v32 = vld [vmem:[%s16572_s1 + $0xfd4] ss:$24 sps:$4 sm:$0xff]  }
 0x5d3   :  { %6177 = vmatprep.mubr.bf16.mxu0 %v11745_v34 }
 0x5d5   :  { %v5963_v48 = vpop.f32.mrb[76].mxu0 }
 0x5d6   :  { %v14951_v31 = vadd.f32 %v5963_v48, %v16929_v20  ;;  %v5965_v15 = vpop.f32.mrb[77].mxu0 }
 0x5d7   :  { %v5966_v19 = vpop.f32.mrb[78].mxu0  ;;  %v14962_v42 = vpop.f32.mrb[184].mxu1 }
 0x5d8   :  { %16930 = vst [vmem:[#allocation48_spill] sm:$0xff] %v14951_v31  ;;  %v14960_v34 = vadd.f32 %v5966_v19, %v16931_v8  ;;  %v5968_v46 = vpop.f32.mrb[79].mxu0  ;;  %v4499_v20 = vpop.f32.mrb[185].mxu1  ;;  %v16935_v8 = vld [vmem:[#allocation68_spill] sm:$0xff] }
 0x5d9   :  { %v14964_v48 = vpop.f32.mrb[186].mxu1  ;;  %v11773_v31 = vld [vmem:[%s16572_s1 + $0x1090] ss:$24 sps:$4 sm:$0xff]  }
 0x5da   :  { %16932 = vst [vmem:[#allocation49_spill] sm:$0xff] %v14960_v34  ;;  %6178 = vmatmul.mubr.bf16.gmra.mrb[224].mxu0 %v11743_v9  ;;  %v4502_v61 = vpop.f32.mrb[187].mxu1  ;;  %v11757_v9 = vld [vmem:[%s16572_s1 + $0x1004] ss:$24 sps:$4 sm:$0xff]  }
 0x5db   :  { %6185 = vmatprep.mubr.bf16.mxu0 %v11751_v32 }
 0x5dd   :  { %v5971_v15 = vpop.f32.mrb[80].mxu0 }
 0x5de   :  { %v14967_v11 = vadd.f32 %v5971_v15, %v16933_v21  ;;  %v5973_v49 = vpop.f32.mrb[81].mxu0 }
 0x5df   :  { %v5974_v19 = vpop.f32.mrb[82].mxu0  ;;  %v14978_v20 = vpop.f32.mrb[188].mxu1 }
 0x5e0   :  { %16934 = vst [vmem:[#allocation50_spill] sm:$0xff] %v14967_v11  ;;  %v14976_v32 = vadd.f32 %v5974_v19, %v16935_v8  ;;  %v5976_v46 = vpop.f32.mrb[83].mxu0  ;;  %v4507_v61 = vpop.f32.mrb[189].mxu1  ;;  %v16939_v8 = vld [vmem:[#allocation70_spill] sm:$0xff]  ;;  %v11761_v11 = vld [vmem:[%s16572_s1 + $0x1030] ss:$24 sps:$4 sm:$0xff]  }
 0x5e1   :  { %v14980_v21 = vpop.f32.mrb[190].mxu1 }
 0x5e2   :  { %16936 = vst [vmem:[#allocation51_spill] sm:$0xff] %v14976_v32  ;;  %6186 = vmatmul.mubr.bf16.gmra.mrb[228].mxu0 %v11749_v50  ;;  %v4510_v15 = vpop.f32.mrb[191].mxu1  ;;  %v11763_v50 = vld [vmem:[%s16572_s1 + $0x1034] ss:$24 sps:$4 sm:$0xff]  }
 0x5e3   :  { %6193 = vmatprep.mubr.bf16.mxu0 %v11757_v9 }
 0x5e5   :  { %v5979_v49 = vpop.f32.mrb[84].mxu0 }
 0x5e6   :  { %v14983_v4 = vadd.f32 %v5979_v49, %v16937_v37  ;;  %v5981_v27 = vpop.f32.mrb[85].mxu0 }
 0x5e7   :  { %v5982_v19 = vpop.f32.mrb[86].mxu0  ;;  %v14994_v61 = vpop.f32.mrb[192].mxu1 }
 0x5e8   :  { %16938 = vst [vmem:[#allocation52_spill] sm:$0xff] %v14983_v4  ;;  %v14992_v9 = vadd.f32 %v5982_v19, %v16939_v8  ;;  %v5984_v46 = vpop.f32.mrb[87].mxu0  ;;  %v4515_v37 = vpop.f32.mrb[193].mxu1  ;;  %v16941_v4 = vld [vmem:[#allocation71_spill] sm:$0xff]  ;;  %v16943_v8 = vld [vmem:[#allocation72_spill] sm:$0xff] }
 0x5e9   :  { %v14996_v49 = vpop.f32.mrb[194].mxu1 }
 0x5ea   :  { %16940 = vst [vmem:[#allocation53_spill] sm:$0xff] %v14992_v9  ;;  %6194 = vmatmul.mubr.bf16.gmra.mrb[232].mxu0 %v11755_v44  ;;  %v4518_v15 = vpop.f32.mrb[195].mxu1  ;;  %v11769_v44 = vld [vmem:[%s16572_s1 + $0x1064] ss:$24 sps:$4 sm:$0xff]  }
 0x5eb   :  { %6201 = vmatprep.mubr.bf16.mxu0 %v11763_v50 }
 0x5ed   :  { %v5987_v27 = vpop.f32.mrb[88].mxu0 }
 0x5ee   :  { %v14999_v32 = vadd.f32 %v5987_v27, %v16941_v4  ;;  %v5989_v18 = vpop.f32.mrb[89].mxu0 }
 0x5ef   :  { %v5990_v19 = vpop.f32.mrb[90].mxu0  ;;  %v15010_v37 = vpop.f32.mrb[196].mxu1 }
 0x5f0   :  { %16942 = vst [vmem:[#allocation54_spill] sm:$0xff] %v14999_v32  ;;  %v15008_v50 = vadd.f32 %v5990_v19, %v16943_v8  ;;  %v5992_v46 = vpop.f32.mrb[91].mxu0  ;;  %v4523_v4 = vpop.f32.mrb[197].mxu1  ;;  %v16945_v32 = vld [vmem:[#allocation73_spill] sm:$0xff]  ;;  %v16947_v8 = vld [vmem:[#allocation74_spill] sm:$0xff] }
 0x5f1   :  { %v15012_v27 = vpop.f32.mrb[198].mxu1 }
 0x5f2   :  { %16944 = vst [vmem:[#allocation55_spill] sm:$0xff] %v15008_v50  ;;  %6202 = vmatmul.mubr.bf16.gmra.mrb[236].mxu0 %v11761_v11  ;;  %v4526_v15 = vpop.f32.mrb[199].mxu1  ;;  %v11775_v11 = vld [vmem:[%s16572_s1 + $0x1094] ss:$24 sps:$4 sm:$0xff]  }
 0x5f3   :  { %6209 = vmatprep.mubr.bf16.mxu0 %v11769_v44 }
 0x5f5   :  { %v5995_v18 = vpop.f32.mrb[92].mxu0 }
 0x5f6   :  { %v15015_v9 = vadd.f32 %v5995_v18, %v16945_v32  ;;  %v5997_v34 = vpop.f32.mrb[93].mxu0 }
 0x5f7   :  { %v5998_v19 = vpop.f32.mrb[94].mxu0  ;;  %v15026_v4 = vpop.f32.mrb[200].mxu1 }
 0x5f8   :  { %16946 = vst [vmem:[#allocation56_spill] sm:$0xff] %v15015_v9  ;;  %v15024_v44 = vadd.f32 %v5998_v19, %v16947_v8  ;;  %v6000_v46 = vpop.f32.mrb[95].mxu0  ;;  %v4531_v32 = vpop.f32.mrb[201].mxu1  ;;  %v16949_v9 = vld [vmem:[#allocation75_spill] sm:$0xff]  ;;  %v16951_v8 = vld [vmem:[#allocation76_spill] sm:$0xff] }
 0x5f9   :  { %v15028_v18 = vpop.f32.mrb[202].mxu1 }
 0x5fa   :  { %16948 = vst [vmem:[#allocation57_spill] sm:$0xff] %v15024_v44  ;;  %6210 = vmatmul.mubr.bf16.gmra.mrb[240].mxu0 %v11767_v38  ;;  %v4534_v15 = vpop.f32.mrb[203].mxu1  ;;  %v11781_v38 = vld [vmem:[%s16572_s1 + $0x10c4] ss:$24 sps:$4 sm:$0xff]  }
 0x5fb   :  { %6217 = vmatprep.mubr.bf16.mxu0 %v11775_v11 }
 0x5fd   :  { %v6003_v34 = vpop.f32.mrb[96].mxu0 }
 0x5fe   :  { %v15031_v50 = vadd.f32 %v6003_v34, %v16949_v9  ;;  %v6005_v10 = vpop.f32.mrb[97].mxu0 }
 0x5ff   :  { %v6006_v19 = vpop.f32.mrb[98].mxu0  ;;  %v15042_v32 = vpop.f32.mrb[204].mxu1 }
 0x600   :  { %16950 = vst [vmem:[#allocation58_spill] sm:$0xff] %v15031_v50  ;;  %v15040_v11 = vadd.f32 %v6006_v19, %v16951_v8  ;;  %v6008_v46 = vpop.f32.mrb[99].mxu0  ;;  %v4539_v9 = vpop.f32.mrb[205].mxu1  ;;  %v16953_v50 = vld [vmem:[#allocation77_spill] sm:$0xff]  ;;  %v16955_v8 = vld [vmem:[#allocation78_spill] sm:$0xff] }
 0x601   :  { %v15044_v34 = vpop.f32.mrb[206].mxu1 }
 0x602   :  { %16952 = vst [vmem:[#allocation59_spill] sm:$0xff] %v15040_v11  ;;  %6218 = vmatmul.mubr.bf16.gmra.mrb[244].mxu0 %v11773_v31  ;;  %v4542_v15 = vpop.f32.mrb[207].mxu1  ;;  %v11787_v31 = vld [vmem:[%s16572_s1 + $0x10f4] ss:$24 sps:$4 sm:$0xff]  }
 0x603   :  { %6225 = vmatprep.mubr.bf16.mxu0 %v11781_v38 }
 0x605   :  { %v6011_v10 = vpop.f32.mrb[100].mxu0 }
 0x606   :  { %v15047_v44 = vadd.f32 %v6011_v10, %v16953_v50  ;;  %v6013_v43 = vpop.f32.mrb[101].mxu0 }
 0x607   :  { %v6014_v19 = vpop.f32.mrb[102].mxu0  ;;  %v15058_v9 = vpop.f32.mrb[208].mxu1 }
 0x608   :  { %16954 = vst [vmem:[#allocation60_spill] sm:$0xff] %v15047_v44  ;;  %v15056_v38 = vadd.f32 %v6014_v19, %v16955_v8  ;;  %v6016_v46 = vpop.f32.mrb[103].mxu0  ;;  %16957 = vst [vmem:[#allocation62_spill] sm:$0xff] %v15058_v9  ;;  %v4547_v50 = vpop.f32.mrb[209].mxu1  ;;  %v16959_v44 = vld [vmem:[#allocation79_spill] sm:$0xff]  ;;  %v16961_v8 = vld [vmem:[#allocation80_spill] sm:$0xff] }
 0x609   :  { %v15060_v10 = vpop.f32.mrb[210].mxu1  ;;  %v11791_v9 = vld [vmem:[%s16572_s1 + $0x1120] ss:$24 sps:$4 sm:$0xff]  }
 0x60a   :  { %16956 = vst [vmem:[#allocation61_spill] sm:$0xff] %v15056_v38  ;;  %6226 = vmatmul.mubr.bf16.gmra.mrb[248].mxu0 %v11779_v2  ;;  %16958 = vst [vmem:[#allocation63_spill] sm:$0xff] %v15060_v10  ;;  %v4550_v15 = vpop.f32.mrb[211].mxu1  ;;  %v11793_v2 = vld [vmem:[%s16572_s1 + $0x1124] ss:$24 sps:$4 sm:$0xff]  }
 0x60b   :  { %6233 = vmatprep.mubr.bf16.mxu0 %v11787_v31 }
 0x60d   :  { %v6019_v43 = vpop.f32.mrb[104].mxu0 }
 0x60e   :  { %v15063_v11 = vadd.f32 %v6019_v43, %v16959_v44  ;;  %v6021_v23 = vpop.f32.mrb[105].mxu0 }
 0x60f   :  { %v6022_v19 = vpop.f32.mrb[106].mxu0  ;;  %v15074_v50 = vpop.f32.mrb[212].mxu1 }
 0x610   :  { %16960 = vst [vmem:[#allocation64_spill] sm:$0xff] %v15063_v11  ;;  %v15072_v31 = vadd.f32 %v6022_v19, %v16961_v8  ;;  %v6024_v46 = vpop.f32.mrb[107].mxu0  ;;  %16963 = vst [vmem:[#allocation66_spill] sm:$0xff] %v15074_v50  ;;  %v4555_v44 = vpop.f32.mrb[213].mxu1  ;;  %v16965_v11 = vld [vmem:[#allocation81_spill] sm:$0xff]  ;;  %v16967_v8 = vld [vmem:[#allocation82_spill] sm:$0xff] }
 0x611   :  { %v15076_v43 = vpop.f32.mrb[214].mxu1  ;;  %v11797_v50 = vld [vmem:[%s16572_s1 + $0x1150] ss:$24 sps:$4 sm:$0xff]  }
 0x612   :  { %16962 = vst [vmem:[#allocation65_spill] sm:$0xff] %v15072_v31  ;;  %6234 = vmatmul.mubr.bf16.gmra.mrb[252].mxu0 %v11785_v36  ;;  %16964 = vst [vmem:[#allocation67_spill] sm:$0xff] %v15076_v43  ;;  %v4558_v15 = vpop.f32.mrb[215].mxu1  ;;  %v11799_v36 = vld [vmem:[%s16572_s1 + $0x1154] ss:$24 sps:$4 sm:$0xff]  }
 0x613   :  { %6241 = vmatprep.mubr.bf16.mxu0 %v11793_v2 }
 0x615   :  { %v6027_v23 = vpop.f32.mrb[108].mxu0 }
 0x616   :  { %v15079_v38 = vadd.f32 %v6027_v23, %v16965_v11  ;;  %v6029_v10 = vpop.f32.mrb[109].mxu0 }
 0x617   :  { %v6030_v19 = vpop.f32.mrb[110].mxu0  ;;  %v15090_v44 = vpop.f32.mrb[216].mxu1 }
 0x618   :  { %16966 = vst [vmem:[#allocation68_spill] sm:$0xff] %v15079_v38  ;;  %v15088_v2 = vadd.f32 %v6030_v19, %v16967_v8  ;;  %v6032_v46 = vpop.f32.mrb[111].mxu0  ;;  %16969 = vst [vmem:[#allocation70_spill] sm:$0xff] %v15090_v44  ;;  %v4563_v11 = vpop.f32.mrb[217].mxu1  ;;  %v16971_v38 = vld [vmem:[#allocation83_spill] sm:$0xff]  ;;  %v16973_v8 = vld [vmem:[#allocation84_spill] sm:$0xff] }
 0x619   :  { %v15092_v23 = vpop.f32.mrb[218].mxu1  ;;  %v11803_v44 = vld [vmem:[%s16572_s1 + $0x1180] ss:$24 sps:$4 sm:$0xff]  }
 0x61a   :  { %16968 = vst [vmem:[#allocation69_spill] sm:$0xff] %v15088_v2  ;;  %6242 = vmatmul.mubr.bf16.gmra.mrb[148].mxu0 %v11791_v9  ;;  %16970 = vst [vmem:[#allocation71_spill] sm:$0xff] %v15092_v23  ;;  %v4566_v15 = vpop.f32.mrb[219].mxu1  ;;  %v11805_v9 = vld [vmem:[%s16572_s1 + $0x1184] ss:$24 sps:$4 sm:$0xff]  }
 0x61b   :  { %6249 = vmatprep.mubr.bf16.mxu0 %v11799_v36 }
 0x61d   :  { %v6035_v10 = vpop.f32.mrb[112].mxu0 }
 0x61e   :  { %v15095_v31 = vadd.f32 %v6035_v10, %v16971_v38  ;;  %v6037_v43 = vpop.f32.mrb[113].mxu0 }
 0x61f   :  { %v6038_v19 = vpop.f32.mrb[114].mxu0  ;;  %v15106_v11 = vpop.f32.mrb[220].mxu1 }
 0x620   :  { %16972 = vst [vmem:[#allocation72_spill] sm:$0xff] %v15095_v31  ;;  %v15104_v36 = vadd.f32 %v6038_v19, %v16973_v8  ;;  %v6040_v46 = vpop.f32.mrb[115].mxu0  ;;  %v4571_v38 = vpop.f32.mrb[221].mxu1  ;;  %v16976_v31 = vld [vmem:[#allocation85_spill] sm:$0xff]  ;;  %v16978_v8 = vld [vmem:[#allocation86_spill] sm:$0xff] }
 0x621   :  { %v15108_v10 = vpop.f32.mrb[222].mxu1 }
 0x622   :  { %16974 = vst [vmem:[#allocation73_spill] sm:$0xff] %v15104_v36  ;;  %6250 = vmatmul.mubr.bf16.gmra.mrb[152].mxu0 %v11797_v50  ;;  %16975 = vst [vmem:[#allocation74_spill] sm:$0xff] %v15108_v10  ;;  %v4574_v15 = vpop.f32.mrb[223].mxu1  ;;  %v11811_v50 = vld [vmem:[%s16572_s1 + $0x11b4] ss:$24 sps:$4 sm:$0xff]  }
 0x623   :  { %6257 = vmatprep.mubr.bf16.mxu0 %v11805_v9  ;;  %v11809_v10 = vld [vmem:[%s16572_s1 + $0x11b0] ss:$24 sps:$4 sm:$0xff]  }
 0x625   :  { %v6043_v43 = vpop.f32.mrb[116].mxu0 }
 0x626   :  { %v15111_v2 = vadd.f32 %v6043_v43, %v16976_v31  ;;  %v6045_v23 = vpop.f32.mrb[117].mxu0 }
 0x627   :  { %v6046_v19 = vpop.f32.mrb[118].mxu0  ;;  %v15122_v38 = vpop.f32.mrb[224].mxu1 }
 0x628   :  { %16977 = vst [vmem:[#allocation75_spill] sm:$0xff] %v15111_v2  ;;  %v15120_v9 = vadd.f32 %v6046_v19, %v16978_v8  ;;  %v6048_v46 = vpop.f32.mrb[119].mxu0  ;;  %v4579_v31 = vpop.f32.mrb[225].mxu1 }
 0x629   :  { %v15124_v43 = vpop.f32.mrb[226].mxu1 }
 0x62a   :  { %16979 = vst [vmem:[#allocation76_spill] sm:$0xff] %v15120_v9  ;;  %6258 = vmatmul.mubr.bf16.gmra.mrb[156].mxu0 %v11803_v44  ;;  %v4582_v15 = vpop.f32.mrb[227].mxu1  ;;  %v11817_v44 = vld [vmem:[%s16572_s1 + $0x11e4] ss:$24 sps:$4 sm:$0xff]   ;;  %v11815_v9 = vld [vmem:[%s16572_s1 + $0x11e0] ss:$24 sps:$4 sm:$0xff]  }
 0x62b   :  { %6265 = vmatprep.mubr.bf16.mxu0 %v11811_v50 }
 0x62d   :  { %v6051_v23 = vpop.f32.mrb[120].mxu0 }
 0x62e   :  { %v15127_v2 = vadd.f32 %v6051_v23, %v13546_v22  ;;  %v6053_v36 = vpop.f32.mrb[121].mxu0 }
 0x62f   :  { %v6054_v19 = vpop.f32.mrb[122].mxu0  ;;  %v15138_v46 = vpop.f32.mrb[228].mxu1 }
 0x630   :  { %16980 = vst [vmem:[#allocation77_spill] sm:$0xff] %v15127_v2  ;;  %v15136_v50 = vadd.f32 %v6054_v19, %v13551_v63  ;;  %v6056_v8 = vpop.f32.mrb[123].mxu0  ;;  %16982 = vst [vmem:[#allocation79_spill] sm:$0xff] %v15138_v46  ;;  %v4587_v22 = vpop.f32.mrb[229].mxu1  ;;  %v16985_v19 = vld [vmem:[#allocation87_spill] sm:$0xff] }
 0x631   :  { %v15140_v31 = vpop.f32.mrb[230].mxu1 }
 0x632   :  { %16981 = vst [vmem:[#allocation78_spill] sm:$0xff] %v15136_v50  ;;  %6266 = vmatmul.mubr.bf16.gmra.mrb[160].mxu0 %v11809_v10  ;;  %16983 = vst [vmem:[#allocation80_spill] sm:$0xff] %v15140_v31  ;;  %v4590_v23 = vpop.f32.mrb[231].mxu1 }
 0x633   :  { %6273 = vmatprep.mubr.bf16.mxu0 %v11817_v44 }
 0x635   :  { %v6059_v36 = vpop.f32.mrb[124].mxu0 }
 0x636   :  { %v15143_v15 = vadd.f32 %v6059_v36, %v13556_v51  ;;  %v6061_v2 = vpop.f32.mrb[125].mxu0 }
 0x637   :  { %v6062_v63 = vpop.f32.mrb[126].mxu0  ;;  %v15151_v44 = vpop.f32.mrb[232].mxu1 }
 0x638   :  { %16984 = vst [vmem:[#allocation81_spill] sm:$0xff] %v15143_v15  ;;  %v15149_v8 = vadd.f32 %v6062_v63, %v16985_v19  ;;  %v6064_v10 = vpop.f32.mrb[127].mxu0  ;;  %v4595_v22 = vpop.f32.mrb[233].mxu1 }
 0x639   :  { %v15153_v50 = vpop.f32.mrb[234].mxu1 }
 0x63a   :  { %16986 = vst [vmem:[#allocation82_spill] sm:$0xff] %v15149_v8  ;;  %6274 = vmatmul.mubr.bf16.gmra.mrb[164].mxu0 %v11815_v9  ;;  %16987 = vst [vmem:[#allocation83_spill] sm:$0xff] %v15153_v50  ;;  %v4598_v31 = vpop.f32.mrb[235].mxu1 }
 0x63d   :  { %v6067_v23 = vpop.f32.mrb[168].mxu0 }
 0x63e   :  { %v15156_v51 = vadd.f32 %v6067_v23, %v14898_v52  ;;  %v6069_v2 = vpop.f32.mrb[169].mxu0 }
 0x63f   :  { %v6070_v36 = vpop.f32.mrb[170].mxu0  ;;  %v15161_v63 = vpop.f32.mrb[236].mxu1 }
 0x640   :  { %16988 = vst [vmem:[#allocation84_spill] sm:$0xff] %v15156_v51  ;;  %v15159_v15 = vadd.f32 %v6070_v36, %v14900_v16  ;;  %v6072_v46 = vpop.f32.mrb[171].mxu0  ;;  %v4603_v19 = vpop.f32.mrb[237].mxu1 }
 0x641   :  { %v15163_v9 = vpop.f32.mrb[238].mxu1 }
 0x642   :  { %16989 = vst [vmem:[#allocation85_spill] sm:$0xff] %v15159_v15  ;;  %v4606_v22 = vpop.f32.mrb[239].mxu1 }
 0x645   :  { %v6075_v10 = vpop.f32.mrb[172].mxu0 }
 0x646   :  { %v15166_v8 = vadd.f32 %v6075_v10, %v14914_v30  ;;  %v6077_v31 = vpop.f32.mrb[173].mxu0 }
 0x647   :  { %v6078_v50 = vpop.f32.mrb[174].mxu0  ;;  %v15171_v2 = vpop.f32.mrb[240].mxu1 }
 0x648   :  { %16990 = vst [vmem:[#allocation86_spill] sm:$0xff] %v15166_v8  ;;  %v15169_v52 = vadd.f32 %v6078_v50, %v14916_v58  ;;  %v6080_v23 = vpop.f32.mrb[175].mxu0  ;;  %16992 = vst [vmem:[#allocation128_spill] sm:$0xff] %v15171_v2  ;;  %v4611_v16 = vpop.f32.mrb[241].mxu1 }
 0x649   :  { %v15173_v46 = vpop.f32.mrb[242].mxu1  ;;  %v6477_v31 = vpop.permute.xlu0 %6476 }
 0x64a   :  { %16991 = vst [vmem:[#allocation87_spill] sm:$0xff] %v15169_v52  ;;  %16993 = vst [vmem:[#allocation129_spill] sm:$0xff] %v15173_v46  ;;  %v4614_v19 = vpop.f32.mrb[243].mxu1 }
 0x64d   :  { %v6083_v36 = vpop.f32.mrb[176].mxu0 }
 0x64e   :  { %v15176_v15 = vadd.f32 %v6083_v36, %v14930_v14  ;;  %v6085_v22 = vpop.f32.mrb[177].mxu0 }
 0x64f   :  { %v6086_v51 = vpop.f32.mrb[178].mxu0 }
 0x650   :  { %16994 = vst [vmem:[#allocation130_spill] sm:$0xff] %v15176_v15  ;;  %v15179_v30 = vadd.f32 %v6086_v51, %v14932_v55  ;;  %v6088_v10 = vpop.f32.mrb[179].mxu0  ;;  %v16997_v55 = vld [vmem:[#allocation3_spill] sm:$0xff]  ;;  %v6482_v15 = vpop.permute.xlu0 %6481 }
 0x651   :  { %v16998_v51 = vmax.f32 %v13726_v54, %v16997_v55 }
 0x652   :  { %16995 = vst [vmem:[#allocation131_spill] sm:$0xff] %v15179_v30  ;;  %v15181_v50 = vpop.f32.mrb[244].mxu1 }
 0x653   :  { %16996 = vst [vmem:[#allocation132_spill] sm:$0xff] %v15181_v50  ;;  %v4619_v52 = vpop.f32.mrb[245].mxu1  ;;  %v6487_v50 = vpop.permute.xlu1 %6486 }
 0x654   :  { %v15184_v46 = vpop.f32.mrb[246].mxu1  ;;  %v17000_v52 = vld [vmem:[#allocation4_spill] sm:$0xff] }
 0x655   :  { %v6091_v58 = vpop.f32.mrb[180].mxu0  ;;  %v4622_v22 = vpop.f32.mrb[247].mxu1 }
 0x656   :  { %v10597_v23 = vadd.f32 %v6091_v58, %v14946_v26  ;;  %v6093_v16 = vpop.f32.mrb[181].mxu0  ;;  %v16999_v58 = vld [vmem:[#allocation88_spill] sm:$0xff] }
 0x657   :  { %v6094_v8 = vpop.f32.mrb[182].mxu0  ;;  %v17001_v16 = vmax.f32 %v16999_v58, %v17000_v52  ;;  %v17002_v58 = vmax.f32 %v13738_v25, %v14081_v17  ;;  %v6492_v52 = vpop.permute.xlu1 %6491 }
 0x658   :  { %v6330_v14 = vmax.f32 %v14809_v39, %v10597_v23  ;;  %v10598_v36 = vadd.f32 %v6094_v8, %v14948_v5  ;;  %v6096_v19 = vpop.f32.mrb[183].mxu0  ;;  %v11820_v39 = vld [vmem:[%s16578_s3 + $0x4] ss:$12 sps:$4 sm:$0xff]  }
 0x659   :  { %7826 = vmatprep.mubr.bf16.mxu1 %v11820_v39  ;;  %v17004_v39 = vld [vmem:[#allocation5_spill] sm:$0xff] }
 0x65a   :  { %v6378_v10 = vmax.f32 %v16998_v51, %v6330_v14  ;;  %v6331_v30 = vmax.f32 %v14821_v59, %v10598_v36  ;;  %v15198_v8 = vpop.f32.mrb[248].mxu1 }
 0x65b   :  { %v4627_v19 = vpop.f32.mrb[249].mxu1 }
 0x65c   :  { %v6714_v26 = vadd.f32 %v6477_v31, %v6378_v10  ;;  %v6379_v2 = vmax.f32 %v17001_v16, %v6331_v30  ;;  %v15201_v31 = vpop.f32.mrb[250].mxu1 }
 0x65d   :  { %v6099_v5 = vpop.f32.mrb[184].mxu0  ;;  %v4630_v10 = vpop.f32.mrb[251].mxu1 }
 0x65e   :  { %v6715_v23 = vadd.f32 %v6482_v15, %v6379_v2  ;;  %v10599_v54 = vadd.f32 %v6099_v5, %v14962_v42  ;;  %v6101_v14 = vpop.f32.mrb[185].mxu0  ;;  %v6762_v59 = vmax.f32 %v6714_v26, 0.0  ;;  %v17003_v26 = vld [vmem:[#allocation89_spill] sm:$0xff]  ;;  %v17007_v10 = vmax.f32 %v13750_v33, %v14115_v3 }
 0x65f   :  { %v6102_v36 = vpop.f32.mrb[186].mxu0  ;;  %v17005_v5 = vmax.f32 %v17003_v26, %v17004_v39  ;;  %v17009_v26 = vld [vmem:[#allocation6_spill] sm:$0xff] }
 0x660   :  { %v6763_v22 = vmax.f32 %v6715_v23, 0.0  ;;  %v6332_v30 = vmax.f32 %v14827_v13, %v10599_v54  ;;  %v10600_v55 = vadd.f32 %v6102_v36, %v14964_v48  ;;  %v6104_v51 = vpop.f32.mrb[187].mxu0  ;;  %v17006_v13 = vmov 0  }
 0x662   :  { %v6380_v15 = vmax.f32 %v17002_v58, %v6332_v30  ;;  %v6333_v42 = vmax.f32 %v14839_v7, %v10600_v55  ;;  %v6810_v2 = vpack.c.bf16 %v6763_v22, %v6762_v59 }
 0x663   :  { %v15213_v48 = vpop.f32.mrb[252].mxu1 }
 0x664   :  { %v6716_v16 = vadd.f32 %v6487_v50, %v6380_v15  ;;  %v6381_v14 = vmax.f32 %v17005_v5, %v6333_v42  ;;  %7795 = vmatpush1.bf16.msra.mxu1 %v6810_v2  ;;  %v4635_v17 = vpop.f32.mrb[253].mxu1  ;;  %v6497_v42 = vpop.permute.xlu0 %6496 }
 0x665   :  { %v6107_v23 = vpop.f32.mrb[188].mxu0  ;;  %7796 = vmatprep.subr.bf16.mxu1 %v17006_v13  ;;  %v15216_v59 = vpop.f32.mrb[254].mxu1 }
 0x666   :  { %v6717_v54 = vadd.f32 %v6492_v52, %v6381_v14  ;;  %v10601_v19 = vadd.f32 %v6107_v23, %v14978_v20  ;;  %v6109_v25 = vpop.f32.mrb[189].mxu0  ;;  %v6764_v36 = vmax.f32 %v6716_v16, 0.0  ;;  %v4638_v51 = vpop.f32.mrb[255].mxu1  ;;  %v17008_v16 = vld [vmem:[#allocation90_spill] sm:$0xff] }
 0x667   :  { %v6110_v7 = vpop.f32.mrb[190].mxu0  ;;  %v6502_v2 = vpop.permute.xlu1 %6501  ;;  %v17010_v39 = vmax.f32 %v17008_v16, %v17009_v26 }
 0x668   :  { %v6765_v50 = vmax.f32 %v6717_v54, 0.0  ;;  %v6334_v22 = vmax.f32 %v14845_v12, %v10601_v19  ;;  %v10602_v30 = vadd.f32 %v6110_v7, %v14980_v21  ;;  %v6112_v55 = vpop.f32.mrb[191].mxu0  ;;  %v6507_v51 = vpop.permute.xlu0 %6506 }
 0x66a   :  { %v6382_v58 = vmax.f32 %v17007_v10, %v6334_v22  ;;  %v6335_v15 = vmax.f32 %v14857_v35, %v10602_v30  ;;  %v6811_v20 = vpack.c.bf16 %v6765_v50, %v6764_v36  ;;  %v17011_v22 = vmax.f32 %v13762_v41, %v14149_v47 }
 0x66b   :  { %v15228_v21 = vpop.f32.mrb[148].mxu1  ;;  %v6512_v10 = vpop.permute.xlu1 %6511 }
 0x66c   :  { %v6718_v52 = vadd.f32 %v6497_v42, %v6382_v58  ;;  %v6383_v5 = vmax.f32 %v17010_v39, %v6335_v15  ;;  %7797 = vmatpush1.bf16.msra.mxu1 %v6811_v20  ;;  %v4643_v23 = vpop.f32.mrb[149].mxu1  ;;  %v17012_v15 = vld [vmem:[#allocation91_spill] sm:$0xff] }
 0x66d   :  { %v6115_v12 = vpop.f32.mrb[192].mxu0  ;;  %7798 = vmatprep.subr.bf16.mxu1 %v17006_v13  ;;  %v15231_v19 = vpop.f32.mrb[150].mxu1  ;;  %v17013_v20 = vld [vmem:[#allocation7_spill] sm:$0xff]  ;;  %v17015_v23 = vmax.f32 %v13774_v45, %v14183_v29 }
 0x66e   :  { %v6719_v14 = vadd.f32 %v6502_v2, %v6383_v5  ;;  %v10603_v33 = vadd.f32 %v6115_v12, %v14994_v61  ;;  %v6117_v3 = vpop.f32.mrb[193].mxu0  ;;  %v6766_v35 = vmax.f32 %v6718_v52, 0.0  ;;  %v4646_v50 = vpop.f32.mrb[151].mxu1  ;;  %v17014_v42 = vmax.f32 %v17012_v15, %v17013_v20 }
 0x66f   :  { %v6118_v54 = vpop.f32.mrb[194].mxu0  ;;  %v17017_v50 = vld [vmem:[#allocation8_spill] sm:$0xff] }
 0x670   :  { %v6767_v25 = vmax.f32 %v6719_v14, 0.0  ;;  %v6336_v17 = vmax.f32 %v14863_v28, %v10603_v33  ;;  %v10604_v36 = vadd.f32 %v6118_v54, %v14996_v49  ;;  %v6120_v7 = vpop.f32.mrb[195].mxu0 }
 0x671   :  { %v17016_v7 = vld [vmem:[#allocation92_spill] sm:$0xff] }
 0x672   :  { %v6384_v30 = vmax.f32 %v17011_v22, %v6336_v17  ;;  %v6337_v55 = vmax.f32 %v14875_v62, %v10604_v36  ;;  %v6812_v61 = vpack.c.bf16 %v6767_v25, %v6766_v35  ;;  %v6517_v25 = vpop.permute.xlu0 %6516  ;;  %v6522_v17 = vpop.permute.xlu1 %6521  ;;  %v17018_v22 = vmax.f32 %v17016_v7, %v17017_v50 }
 0x673   :  { %v15243_v49 = vpop.f32.mrb[152].mxu1  ;;  %v17023_v7 = vmax.f32 %v13798_v57, %v14251_v0  ;;  %v17028_v57 = vld [vmem:[#allocation62_spill] sm:$0xff] }
 0x674   :  { %v6720_v58 = vadd.f32 %v6507_v51, %v6384_v30  ;;  %v6385_v2 = vmax.f32 %v17014_v42, %v6337_v55  ;;  %7799 = vmatpush1.bf16.msra.mxu1 %v6812_v61  ;;  %v4651_v16 = vpop.f32.mrb[153].mxu1 }
 0x675   :  { %v6123_v28 = vpop.f32.mrb[196].mxu0  ;;  %7800 = vmatprep.subr.bf16.mxu1 %v17006_v13  ;;  %v15246_v39 = vpop.f32.mrb[154].mxu1 }
 0x676   :  { %v6721_v52 = vadd.f32 %v6512_v10, %v6385_v2  ;;  %v10605_v41 = vadd.f32 %v6123_v28, %v15010_v37  ;;  %v6125_v47 = vpop.f32.mrb[197].mxu0  ;;  %v6768_v62 = vmax.f32 %v6720_v58, 0.0  ;;  %v4654_v3 = vpop.f32.mrb[155].mxu1  ;;  %v17019_v28 = vmax.f32 %v13786_v53, %v14217_v24 }
 0x677   :  { %v6126_v26 = vpop.f32.mrb[198].mxu0  ;;  %v6527_v47 = vpop.permute.xlu0 %6526 }
 0x678   :  { %v6769_v5 = vmax.f32 %v6721_v52, 0.0  ;;  %v6338_v12 = vmax.f32 %v14881_v60, %v10605_v41  ;;  %v10606_v14 = vadd.f32 %v6126_v26, %v15012_v27  ;;  %v6128_v33 = vpop.f32.mrb[199].mxu0  ;;  %v6532_v16 = vpop.permute.xlu1 %6531  ;;  %v17020_v26 = vld [vmem:[#allocation93_spill] sm:$0xff] }
 0x67a   :  { %v6386_v35 = vmax.f32 %v17015_v23, %v6338_v12  ;;  %v6339_v54 = vmax.f32 %v14893_v56, %v10606_v14  ;;  %v6813_v37 = vpack.c.bf16 %v6769_v5, %v6768_v62  ;;  %v17021_v5 = vld [vmem:[#allocation9_spill] sm:$0xff] }
 0x67b   :  { %v15258_v27 = vpop.f32.mrb[156].mxu1  ;;  %v17022_v12 = vmax.f32 %v17020_v26, %v17021_v5  ;;  %v17031_v26 = vld [vmem:[#allocation95_spill] sm:$0xff] }
 0x67c   :  { %v6722_v36 = vadd.f32 %v6517_v25, %v6386_v35  ;;  %v6387_v30 = vmax.f32 %v17018_v22, %v6339_v54  ;;  %7801 = vmatpush1.bf16.msra.mxu1 %v6813_v37  ;;  %v4659_v61 = vpop.f32.mrb[157].mxu1  ;;  %v17024_v22 = vld [vmem:[#allocation45_spill] sm:$0xff]  ;;  %v17032_v5 = vld [vmem:[#allocation11_spill] sm:$0xff] }
 0x67d   :  { %v6131_v60 = vpop.f32.mrb[200].mxu0  ;;  %7802 = vmatprep.subr.bf16.mxu1 %v17006_v13  ;;  %v15261_v51 = vpop.f32.mrb[158].mxu1  ;;  %v17026_v61 = vld [vmem:[#allocation10_spill] sm:$0xff] }
 0x67e   :  { %v6723_v55 = vadd.f32 %v6522_v17, %v6387_v30  ;;  %v10607_v45 = vadd.f32 %v6131_v60, %v15026_v4  ;;  %v6133_v29 = vpop.f32.mrb[201].mxu0  ;;  %v6770_v10 = vmax.f32 %v6722_v36, 0.0  ;;  %v4662_v2 = vpop.f32.mrb[159].mxu1 }
 0x67f   :  { %v6134_v56 = vpop.f32.mrb[202].mxu0  ;;  %v6537_v60 = vpop.permute.xlu0 %6536  ;;  %v17025_v29 = vld [vmem:[#allocation94_spill] sm:$0xff] }
 0x680   :  { %v6771_v58 = vmax.f32 %v6723_v55, 0.0  ;;  %v6340_v15 = vmax.f32 %v14903_v1, %v10607_v45  ;;  %v10608_v20 = vadd.f32 %v6134_v56, %v15028_v18  ;;  %v6136_v42 = vpop.f32.mrb[203].mxu0  ;;  %v6542_v55 = vpop.permute.xlu1 %6541  ;;  %v17027_v56 = vmax.f32 %v17025_v29, %v17026_v61  ;;  %v17040_v61 = vld [vmem:[#allocation67_spill] sm:$0xff] }
 0x682   :  { %v6388_v52 = vmax.f32 %v17019_v28, %v6340_v15  ;;  %v6341_v41 = vmax.f32 %v14912_v40, %v10608_v20  ;;  %v6814_v4 = vpack.c.bf16 %v6771_v58, %v6770_v10 }
 0x683   :  { %v15273_v18 = vpop.f32.mrb[160].mxu1 }
 0x684   :  { %v6724_v62 = vadd.f32 %v6527_v47, %v6388_v52  ;;  %v6389_v14 = vmax.f32 %v17022_v12, %v6341_v41  ;;  %7803 = vmatpush1.bf16.msra.mxu1 %v6814_v4  ;;  %v4667_v3 = vpop.f32.mrb[161].mxu1  ;;  %v17029_v41 = vld [vmem:[#allocation46_spill] sm:$0xff]  ;;  %v17030_v47 = vld [vmem:[#allocation63_spill] sm:$0xff]  ;;  %v17033_v12 = vmax.f32 %v17031_v26, %v17032_v5 }
 0x685   :  { %v6139_v1 = vpop.f32.mrb[204].mxu0  ;;  %7804 = vmatprep.subr.bf16.mxu1 %v17006_v13  ;;  %v15276_v23 = vpop.f32.mrb[162].mxu1 }
 0x686   :  { %v6725_v33 = vadd.f32 %v6532_v16, %v6389_v14  ;;  %v10609_v53 = vadd.f32 %v6139_v1, %v15042_v32  ;;  %v6141_v24 = vpop.f32.mrb[205].mxu0  ;;  %v6772_v35 = vmax.f32 %v6724_v62, 0.0  ;;  %v4670_v36 = vpop.f32.mrb[163].mxu1  ;;  %v17034_v1 = vld [vmem:[#allocation47_spill] sm:$0xff] }
 0x687   :  { %v6142_v40 = vpop.f32.mrb[206].mxu0  ;;  %v6547_v24 = vpop.permute.xlu0 %6546 }
 0x688   :  { %v6773_v54 = vmax.f32 %v6725_v33, 0.0  ;;  %v6342_v37 = vmax.f32 %v14919_v6, %v10609_v53  ;;  %v10610_v25 = vadd.f32 %v6142_v40, %v15044_v34  ;;  %v6144_v17 = vpop.f32.mrb[207].mxu0  ;;  %v6552_v3 = vpop.permute.xlu1 %6551 }
 0x68a   :  { %v6390_v50 = vmax.f32 %v17023_v7, %v6342_v37  ;;  %v6343_v30 = vmax.f32 %v17024_v22, %v10610_v25  ;;  %v6815_v32 = vpack.c.bf16 %v6773_v54, %v6772_v35  ;;  %v17035_v35 = vld [vmem:[#allocation96_spill] sm:$0xff] }
 0x68b   :  { %v15288_v34 = vpop.f32.mrb[164].mxu1  ;;  %v17036_v54 = vld [vmem:[#allocation12_spill] sm:$0xff] }
 0x68c   :  { %v6726_v45 = vadd.f32 %v6537_v60, %v6390_v50  ;;  %v6391_v10 = vmax.f32 %v17027_v56, %v6343_v30  ;;  %7805 = vmatpush1.bf16.msra.mxu1 %v6815_v32  ;;  %v4675_v42 = vpop.f32.mrb[165].mxu1  ;;  %v17037_v37 = vmax.f32 %v17035_v35, %v17036_v54  ;;  %v17038_v50 = vld [vmem:[#allocation66_spill] sm:$0xff]  ;;  %v17050_v35 = vld [vmem:[#allocation71_spill] sm:$0xff] }
 0x68d   :  { %v6147_v6 = vpop.f32.mrb[208].mxu0  ;;  %7806 = vmatprep.subr.bf16.mxu1 %v17006_v13  ;;  %v15291_v28 = vpop.f32.mrb[166].mxu1 }
 0x68e   :  { %v6774_v58 = vmax.f32 %v6726_v45, 0.0  ;;  %v6727_v15 = vadd.f32 %v6542_v55, %v6391_v10  ;;  %v10611_v0 = vadd.f32 %v6147_v6, %v17028_v57  ;;  %v6149_v20 = vpop.f32.mrb[209].mxu0  ;;  %v4678_v36 = vpop.f32.mrb[167].mxu1  ;;  %v17039_v45 = vld [vmem:[#allocation48_spill] sm:$0xff]  ;;  %v17041_v6 = vld [vmem:[#allocation97_spill] sm:$0xff] }
 0x68f   :  { %v6150_v2 = vpop.f32.mrb[210].mxu0 }
 0x690   :  { %v6775_v52 = vmax.f32 %v6727_v15, 0.0  ;;  %v6344_v4 = vmax.f32 %v17029_v41, %v10611_v0  ;;  %v10612_v16 = vadd.f32 %v6150_v2, %v17030_v47  ;;  %v6152_v62 = vpop.f32.mrb[211].mxu0  ;;  %v17044_v0 = vld [vmem:[#allocation49_spill] sm:$0xff]  ;;  %v6557_v2 = vpop.permute.xlu0 %6556  ;;  %v17045_v41 = vld [vmem:[#allocation98_spill] sm:$0xff] }
 0x691   :  { %v6562_v62 = vpop.permute.xlu1 %6561 }
 0x692   :  { %v6392_v14 = vmax.f32 %v17033_v12, %v6344_v4  ;;  %v6345_v33 = vmax.f32 %v17034_v1, %v10612_v16  ;;  %v6816_v53 = vpack.c.bf16 %v6775_v52, %v6774_v58  ;;  %v17042_v58 = vld [vmem:[#allocation13_spill] sm:$0xff]  ;;  %v17046_v4 = vld [vmem:[#allocation14_spill] sm:$0xff] }
 0x693   :  { %v17043_v15 = vmax.f32 %v17041_v6, %v17042_v58  ;;  %v17047_v47 = vmax.f32 %v17045_v41, %v17046_v4  ;;  %v17048_v12 = vld [vmem:[#allocation70_spill] sm:$0xff] }
 0x694   :  { %v6728_v40 = vadd.f32 %v6547_v24, %v6392_v14  ;;  %v6393_v25 = vmax.f32 %v17037_v37, %v6345_v33  ;;  %7807 = vmatpush1.bf16.msra.mxu1 %v6816_v53 }
 0x695   :  { %v6155_v17 = vpop.f32.mrb[212].mxu0  ;;  %7808 = vmatprep.subr.bf16.mxu1 %v17006_v13 }
 0x696   :  { %v6729_v7 = vadd.f32 %v6552_v3, %v6393_v25  ;;  %v10613_v22 = vadd.f32 %v6155_v17, %v17038_v50  ;;  %v6157_v30 = vpop.f32.mrb[213].mxu0  ;;  %v6776_v32 = vmax.f32 %v6728_v40, 0.0  ;;  %v17049_v3 = vld [vmem:[#allocation50_spill] sm:$0xff]  ;;  %v17051_v25 = vld [vmem:[#allocation99_spill] sm:$0xff] }
 0x697   :  { %v6158_v60 = vpop.f32.mrb[214].mxu0  ;;  %v17052_v17 = vld [vmem:[#allocation15_spill] sm:$0xff] }
 0x698   :  { %v6777_v55 = vmax.f32 %v6729_v7, 0.0  ;;  %v6346_v29 = vmax.f32 %v17039_v45, %v10613_v22  ;;  %v10614_v56 = vadd.f32 %v6158_v60, %v17040_v61  ;;  %v6160_v10 = vpop.f32.mrb[215].mxu0  ;;  %v17053_v36 = vmax.f32 %v17051_v25, %v17052_v17  ;;  %v17054_v50 = vld [vmem:[#allocation51_spill] sm:$0xff]  ;;  %v17056_v45 = vld [vmem:[#allocation16_spill] sm:$0xff] }
 0x69a   :  { %v6394_v57 = vmax.f32 %v17043_v15, %v6346_v29  ;;  %v6347_v20 = vmax.f32 %v17044_v0, %v10614_v56  ;;  %v6817_v42 = vpack.c.bf16 %v6777_v55, %v6776_v32  ;;  %v6567_v32 = vpop.permute.xlu0 %6566  ;;  %v17055_v55 = vld [vmem:[#allocation100_spill] sm:$0xff]  ;;  %v6572_v56 = vpop.permute.xlu1 %6571 }
 0x69b   :  { %v17057_v29 = vmax.f32 %v17055_v55, %v17056_v45  ;;  %v17069_v55 = vld [vmem:[#allocation19_spill] sm:$0xff] }
 0x69c   :  { %v6730_v52 = vadd.f32 %v6557_v2, %v6394_v57  ;;  %v6395_v16 = vmax.f32 %v17047_v47, %v6347_v20  ;;  %7809 = vmatpush1.bf16.msra.mxu1 %v6817_v42  ;;  %v17058_v42 = vld [vmem:[#allocation52_spill] sm:$0xff]  ;;  %v17060_v47 = vld [vmem:[#allocation101_spill] sm:$0xff] }
 0x69d   :  { %v6163_v26 = vpop.f32.mrb[216].mxu0  ;;  %7810 = vmatprep.subr.bf16.mxu1 %v17006_v13 }
 0x69e   :  { %v6731_v5 = vadd.f32 %v6562_v62, %v6395_v16  ;;  %v10615_v14 = vadd.f32 %v6163_v26, %v17048_v12  ;;  %v6165_v1 = vpop.f32.mrb[217].mxu0  ;;  %v6778_v33 = vmax.f32 %v6730_v52, 0.0  ;;  %v17059_v52 = vld [vmem:[#allocation74_spill] sm:$0xff]  ;;  %v17061_v16 = vld [vmem:[#allocation17_spill] sm:$0xff] }
 0x69f   :  { %v6166_v53 = vpop.f32.mrb[218].mxu0  ;;  %v17062_v62 = vmax.f32 %v17060_v47, %v17061_v16  ;;  %v6577_v1 = vpop.permute.xlu0 %6576 }
 0x6a0   :  { %v6779_v24 = vmax.f32 %v6731_v5, 0.0  ;;  %v6348_v40 = vmax.f32 %v17049_v3, %v10615_v14  ;;  %v10616_v54 = vadd.f32 %v6166_v53, %v17050_v35  ;;  %v6168_v37 = vpop.f32.mrb[219].mxu0  ;;  %v17063_v5 = vld [vmem:[#allocation53_spill] sm:$0xff]  ;;  %v17064_v53 = vld [vmem:[#allocation102_spill] sm:$0xff] }
 0x6a2   :  { %v6396_v7 = vmax.f32 %v17053_v36, %v6348_v40  ;;  %v6349_v22 = vmax.f32 %v17054_v50, %v10616_v54  ;;  %v6818_v30 = vpack.c.bf16 %v6779_v24, %v6778_v33  ;;  %v6582_v40 = vpop.permute.xlu1 %6581  ;;  %v17067_v50 = vld [vmem:[#allocation54_spill] sm:$0xff] }
 0x6a4   :  { %v6732_v60 = vadd.f32 %v6567_v32, %v6396_v7  ;;  %v6397_v61 = vmax.f32 %v17057_v29, %v6349_v22  ;;  %7811 = vmatpush1.bf16.msra.mxu1 %v6818_v30 }
 0x6a5   :  { %v6171_v10 = vpop.f32.mrb[220].mxu0  ;;  %7812 = vmatprep.subr.bf16.mxu1 %v17006_v13 }
 0x6a6   :  { %v6733_v6 = vadd.f32 %v6572_v56, %v6397_v61  ;;  %v10617_v58 = vadd.f32 %v6171_v10, %v15106_v11  ;;  %v6173_v15 = vpop.f32.mrb[221].mxu0  ;;  %v6780_v57 = vmax.f32 %v6732_v60, 0.0  ;;  %v17065_v11 = vld [vmem:[#allocation18_spill] sm:$0xff]  ;;  %v17068_v60 = vld [vmem:[#allocation103_spill] sm:$0xff] }
 0x6a7   :  { %v6174_v0 = vpop.f32.mrb[222].mxu0  ;;  %v17066_v24 = vmax.f32 %v17064_v53, %v17065_v11  ;;  %v17070_v45 = vmax.f32 %v17068_v60, %v17069_v55  ;;  %v17071_v61 = vld [vmem:[#allocation55_spill] sm:$0xff]  ;;  %v17072_v15 = vld [vmem:[#allocation104_spill] sm:$0xff] }
 0x6a8   :  { %v6781_v20 = vmax.f32 %v6733_v6, 0.0  ;;  %v6350_v2 = vmax.f32 %v17058_v42, %v10617_v58  ;;  %v10618_v41 = vadd.f32 %v6174_v0, %v17059_v52  ;;  %v6176_v4 = vpop.f32.mrb[223].mxu0  ;;  %v6587_v6 = vpop.permute.xlu0 %6586 }
 0x6aa   :  { %v6398_v26 = vmax.f32 %v17062_v62, %v6350_v2  ;;  %v6351_v12 = vmax.f32 %v17063_v5, %v10618_v41  ;;  %v6819_v14 = vpack.c.bf16 %v6781_v20, %v6780_v57  ;;  %v6592_v20 = vpop.permute.xlu1 %6591  ;;  %v17075_v2 = vld [vmem:[#allocation79_spill] sm:$0xff]  ;;  %v17076_v62 = vld [vmem:[#allocation56_spill] sm:$0xff] }
 0x6ab   :  { %v17077_v5 = vld [vmem:[#allocation80_spill] sm:$0xff] }
 0x6ac   :  { %v6734_v33 = vadd.f32 %v6577_v1, %v6398_v26  ;;  %v6399_v3 = vmax.f32 %v17066_v24, %v6351_v12  ;;  %7813 = vmatpush1.bf16.msra.mxu1 %v6819_v14  ;;  %v17078_v1 = vld [vmem:[#allocation105_spill] sm:$0xff] }
 0x6ad   :  { %v6179_v35 = vpop.f32.mrb[224].mxu0  ;;  %7814 = vmatprep.subr.bf16.mxu1 %v17006_v13  ;;  %v17081_v24 = vld [vmem:[#allocation57_spill] sm:$0xff] }
 0x6ae   :  { %v6735_v54 = vadd.f32 %v6582_v40, %v6399_v3  ;;  %v10619_v37 = vadd.f32 %v6179_v35, %v15122_v38  ;;  %v6181_v25 = vpop.f32.mrb[225].mxu0  ;;  %v6782_v36 = vmax.f32 %v6734_v33, 0.0  ;;  %v17073_v38 = vld [vmem:[#allocation20_spill] sm:$0xff]  ;;  %v17079_v33 = vld [vmem:[#allocation21_spill] sm:$0xff]  ;;  %v6597_v35 = vpop.permute.xlu0 %6596 }
 0x6af   :  { %v6182_v17 = vpop.f32.mrb[226].mxu0  ;;  %v17074_v57 = vmax.f32 %v17072_v15, %v17073_v38  ;;  %v17080_v53 = vmax.f32 %v17078_v1, %v17079_v33  ;;  %v17083_v25 = vld [vmem:[#allocation22_spill] sm:$0xff]  ;;  %v17088_v15 = vld [vmem:[#allocation23_spill] sm:$0xff]  ;;  %v17094_v33 = vld [vmem:[#allocation60_spill] sm:$0xff] }
 0x6b0   :  { %v6783_v7 = vmax.f32 %v6735_v54, 0.0  ;;  %v6352_v22 = vmax.f32 %v17067_v50, %v10619_v37  ;;  %v10620_v30 = vadd.f32 %v6182_v17, %v15124_v43  ;;  %v6184_v32 = vpop.f32.mrb[227].mxu0  ;;  %v17082_v37 = vld [vmem:[#allocation106_spill] sm:$0xff] }
 0x6b1   :  { %v17084_v17 = vmax.f32 %v17082_v37, %v17083_v25  ;;  %v17098_v37 = vld [vmem:[#allocation61_spill] sm:$0xff] }
 0x6b2   :  { %v6400_v29 = vmax.f32 %v17070_v45, %v6352_v22  ;;  %v6353_v56 = vmax.f32 %v17071_v61, %v10620_v30  ;;  %v6820_v10 = vpack.c.bf16 %v6783_v7, %v6782_v36  ;;  %v6602_v7 = vpop.permute.xlu1 %6601 }
 0x6b4   :  { %v6736_v58 = vadd.f32 %v6587_v6, %v6400_v29  ;;  %v6401_v0 = vmax.f32 %v17074_v57, %v6353_v56  ;;  %7815 = vmatpush1.bf16.msra.mxu1 %v6820_v10  ;;  %v17085_v29 = vld [vmem:[#allocation58_spill] sm:$0xff]  ;;  %v17086_v56 = vld [vmem:[#allocation83_spill] sm:$0xff] }
 0x6b5   :  { %v6187_v42 = vpop.f32.mrb[228].mxu0  ;;  %7816 = vmatprep.subr.bf16.mxu1 %v17006_v13 }
 0x6b6   :  { %v6737_v43 = vadd.f32 %v6592_v20, %v6401_v0  ;;  %v10621_v52 = vadd.f32 %v6187_v42, %v17075_v2  ;;  %v6189_v41 = vpop.f32.mrb[229].mxu0  ;;  %v6784_v47 = vmax.f32 %v6736_v58, 0.0  ;;  %v17087_v58 = vld [vmem:[#allocation107_spill] sm:$0xff] }
 0x6b7   :  { %v6190_v4 = vpop.f32.mrb[230].mxu0  ;;  %v17089_v38 = vmax.f32 %v17087_v58, %v17088_v15  ;;  %v17090_v0 = vld [vmem:[#allocation59_spill] sm:$0xff]  ;;  %v17104_v15 = vld [vmem:[#allocation129_spill] sm:$0xff] }
 0x6b8   :  { %v6785_v16 = vmax.f32 %v6737_v43, 0.0  ;;  %v6354_v26 = vmax.f32 %v17076_v62, %v10621_v52  ;;  %v10622_v12 = vadd.f32 %v6190_v4, %v17077_v5  ;;  %v6192_v14 = vpop.f32.mrb[231].mxu0  ;;  %v6607_v43 = vpop.permute.xlu0 %6606  ;;  %v17091_v52 = vld [vmem:[#allocation108_spill] sm:$0xff] }
 0x6ba   :  { %v6402_v11 = vmax.f32 %v17080_v53, %v6354_v26  ;;  %v6355_v3 = vmax.f32 %v17081_v24, %v10622_v12  ;;  %v6821_v40 = vpack.c.bf16 %v6785_v16, %v6784_v47  ;;  %v6612_v47 = vpop.permute.xlu1 %6611 }
 0x6bc   :  { %v6738_v54 = vadd.f32 %v6597_v35, %v6402_v11  ;;  %v6403_v36 = vmax.f32 %v17084_v17, %v6355_v3  ;;  %7817 = vmatpush1.bf16.msra.mxu1 %v6821_v40  ;;  %v17095_v3 = vld [vmem:[#allocation109_spill] sm:$0xff] }
 0x6bd   :  { %v6195_v50 = vpop.f32.mrb[232].mxu0  ;;  %7818 = vmatprep.subr.bf16.mxu1 %v17006_v13  ;;  %v17096_v40 = vld [vmem:[#allocation25_spill] sm:$0xff] }
 0x6be   :  { %v6739_v22 = vadd.f32 %v6602_v7, %v6403_v36  ;;  %v10623_v30 = vadd.f32 %v6195_v50, %v15151_v44  ;;  %v6197_v32 = vpop.f32.mrb[233].mxu0  ;;  %v6786_v55 = vmax.f32 %v6738_v54, 0.0  ;;  %v17092_v44 = vld [vmem:[#allocation24_spill] sm:$0xff]  ;;  %v17097_v35 = vmax.f32 %v17095_v3, %v17096_v40  ;;  %v6617_v36 = vpop.permute.xlu0 %6616  ;;  %v17099_v50 = vld [vmem:[#allocation110_spill] sm:$0xff] }
 0x6bf   :  { %v6198_v60 = vpop.f32.mrb[234].mxu0  ;;  %v17093_v41 = vmax.f32 %v17091_v52, %v17092_v44  ;;  %v6622_v32 = vpop.permute.xlu1 %6621  ;;  %v17113_v40 = vld [vmem:[#allocation68_spill] sm:$0xff] }
 0x6c0   :  { %v6787_v45 = vmax.f32 %v6739_v22, 0.0  ;;  %v6356_v61 = vmax.f32 %v17085_v29, %v10623_v30  ;;  %v10624_v10 = vadd.f32 %v6198_v60, %v17086_v56  ;;  %v6200_v6 = vpop.f32.mrb[235].mxu0 }
 0x6c1   :  { %v17103_v6 = vld [vmem:[#allocation64_spill] sm:$0xff] }
 0x6c2   :  { %v6404_v57 = vmax.f32 %v17089_v38, %v6356_v61  ;;  %v6357_v20 = vmax.f32 %v17090_v0, %v10624_v10  ;;  %v6822_v42 = vpack.c.bf16 %v6787_v45, %v6786_v55  ;;  %v17102_v55 = vld [vmem:[#allocation128_spill] sm:$0xff]  ;;  %v17105_v0 = vld [vmem:[#allocation111_spill] sm:$0xff] }
 0x6c4   :  { %v6740_v2 = vadd.f32 %v6607_v43, %v6404_v57  ;;  %v6405_v4 = vmax.f32 %v17093_v41, %v6357_v20  ;;  %7819 = vmatpush1.bf16.msra.mxu1 %v6822_v42  ;;  %v17106_v20 = vld [vmem:[#allocation27_spill] sm:$0xff]  ;;  %v6627_v41 = vpop.permute.xlu0 %6626 }
 0x6c5   :  { %v6203_v16 = vpop.f32.mrb[236].mxu0  ;;  %7820 = vmatprep.subr.bf16.mxu1 %v17006_v13  ;;  %v17107_v42 = vmax.f32 %v17105_v0, %v17106_v20 }
 0x6c6   :  { %v6741_v62 = vadd.f32 %v6612_v47, %v6405_v4  ;;  %v10625_v26 = vadd.f32 %v6203_v16, %v15161_v63  ;;  %v6205_v5 = vpop.f32.mrb[237].mxu0  ;;  %v6788_v14 = vmax.f32 %v6740_v2, 0.0  ;;  %v17100_v63 = vld [vmem:[#allocation26_spill] sm:$0xff]  ;;  %v17108_v2 = vld [vmem:[#allocation65_spill] sm:$0xff]  ;;  %v17109_v47 = vld [vmem:[#allocation112_spill] sm:$0xff] }
 0x6c7   :  { %v6206_v12 = vpop.f32.mrb[238].mxu0  ;;  %v17101_v22 = vmax.f32 %v17099_v50, %v17100_v63  ;;  %v17110_v16 = vld [vmem:[#allocation28_spill] sm:$0xff]  ;;  %v6632_v5 = vpop.permute.xlu1 %6631  ;;  %v17117_v50 = vld [vmem:[#allocation69_spill] sm:$0xff] }
 0x6c8   :  { %v6789_v1 = vmax.f32 %v6741_v62, 0.0  ;;  %v6358_v53 = vmax.f32 %v17094_v33, %v10625_v26  ;;  %v10626_v11 = vadd.f32 %v6206_v12, %v15163_v9  ;;  %v6208_v24 = vpop.f32.mrb[239].mxu0  ;;  %v17111_v62 = vmax.f32 %v17109_v47, %v17110_v16 }
 0x6ca   :  { %v6406_v54 = vmax.f32 %v17097_v35, %v6358_v53  ;;  %v6359_v25 = vmax.f32 %v17098_v37, %v10626_v11  ;;  %v6823_v17 = vpack.c.bf16 %v6789_v1, %v6788_v14  ;;  %v17112_v1 = vld [vmem:[#allocation132_spill] sm:$0xff] }
 0x6cc   :  { %v6742_v7 = vadd.f32 %v6617_v36, %v6406_v54  ;;  %v6407_v30 = vmax.f32 %v17101_v22, %v6359_v25  ;;  %7821 = vmatpush1.bf16.msra.mxu1 %v6823_v17  ;;  %v17114_v25 = vld [vmem:[#allocation113_spill] sm:$0xff] }
 0x6cd   :  { %v6211_v60 = vpop.f32.mrb[240].mxu0  ;;  %7822 = vmatprep.subr.bf16.mxu1 %v17006_v13  ;;  %v17115_v17 = vld [vmem:[#allocation29_spill] sm:$0xff] }
 0x6ce   :  { %v6743_v9 = vadd.f32 %v6622_v32, %v6407_v30  ;;  %v10627_v45 = vadd.f32 %v6211_v60, %v17102_v55  ;;  %v6213_v29 = vpop.f32.mrb[241].mxu0  ;;  %v6790_v56 = vmax.f32 %v6742_v7, 0.0  ;;  %v17116_v36 = vmax.f32 %v17114_v25, %v17115_v17  ;;  %v6637_v30 = vpop.permute.xlu0 %6636  ;;  %v11818_v32 = vld [vmem:[%s16578_s3] ss:$12 sps:$4 sm:$0xff]  }
 0x6cf   :  { %v6214_v61 = vpop.f32.mrb[242].mxu0  ;;  %v17118_v60 = vld [vmem:[#allocation114_spill] sm:$0xff] }
 0x6d0   :  { %v6791_v10 = vmax.f32 %v6743_v9, 0.0  ;;  %v6360_v58 = vmax.f32 %v17103_v6, %v10627_v45  ;;  %v10628_v38 = vadd.f32 %v6214_v61, %v17104_v15  ;;  %v6216_v57 = vpop.f32.mrb[243].mxu0  ;;  %v17119_v9 = vld [vmem:[#allocation30_spill] sm:$0xff]  ;;  %v6642_v61 = vpop.permute.xlu1 %6641 }
 0x6d1   :  { %v17120_v55 = vmax.f32 %v17118_v60, %v17119_v9  ;;  %v11824_v9 = vld [vmem:[%s16578_s3 + $0x30] ss:$12 sps:$4 sm:$0xff]  }
 0x6d2   :  { %v6408_v43 = vmax.f32 %v17107_v42, %v6360_v58  ;;  %v6361_v52 = vmax.f32 %v17108_v2, %v10628_v38  ;;  %v6824_v44 = vpack.c.bf16 %v6791_v10, %v6790_v56  ;;  %v17121_v38 = vld [vmem:[#allocation72_spill] sm:$0xff]  ;;  %v17122_v2 = vld [vmem:[#allocation115_spill] sm:$0xff] }
 0x6d4   :  { %v6744_v4 = vadd.f32 %v6627_v41, %v6408_v43  ;;  %v6409_v26 = vmax.f32 %v17111_v62, %v6361_v52  ;;  %7823 = vmatpush1.bf16.msra.mxu1 %v6824_v44  ;;  %v17123_v52 = vld [vmem:[#allocation31_spill] sm:$0xff]  ;;  %v11821_v62 = vld [vmem:[%s16578_s3 + $0x18] ss:$12 sps:$4 sm:$0xff]  }
 0x6d5   :  { %v6219_v12 = vpop.f32.mrb[244].mxu0  ;;  %7824 = vmatprep.subr.bf16.mxu1 %v17006_v13  ;;  %v17124_v44 = vmax.f32 %v17122_v2, %v17123_v52  ;;  %v17138_v52 = vld [vmem:[#allocation119_spill] sm:$0xff] }
 0x6d6   :  { %v6745_v14 = vadd.f32 %v6632_v5, %v6409_v26  ;;  %v10629_v33 = vadd.f32 %v6219_v12, %v17112_v1  ;;  %v6221_v53 = vpop.f32.mrb[245].mxu0  ;;  %v6792_v24 = vmax.f32 %v6744_v4, 0.0  ;;  %v17125_v4 = vld [vmem:[#allocation73_spill] sm:$0xff]  ;;  %v17126_v26 = vld [vmem:[#allocation116_spill] sm:$0xff] }
 0x6d7   :  { %v6222_v11 = vpop.f32.mrb[246].mxu0  ;;  %v17127_v5 = vld [vmem:[#allocation32_spill] sm:$0xff] }
 0x6d8   :  { %v6793_v3 = vmax.f32 %v6745_v14, 0.0  ;;  %v6362_v35 = vmax.f32 %v17113_v40, %v10629_v33  ;;  %v10630_v54 = vadd.f32 %v6222_v11, %v15184_v46  ;;  %v6224_v37 = vpop.f32.mrb[247].mxu0  ;;  %v11823_v46 = vld [vmem:[%s16578_s3 + $0x1c] ss:$12 sps:$4 sm:$0xff]   ;;  %v17128_v12 = vmax.f32 %v17126_v26, %v17127_v5  ;;  %v11826_v1 = vld [vmem:[%s16578_s3 + $0x34] ss:$12 sps:$4 sm:$0xff]   ;;  %v6652_v33 = vpop.permute.xlu1 %6651 }
 0x6d9   :  { %v17142_v26 = vld [vmem:[#allocation120_spill] sm:$0xff] }
 0x6da   :  { %v6410_v7 = vmax.f32 %v17116_v36, %v6362_v35  ;;  %v6363_v63 = vmax.f32 %v17117_v50, %v10630_v54  ;;  %v6825_v22 = vpack.c.bf16 %v6793_v3, %v6792_v24  ;;  %v17129_v35 = vld [vmem:[#allocation75_spill] sm:$0xff]  ;;  %v17131_v50 = vld [vmem:[#allocation33_spill] sm:$0xff]  ;;  %v17143_v5 = vld [vmem:[#allocation36_spill] sm:$0xff] }
 0x6dc   :  { %v6411_v45 = vmax.f32 %v17120_v55, %v6363_v63  ;;  %7825 = vmatpush1.bf16.msra.mxu1 %v6825_v22  ;;  %v6746_v29 = vadd.f32 %v6637_v30, %v6410_v7  ;;  %v17130_v7 = vld [vmem:[#allocation117_spill] sm:$0xff]  ;;  %v17133_v30 = vld [vmem:[#allocation76_spill] sm:$0xff]  ;;  %v17134_v55 = vld [vmem:[#allocation118_spill] sm:$0xff] }
 0x6dd   :  { %v6227_v56 = vpop.f32.mrb[248].mxu0  ;;  %v17132_v63 = vmax.f32 %v17130_v7, %v17131_v50  ;;  %v17147_v7 = vld [vmem:[#allocation37_spill] sm:$0xff] }
 0x6de   :  { %v10631_v10 = vadd.f32 %v6227_v56, %v15198_v8  ;;  %v6229_v6 = vpop.f32.mrb[249].mxu0  ;;  %v6747_v58 = vadd.f32 %v6642_v61, %v6411_v45  ;;  %v6794_v42 = vmax.f32 %v6746_v29, 0.0  ;;  %v6647_v8 = vpop.permute.xlu0 %6646  ;;  %v17135_v45 = vld [vmem:[#allocation34_spill] sm:$0xff]  ;;  %v11829_v61 = vld [vmem:[%s16578_s3 + $0x4c] ss:$12 sps:$4 sm:$0xff]  }
 0x6df   :  { %v6230_v15 = vpop.f32.mrb[250].mxu0  ;;  %7827 = vmatmul.mubr.bf16.vlgmr.msra.gmra.mrb[0].mxu1 %v11818_v32  ;;  %v17136_v29 = vmax.f32 %v17134_v55, %v17135_v45  ;;  %v6662_v56 = vpop.permute.xlu1 %6661 }
 0x6e0   :  { %v6364_v57 = vmax.f32 %v17121_v38, %v10631_v10  ;;  %v10632_v0 = vadd.f32 %v6230_v15, %v15201_v31  ;;  %v6232_v20 = vpop.f32.mrb[251].mxu0  ;;  %v6795_v43 = vmax.f32 %v6747_v58, 0.0  ;;  %7834 = vmatprep.mubr.bf16.mxu1 %v11823_v46 }
 0x6e2   :  { %v6412_v41 = vmax.f32 %v17124_v44, %v6364_v57  ;;  %v6365_v47 = vmax.f32 %v17125_v4, %v10632_v0  ;;  %v6826_v16 = vpack.c.bf16 %v6795_v43, %v6794_v42  ;;  %v17137_v57 = vld [vmem:[#allocation77_spill] sm:$0xff]  ;;  %v17139_v44 = vld [vmem:[#allocation35_spill] sm:$0xff] }
 0x6e4   :  { %v6413_v31 = vmax.f32 %v17128_v12, %v6365_v47  ;;  %10249 = vmatprep.subr.bf16.mxu1 %v6826_v16  ;;  %v6748_v14 = vadd.f32 %v6647_v8, %v6412_v41  ;;  %v17140_v41 = vmax.f32 %v17138_v52, %v17139_v44  ;;  %v17141_v47 = vld [vmem:[#allocation78_spill] sm:$0xff]  ;;  %v17144_v12 = vmax.f32 %v17142_v26, %v17143_v5  ;;  %v17157_v44 = vld [vmem:[#allocation85_spill] sm:$0xff] }
 0x6e5   :  { %v6235_v53 = vpop.f32.mrb[252].mxu0  ;;  %10250 = vmatpush3.bf16.msra.mxu1 %v6826_v16  ;;  %v11838_v26 = vld [vmem:[%s16578_s3 + $0x94] ss:$12 sps:$4 sm:$0xff]  }
 0x6e6   :  { %v10633_v11 = vadd.f32 %v6235_v53, %v15213_v48  ;;  %v6237_v24 = vpop.f32.mrb[253].mxu0  ;;  %v6749_v3 = vadd.f32 %v6652_v33, %v6413_v31  ;;  %v6796_v17 = vmax.f32 %v6748_v14, 0.0  ;;  %v6657_v48 = vpop.permute.xlu0 %6656  ;;  %v11832_v14 = vld [vmem:[%s16578_s3 + $0x64] ss:$12 sps:$4 sm:$0xff]  }
 0x6e7   :  { %v6238_v40 = vpop.f32.mrb[254].mxu0  ;;  %7835 = vmatmul.mubr.bf16.gmra.mrb[4].mxu1 %v11821_v62  ;;  %v11827_v62 = vld [vmem:[%s16578_s3 + $0x48] ss:$12 sps:$4 sm:$0xff]  }
 0x6e8   :  { %v6366_v54 = vmax.f32 %v17129_v35, %v10633_v11  ;;  %v10634_v37 = vadd.f32 %v6238_v40, %v15216_v59  ;;  %v6240_v25 = vpop.f32.mrb[255].mxu0  ;;  %v6797_v36 = vmax.f32 %v6749_v3, 0.0  ;;  %7842 = vmatprep.mubr.bf16.mxu1 %v11826_v1  ;;  %v6672_v1 = vpop.permute.xlu1 %6671  ;;  %v17145_v40 = vld [vmem:[#allocation81_spill] sm:$0xff] }
 0x6ea   :  { %v6414_v22 = vmax.f32 %v17132_v63, %v6366_v54  ;;  %v6367_v32 = vmax.f32 %v17133_v30, %v10634_v37  ;;  %v6827_v60 = vpack.c.bf16 %v6797_v36, %v6796_v17  ;;  %v17146_v36 = vld [vmem:[#allocation121_spill] sm:$0xff] }
 0x6eb   :  { %v17148_v50 = vmax.f32 %v17146_v36, %v17147_v7 }
 0x6ec   :  { %v6415_v59 = vmax.f32 %v17136_v29, %v6367_v32  ;;  %10251 = vmatprep.subr.bf16.mxu1 %v6827_v60  ;;  %v6750_v46 = vadd.f32 %v6657_v48, %v6414_v22  ;;  %v17149_v22 = vld [vmem:[#allocation82_spill] sm:$0xff]  ;;  %v11835_v29 = vld [vmem:[%s16578_s3 + $0x7c] ss:$12 sps:$4 sm:$0xff]  }
 0x6ed   :  { %v6243_v10 = vpop.f32.mrb[148].mxu0  ;;  %10252 = vmatpush3.bf16.msra.mxu1 %v6827_v60  ;;  %v11830_v60 = vld [vmem:[%s16578_s3 + $0x60] ss:$12 sps:$4 sm:$0xff]  }
 0x6ee   :  { %v10635_v6 = vadd.f32 %v6243_v10, %v15228_v21  ;;  %v6245_v58 = vpop.f32.mrb[149].mxu0  ;;  %v6751_v15 = vadd.f32 %v6662_v56, %v6415_v59  ;;  %v6798_v43 = vmax.f32 %v6750_v46, 0.0  ;;  %v6667_v21 = vpop.permute.xlu0 %6666  ;;  %v17150_v48 = vld [vmem:[#allocation122_spill] sm:$0xff] }
 0x6ef   :  { %v6246_v38 = vpop.f32.mrb[150].mxu0  ;;  %7843 = vmatmul.mubr.bf16.gmra.mrb[8].mxu1 %v11824_v9  ;;  %v17151_v9 = vld [vmem:[#allocation38_spill] sm:$0xff]  ;;  %v6682_v59 = vpop.permute.xlu1 %6681  ;;  %v17153_v58 = vld [vmem:[#allocation84_spill] sm:$0xff] }
 0x6f0   :  { %v6368_v0 = vmax.f32 %v17137_v57, %v10635_v6  ;;  %v10636_v20 = vadd.f32 %v6246_v38, %v15231_v19  ;;  %v6248_v42 = vpop.f32.mrb[151].mxu0  ;;  %v6799_v2 = vmax.f32 %v6751_v15, 0.0  ;;  %7850 = vmatprep.mubr.bf16.mxu1 %v11829_v61  ;;  %v17152_v55 = vmax.f32 %v17150_v48, %v17151_v9 }
 0x6f1   :  { %v17154_v42 = vld [vmem:[#allocation123_spill] sm:$0xff] }
 0x6f2   :  { %v6416_v4 = vmax.f32 %v17140_v41, %v6368_v0  ;;  %v6369_v16 = vmax.f32 %v17141_v47, %v10636_v20  ;;  %v6828_v8 = vpack.c.bf16 %v6799_v2, %v6798_v43  ;;  %v17155_v43 = vld [vmem:[#allocation39_spill] sm:$0xff]  ;;  %v11833_v47 = vld [vmem:[%s16578_s3 + $0x78] ss:$12 sps:$4 sm:$0xff]  }
 0x6f3   :  { %v17156_v2 = vmax.f32 %v17154_v42, %v17155_v43  ;;  %v6692_v5 = vpop.permute.xlu1 %6691  ;;  %v11839_v42 = vld [vmem:[%s16578_s3 + $0xa8] ss:$12 sps:$4 sm:$0xff]   ;;  %v17174_v43 = vld [vmem:[#allocation2_spill] sm:$0xff] }
 0x6f4   :  { %v6417_v19 = vmax.f32 %v17144_v12, %v6369_v16  ;;  %10253 = vmatprep.subr.bf16.mxu1 %v6828_v8  ;;  %v6752_v31 = vadd.f32 %v6667_v21, %v6416_v4  ;;  %v17158_v16 = vld [vmem:[#allocation124_spill] sm:$0xff] }
 0x6f5   :  { %v6251_v33 = vpop.f32.mrb[152].mxu0  ;;  %10254 = vmatpush3.bf16.msra.mxu1 %v6828_v8  ;;  %v17159_v8 = vld [vmem:[#allocation40_spill] sm:$0xff] }
 0x6f6   :  { %v10637_v53 = vadd.f32 %v6251_v33, %v15243_v49  ;;  %v6253_v11 = vpop.f32.mrb[153].mxu0  ;;  %v6753_v24 = vadd.f32 %v6672_v1, %v6417_v19  ;;  %v6800_v25 = vmax.f32 %v6752_v31, 0.0  ;;  %v6677_v49 = vpop.permute.xlu0 %6676  ;;  %v17160_v21 = vmax.f32 %v17158_v16, %v17159_v8  ;;  %v17161_v33 = vld [vmem:[#allocation86_spill] sm:$0xff] }
 0x6f7   :  { %v6254_v3 = vpop.f32.mrb[154].mxu0  ;;  %7851 = vmatmul.mubr.bf16.gmra.mrb[12].mxu1 %v11827_v62 }
 0x6f8   :  { %v6370_v35 = vmax.f32 %v17145_v40, %v10637_v53  ;;  %v10638_v54 = vadd.f32 %v6254_v3, %v15246_v39  ;;  %v6256_v37 = vpop.f32.mrb[155].mxu0  ;;  %v6801_v17 = vmax.f32 %v6753_v24, 0.0  ;;  %7858 = vmatprep.mubr.bf16.mxu1 %v11832_v14 }
 0x6fa   :  { %v6418_v63 = vmax.f32 %v17148_v50, %v6370_v35  ;;  %v6371_v30 = vmax.f32 %v17149_v22, %v10638_v54  ;;  %v6829_v32 = vpack.c.bf16 %v6801_v17, %v6800_v25  ;;  %v17162_v35 = vld [vmem:[#allocation125_spill] sm:$0xff]  ;;  %v17165_v17 = vld [vmem:[#allocation87_spill] sm:$0xff]  ;;  %v17167_v22 = vld [vmem:[#allocation42_spill] sm:$0xff] }
 0x6fb   :  { %v17163_v54 = vld [vmem:[#allocation41_spill] sm:$0xff] }
 0x6fc   :  { %v6419_v39 = vmax.f32 %v17152_v55, %v6371_v30  ;;  %10255 = vmatprep.subr.bf16.mxu1 %v6829_v32  ;;  %v6754_v45 = vadd.f32 %v6677_v49, %v6418_v63  ;;  %v17164_v37 = vmax.f32 %v17162_v35, %v17163_v54  ;;  %v11836_v50 = vld [vmem:[%s16578_s3 + $0x90] ss:$12 sps:$4 sm:$0xff]   ;;  %v17166_v63 = vld [vmem:[#allocation126_spill] sm:$0xff]  ;;  %v11841_v49 = vld [vmem:[%s16578_s3 + $0xac] ss:$12 sps:$4 sm:$0xff]  }
 0x6fd   :  { %v6259_v46 = vpop.f32.mrb[156].mxu0  ;;  %10256 = vmatpush3.bf16.msra.mxu1 %v6829_v32  ;;  %v17168_v30 = vmax.f32 %v17166_v63, %v17167_v22  ;;  %v11866_v35 = vld [vmem:[%s16578_s3 + $0x180] ss:$12 sps:$4 sm:$0xff]   ;;  %v11871_v54 = vld [vmem:[%s16578_s3 + $0x19c] ss:$12 sps:$4 sm:$0xff]  }
 0x6fe   :  { %v10639_v61 = vadd.f32 %v6259_v46, %v15258_v27  ;;  %v6261_v56 = vpop.f32.mrb[157].mxu0  ;;  %v6755_v10 = vadd.f32 %v6682_v59, %v6419_v39  ;;  %v6802_v0 = vmax.f32 %v6754_v45, 0.0  ;;  %v6687_v27 = vpop.permute.xlu0 %6686  ;;  %v11883_v63 = vld [vmem:[%s16578_s3 + $0x1fc] ss:$12 sps:$4 sm:$0xff]   ;;  %v11881_v22 = vld [vmem:[%s16578_s3 + $0x1f8] ss:$12 sps:$4 sm:$0xff]  }
 0x6ff   :  { %v6262_v6 = vpop.f32.mrb[158].mxu0  ;;  %7859 = vmatmul.mubr.bf16.gmra.mrb[16].mxu1 %v11830_v60  ;;  %v6702_v60 = vpop.permute.xlu1 %6701 }
 0x700   :  { %v6372_v15 = vmax.f32 %v17153_v58, %v10639_v61  ;;  %v10640_v38 = vadd.f32 %v6262_v6, %v15261_v51  ;;  %v6264_v57 = vpop.f32.mrb[159].mxu0  ;;  %v6803_v20 = vmax.f32 %v6755_v10, 0.0  ;;  %7866 = vmatprep.mubr.bf16.mxu1 %v11835_v29  ;;  %v17169_v29 = vld [vmem:[#allocation130_spill] sm:$0xff]  ;;  %v17170_v6 = vld [vmem:[#allocation127_spill] sm:$0xff] }
 0x701   :  { %v17171_v58 = vld [vmem:[#allocation43_spill] sm:$0xff] }
 0x702   :  { %v6420_v52 = vmax.f32 %v17156_v2, %v6372_v15  ;;  %v6373_v41 = vmax.f32 %v17157_v44, %v10640_v38  ;;  %v6830_v4 = vpack.c.bf16 %v6803_v20, %v6802_v0  ;;  %v17172_v15 = vmax.f32 %v17170_v6, %v17171_v58  ;;  %v17173_v57 = vld [vmem:[#allocation131_spill] sm:$0xff]  ;;  %v17175_v2 = vld [vmem:[#allocation44_spill] sm:$0xff] }
 0x704   :  { %v6421_v51 = vmax.f32 %v17160_v21, %v6373_v41  ;;  %10257 = vmatprep.subr.bf16.mxu1 %v6830_v4  ;;  %v6756_v62 = vadd.f32 %v6687_v27, %v6420_v52  ;;  %v17176_v52 = vmax.f32 %v17174_v43, %v17175_v2  ;;  %v11844_v41 = vld [vmem:[%s16578_s3 + $0xc4] ss:$12 sps:$4 sm:$0xff]   ;;  %v11842_v21 = vld [vmem:[%s16578_s3 + $0xc0] ss:$12 sps:$4 sm:$0xff]  }
 0x705   :  { %v6267_v12 = vpop.f32.mrb[160].mxu0  ;;  %10258 = vmatpush3.bf16.msra.mxu1 %v6830_v4  ;;  %v6712_v4 = vpop.permute.xlu1 %6711  ;;  %v11910_v2 = vld [vmem:[%s16578_s3 + $0x2d4] ss:$12 sps:$4 sm:$0xff]  }
 0x706   :  { %v10641_v19 = vadd.f32 %v6267_v12, %v15273_v18  ;;  %v6269_v31 = vpop.f32.mrb[161].mxu0  ;;  %v6757_v14 = vadd.f32 %v6692_v5, %v6421_v51  ;;  %v6804_v3 = vmax.f32 %v6756_v62, 0.0  ;;  %v6697_v18 = vpop.permute.xlu0 %6696  ;;  %v11847_v51 = vld [vmem:[%s16578_s3 + $0xdc] ss:$12 sps:$4 sm:$0xff]   ;;  %v11845_v62 = vld [vmem:[%s16578_s3 + $0xd8] ss:$12 sps:$4 sm:$0xff]  }
 0x707   :  { %v6270_v1 = vpop.f32.mrb[162].mxu0  ;;  %7867 = vmatmul.mubr.bf16.gmra.mrb[20].mxu1 %v11833_v47  ;;  %v11848_v5 = vld [vmem:[%s16578_s3 + $0xf0] ss:$12 sps:$4 sm:$0xff]   ;;  %v11853_v12 = vld [vmem:[%s16578_s3 + $0x10c] ss:$12 sps:$4 sm:$0xff]  }
 0x708   :  { %v6374_v53 = vmax.f32 %v17161_v33, %v10641_v19  ;;  %v10642_v11 = vadd.f32 %v6270_v1, %v15276_v23  ;;  %v6272_v24 = vpop.f32.mrb[163].mxu0  ;;  %v6805_v40 = vmax.f32 %v6757_v14, 0.0  ;;  %7874 = vmatprep.mubr.bf16.mxu1 %v11838_v26  ;;  %v11850_v26 = vld [vmem:[%s16578_s3 + $0xf4] ss:$12 sps:$4 sm:$0xff]   ;;  %v11856_v31 = vld [vmem:[%s16578_s3 + $0x124] ss:$12 sps:$4 sm:$0xff]  }
 0x709   :  { %v11851_v19 = vld [vmem:[%s16578_s3 + $0x108] ss:$12 sps:$4 sm:$0xff]   ;;  %v11854_v14 = vld [vmem:[%s16578_s3 + $0x120] ss:$12 sps:$4 sm:$0xff]   ;;  %v11857_v33 = vld [vmem:[%s16578_s3 + $0x138] ss:$12 sps:$4 sm:$0xff]  }
 0x70a   :  { %v6422_v25 = vmax.f32 %v17164_v37, %v6374_v53  ;;  %v6375_v36 = vmax.f32 %v17165_v17, %v10642_v11  ;;  %v6831_v7 = vpack.c.bf16 %v6805_v40, %v6804_v3  ;;  %v11859_v1 = vld [vmem:[%s16578_s3 + $0x13c] ss:$12 sps:$4 sm:$0xff]   ;;  %v11862_v53 = vld [vmem:[%s16578_s3 + $0x154] ss:$12 sps:$4 sm:$0xff]   ;;  %v11865_v24 = vld [vmem:[%s16578_s3 + $0x16c] ss:$12 sps:$4 sm:$0xff]  }
 0x70b   :  { %v11860_v11 = vld [vmem:[%s16578_s3 + $0x150] ss:$12 sps:$4 sm:$0xff]   ;;  %v11863_v3 = vld [vmem:[%s16578_s3 + $0x168] ss:$12 sps:$4 sm:$0xff]   ;;  %v11869_v37 = vld [vmem:[%s16578_s3 + $0x198] ss:$12 sps:$4 sm:$0xff]  }
 0x70c   :  { %v6423_v23 = vmax.f32 %v17168_v30, %v6375_v36  ;;  %10259 = vmatprep.subr.bf16.mxu1 %v6831_v7  ;;  %v6758_v32 = vadd.f32 %v6697_v18, %v6422_v25  ;;  %v11868_v40 = vld [vmem:[%s16578_s3 + $0x184] ss:$12 sps:$4 sm:$0xff]   ;;  %v11874_v25 = vld [vmem:[%s16578_s3 + $0x1b4] ss:$12 sps:$4 sm:$0xff]   ;;  %v11877_v36 = vld [vmem:[%s16578_s3 + $0x1cc] ss:$12 sps:$4 sm:$0xff]  }
 0x70d   :  { %v6275_v48 = vpop.f32.mrb[164].mxu0  ;;  %10260 = vmatpush3.bf16.msra.mxu1 %v6831_v7  ;;  %v11872_v17 = vld [vmem:[%s16578_s3 + $0x1b0] ss:$12 sps:$4 sm:$0xff]   ;;  %v11875_v7 = vld [vmem:[%s16578_s3 + $0x1c8] ss:$12 sps:$4 sm:$0xff]  }
 0x70e   :  { %v10643_v9 = vadd.f32 %v6275_v48, %v15288_v34  ;;  %v6277_v55 = vpop.f32.mrb[165].mxu0  ;;  %v6759_v39 = vadd.f32 %v6702_v60, %v6423_v23  ;;  %v6806_v56 = vmax.f32 %v6758_v32, 0.0  ;;  %v6707_v34 = vpop.permute.xlu0 %6706  ;;  %v11880_v18 = vld [vmem:[%s16578_s3 + $0x1e4] ss:$12 sps:$4 sm:$0xff]   ;;  %v11886_v30 = vld [vmem:[%s16578_s3 + $0x214] ss:$12 sps:$4 sm:$0xff]  }
 0x70f   :  { %v6278_v45 = vpop.f32.mrb[166].mxu0  ;;  %7875 = vmatmul.mubr.bf16.gmra.mrb[24].mxu1 %v11836_v50  ;;  %v11878_v50 = vld [vmem:[%s16578_s3 + $0x1e0] ss:$12 sps:$4 sm:$0xff]   ;;  %v11884_v23 = vld [vmem:[%s16578_s3 + $0x210] ss:$12 sps:$4 sm:$0xff]  }
 0x710   :  { %v6376_v59 = vmax.f32 %v17169_v29, %v10643_v9  ;;  %v10644_v46 = vadd.f32 %v6278_v45, %v15291_v28  ;;  %v6280_v61 = vpop.f32.mrb[167].mxu0  ;;  %v6807_v10 = vmax.f32 %v6759_v39, 0.0  ;;  %7882 = vmatprep.mubr.bf16.mxu1 %v11841_v49  ;;  %v11889_v32 = vld [vmem:[%s16578_s3 + $0x22c] ss:$12 sps:$4 sm:$0xff]   ;;  %v11887_v49 = vld [vmem:[%s16578_s3 + $0x228] ss:$12 sps:$4 sm:$0xff]  }
 0x711   :  { %v11892_v60 = vld [vmem:[%s16578_s3 + $0x244] ss:$12 sps:$4 sm:$0xff]   ;;  %v11890_v48 = vld [vmem:[%s16578_s3 + $0x240] ss:$12 sps:$4 sm:$0xff]   ;;  %v11895_v9 = vld [vmem:[%s16578_s3 + $0x25c] ss:$12 sps:$4 sm:$0xff]  }
 0x712   :  { %v6424_v38 = vmax.f32 %v17172_v15, %v6376_v59  ;;  %v6377_v0 = vmax.f32 %v17173_v57, %v10644_v46  ;;  %v6832_v20 = vpack.c.bf16 %v6807_v10, %v6806_v56  ;;  %v11893_v55 = vld [vmem:[%s16578_s3 + $0x258] ss:$12 sps:$4 sm:$0xff]   ;;  %v11898_v39 = vld [vmem:[%s16578_s3 + $0x274] ss:$12 sps:$4 sm:$0xff]   ;;  %v11896_v45 = vld [vmem:[%s16578_s3 + $0x270] ss:$12 sps:$4 sm:$0xff]  }
 0x713   :  { %v11901_v29 = vld [vmem:[%s16578_s3 + $0x28c] ss:$12 sps:$4 sm:$0xff]   ;;  %v11899_v46 = vld [vmem:[%s16578_s3 + $0x288] ss:$12 sps:$4 sm:$0xff]   ;;  %v11904_v56 = vld [vmem:[%s16578_s3 + $0x2a4] ss:$12 sps:$4 sm:$0xff]  }
 0x714   :  { %v6425_v28 = vmax.f32 %v17176_v52, %v6377_v0  ;;  %10261 = vmatprep.subr.bf16.mxu1 %v6832_v20  ;;  %v6760_v44 = vadd.f32 %v6707_v34, %v6424_v38  ;;  %v11902_v15 = vld [vmem:[%s16578_s3 + $0x2a0] ss:$12 sps:$4 sm:$0xff]   ;;  %v11907_v57 = vld [vmem:[%s16578_s3 + $0x2bc] ss:$12 sps:$4 sm:$0xff]  }
 0x715   :  { %10262 = vmatpush3.bf16.msra.mxu1 %v6832_v20 }
 0x716   :  { %v6761_v27 = vadd.f32 %v6712_v4, %v6425_v28  ;;  %v6808_v47 = vmax.f32 %v6760_v44, 0.0 }
 0x717   :  { %7883 = vmatmul.mubr.bf16.gmra.mrb[28].mxu1 %v11839_v42  ;;  %v11905_v42 = vld [vmem:[%s16578_s3 + $0x2b8] ss:$12 sps:$4 sm:$0xff]  }
 0x718   :  { %v6809_v16 = vmax.f32 %v6761_v27, 0.0  ;;  %7890 = vmatprep.mubr.bf16.mxu1 %v11844_v41  ;;  %v11908_v41 = vld [vmem:[%s16578_s3 + $0x2d0] ss:$12 sps:$4 sm:$0xff]   ;;  %v11913_v27 = vld [vmem:[%s16578_s3 + $0x2ec] ss:$12 sps:$4 sm:$0xff]  }
 0x71a   :  { %v6833_v8 = vpack.c.bf16 %v6809_v16, %v6808_v47 }
 0x71c   :  { %10263 = vmatprep.subr.bf16.mxu1 %v6833_v8 }
 0x71d   :  { %10264 = vmatpush3.bf16.msra.mxu1 %v6833_v8 }
 0x71e   :  { %9113 = vmatprep.subr.bf16.mxu1 %v17006_v13 }
 0x71f   :  { %7891 = vmatmul.mubr.bf16.gmra.mrb[32].mxu1 %v11842_v21  ;;  %v11911_v21 = vld [vmem:[%s16578_s3 + $0x2e8] ss:$12 sps:$4 sm:$0xff]  }
 0x720   :  { %7898 = vmatprep.mubr.bf16.mxu1 %v11847_v51 }
 0x727   :  { %7899 = vmatmul.mubr.bf16.gmra.mrb[36].mxu1 %v11845_v62  ;;  %v11916_v62 = vld [vmem:[%s16578_s3 + $0x304] ss:$12 sps:$4 sm:$0xff]  }
 0x728   :  { %7906 = vmatprep.mubr.bf16.mxu1 %v11850_v26 }
 0x72f   :  { %7907 = vmatmul.mubr.bf16.gmra.mrb[40].mxu1 %v11848_v5 }
 0x730   :  { %7914 = vmatprep.mubr.bf16.mxu1 %v11853_v12 }
 0x737   :  { %7915 = vmatmul.mubr.bf16.gmra.mrb[44].mxu1 %v11851_v19  ;;  %v11914_v19 = vld [vmem:[%s16578_s3 + $0x300] ss:$12 sps:$4 sm:$0xff]  }
 0x738   :  { %7922 = vmatprep.mubr.bf16.mxu1 %v11856_v31 }
 0x73f   :  { %7923 = vmatmul.mubr.bf16.gmra.mrb[48].mxu1 %v11854_v14  ;;  %v11919_v14 = vld [vmem:[%s16578_s3 + $0x31c] ss:$12 sps:$4 sm:$0xff]  }
 0x740   :  { %7930 = vmatprep.mubr.bf16.mxu1 %v11859_v1 }
 0x747   :  { %7931 = vmatmul.mubr.bf16.gmra.mrb[52].mxu1 %v11857_v33 }
 0x748   :  { %7938 = vmatprep.mubr.bf16.mxu1 %v11862_v53 }
 0x74f   :  { %7939 = vmatmul.mubr.bf16.gmra.mrb[56].mxu1 %v11860_v11  ;;  %v11917_v11 = vld [vmem:[%s16578_s3 + $0x318] ss:$12 sps:$4 sm:$0xff]  }
 0x750   :  { %7946 = vmatprep.mubr.bf16.mxu1 %v11865_v24 }
 0x757   :  { %7947 = vmatmul.mubr.bf16.gmra.mrb[60].mxu1 %v11863_v3  ;;  %v11922_v3 = vld [vmem:[%s16578_s3 + $0x334] ss:$12 sps:$4 sm:$0xff]  }
 0x758   :  { %7954 = vmatprep.mubr.bf16.mxu1 %v11868_v40 }
 0x75f   :  { %7955 = vmatmul.mubr.bf16.gmra.mrb[64].mxu1 %v11866_v35 }
 0x760   :  { %7962 = vmatprep.mubr.bf16.mxu1 %v11871_v54 }
 0x767   :  { %7963 = vmatmul.mubr.bf16.gmra.mrb[68].mxu1 %v11869_v37  ;;  %v11920_v37 = vld [vmem:[%s16578_s3 + $0x330] ss:$12 sps:$4 sm:$0xff]  }
 0x768   :  { %7970 = vmatprep.mubr.bf16.mxu1 %v11874_v25 }
 0x76f   :  { %7971 = vmatmul.mubr.bf16.gmra.mrb[72].mxu1 %v11872_v17  ;;  %v11925_v17 = vld [vmem:[%s16578_s3 + $0x34c] ss:$12 sps:$4 sm:$0xff]  }
 0x770   :  { %7978 = vmatprep.mubr.bf16.mxu1 %v11877_v36 }
 0x777   :  { %7979 = vmatmul.mubr.bf16.gmra.mrb[76].mxu1 %v11875_v7 }
 0x778   :  { %7986 = vmatprep.mubr.bf16.mxu1 %v11880_v18 }
 0x77f   :  { %7987 = vmatmul.mubr.bf16.gmra.mrb[80].mxu1 %v11878_v50  ;;  %v11923_v50 = vld [vmem:[%s16578_s3 + $0x348] ss:$12 sps:$4 sm:$0xff]  }
 0x780   :  { %7994 = vmatprep.mubr.bf16.mxu1 %v11883_v63 }
 0x787   :  { %7995 = vmatmul.mubr.bf16.gmra.mrb[84].mxu1 %v11881_v22  ;;  %v11928_v22 = vld [vmem:[%s16578_s3 + $0x364] ss:$12 sps:$4 sm:$0xff]  }
 0x788   :  { %8002 = vmatprep.mubr.bf16.mxu1 %v11886_v30 }
 0x78f   :  { %8003 = vmatmul.mubr.bf16.gmra.mrb[88].mxu1 %v11884_v23 }
 0x790   :  { %8010 = vmatprep.mubr.bf16.mxu1 %v11889_v32 }
 0x797   :  { %8011 = vmatmul.mubr.bf16.gmra.mrb[92].mxu1 %v11887_v49  ;;  %v11926_v49 = vld [vmem:[%s16578_s3 + $0x360] ss:$12 sps:$4 sm:$0xff]  }
 0x798   :  { %8018 = vmatprep.mubr.bf16.mxu1 %v11892_v60 }
 0x79f   :  { %8019 = vmatmul.mubr.bf16.gmra.mrb[96].mxu1 %v11890_v48  ;;  %v11931_v48 = vld [vmem:[%s16578_s3 + $0x37c] ss:$12 sps:$4 sm:$0xff]  }
 0x7a0   :  { %8026 = vmatprep.mubr.bf16.mxu1 %v11895_v9 }
 0x7a7   :  { %8027 = vmatmul.mubr.bf16.gmra.mrb[100].mxu1 %v11893_v55 }
 0x7a8   :  { %8034 = vmatprep.mubr.bf16.mxu1 %v11898_v39 }
 0x7af   :  { %8035 = vmatmul.mubr.bf16.gmra.mrb[104].mxu1 %v11896_v45  ;;  %v11929_v45 = vld [vmem:[%s16578_s3 + $0x378] ss:$12 sps:$4 sm:$0xff]  }
 0x7b0   :  { %8042 = vmatprep.mubr.bf16.mxu1 %v11901_v29 }
 0x7b2   :  { %v15634_v59 = vpop.f32.mrb[0].mxu1 }
 0x7b3   :  { %v7830_v61 = vpop.f32.mrb[1].mxu1 }
 0x7b4   :  { %v15642_v10 = vpop.f32.mrb[2].mxu1 }
 0x7b5   :  { %v7833_v6 = vpop.f32.mrb[3].mxu1 }
 0x7b7   :  { %8043 = vmatmul.mubr.bf16.gmra.mrb[108].mxu1 %v11899_v46  ;;  %v11934_v46 = vld [vmem:[%s16578_s3 + $0x394] ss:$12 sps:$4 sm:$0xff]  }
 0x7b8   :  { %8050 = vmatprep.mubr.bf16.mxu1 %v11904_v56 }
 0x7ba   :  { %v15644_v58 = vpop.f32.mrb[4].mxu1 }
 0x7bb   :  { %v7838_v38 = vpop.f32.mrb[5].mxu1 }
 0x7bc   :  { %v15652_v0 = vpop.f32.mrb[6].mxu1 }
 0x7bd   :  { %v7841_v20 = vpop.f32.mrb[7].mxu1 }
 0x7bf   :  { %8051 = vmatmul.mubr.bf16.gmra.mrb[112].mxu1 %v11902_v15  ;;  %v11932_v15 = vld [vmem:[%s16578_s3 + $0x390] ss:$12 sps:$4 sm:$0xff]  }
 0x7c0   :  { %8058 = vmatprep.mubr.bf16.mxu1 %v11907_v57  ;;  %v11937_v57 = vld [vmem:[%s16578_s3 + $0x3ac] ss:$12 sps:$4 sm:$0xff]  }
 0x7c2   :  { %v15654_v34 = vpop.f32.mrb[8].mxu1 }
 0x7c3   :  { %v7846_v43 = vpop.f32.mrb[9].mxu1 }
 0x7c4   :  { %v15662_v52 = vpop.f32.mrb[10].mxu1 }
 0x7c5   :  { %v7849_v28 = vpop.f32.mrb[11].mxu1 }
 0x7c7   :  { %8059 = vmatmul.mubr.bf16.gmra.mrb[116].mxu1 %v11905_v42 }
 0x7c8   :  { %8066 = vmatprep.mubr.bf16.mxu1 %v11910_v2  ;;  %v11935_v2 = vld [vmem:[%s16578_s3 + $0x3a8] ss:$12 sps:$4 sm:$0xff]  }
 0x7ca   :  { %v15664_v44 = vpop.f32.mrb[12].mxu1 }
 0x7cb   :  { %v7854_v4 = vpop.f32.mrb[13].mxu1 }
 0x7cc   :  { %v15672_v47 = vpop.f32.mrb[14].mxu1 }
 0x7cd   :  { %v7857_v16 = vpop.f32.mrb[15].mxu1 }
 0x7cf   :  { %8067 = vmatmul.mubr.bf16.gmra.mrb[120].mxu1 %v11908_v41  ;;  %v11940_v41 = vld [vmem:[%s16578_s3 + $0x3c4] ss:$12 sps:$4 sm:$0xff]  }
 0x7d0   :  { %8074 = vmatprep.mubr.bf16.mxu1 %v11913_v27 }
 0x7d2   :  { %v15674_v8 = vpop.f32.mrb[16].mxu1 }
 0x7d3   :  { %v7862_v51 = vpop.f32.mrb[17].mxu1 }
 0x7d4   :  { %v15682_v26 = vpop.f32.mrb[18].mxu1 }
 0x7d5   :  { %v7865_v5 = vpop.f32.mrb[19].mxu1 }
 0x7d7   :  { %8075 = vmatmul.mubr.bf16.gmra.mrb[124].mxu1 %v11911_v21  ;;  %v11938_v21 = vld [vmem:[%s16578_s3 + $0x3c0] ss:$12 sps:$4 sm:$0xff]  }
 0x7d8   :  { %8082 = vmatprep.mubr.bf16.mxu1 %v11916_v62  ;;  %v11943_v62 = vld [vmem:[%s16578_s3 + $0x3dc] ss:$12 sps:$4 sm:$0xff]  }
 0x7da   :  { %v15684_v12 = vpop.f32.mrb[20].mxu1 }
 0x7db   :  { %v7870_v31 = vpop.f32.mrb[21].mxu1 }
 0x7dc   :  { %v15692_v1 = vpop.f32.mrb[22].mxu1 }
 0x7dd   :  { %v7873_v33 = vpop.f32.mrb[23].mxu1 }
 0x7df   :  { %8083 = vmatmul.mubr.bf16.gmra.mrb[128].mxu1 %v11914_v19 }
 0x7e0   :  { %8090 = vmatprep.mubr.bf16.mxu1 %v11919_v14  ;;  %v11941_v14 = vld [vmem:[%s16578_s3 + $0x3d8] ss:$12 sps:$4 sm:$0xff]  }
 0x7e2   :  { %v15694_v53 = vpop.f32.mrb[24].mxu1 }
 0x7e3   :  { %v7878_v24 = vpop.f32.mrb[25].mxu1 }
 0x7e4   :  { %v15702_v40 = vpop.f32.mrb[26].mxu1 }
 0x7e5   :  { %v7881_v35 = vpop.f32.mrb[27].mxu1 }
 0x7e7   :  { %8091 = vmatmul.mubr.bf16.gmra.mrb[132].mxu1 %v11917_v11  ;;  %v11946_v11 = vld [vmem:[%s16578_s3 + $0x3f4] ss:$12 sps:$4 sm:$0xff]  }
 0x7e8   :  { %8098 = vmatprep.mubr.bf16.mxu1 %v11922_v3 }
 0x7ea   :  { %v15704_v54 = vpop.f32.mrb[28].mxu1 }
 0x7eb   :  { %v7886_v25 = vpop.f32.mrb[29].mxu1 }
 0x7ec   :  { %v15712_v36 = vpop.f32.mrb[30].mxu1 }
 0x7ed   :  { %v7889_v7 = vpop.f32.mrb[31].mxu1 }
 0x7ef   :  { %8099 = vmatmul.mubr.bf16.gmra.mrb[136].mxu1 %v11920_v37  ;;  %v11944_v37 = vld [vmem:[%s16578_s3 + $0x3f0] ss:$12 sps:$4 sm:$0xff]  }
 0x7f0   :  { %8106 = vmatprep.mubr.bf16.mxu1 %v11925_v17  ;;  %v11949_v17 = vld [vmem:[%s16578_s3 + $0x40c] ss:$12 sps:$4 sm:$0xff]  }
 0x7f2   :  { %v15714_v18 = vpop.f32.mrb[32].mxu1 }
 0x7f3   :  { %v7894_v63 = vpop.f32.mrb[33].mxu1 }
 0x7f4   :  { %v15722_v30 = vpop.f32.mrb[34].mxu1 }
 0x7f5   :  { %v7897_v23 = vpop.f32.mrb[35].mxu1 }
 0x7f7   :  { %8107 = vmatmul.mubr.bf16.gmra.mrb[140].mxu1 %v11923_v50 }
 0x7f8   :  { %8114 = vmatprep.mubr.bf16.mxu1 %v11928_v22  ;;  %v11947_v22 = vld [vmem:[%s16578_s3 + $0x408] ss:$12 sps:$4 sm:$0xff]  }
 0x7fa   :  { %v15724_v32 = vpop.f32.mrb[36].mxu1 }
 0x7fb   :  { %v7902_v60 = vpop.f32.mrb[37].mxu1 }
 0x7fc   :  { %v15732_v9 = vpop.f32.mrb[38].mxu1 }
 0x7fd   :  { %v7905_v55 = vpop.f32.mrb[39].mxu1 }
 0x7ff   :  { %8115 = vmatmul.mubr.bf16.gmra.mrb[144].mxu1 %v11926_v49  ;;  %v11952_v49 = vld [vmem:[%s16578_s3 + $0x424] ss:$12 sps:$4 sm:$0xff]  }
 0x800   :  { %8122 = vmatprep.mubr.bf16.mxu1 %v11931_v48 }
 0x802   :  { %v15734_v39 = vpop.f32.mrb[40].mxu1 }
 0x803   :  { %v7910_v29 = vpop.f32.mrb[41].mxu1 }
 0x804   :  { %v15742_v61 = vpop.f32.mrb[42].mxu1 }
 0x805   :  { %v7913_v56 = vpop.f32.mrb[43].mxu1 }
 0x807   :  { %8123 = vmatmul.mubr.bf16.gmra.mrb[168].mxu1 %v11929_v45  ;;  %v11950_v45 = vld [vmem:[%s16578_s3 + $0x420] ss:$12 sps:$4 sm:$0xff]  }
 0x808   :  { %8130 = vmatprep.mubr.bf16.mxu1 %v11934_v46  ;;  %v11955_v46 = vld [vmem:[%s16578_s3 + $0x43c] ss:$12 sps:$4 sm:$0xff]  }
 0x80a   :  { %v15744_v6 = vpop.f32.mrb[44].mxu1 }
 0x80b   :  { %v7918_v38 = vpop.f32.mrb[45].mxu1 }
 0x80c   :  { %v15752_v20 = vpop.f32.mrb[46].mxu1 }
 0x80d   :  { %v7921_v42 = vpop.f32.mrb[47].mxu1 }
 0x80f   :  { %8131 = vmatmul.mubr.bf16.gmra.mrb[172].mxu1 %v11932_v15 }
 0x810   :  { %8138 = vmatprep.mubr.bf16.mxu1 %v11937_v57  ;;  %v11953_v57 = vld [vmem:[%s16578_s3 + $0x438] ss:$12 sps:$4 sm:$0xff]  }
 0x812   :  { %v15754_v43 = vpop.f32.mrb[48].mxu1 }
 0x813   :  { %v7926_v28 = vpop.f32.mrb[49].mxu1 }
 0x814   :  { %v15762_v4 = vpop.f32.mrb[50].mxu1 }
 0x815   :  { %v7929_v27 = vpop.f32.mrb[51].mxu1 }
 0x817   :  { %8139 = vmatmul.mubr.bf16.gmra.mrb[176].mxu1 %v11935_v2  ;;  %v11958_v2 = vld [vmem:[%s16578_s3 + $0x454] ss:$12 sps:$4 sm:$0xff]  }
 0x818   :  { %8146 = vmatprep.mubr.bf16.mxu1 %v11940_v41 }
 0x81a   :  { %v15764_v16 = vpop.f32.mrb[52].mxu1 }
 0x81b   :  { %v7934_v51 = vpop.f32.mrb[53].mxu1 }
 0x81c   :  { %v15772_v5 = vpop.f32.mrb[54].mxu1 }
 0x81d   :  { %v7937_v19 = vpop.f32.mrb[55].mxu1 }
 0x81f   :  { %8147 = vmatmul.mubr.bf16.gmra.mrb[180].mxu1 %v11938_v21  ;;  %v11956_v21 = vld [vmem:[%s16578_s3 + $0x450] ss:$12 sps:$4 sm:$0xff]  }
 0x820   :  { %8154 = vmatprep.mubr.bf16.mxu1 %v11943_v62  ;;  %v11961_v62 = vld [vmem:[%s16578_s3 + $0x46c] ss:$12 sps:$4 sm:$0xff]  }
 0x822   :  { %v15774_v31 = vpop.f32.mrb[56].mxu1 }
 0x823   :  { %v7942_v33 = vpop.f32.mrb[57].mxu1 }
 0x824   :  { %v15782_v24 = vpop.f32.mrb[58].mxu1 }
 0x825   :  { %v7945_v3 = vpop.f32.mrb[59].mxu1 }
 0x827   :  { %8155 = vmatmul.mubr.bf16.gmra.mrb[184].mxu1 %v11941_v14 }
 0x828   :  { %8162 = vmatprep.mubr.bf16.mxu1 %v11946_v11  ;;  %v11959_v11 = vld [vmem:[%s16578_s3 + $0x468] ss:$12 sps:$4 sm:$0xff]  }
 0x82a   :  { %v15784_v35 = vpop.f32.mrb[60].mxu1 }
 0x82b   :  { %v7950_v25 = vpop.f32.mrb[61].mxu1 }
 0x82c   :  { %v15792_v7 = vpop.f32.mrb[62].mxu1 }
 0x82d   :  { %v7953_v50 = vpop.f32.mrb[63].mxu1 }
 0x82f   :  { %8163 = vmatmul.mubr.bf16.gmra.mrb[188].mxu1 %v11944_v37  ;;  %v11962_v37 = vld [vmem:[%s16578_s3 + $0x8] ss:$12 sps:$4 sm:$0xff]  }
 0x830   :  { %8170 = vmatprep.mubr.bf16.mxu1 %v11949_v17 }
 0x832   :  { %v15794_v63 = vpop.f32.mrb[64].mxu1 }
 0x833   :  { %v7958_v23 = vpop.f32.mrb[65].mxu1 }
 0x834   :  { %v15802_v60 = vpop.f32.mrb[66].mxu1 }
 0x835   :  { %v7961_v48 = vpop.f32.mrb[67].mxu1 }
 0x837   :  { %8171 = vmatmul.mubr.bf16.gmra.mrb[192].mxu1 %v11947_v22  ;;  %v11963_v22 = vld [vmem:[%s16578_s3 + $0x20] ss:$12 sps:$4 sm:$0xff]  }
 0x838   :  { %8178 = vmatprep.mubr.bf16.mxu1 %v11952_v49  ;;  %v11964_v49 = vld [vmem:[%s16578_s3 + $0x38] ss:$12 sps:$4 sm:$0xff]  }
 0x83a   :  { %v15804_v55 = vpop.f32.mrb[68].mxu1 }
 0x83b   :  { %v7966_v29 = vpop.f32.mrb[69].mxu1 }
 0x83c   :  { %v15812_v56 = vpop.f32.mrb[70].mxu1 }
 0x83d   :  { %v7969_v15 = vpop.f32.mrb[71].mxu1 }
 0x83f   :  { %8179 = vmatmul.mubr.bf16.gmra.mrb[196].mxu1 %v11950_v45 }
 0x840   :  { %8186 = vmatprep.mubr.bf16.mxu1 %v11955_v46  ;;  %v11965_v46 = vld [vmem:[%s16578_s3 + $0x50] ss:$12 sps:$4 sm:$0xff]  }
 0x842   :  { %v15814_v38 = vpop.f32.mrb[72].mxu1 }
 0x843   :  { %v7974_v42 = vpop.f32.mrb[73].mxu1 }
 0x844   :  { %v15822_v28 = vpop.f32.mrb[74].mxu1 }
 0x845   :  { %v7977_v41 = vpop.f32.mrb[75].mxu1 }
 0x847   :  { %8187 = vmatmul.mubr.bf16.gmra.mrb[200].mxu1 %v11953_v57  ;;  %v11966_v57 = vld [vmem:[%s16578_s3 + $0x68] ss:$12 sps:$4 sm:$0xff]  }
 0x848   :  { %8194 = vmatprep.mubr.bf16.mxu1 %v11958_v2 }
 0x84a   :  { %v15824_v27 = vpop.f32.mrb[76].mxu1 }
 0x84b   :  { %v7982_v51 = vpop.f32.mrb[77].mxu1 }
 0x84c   :  { %v15832_v19 = vpop.f32.mrb[78].mxu1 }
 0x84d   :  { %v7985_v14 = vpop.f32.mrb[79].mxu1 }
 0x84f   :  { %8195 = vmatmul.mubr.bf16.gmra.mrb[204].mxu1 %v11956_v21  ;;  %v11967_v21 = vld [vmem:[%s16578_s3 + $0x80] ss:$12 sps:$4 sm:$0xff]  }
 0x850   :  { %8202 = vmatprep.mubr.bf16.mxu1 %v11961_v62  ;;  %v11968_v62 = vld [vmem:[%s16578_s3 + $0x98] ss:$12 sps:$4 sm:$0xff]  }
 0x852   :  { %v15834_v33 = vpop.f32.mrb[80].mxu1 }
 0x853   :  { %v7990_v3 = vpop.f32.mrb[81].mxu1 }
 0x854   :  { %v15842_v25 = vpop.f32.mrb[82].mxu1 }
 0x855   :  { %v7993_v17 = vpop.f32.mrb[83].mxu1 }
 0x857   :  { %8203 = vmatmul.mubr.bf16.gmra.mrb[208].mxu1 %v11959_v11 }
 0x858   :  { %10265 = vmatprep.mubr.bf16.mxu1 %v11962_v37  ;;  %v11969_v37 = vld [vmem:[%s16578_s3 + $0xb0] ss:$12 sps:$4 sm:$0xff]  }
 0x85a   :  { %v15844_v50 = vpop.f32.mrb[84].mxu1 }
 0x85b   :  { %v7998_v23 = vpop.f32.mrb[85].mxu1 }
 0x85c   :  { %v15852_v48 = vpop.f32.mrb[86].mxu1 }
 0x85d   :  { %v8001_v45 = vpop.f32.mrb[87].mxu1 }
 0x85f   :  { %10266 = vmatmul.mubr.bf16.vlgmr.msra.gmra.mrb[212].mxu1 %v11963_v22  ;;  %v11970_v22 = vld [vmem:[%s16578_s3 + $0xc8] ss:$12 sps:$4 sm:$0xff]  }
 0x860   :  { %10269 = vmatprep.mubr.bf16.mxu1 %v11964_v49 }
 0x862   :  { %v15854_v29 = vpop.f32.mrb[88].mxu1 }
 0x863   :  { %v8006_v15 = vpop.f32.mrb[89].mxu1 }
 0x864   :  { %v15862_v42 = vpop.f32.mrb[90].mxu1 }
 0x865   :  { %v8009_v2 = vpop.f32.mrb[91].mxu1 }
 0x867   :  { %10270 = vmatmul.mubr.bf16.gmra.mrb[216].mxu1 %v11965_v46  ;;  %v11971_v46 = vld [vmem:[%s16578_s3 + $0xe0] ss:$12 sps:$4 sm:$0xff]  }
 0x868   :  { %10273 = vmatprep.mubr.bf16.mxu1 %v11966_v57  ;;  %v11972_v57 = vld [vmem:[%s16578_s3 + $0xf8] ss:$12 sps:$4 sm:$0xff]  }
 0x86a   :  { %v15864_v41 = vpop.f32.mrb[92].mxu1 }
 0x86b   :  { %v8014_v51 = vpop.f32.mrb[93].mxu1 }
 0x86c   :  { %v15872_v14 = vpop.f32.mrb[94].mxu1 }
 0x86d   :  { %v8017_v11 = vpop.f32.mrb[95].mxu1 }
 0x86f   :  { %10274 = vmatmul.mubr.bf16.gmra.mrb[220].mxu1 %v11967_v21 }
 0x870   :  { %10277 = vmatprep.mubr.bf16.mxu1 %v11968_v62  ;;  %v11973_v62 = vld [vmem:[%s16578_s3 + $0x110] ss:$12 sps:$4 sm:$0xff]  }
 0x872   :  { %v15874_v3 = vpop.f32.mrb[96].mxu1 }
 0x873   :  { %v8022_v17 = vpop.f32.mrb[97].mxu1 }
 0x874   :  { %v15882_v23 = vpop.f32.mrb[98].mxu1 }
 0x875   :  { %17177 = vst [vmem:[#allocation3_spill] sm:$0xff] %v15882_v23  ;;  %v8025_v49 = vpop.f32.mrb[99].mxu1 }
 0x877   :  { %10278 = vmatmul.mubr.bf16.gmra.mrb[224].mxu1 %v11969_v37  ;;  %v11974_v37 = vld [vmem:[%s16578_s3 + $0x128] ss:$12 sps:$4 sm:$0xff]  }
 0x878   :  { %10281 = vmatprep.mubr.bf16.mxu1 %v11970_v22 }
 0x87a   :  { %v15884_v45 = vpop.f32.mrb[100].mxu1 }
 0x87b   :  { %v8030_v15 = vpop.f32.mrb[101].mxu1 }
 0x87c   :  { %v15892_v2 = vpop.f32.mrb[102].mxu1 }
 0x87d   :  { %17178 = vst [vmem:[#allocation88_spill] sm:$0xff] %v15892_v2  ;;  %v8033_v21 = vpop.f32.mrb[103].mxu1 }
 0x87f   :  { %10282 = vmatmul.mubr.bf16.gmra.mrb[228].mxu1 %v11971_v46  ;;  %v11975_v46 = vld [vmem:[%s16578_s3 + $0x140] ss:$12 sps:$4 sm:$0xff]  }
 0x880   :  { %10285 = vmatprep.mubr.bf16.mxu1 %v11972_v57  ;;  %v11976_v57 = vld [vmem:[%s16578_s3 + $0x158] ss:$12 sps:$4 sm:$0xff]  }
 0x882   :  { %v15894_v51 = vpop.f32.mrb[104].mxu1 }
 0x883   :  { %17179 = vst [vmem:[#allocation4_spill] sm:$0xff] %v15894_v51  ;;  %v8038_v11 = vpop.f32.mrb[105].mxu1 }
 0x884   :  { %v15902_v17 = vpop.f32.mrb[106].mxu1 }
 0x885   :  { %17180 = vst [vmem:[#allocation89_spill] sm:$0xff] %v15902_v17  ;;  %v8041_v22 = vpop.f32.mrb[107].mxu1 }
 0x886   :  { %v11978_v22 = vld [vmem:[%s16578_s3 + $0x188] ss:$12 sps:$4 sm:$0xff]  }
 0x887   :  { %10286 = vmatmul.mubr.bf16.gmra.mrb[232].mxu1 %v11973_v62  ;;  %v11977_v62 = vld [vmem:[%s16578_s3 + $0x170] ss:$12 sps:$4 sm:$0xff]  }
 0x888   :  { %10289 = vmatprep.mubr.bf16.mxu1 %v11974_v37 }
 0x88a   :  { %v15904_v49 = vpop.f32.mrb[108].mxu1 }
 0x88b   :  { %17181 = vst [vmem:[#allocation5_spill] sm:$0xff] %v15904_v49  ;;  %v8046_v15 = vpop.f32.mrb[109].mxu1 }
 0x88c   :  { %v15912_v21 = vpop.f32.mrb[110].mxu1 }
 0x88d   :  { %17182 = vst [vmem:[#allocation90_spill] sm:$0xff] %v15912_v21  ;;  %v8049_v11 = vpop.f32.mrb[111].mxu1 }
 0x88e   :  { %v11980_v11 = vld [vmem:[%s16578_s3 + $0x1b8] ss:$12 sps:$4 sm:$0xff]  }
 0x88f   :  { %10290 = vmatmul.mubr.bf16.gmra.mrb[236].mxu1 %v11975_v46  ;;  %v11979_v46 = vld [vmem:[%s16578_s3 + $0x1a0] ss:$12 sps:$4 sm:$0xff]  }
 0x890   :  { %10293 = vmatprep.mubr.bf16.mxu1 %v11976_v57 }
 0x892   :  { %v15914_v13 = vpop.f32.mrb[112].mxu1 }
 0x893   :  { %17183 = vst [vmem:[#allocation6_spill] sm:$0xff] %v15914_v13  ;;  %v8054_v37 = vpop.f32.mrb[113].mxu1 }
 0x894   :  { %v15922_v15 = vpop.f32.mrb[114].mxu1 }
 0x895   :  { %17184 = vst [vmem:[#allocation91_spill] sm:$0xff] %v15922_v15  ;;  %v8057_v17 = vpop.f32.mrb[115].mxu1 }
 0x896   :  { %v11981_v17 = vld [vmem:[%s16578_s3 + $0x1d0] ss:$12 sps:$4 sm:$0xff]  }
 0x897   :  { %10294 = vmatmul.mubr.bf16.gmra.mrb[240].mxu1 %v11977_v62 }
 0x898   :  { %10297 = vmatprep.mubr.bf16.mxu1 %v11978_v22  ;;  %v11982_v22 = vld [vmem:[%s16578_s3 + $0x1e8] ss:$12 sps:$4 sm:$0xff]  }
 0x89a   :  { %v15924_v21 = vpop.f32.mrb[116].mxu1 }
 0x89b   :  { %17185 = vst [vmem:[#allocation7_spill] sm:$0xff] %v15924_v21  ;;  %v8062_v57 = vpop.f32.mrb[117].mxu1 }
 0x89c   :  { %v15932_v37 = vpop.f32.mrb[118].mxu1 }
 0x89d   :  { %17186 = vst [vmem:[#allocation92_spill] sm:$0xff] %v15932_v37  ;;  %v8065_v13 = vpop.f32.mrb[119].mxu1 }
 0x89e   :  { %v11983_v13 = vld [vmem:[%s16578_s3 + $0x200] ss:$12 sps:$4 sm:$0xff]  }
 0x89f   :  { %10298 = vmatmul.mubr.bf16.gmra.mrb[244].mxu1 %v11979_v46 }
 0x8a0   :  { %10301 = vmatprep.mubr.bf16.mxu1 %v11980_v11  ;;  %v11984_v11 = vld [vmem:[%s16578_s3 + $0x218] ss:$12 sps:$4 sm:$0xff]  }
 0x8a2   :  { %v15934_v15 = vpop.f32.mrb[120].mxu1 }
 0x8a3   :  { %17187 = vst [vmem:[#allocation8_spill] sm:$0xff] %v15934_v15  ;;  %v8070_v62 = vpop.f32.mrb[121].mxu1 }
 0x8a4   :  { %v15942_v57 = vpop.f32.mrb[122].mxu1 }
 0x8a5   :  { %17188 = vst [vmem:[#allocation93_spill] sm:$0xff] %v15942_v57  ;;  %v8073_v21 = vpop.f32.mrb[123].mxu1 }
 0x8a6   :  { %v11985_v21 = vld [vmem:[%s16578_s3 + $0x230] ss:$12 sps:$4 sm:$0xff]  }
 0x8a7   :  { %10302 = vmatmul.mubr.bf16.gmra.mrb[248].mxu1 %v11981_v17 }
 0x8a8   :  { %10305 = vmatprep.mubr.bf16.mxu1 %v11982_v22  ;;  %v11986_v22 = vld [vmem:[%s16578_s3 + $0x248] ss:$12 sps:$4 sm:$0xff]  }
 0x8aa   :  { %v15944_v37 = vpop.f32.mrb[124].mxu1 }
 0x8ab   :  { %17189 = vst [vmem:[#allocation9_spill] sm:$0xff] %v15944_v37  ;;  %v8078_v46 = vpop.f32.mrb[125].mxu1 }
 0x8ac   :  { %v15952_v62 = vpop.f32.mrb[126].mxu1 }
 0x8ad   :  { %17190 = vst [vmem:[#allocation45_spill] sm:$0xff] %v15952_v62  ;;  %v8081_v15 = vpop.f32.mrb[127].mxu1 }
 0x8ae   :  { %v11987_v15 = vld [vmem:[%s16578_s3 + $0x260] ss:$12 sps:$4 sm:$0xff]  }
 0x8af   :  { %10306 = vmatmul.mubr.bf16.gmra.mrb[252].mxu1 %v11983_v13 }
 0x8b0   :  { %10309 = vmatprep.mubr.bf16.mxu1 %v11984_v11  ;;  %v11988_v11 = vld [vmem:[%s16578_s3 + $0x278] ss:$12 sps:$4 sm:$0xff]  }
 0x8b2   :  { %v15954_v57 = vpop.f32.mrb[128].mxu1 }
 0x8b3   :  { %17191 = vst [vmem:[#allocation94_spill] sm:$0xff] %v15954_v57  ;;  %v8086_v17 = vpop.f32.mrb[129].mxu1 }
 0x8b4   :  { %v15962_v46 = vpop.f32.mrb[130].mxu1 }
 0x8b5   :  { %17192 = vst [vmem:[#allocation10_spill] sm:$0xff] %v15962_v46  ;;  %v8089_v37 = vpop.f32.mrb[131].mxu1 }
 0x8b6   :  { %v11989_v37 = vld [vmem:[%s16578_s3 + $0x290] ss:$12 sps:$4 sm:$0xff]  }
 0x8b7   :  { %10310 = vmatmul.mubr.bf16.gmra.mrb[148].mxu1 %v11985_v21 }
 0x8b8   :  { %10313 = vmatprep.mubr.bf16.mxu1 %v11986_v22  ;;  %v11990_v22 = vld [vmem:[%s16578_s3 + $0x2a8] ss:$12 sps:$4 sm:$0xff]  }
 0x8ba   :  { %v15964_v62 = vpop.f32.mrb[132].mxu1 }
 0x8bb   :  { %17193 = vst [vmem:[#allocation62_spill] sm:$0xff] %v15964_v62  ;;  %v8094_v13 = vpop.f32.mrb[133].mxu1 }
 0x8bc   :  { %v15972_v17 = vpop.f32.mrb[134].mxu1 }
 0x8bd   :  { %17194 = vst [vmem:[#allocation46_spill] sm:$0xff] %v15972_v17  ;;  %v8097_v57 = vpop.f32.mrb[135].mxu1 }
 0x8be   :  { %v11991_v57 = vld [vmem:[%s16578_s3 + $0x2c0] ss:$12 sps:$4 sm:$0xff]  }
 0x8bf   :  { %10314 = vmatmul.mubr.bf16.gmra.mrb[152].mxu1 %v11987_v15 }
 0x8c0   :  { %10317 = vmatprep.mubr.bf16.mxu1 %v11988_v11  ;;  %v11992_v11 = vld [vmem:[%s16578_s3 + $0x2d8] ss:$12 sps:$4 sm:$0xff]  }
 0x8c2   :  { %v15974_v46 = vpop.f32.mrb[136].mxu1 }
 0x8c3   :  { %17195 = vst [vmem:[#allocation63_spill] sm:$0xff] %v15974_v46  ;;  %v8102_v21 = vpop.f32.mrb[137].mxu1 }
 0x8c4   :  { %v15982_v13 = vpop.f32.mrb[138].mxu1 }
 0x8c5   :  { %17196 = vst [vmem:[#allocation95_spill] sm:$0xff] %v15982_v13  ;;  %v8105_v62 = vpop.f32.mrb[139].mxu1 }
 0x8c6   :  { %v11993_v62 = vld [vmem:[%s16578_s3 + $0x2f0] ss:$12 sps:$4 sm:$0xff]  }
 0x8c7   :  { %10318 = vmatmul.mubr.bf16.gmra.mrb[156].mxu1 %v11989_v37 }
 0x8c8   :  { %10321 = vmatprep.mubr.bf16.mxu1 %v11990_v22  ;;  %v11994_v22 = vld [vmem:[%s16578_s3 + $0x308] ss:$12 sps:$4 sm:$0xff]  }
 0x8ca   :  { %v15984_v17 = vpop.f32.mrb[140].mxu1 }
 0x8cb   :  { %17197 = vst [vmem:[#allocation11_spill] sm:$0xff] %v15984_v17  ;;  %v8110_v15 = vpop.f32.mrb[141].mxu1 }
 0x8cc   :  { %v15992_v21 = vpop.f32.mrb[142].mxu1 }
 0x8cd   :  { %17198 = vst [vmem:[#allocation47_spill] sm:$0xff] %v15992_v21  ;;  %v8113_v46 = vpop.f32.mrb[143].mxu1 }
 0x8ce   :  { %v11995_v46 = vld [vmem:[%s16578_s3 + $0x320] ss:$12 sps:$4 sm:$0xff]  }
 0x8cf   :  { %10322 = vmatmul.mubr.bf16.gmra.mrb[160].mxu1 %v11991_v57 }
 0x8d0   :  { %10325 = vmatprep.mubr.bf16.mxu1 %v11992_v11  ;;  %v11996_v11 = vld [vmem:[%s16578_s3 + $0x338] ss:$12 sps:$4 sm:$0xff]  }
 0x8d2   :  { %v15994_v13 = vpop.f32.mrb[144].mxu1 }
 0x8d3   :  { %17199 = vst [vmem:[#allocation96_spill] sm:$0xff] %v15994_v13  ;;  %v8118_v37 = vpop.f32.mrb[145].mxu1 }
 0x8d4   :  { %v16002_v15 = vpop.f32.mrb[146].mxu1 }
 0x8d5   :  { %17200 = vst [vmem:[#allocation12_spill] sm:$0xff] %v16002_v15  ;;  %v8121_v17 = vpop.f32.mrb[147].mxu1 }
 0x8d6   :  { %v11997_v17 = vld [vmem:[%s16578_s3 + $0x350] ss:$12 sps:$4 sm:$0xff]  }
 0x8d7   :  { %10326 = vmatmul.mubr.bf16.gmra.mrb[164].mxu1 %v11993_v62 }
 0x8d8   :  { %10329 = vmatprep.mubr.bf16.mxu1 %v11994_v22  ;;  %v11998_v22 = vld [vmem:[%s16578_s3 + $0x368] ss:$12 sps:$4 sm:$0xff]  }
 0x8da   :  { %v16004_v21 = vpop.f32.mrb[168].mxu1 }
 0x8db   :  { %17201 = vst [vmem:[#allocation66_spill] sm:$0xff] %v16004_v21  ;;  %v8126_v57 = vpop.f32.mrb[169].mxu1 }
 0x8dc   :  { %v16012_v37 = vpop.f32.mrb[170].mxu1 }
 0x8dd   :  { %17202 = vst [vmem:[#allocation48_spill] sm:$0xff] %v16012_v37  ;;  %v8129_v13 = vpop.f32.mrb[171].mxu1 }
 0x8de   :  { %v11999_v13 = vld [vmem:[%s16578_s3 + $0x380] ss:$12 sps:$4 sm:$0xff]  }
 0x8df   :  { %10330 = vmatmul.mubr.bf16.gmra.mrb[0].mxu1 %v11995_v46 }
 0x8e0   :  { %10333 = vmatprep.mubr.bf16.mxu1 %v11996_v11  ;;  %v12000_v11 = vld [vmem:[%s16578_s3 + $0x398] ss:$12 sps:$4 sm:$0xff]  }
 0x8e2   :  { %v16014_v15 = vpop.f32.mrb[172].mxu1 }
 0x8e3   :  { %17203 = vst [vmem:[#allocation67_spill] sm:$0xff] %v16014_v15  ;;  %v8134_v62 = vpop.f32.mrb[173].mxu1 }
 0x8e4   :  { %v16022_v57 = vpop.f32.mrb[174].mxu1 }
 0x8e5   :  { %17204 = vst [vmem:[#allocation97_spill] sm:$0xff] %v16022_v57  ;;  %v8137_v21 = vpop.f32.mrb[175].mxu1 }
 0x8e6   :  { %v12001_v21 = vld [vmem:[%s16578_s3 + $0x3b0] ss:$12 sps:$4 sm:$0xff]  }
 0x8e7   :  { %10334 = vmatmul.mubr.bf16.gmra.mrb[4].mxu1 %v11997_v17 }
 0x8e8   :  { %10337 = vmatprep.mubr.bf16.mxu1 %v11998_v22  ;;  %v12002_v22 = vld [vmem:[%s16578_s3 + $0x3c8] ss:$12 sps:$4 sm:$0xff]  }
 0x8ea   :  { %v16024_v37 = vpop.f32.mrb[176].mxu1 }
 0x8eb   :  { %17205 = vst [vmem:[#allocation13_spill] sm:$0xff] %v16024_v37  ;;  %v8142_v46 = vpop.f32.mrb[177].mxu1 }
 0x8ec   :  { %v16032_v62 = vpop.f32.mrb[178].mxu1 }
 0x8ed   :  { %17206 = vst [vmem:[#allocation49_spill] sm:$0xff] %v16032_v62  ;;  %v8145_v15 = vpop.f32.mrb[179].mxu1 }
 0x8ee   :  { %v12003_v15 = vld [vmem:[%s16578_s3 + $0x3e0] ss:$12 sps:$4 sm:$0xff]  }
 0x8ef   :  { %10338 = vmatmul.mubr.bf16.gmra.mrb[8].mxu1 %v11999_v13 }
 0x8f0   :  { %10341 = vmatprep.mubr.bf16.mxu1 %v12000_v11  ;;  %v12004_v11 = vld [vmem:[%s16578_s3 + $0x3f8] ss:$12 sps:$4 sm:$0xff]  }
 0x8f2   :  { %v16034_v57 = vpop.f32.mrb[180].mxu1 }
 0x8f3   :  { %17207 = vst [vmem:[#allocation98_spill] sm:$0xff] %v16034_v57  ;;  %v8150_v17 = vpop.f32.mrb[181].mxu1 }
 0x8f4   :  { %v16042_v46 = vpop.f32.mrb[182].mxu1 }
 0x8f5   :  { %17208 = vst [vmem:[#allocation14_spill] sm:$0xff] %v16042_v46  ;;  %v8153_v37 = vpop.f32.mrb[183].mxu1 }
 0x8f6   :  { %v12005_v37 = vld [vmem:[%s16578_s3 + $0x410] ss:$12 sps:$4 sm:$0xff]  }
 0x8f7   :  { %10342 = vmatmul.mubr.bf16.gmra.mrb[12].mxu1 %v12001_v21 }
 0x8f8   :  { %10345 = vmatprep.mubr.bf16.mxu1 %v12002_v22  ;;  %v12006_v22 = vld [vmem:[%s16578_s3 + $0x428] ss:$12 sps:$4 sm:$0xff]  }
 0x8fa   :  { %v16044_v62 = vpop.f32.mrb[184].mxu1 }
 0x8fb   :  { %17209 = vst [vmem:[#allocation70_spill] sm:$0xff] %v16044_v62  ;;  %v8158_v13 = vpop.f32.mrb[185].mxu1 }
 0x8fc   :  { %v16052_v17 = vpop.f32.mrb[186].mxu1 }
 0x8fd   :  { %17210 = vst [vmem:[#allocation50_spill] sm:$0xff] %v16052_v17  ;;  %v8161_v57 = vpop.f32.mrb[187].mxu1 }
 0x8fe   :  { %v12007_v57 = vld [vmem:[%s16578_s3 + $0x440] ss:$12 sps:$4 sm:$0xff]  }
 0x8ff   :  { %10346 = vmatmul.mubr.bf16.gmra.mrb[16].mxu1 %v12003_v15 }
 0x900   :  { %10349 = vmatprep.mubr.bf16.mxu1 %v12004_v11  ;;  %v12008_v11 = vld [vmem:[%s16578_s3 + $0x458] ss:$12 sps:$4 sm:$0xff]  }
 0x902   :  { %v16054_v46 = vpop.f32.mrb[188].mxu1 }
 0x903   :  { %17211 = vst [vmem:[#allocation71_spill] sm:$0xff] %v16054_v46  ;;  %v8166_v21 = vpop.f32.mrb[189].mxu1 }
 0x904   :  { %v16062_v13 = vpop.f32.mrb[190].mxu1 }
 0x905   :  { %17212 = vst [vmem:[#allocation99_spill] sm:$0xff] %v16062_v13  ;;  %v8169_v62 = vpop.f32.mrb[191].mxu1 }
 0x906   :  { %v12009_v62 = vld [vmem:[%s16578_s3 + $0x470] ss:$12 sps:$4 sm:$0xff]  }
 0x907   :  { %10350 = vmatmul.mubr.bf16.gmra.mrb[20].mxu1 %v12005_v37 }
 0x908   :  { %10353 = vmatprep.mubr.bf16.mxu1 %v12006_v22 }
 0x90a   :  { %v16064_v17 = vpop.f32.mrb[192].mxu1 }
 0x90b   :  { %17213 = vst [vmem:[#allocation15_spill] sm:$0xff] %v16064_v17  ;;  %v8174_v15 = vpop.f32.mrb[193].mxu1 }
 0x90c   :  { %v16072_v21 = vpop.f32.mrb[194].mxu1 }
 0x90d   :  { %17214 = vst [vmem:[#allocation51_spill] sm:$0xff] %v16072_v21  ;;  %v8177_v46 = vpop.f32.mrb[195].mxu1 }
 0x90f   :  { %10354 = vmatmul.mubr.bf16.gmra.mrb[24].mxu1 %v12007_v57 }
 0x910   :  { %10357 = vmatprep.mubr.bf16.mxu1 %v12008_v11 }
 0x912   :  { %v16074_v13 = vpop.f32.mrb[196].mxu1 }
 0x913   :  { %17215 = vst [vmem:[#allocation100_spill] sm:$0xff] %v16074_v13  ;;  %v8182_v37 = vpop.f32.mrb[197].mxu1 }
 0x914   :  { %v16079_v22 = vpop.f32.mrb[198].mxu1 }
 0x915   :  { %17216 = vst [vmem:[#allocation16_spill] sm:$0xff] %v16079_v22  ;;  %v8185_v17 = vpop.f32.mrb[199].mxu1 }
 0x917   :  { %10358 = vmatmul.mubr.bf16.gmra.mrb[28].mxu1 %v12009_v62 }
 0x91a   :  { %v16081_v15 = vpop.f32.mrb[200].mxu1 }
 0x91b   :  { %17217 = vst [vmem:[#allocation52_spill] sm:$0xff] %v16081_v15  ;;  %v8190_v51 = vpop.f32.mrb[201].mxu1 }
 0x91c   :  { %v16083_v49 = vpop.f32.mrb[202].mxu1 }
 0x91d   :  { %17218 = vst [vmem:[#allocation74_spill] sm:$0xff] %v16083_v49  ;;  %v8193_v21 = vpop.f32.mrb[203].mxu1 }
 0x922   :  { %v16085_v46 = vpop.f32.mrb[204].mxu1 }
 0x923   :  { %17219 = vst [vmem:[#allocation101_spill] sm:$0xff] %v16085_v46  ;;  %v8198_v57 = vpop.f32.mrb[205].mxu1  ;;  %v17254_v46 = vld [vmem:[#allocation92_spill] sm:$0xff] }
 0x924   :  { %v16087_v11 = vpop.f32.mrb[206].mxu1 }
 0x925   :  { %17220 = vst [vmem:[#allocation17_spill] sm:$0xff] %v16087_v11  ;;  %v8201_v13 = vpop.f32.mrb[207].mxu1 }
 0x92a   :  { %v16089_v23 = vpop.f32.mrb[208].mxu1 }
 0x92b   :  { %17221 = vst [vmem:[#allocation53_spill] sm:$0xff] %v16089_v23  ;;  %v8206_v2 = vpop.f32.mrb[209].mxu1  ;;  %v17255_v23 = vld [vmem:[#allocation91_spill] sm:$0xff] }
 0x92c   :  { %v16091_v37 = vpop.f32.mrb[210].mxu1 }
 0x92d   :  { %17222 = vst [vmem:[#allocation102_spill] sm:$0xff] %v16091_v37  ;;  %v8209_v22 = vpop.f32.mrb[211].mxu1 }
 0x932   :  { %v10267_v17 = vpop.f32.mrb[212].mxu1 }
 0x933   :  { %v16094_v62 = vadd.f32 %v10267_v17, %v15644_v58  ;;  %v8245_v51 = vpop.f32.mrb[213].mxu1 }
 0x934   :  { %v16097_v49 = vadd.f32 %v8245_v51, %v15634_v59  ;;  %v10268_v21 = vpop.f32.mrb[214].mxu1 }
 0x935   :  { %v16100_v57 = vadd.f32 %v10268_v21, %v15652_v0  ;;  %v8248_v11 = vpop.f32.mrb[215].mxu1 }
 0x936   :  { %v16103_v13 = vadd.f32 %v8248_v11, %v15642_v10 }
 0x93a   :  { %v10271_v2 = vpop.f32.mrb[216].mxu1 }
 0x93b   :  { %v16106_v37 = vadd.f32 %v10271_v2, %v15664_v44  ;;  %v8261_v22 = vpop.f32.mrb[217].mxu1 }
 0x93c   :  { %v16109_v58 = vadd.f32 %v8261_v22, %v15654_v34  ;;  %v10272_v17 = vpop.f32.mrb[218].mxu1 }
 0x93d   :  { %v16112_v59 = vadd.f32 %v10272_v17, %v15672_v47  ;;  %v8264_v51 = vpop.f32.mrb[219].mxu1 }
 0x93e   :  { %v16115_v0 = vadd.f32 %v8264_v51, %v15662_v52 }
 0x942   :  { %v10275_v21 = vpop.f32.mrb[220].mxu1 }
 0x943   :  { %v16118_v10 = vadd.f32 %v10275_v21, %v15684_v12  ;;  %v8277_v11 = vpop.f32.mrb[221].mxu1 }
 0x944   :  { %v16121_v44 = vadd.f32 %v8277_v11, %v15674_v8  ;;  %v10276_v2 = vpop.f32.mrb[222].mxu1 }
 0x945   :  { %v16124_v34 = vadd.f32 %v10276_v2, %v15692_v1  ;;  %v8280_v22 = vpop.f32.mrb[223].mxu1 }
 0x946   :  { %v16127_v47 = vadd.f32 %v8280_v22, %v15682_v26 }
 0x94a   :  { %v10279_v17 = vpop.f32.mrb[224].mxu1 }
 0x94b   :  { %v16130_v52 = vadd.f32 %v10279_v17, %v15704_v54  ;;  %v8293_v51 = vpop.f32.mrb[225].mxu1 }
 0x94c   :  { %v16133_v12 = vadd.f32 %v8293_v51, %v15694_v53  ;;  %v10280_v21 = vpop.f32.mrb[226].mxu1 }
 0x94d   :  { %v16136_v8 = vadd.f32 %v10280_v21, %v15712_v36  ;;  %v8296_v11 = vpop.f32.mrb[227].mxu1 }
 0x94e   :  { %17223 = vst [vmem:[#allocation18_spill] sm:$0xff] %v16133_v12  ;;  %v16139_v1 = vadd.f32 %v8296_v11, %v15702_v40 }
 0x94f   :  { %17224 = vst [vmem:[#allocation54_spill] sm:$0xff] %v16136_v8 }
 0x950   :  { %17225 = vst [vmem:[#allocation103_spill] sm:$0xff] %v16139_v1 }
 0x952   :  { %v10283_v2 = vpop.f32.mrb[228].mxu1 }
 0x953   :  { %v16142_v26 = vadd.f32 %v10283_v2, %v15724_v32  ;;  %v8309_v22 = vpop.f32.mrb[229].mxu1 }
 0x954   :  { %v16145_v54 = vadd.f32 %v8309_v22, %v15714_v18  ;;  %v10284_v17 = vpop.f32.mrb[230].mxu1 }
 0x955   :  { %17226 = vst [vmem:[#allocation19_spill] sm:$0xff] %v16142_v26  ;;  %v16148_v53 = vadd.f32 %v10284_v17, %v15732_v9  ;;  %v8312_v51 = vpop.f32.mrb[231].mxu1 }
 0x956   :  { %17227 = vst [vmem:[#allocation55_spill] sm:$0xff] %v16145_v54  ;;  %v16151_v36 = vadd.f32 %v8312_v51, %v15722_v30 }
 0x957   :  { %17228 = vst [vmem:[#allocation104_spill] sm:$0xff] %v16148_v53  ;;  %v8727_v53 = vpop.permute.xlu0 %8726 }
 0x958   :  { %17229 = vst [vmem:[#allocation20_spill] sm:$0xff] %v16151_v36  ;;  %v17257_v36 = vld [vmem:[#allocation8_spill] sm:$0xff] }
 0x95a   :  { %v10287_v21 = vpop.f32.mrb[232].mxu1 }
 0x95b   :  { %v16154_v40 = vadd.f32 %v10287_v21, %v15744_v6  ;;  %v8325_v11 = vpop.f32.mrb[233].mxu1 }
 0x95c   :  { %v16157_v32 = vadd.f32 %v8325_v11, %v15734_v39  ;;  %v10288_v2 = vpop.f32.mrb[234].mxu1  ;;  %v17246_v39 = vld [vmem:[#allocation88_spill] sm:$0xff] }
 0x95d   :  { %17230 = vst [vmem:[#allocation79_spill] sm:$0xff] %v16154_v40  ;;  %v16160_v18 = vadd.f32 %v10288_v2, %v15752_v20  ;;  %v8328_v22 = vpop.f32.mrb[235].mxu1  ;;  %v17253_v40 = vld [vmem:[#allocation6_spill] sm:$0xff] }
 0x95e   :  { %17231 = vst [vmem:[#allocation56_spill] sm:$0xff] %v16157_v32  ;;  %v16163_v9 = vadd.f32 %v8328_v22, %v15742_v61  ;;  %v17251_v32 = vld [vmem:[#allocation89_spill] sm:$0xff] }
 0x95f   :  { %17232 = vst [vmem:[#allocation80_spill] sm:$0xff] %v16160_v18 }
 0x960   :  { %17233 = vst [vmem:[#allocation105_spill] sm:$0xff] %v16163_v9  ;;  %v17250_v9 = vld [vmem:[#allocation90_spill] sm:$0xff] }
 0x962   :  { %v10291_v17 = vpop.f32.mrb[236].mxu1 }
 0x963   :  { %v16166_v30 = vadd.f32 %v10291_v17, %v15764_v16  ;;  %v8341_v51 = vpop.f32.mrb[237].mxu1 }
 0x964   :  { %v16169_v6 = vadd.f32 %v8341_v51, %v15754_v43  ;;  %v10292_v21 = vpop.f32.mrb[238].mxu1 }
 0x965   :  { %v16174_v11 = vadd.f32 %v10292_v21, %v15772_v5  ;;  %v8344_v20 = vpop.f32.mrb[239].mxu1 }
 0x966   :  { %v16179_v2 = vadd.f32 %v8344_v20, %v15762_v4 }
 0x96a   :  { %v10295_v22 = vpop.f32.mrb[240].mxu1 }
 0x96b   :  { %v16186_v17 = vadd.f32 %v10295_v22, %v15784_v35  ;;  %v8357_v51 = vpop.f32.mrb[241].mxu1 }
 0x96c   :  { %v16189_v5 = vadd.f32 %v8357_v51, %v15774_v31  ;;  %v10296_v21 = vpop.f32.mrb[242].mxu1 }
 0x96d   :  { %v16194_v4 = vadd.f32 %v10296_v21, %v15792_v7  ;;  %v8360_v20 = vpop.f32.mrb[243].mxu1 }
 0x96e   :  { %v16199_v43 = vadd.f32 %v8360_v20, %v15782_v24 }
 0x972   :  { %v10299_v22 = vpop.f32.mrb[244].mxu1 }
 0x973   :  { %v16206_v51 = vadd.f32 %v10299_v22, %v15804_v55  ;;  %v8373_v61 = vpop.f32.mrb[245].mxu1 }
 0x974   :  { %v16209_v7 = vadd.f32 %v8373_v61, %v15794_v63  ;;  %v10300_v21 = vpop.f32.mrb[246].mxu1 }
 0x975   :  { %v16214_v24 = vadd.f32 %v10300_v21, %v15812_v56  ;;  %v8376_v20 = vpop.f32.mrb[247].mxu1 }
 0x976   :  { %v16219_v31 = vadd.f32 %v8376_v20, %v15802_v60 }
 0x97a   :  { %v10303_v61 = vpop.f32.mrb[248].mxu1 }
 0x97b   :  { %v16226_v22 = vadd.f32 %v10303_v61, %v15824_v27  ;;  %v8389_v16 = vpop.f32.mrb[249].mxu1 }
 0x97c   :  { %v16229_v56 = vadd.f32 %v8389_v16, %v15814_v38  ;;  %v10304_v21 = vpop.f32.mrb[250].mxu1  ;;  %v12012_v38 = vld [vmem:[%s16579_s5 + $0x4] ss:$8 sps:$4 sm:$0xff]  }
 0x97d   :  { %17234 = vst [vmem:[#allocation21_spill] sm:$0xff] %v16226_v22  ;;  %v16234_v60 = vadd.f32 %v10304_v21, %v15832_v19  ;;  %v8392_v20 = vpop.f32.mrb[251].mxu1  ;;  %10169 = vmatprep.mubr.msk.bf16.mxu1 %vm9088_vm0, %v12012_v38 }
 0x97e   :  { %17235 = vst [vmem:[#allocation57_spill] sm:$0xff] %v16229_v56  ;;  %v16239_v63 = vadd.f32 %v8392_v20, %v15822_v28  ;;  %v17278_v56 = vld [vmem:[#allocation66_spill] sm:$0xff] }
 0x97f   :  { %17236 = vst [vmem:[#allocation106_spill] sm:$0xff] %v16234_v60  ;;  %v17270_v60 = vld [vmem:[#allocation11_spill] sm:$0xff] }
 0x980   :  { %17237 = vst [vmem:[#allocation22_spill] sm:$0xff] %v16239_v63  ;;  %v17268_v63 = vld [vmem:[#allocation10_spill] sm:$0xff] }
 0x982   :  { %v10307_v19 = vpop.f32.mrb[252].mxu1 }
 0x983   :  { %v16250_v61 = vadd.f32 %v10307_v19, %v15844_v50  ;;  %v8405_v21 = vpop.f32.mrb[253].mxu1 }
 0x984   :  { %v16253_v28 = vadd.f32 %v8405_v21, %v15834_v33  ;;  %v10308_v20 = vpop.f32.mrb[254].mxu1 }
 0x985   :  { %17238 = vst [vmem:[#allocation58_spill] sm:$0xff] %v16250_v61  ;;  %v16258_v55 = vadd.f32 %v10308_v20, %v15852_v48  ;;  %v8408_v35 = vpop.f32.mrb[255].mxu1  ;;  %v17264_v61 = vld [vmem:[#allocation94_spill] sm:$0xff] }
 0x986   :  { %17239 = vst [vmem:[#allocation83_spill] sm:$0xff] %v16253_v28  ;;  %v16263_v38 = vadd.f32 %v8408_v35, %v15842_v25  ;;  %v8732_v28 = vpop.permute.xlu1 %8731 }
 0x987   :  { %17240 = vst [vmem:[#allocation107_spill] sm:$0xff] %v16258_v55  ;;  %v17258_v55 = vld [vmem:[#allocation45_spill] sm:$0xff] }
 0x988   :  { %17241 = vst [vmem:[#allocation23_spill] sm:$0xff] %v16263_v38  ;;  %v17256_v38 = vld [vmem:[#allocation9_spill] sm:$0xff] }
 0x98a   :  { %v10311_v19 = vpop.f32.mrb[148].mxu1 }
 0x98b   :  { %v16270_v21 = vadd.f32 %v10311_v19, %v15864_v41  ;;  %v8421_v27 = vpop.f32.mrb[149].mxu1 }
 0x98c   :  { %v16273_v48 = vadd.f32 %v8421_v27, %v15854_v29  ;;  %v10312_v20 = vpop.f32.mrb[150].mxu1 }
 0x98d   :  { %17242 = vst [vmem:[#allocation59_spill] sm:$0xff] %v16270_v21  ;;  %v16278_v25 = vadd.f32 %v10312_v20, %v15872_v14  ;;  %v8424_v35 = vpop.f32.mrb[151].mxu1  ;;  %v17252_v21 = vld [vmem:[#allocation7_spill] sm:$0xff] }
 0x98e   :  { %17243 = vst [vmem:[#allocation108_spill] sm:$0xff] %v16273_v48  ;;  %v16283_v33 = vadd.f32 %v8424_v35, %v15862_v42  ;;  %v17247_v35 = vld [vmem:[#allocation3_spill] sm:$0xff] }
 0x98f   :  { %17244 = vst [vmem:[#allocation24_spill] sm:$0xff] %v16278_v25  ;;  %v17248_v25 = vld [vmem:[#allocation5_spill] sm:$0xff] }
 0x990   :  { %17245 = vst [vmem:[#allocation60_spill] sm:$0xff] %v16283_v33  ;;  %v17249_v33 = vld [vmem:[#allocation4_spill] sm:$0xff] }
 0x992   :  { %v10315_v27 = vpop.f32.mrb[152].mxu1 }
 0x993   :  { %v16290_v19 = vadd.f32 %v10315_v27, %v15884_v45  ;;  %v8437_v16 = vpop.f32.mrb[153].mxu1 }
 0x994   :  { %v16293_v14 = vadd.f32 %v8437_v16, %v15874_v3  ;;  %v10316_v20 = vpop.f32.mrb[154].mxu1 }
 0x995   :  { %v16296_v50 = vadd.f32 %v10316_v20, %v17246_v39  ;;  %v8440_v42 = vpop.f32.mrb[155].mxu1 }
 0x996   :  { %v16299_v48 = vadd.f32 %v8440_v42, %v17247_v35 }
 0x99a   :  { %v10319_v41 = vpop.f32.mrb[156].mxu1 }
 0x99b   :  { %v16302_v18 = vadd.f32 %v10319_v41, %v17248_v25  ;;  %v8453_v29 = vpop.f32.mrb[157].mxu1 }
 0x99c   :  { %v16305_v45 = vadd.f32 %v8453_v29, %v17249_v33  ;;  %v10320_v27 = vpop.f32.mrb[158].mxu1 }
 0x99d   :  { %v16308_v3 = vadd.f32 %v10320_v27, %v17250_v9  ;;  %v8456_v16 = vpop.f32.mrb[159].mxu1 }
 0x99e   :  { %v16311_v39 = vadd.f32 %v8456_v16, %v17251_v32 }
 0x9a2   :  { %v10323_v20 = vpop.f32.mrb[160].mxu1 }
 0x9a3   :  { %v16314_v42 = vadd.f32 %v10323_v20, %v17252_v21  ;;  %v8469_v35 = vpop.f32.mrb[161].mxu1 }
 0x9a4   :  { %v16317_v25 = vadd.f32 %v8469_v35, %v17253_v40  ;;  %v10324_v41 = vpop.f32.mrb[162].mxu1 }
 0x9a5   :  { %v16320_v33 = vadd.f32 %v10324_v41, %v17254_v46  ;;  %v8472_v29 = vpop.f32.mrb[163].mxu1  ;;  %v17260_v46 = vld [vmem:[#allocation93_spill] sm:$0xff] }
 0x9a6   :  { %v16323_v9 = vadd.f32 %v8472_v29, %v17255_v23  ;;  %v17262_v29 = vld [vmem:[#allocation62_spill] sm:$0xff] }
 0x9aa   :  { %v10327_v27 = vpop.f32.mrb[164].mxu1 }
 0x9ab   :  { %v16326_v32 = vadd.f32 %v10327_v27, %v17256_v38  ;;  %v8485_v16 = vpop.f32.mrb[165].mxu1  ;;  %v8737_v27 = vpop.permute.xlu0 %8736 }
 0x9ac   :  { %v16329_v21 = vadd.f32 %v8485_v16, %v17257_v36  ;;  %v10328_v20 = vpop.f32.mrb[166].mxu1  ;;  %v17266_v16 = vld [vmem:[#allocation46_spill] sm:$0xff] }
 0x9ad   :  { %v16332_v40 = vadd.f32 %v10328_v20, %v17258_v55  ;;  %v8488_v35 = vpop.f32.mrb[167].mxu1  ;;  %v8742_v20 = vpop.permute.xlu1 %8741 }
 0x9ae   :  { %v16335_v41 = vadd.f32 %v8488_v35, %v17260_v46 }
 0x9af   :  { %17259 = vst [vmem:[#allocation109_spill] sm:$0xff] %v16332_v40  ;;  %v8747_v35 = vpop.permute.xlu0 %8746 }
 0x9b0   :  { %17261 = vst [vmem:[#allocation25_spill] sm:$0xff] %v16335_v41 }
 0x9b2   :  { %v10331_v23 = vpop.f32.mrb[0].mxu1 }
 0x9b3   :  { %v16338_v54 = vadd.f32 %v10331_v23, %v17262_v29  ;;  %v8501_v38 = vpop.f32.mrb[1].mxu1  ;;  %v16352_v29 = vpop.permute.xlu1 %8751 }
 0x9b4   :  { %v16341_v26 = vadd.f32 %v8501_v38, %v17264_v61  ;;  %v10332_v36 = vpop.f32.mrb[2].mxu1 }
 0x9b5   :  { %17263 = vst [vmem:[#allocation61_spill] sm:$0xff] %v16338_v54  ;;  %v16344_v15 = vadd.f32 %v10332_v36, %v17266_v16  ;;  %v8504_v55 = vpop.f32.mrb[3].mxu1  ;;  %v17272_v54 = vld [vmem:[#allocation63_spill] sm:$0xff] }
 0x9b6   :  { %17265 = vst [vmem:[#allocation110_spill] sm:$0xff] %v16341_v26  ;;  %v16347_v1 = vadd.f32 %v8504_v55, %v17268_v63  ;;  %v17274_v26 = vld [vmem:[#allocation47_spill] sm:$0xff]  ;;  %v8757_v63 = vpop.permute.xlu0 %8756 }
 0x9b7   :  { %17267 = vst [vmem:[#allocation26_spill] sm:$0xff] %v16344_v15  ;;  %v17276_v15 = vld [vmem:[#allocation95_spill] sm:$0xff]  ;;  %v8762_v55 = vpop.permute.xlu1 %8761 }
 0x9b8   :  { %17269 = vst [vmem:[#allocation128_spill] sm:$0xff] %v16347_v1 }
 0x9ba   :  { %v10335_v46 = vpop.f32.mrb[4].mxu1 }
 0x9bb   :  { %v16350_v8 = vadd.f32 %v10335_v46, %v17270_v60  ;;  %v8517_v23 = vpop.f32.mrb[5].mxu1 }
 0x9bc   :  { %v16355_v61 = vadd.f32 %v8517_v23, %v17272_v54  ;;  %v10336_v38 = vpop.f32.mrb[6].mxu1  ;;  %v17280_v23 = vld [vmem:[#allocation48_spill] sm:$0xff] }
 0x9bd   :  { %17271 = vst [vmem:[#allocation64_spill] sm:$0xff] %v16350_v8  ;;  %v16358_v36 = vadd.f32 %v10336_v38, %v17274_v26  ;;  %v8520_v16 = vpop.f32.mrb[7].mxu1  ;;  %v17279_v8 = vld [vmem:[#allocation96_spill] sm:$0xff]  ;;  %v16367_v26 = vpop.permute.xlu0 %8766 }
 0x9be   :  { %17273 = vst [vmem:[#allocation129_spill] sm:$0xff] %v16355_v61  ;;  %v16361_v41 = vadd.f32 %v8520_v16, %v17276_v15  ;;  %v17281_v15 = vld [vmem:[#allocation12_spill] sm:$0xff] }
 0x9bf   :  { %17275 = vst [vmem:[#allocation111_spill] sm:$0xff] %v16358_v36 }
 0x9c0   :  { %17277 = vst [vmem:[#allocation27_spill] sm:$0xff] %v16361_v41  ;;  %v17282_v41 = vmax.f32 %v16094_v62, %v16166_v30  ;;  %v17285_v62 = vmax.f32 %v16103_v13, %v16179_v2 }
 0x9c2   :  { %v10339_v1 = vpop.f32.mrb[8].mxu1 }
 0x9c3   :  { %v8542_v60 = vadd.f32 %v10339_v1, %v17278_v56  ;;  %v8533_v46 = vpop.f32.mrb[9].mxu1  ;;  %v16375_v56 = vpop.permute.xlu1 %8771 }
 0x9c4   :  { %v8534_v12 = vadd.f32 %v8533_v46, %v17279_v8  ;;  %v10340_v40 = vpop.f32.mrb[10].mxu1  ;;  %v17283_v8 = vmax.f32 %v16097_v49, %v16169_v6  ;;  %v17287_v6 = vld [vmem:[#allocation67_spill] sm:$0xff] }
 0x9c5   :  { %v8654_v54 = vmax.f32 %v16290_v19, %v8542_v60  ;;  %v8545_v61 = vadd.f32 %v10340_v40, %v17280_v23  ;;  %v8536_v22 = vpop.f32.mrb[11].mxu1  ;;  %v8777_v23 = vpop.permute.xlu0 %8776 }
 0x9c6   :  { %v8652_v38 = vmax.f32 %v16293_v14, %v8534_v12  ;;  %v8537_v16 = vadd.f32 %v8536_v22, %v17281_v15  ;;  %v17284_v12 = vmax.f32 %v16100_v57, %v16174_v11  ;;  %v17288_v11 = vld [vmem:[#allocation49_spill] sm:$0xff] }
 0x9c7   :  { %v8678_v36 = vmax.f32 %v17282_v41, %v8654_v54  ;;  %v8655_v1 = vmax.f32 %v16296_v50, %v8545_v61  ;;  %v17286_v61 = vld [vmem:[#allocation13_spill] sm:$0xff] }
 0x9c8   :  { %v8676_v19 = vmax.f32 %v17283_v8, %v8652_v38  ;;  %v8653_v40 = vmax.f32 %v16299_v48, %v8537_v16  ;;  %v8782_v16 = vpop.permute.xlu1 %8781 }
 0x9c9   :  { %v8846_v60 = vadd.f32 %v8737_v27, %v8678_v36  ;;  %v8679_v14 = vmax.f32 %v17284_v12, %v8655_v1  ;;  %v17289_v1 = vld [vmem:[#allocation97_spill] sm:$0xff] }
 0x9ca   :  { %v8844_v22 = vadd.f32 %v8727_v53, %v8676_v19  ;;  %v8677_v30 = vmax.f32 %v17285_v62, %v8653_v40  ;;  %v10343_v41 = vpop.f32.mrb[12].mxu1 }
 0x9cb   :  { %v8847_v50 = vadd.f32 %v8742_v20, %v8679_v14  ;;  %v8558_v46 = vadd.f32 %v10343_v41, %v17286_v61  ;;  %v8549_v54 = vpop.f32.mrb[13].mxu1  ;;  %v8870_v27 = vmax.f32 %v8846_v60, 0.0  ;;  %v16404_v41 = vpop.permute.xlu0 %8786 }
 0x9cc   :  { %v8845_v49 = vadd.f32 %v8732_v28, %v8677_v30  ;;  %v8550_v38 = vadd.f32 %v8549_v54, %v17287_v6  ;;  %v10344_v48 = vpop.f32.mrb[14].mxu1  ;;  %v8868_v13 = vmax.f32 %v8844_v22, 0.0  ;;  %v17290_v28 = vmax.f32 %v16106_v37, %v16186_v17 }
 0x9cd   :  { %v8871_v36 = vmax.f32 %v8847_v50, 0.0  ;;  %v8658_v57 = vmax.f32 %v16302_v18, %v8558_v46  ;;  %v8561_v53 = vadd.f32 %v10344_v48, %v17288_v11  ;;  %v8552_v15 = vpop.f32.mrb[15].mxu1  ;;  %v17291_v18 = vmax.f32 %v16109_v58, %v16189_v5  ;;  %v17294_v58 = vld [vmem:[#allocation70_spill] sm:$0xff] }
 0x9ce   :  { %v8869_v2 = vmax.f32 %v8845_v49, 0.0  ;;  %v8656_v20 = vmax.f32 %v16305_v45, %v8550_v38  ;;  %v8553_v8 = vadd.f32 %v8552_v15, %v17289_v1  ;;  %v17292_v45 = vmax.f32 %v16112_v59, %v16194_v4  ;;  %v17296_v4 = vld [vmem:[#allocation98_spill] sm:$0xff] }
 0x9cf   :  { %v8682_v19 = vmax.f32 %v17290_v28, %v8658_v57  ;;  %v8659_v40 = vmax.f32 %v16308_v3, %v8561_v53  ;;  %v8893_v60 = vpack.c.bf16 %v8871_v36, %v8870_v27  ;;  %v17293_v37 = vmax.f32 %v16115_v0, %v16199_v43  ;;  %v17297_v43 = vld [vmem:[#allocation50_spill] sm:$0xff] }
 0x9d0   :  { %v8680_v12 = vmax.f32 %v17291_v18, %v8656_v20  ;;  %v8657_v14 = vmax.f32 %v16311_v39, %v8553_v8  ;;  %v8892_v62 = vpack.c.bf16 %v8869_v2, %v8868_v13  ;;  %v17295_v39 = vmov 0   ;;  %v17298_v57 = vld [vmem:[#allocation14_spill] sm:$0xff] }
 0x9d1   :  { %v8850_v22 = vadd.f32 %v8757_v63, %v8682_v19  ;;  %v8683_v30 = vmax.f32 %v17292_v45, %v8659_v40  ;;  %v16411_v63 = vpop.permute.xlu1 %8791  ;;  %v17300_v2 = vmax.f32 %v16121_v44, %v16209_v7  ;;  %v17301_v28 = vmax.f32 %v16124_v34, %v16214_v24  ;;  %v17303_v44 = vld [vmem:[#allocation15_spill] sm:$0xff] }
 0x9d2   :  { %v8848_v50 = vadd.f32 %v8747_v35, %v8680_v12  ;;  %v8681_v17 = vmax.f32 %v17293_v37, %v8657_v14  ;;  %v10347_v3 = vpop.f32.mrb[16].mxu1  ;;  %9114 = vmatpush1.bf16.msra.mxu1 %v8892_v62  ;;  %v17306_v37 = vld [vmem:[#allocation99_spill] sm:$0xff] }
 0x9d3   :  { %v8851_v61 = vadd.f32 %v8762_v55, %v8683_v30  ;;  %v8574_v5 = vadd.f32 %v10347_v3, %v17294_v58  ;;  %v8565_v46 = vpop.f32.mrb[17].mxu1  ;;  %9115 = vmatprep.subr.bf16.mxu1 %v17295_v39  ;;  %v8874_v35 = vmax.f32 %v8850_v22, 0.0  ;;  %v17305_v22 = vld [vmem:[#allocation51_spill] sm:$0xff]  ;;  %v17309_v58 = vld [vmem:[#allocation109_spill] sm:$0xff] }
 0x9d4   :  { %v8849_v59 = vadd.f32 %v16352_v29, %v8681_v17  ;;  %v8566_v54 = vadd.f32 %v8565_v46, %v17296_v4  ;;  %v10348_v49 = vpop.f32.mrb[18].mxu1  ;;  %v8872_v55 = vmax.f32 %v8848_v50, 0.0  ;;  %v17299_v29 = vmax.f32 %v16118_v10, %v16206_v51  ;;  %v17311_v4 = vld [vmem:[#allocation57_spill] sm:$0xff] }
 0x9d5   :  { %v8875_v6 = vmax.f32 %v8851_v61, 0.0  ;;  %v8662_v0 = vmax.f32 %v16314_v42, %v8574_v5  ;;  %v8577_v38 = vadd.f32 %v10348_v49, %v17297_v43  ;;  %v8568_v48 = vpop.f32.mrb[19].mxu1  ;;  %v8797_v42 = vpop.permute.xlu0 %8796  ;;  %v17314_v43 = vld [vmem:[#allocation54_spill] sm:$0xff] }
 0x9d6   :  { %v8873_v27 = vmax.f32 %v8849_v59, 0.0  ;;  %v8660_v36 = vmax.f32 %v16317_v25, %v8566_v54  ;;  %v8569_v11 = vadd.f32 %v8568_v48, %v17298_v57  ;;  %9116 = vmatpush1.bf16.msra.mxu1 %v8893_v60  ;;  %v8802_v10 = vpop.permute.xlu1 %8801  ;;  %v17310_v59 = vld [vmem:[#allocation18_spill] sm:$0xff] }
 0x9d7   :  { %v8686_v53 = vmax.f32 %v17299_v29, %v8662_v0  ;;  %v8663_v15 = vmax.f32 %v16320_v33, %v8577_v38  ;;  %9117 = vmatprep.subr.bf16.mxu1 %v17295_v39  ;;  %v8895_v13 = vpack.c.bf16 %v8875_v6, %v8874_v35  ;;  %v17302_v33 = vmax.f32 %v16127_v47, %v16219_v31  ;;  %v17313_v35 = vld [vmem:[#allocation25_spill] sm:$0xff]  ;;  %v17315_v38 = vld [vmem:[#allocation106_spill] sm:$0xff] }
 0x9d8   :  { %v8684_v20 = vmax.f32 %v17300_v2, %v8660_v36  ;;  %v8661_v1 = vmax.f32 %v16323_v9, %v8569_v11  ;;  %v8894_v25 = vpack.c.bf16 %v8873_v27, %v8872_v55  ;;  %v17312_v54 = vmax.f32 %v17310_v59, %v17311_v4  ;;  %v17317_v27 = vld [vmem:[#allocation103_spill] sm:$0xff]  ;;  %v17318_v36 = vld [vmem:[#allocation22_spill] sm:$0xff]  ;;  %v17337_v4 = vld [vmem:[#allocation20_spill] sm:$0xff] }
 0x9d9   :  { %v8854_v8 = vadd.f32 %v8777_v23, %v8686_v53  ;;  %v8687_v19 = vmax.f32 %v17301_v28, %v8663_v15  ;;  %v17304_v23 = vld [vmem:[#allocation71_spill] sm:$0xff]  ;;  %v8807_v45 = vpop.permute.xlu0 %8806  ;;  %v17316_v48 = vmax.f32 %v17314_v43, %v17315_v38  ;;  %v17319_v57 = vmax.f32 %v17317_v27, %v17318_v36  ;;  %v17320_v15 = vld [vmem:[#allocation52_spill] sm:$0xff] }
 0x9da   :  { %v8852_v51 = vadd.f32 %v16367_v26, %v8684_v20  ;;  %v8685_v40 = vmax.f32 %v17302_v33, %v8661_v1  ;;  %v10351_v60 = vpop.f32.mrb[20].mxu1  ;;  %9118 = vmatpush1.bf16.msra.mxu1 %v8894_v25  ;;  %v8812_v46 = vpop.permute.xlu1 %8811  ;;  %v17321_v1 = vld [vmem:[#allocation100_spill] sm:$0xff]  ;;  %v17323_v33 = vld [vmem:[#allocation74_spill] sm:$0xff] }
 0x9db   :  { %v8855_v18 = vadd.f32 %v8782_v16, %v8687_v19  ;;  %v8590_v7 = vadd.f32 %v10351_v60, %v17303_v44  ;;  %v8581_v12 = vpop.f32.mrb[21].mxu1  ;;  %9119 = vmatprep.subr.bf16.mxu1 %v17295_v39  ;;  %v8878_v14 = vmax.f32 %v8854_v8, 0.0  ;;  %v17322_v19 = vld [vmem:[#allocation61_spill] sm:$0xff] }
 0x9dc   :  { %v8853_v9 = vadd.f32 %v16375_v56, %v8685_v40  ;;  %v8582_v34 = vadd.f32 %v8581_v12, %v17304_v23  ;;  %v10352_v24 = vpop.f32.mrb[22].mxu1  ;;  %v8876_v30 = vmax.f32 %v8852_v51, 0.0  ;;  %v17307_v56 = vld [vmem:[#allocation21_spill] sm:$0xff] }
 0x9dd   :  { %v8879_v62 = vmax.f32 %v8855_v18, 0.0  ;;  %v8666_v26 = vmax.f32 %v16326_v32, %v8590_v7  ;;  %v8593_v47 = vadd.f32 %v10352_v24, %v17305_v22  ;;  %v8584_v31 = vpop.f32.mrb[23].mxu1  ;;  %v17308_v3 = vmax.f32 %v16130_v52, %v17307_v56  ;;  %v8817_v20 = vpop.permute.xlu0 %8816  ;;  %v17324_v7 = vld [vmem:[#allocation110_spill] sm:$0xff] }
 0x9de   :  { %v8877_v16 = vmax.f32 %v8853_v9, 0.0  ;;  %v8664_v50 = vmax.f32 %v16329_v21, %v8582_v34  ;;  %v8585_v17 = vadd.f32 %v8584_v31, %v17306_v37  ;;  %9120 = vmatpush1.bf16.msra.mxu1 %v8895_v13  ;;  %v8822_v18 = vpop.permute.xlu1 %8821  ;;  %v17325_v9 = vld [vmem:[#allocation16_spill] sm:$0xff]  ;;  %v17326_v34 = vld [vmem:[#allocation19_spill] sm:$0xff] }
 0x9df   :  { %v8690_v61 = vmax.f32 %v17308_v3, %v8666_v26  ;;  %v8667_v5 = vmax.f32 %v17309_v58, %v8593_v47  ;;  %9121 = vmatprep.subr.bf16.mxu1 %v17295_v39  ;;  %v8897_v32 = vpack.c.bf16 %v8879_v62, %v8878_v14  ;;  %v17329_v62 = vld [vmem:[#allocation26_spill] sm:$0xff]  ;;  %v17330_v47 = vld [vmem:[#allocation55_spill] sm:$0xff]  ;;  %v17334_v3 = vld [vmem:[#allocation104_spill] sm:$0xff] }
 0x9e0   :  { %v8688_v49 = vmax.f32 %v17312_v54, %v8664_v50  ;;  %v8665_v6 = vmax.f32 %v17313_v35, %v8585_v17  ;;  %v8896_v21 = vpack.c.bf16 %v8877_v16, %v8876_v30  ;;  %v17331_v31 = vld [vmem:[#allocation83_spill] sm:$0xff]  ;;  %v17333_v50 = vld [vmem:[#allocation128_spill] sm:$0xff] }
 0x9e1   :  { %v8858_v0 = vadd.f32 %v8797_v42, %v8690_v61  ;;  %v8691_v55 = vmax.f32 %v17316_v48, %v8667_v5  ;;  %v17332_v30 = vmax.f32 %v17330_v47, %v17331_v31  ;;  %v17335_v61 = vld [vmem:[#allocation107_spill] sm:$0xff]  ;;  %v17357_v47 = vld [vmem:[#allocation105_spill] sm:$0xff]  ;;  %v17358_v31 = vld [vmem:[#allocation60_spill] sm:$0xff] }
 0x9e2   :  { %v8856_v52 = vadd.f32 %v16404_v41, %v8688_v49  ;;  %v8689_v11 = vmax.f32 %v17319_v57, %v8665_v6  ;;  %v10355_v29 = vpop.f32.mrb[24].mxu1  ;;  %9122 = vmatpush1.bf16.msra.mxu1 %v8896_v21  ;;  %v17336_v58 = vmax.f32 %v17334_v3, %v17335_v61  ;;  %v17338_v54 = vld [vmem:[#allocation23_spill] sm:$0xff]  ;;  %v8832_v48 = vpop.permute.xlu1 %8831 }
 0x9e3   :  { %v8859_v53 = vadd.f32 %v8802_v10, %v8691_v55  ;;  %v8606_v13 = vadd.f32 %v10355_v29, %v17320_v15  ;;  %v8597_v2 = vpop.f32.mrb[25].mxu1  ;;  %9123 = vmatprep.subr.bf16.mxu1 %v17295_v39  ;;  %v8882_v28 = vmax.f32 %v8858_v0, 0.0  ;;  %v17339_v49 = vmax.f32 %v17337_v4, %v17338_v54  ;;  %v17340_v0 = vld [vmem:[#allocation53_spill] sm:$0xff]  ;;  %v12016_v54 = vld [vmem:[%s16579_s5 + $0x20] ss:$8 sps:$4 sm:$0xff]  }
 0x9e4   :  { %v8857_v42 = vadd.f32 %v16411_v63, %v8689_v11  ;;  %v8598_v25 = vadd.f32 %v8597_v2, %v17321_v1  ;;  %v10356_v8 = vpop.f32.mrb[26].mxu1  ;;  %v8880_v10 = vmax.f32 %v8856_v52, 0.0  ;;  %v17327_v63 = vld [vmem:[#allocation58_spill] sm:$0xff]  ;;  %v17341_v52 = vld [vmem:[#allocation101_spill] sm:$0xff] }
 0x9e5   :  { %v8883_v41 = vmax.f32 %v8859_v53, 0.0  ;;  %v8670_v51 = vmax.f32 %v17322_v19, %v8606_v13  ;;  %v8609_v40 = vadd.f32 %v10356_v8, %v17323_v33  ;;  %v8600_v60 = vpop.f32.mrb[27].mxu1  ;;  %v17328_v24 = vmax.f32 %v17326_v34, %v17327_v63  ;;  %v17343_v53 = vld [vmem:[#allocation102_spill] sm:$0xff]  ;;  %v17354_v63 = vld [vmem:[#allocation80_spill] sm:$0xff] }
 0x9e6   :  { %v8881_v44 = vmax.f32 %v8857_v42, 0.0  ;;  %v8668_v12 = vmax.f32 %v17324_v7, %v8598_v25  ;;  %v8601_v23 = vadd.f32 %v8600_v60, %v17325_v9  ;;  %9124 = vmatpush1.bf16.msra.mxu1 %v8897_v32  ;;  %v8827_v32 = vpop.permute.xlu0 %8826  ;;  %v17344_v42 = vld [vmem:[#allocation129_spill] sm:$0xff] }
 0x9e7   :  { %v8694_v14 = vmax.f32 %v17328_v24, %v8670_v51  ;;  %v8671_v26 = vmax.f32 %v17329_v62, %v8609_v40  ;;  %9125 = vmatprep.subr.bf16.mxu1 %v17295_v39  ;;  %v8899_v22 = vpack.c.bf16 %v8883_v41, %v8882_v28  ;;  %v17345_v25 = vld [vmem:[#allocation17_spill] sm:$0xff]  ;;  %v17346_v28 = vld [vmem:[#allocation79_spill] sm:$0xff]  ;;  %v17355_v24 = vld [vmem:[#allocation24_spill] sm:$0xff] }
 0x9e8   :  { %v8692_v16 = vmax.f32 %v17332_v30, %v8668_v12  ;;  %v8669_v37 = vmax.f32 %v17333_v50, %v8601_v23  ;;  %v8898_v17 = vpack.c.bf16 %v8881_v44, %v8880_v10  ;;  %v17347_v41 = vld [vmem:[#allocation59_spill] sm:$0xff]  ;;  %v17351_v10 = vld [vmem:[#allocation108_spill] sm:$0xff]  ;;  %v17359_v30 = vmax.f32 %v17357_v47, %v17358_v31 }
 0x9e9   :  { %v8862_v56 = vadd.f32 %v8817_v20, %v8694_v14  ;;  %v8695_v5 = vmax.f32 %v17336_v58, %v8671_v26  ;;  %v17349_v51 = vld [vmem:[#allocation111_spill] sm:$0xff]  ;;  %v17356_v14 = vmax.f32 %v17354_v63, %v17355_v24  ;;  %v8842_v26 = vpop.permute.xlu1 %8841  ;;  %v12013_v4 = vld [vmem:[%s16579_s5 + $0x10] ss:$8 sps:$4 sm:$0xff]  }
 0x9ea   :  { %v8860_v59 = vadd.f32 %v8807_v45, %v8692_v16  ;;  %v8693_v35 = vmax.f32 %v17339_v49, %v8669_v37  ;;  %v10359_v6 = vpop.f32.mrb[28].mxu1  ;;  %9126 = vmatpush1.bf16.msra.mxu1 %v8898_v17  ;;  %v17342_v45 = vld [vmem:[#allocation64_spill] sm:$0xff]  ;;  %v8837_v60 = vpop.permute.xlu0 %8836  ;;  %v17353_v12 = vld [vmem:[#allocation27_spill] sm:$0xff] }
 0x9eb   :  { %v8863_v21 = vadd.f32 %v8822_v18, %v8695_v5  ;;  %v8622_v43 = vadd.f32 %v10359_v6, %v17340_v0  ;;  %v8613_v38 = vpop.f32.mrb[29].mxu1  ;;  %9127 = vmatprep.subr.bf16.mxu1 %v17295_v39  ;;  %v8886_v57 = vmax.f32 %v8862_v56, 0.0  ;;  %v17350_v18 = vld [vmem:[#allocation56_spill] sm:$0xff]  ;;  %v12024_v6 = vld [vmem:[%s16579_s5 + $0x44] ss:$8 sps:$4 sm:$0xff]  }
 0x9ec   :  { %v8861_v55 = vadd.f32 %v8812_v46, %v8693_v35  ;;  %v8614_v27 = vadd.f32 %v8613_v38, %v17341_v52  ;;  %v10360_v36 = vpop.f32.mrb[30].mxu1  ;;  %v8884_v2 = vmax.f32 %v8860_v59, 0.0  ;;  %v17348_v46 = vmax.f32 %v17346_v28, %v17347_v41  ;;  %v12015_v59 = vld [vmem:[%s16579_s5 + $0x14] ss:$8 sps:$4 sm:$0xff]   ;;  %v12019_v35 = vld [vmem:[%s16579_s5 + $0x30] ss:$8 sps:$4 sm:$0xff]  }
 0x9ed   :  { %v8887_v11 = vmax.f32 %v8863_v21, 0.0  ;;  %v8674_v29 = vmax.f32 %v17342_v45, %v8622_v43  ;;  %v8625_v15 = vadd.f32 %v10360_v36, %v17343_v53  ;;  %v8616_v13 = vpop.f32.mrb[31].mxu1  ;;  %v17352_v44 = vmax.f32 %v17350_v18, %v17351_v10  ;;  %v12021_v49 = vld [vmem:[%s16579_s5 + $0x34] ss:$8 sps:$4 sm:$0xff]   ;;  %v12022_v21 = vld [vmem:[%s16579_s5 + $0x40] ss:$8 sps:$4 sm:$0xff]  }
 0x9ee   :  { %v8885_v20 = vmax.f32 %v8861_v55, 0.0  ;;  %v8672_v1 = vmax.f32 %v17344_v42, %v8614_v27  ;;  %v8617_v8 = vadd.f32 %v8616_v13, %v17345_v25  ;;  %9128 = vmatpush1.bf16.msra.mxu1 %v8899_v22  ;;  %v12027_v0 = vld [vmem:[%s16579_s5 + $0x54] ss:$8 sps:$4 sm:$0xff]   ;;  %v12025_v43 = vld [vmem:[%s16579_s5 + $0x50] ss:$8 sps:$4 sm:$0xff]   ;;  %v12034_v27 = vld [vmem:[%s16580_s7] sm:$0xff]   ;;  %v8939_v36 = vpop.permute.xlu0 %8938 }
 0x9ef   :  { %v8698_v19 = vmax.f32 %v17348_v46, %v8674_v29  ;;  %v8675_v33 = vmax.f32 %v17349_v51, %v8625_v15  ;;  %9129 = vmatprep.subr.bf16.mxu1 %v17295_v39  ;;  %v8901_v40 = vpack.c.bf16 %v8887_v11, %v8886_v57  ;;  %v12030_v38 = vld [vmem:[%s16579_s5 + $0x64] ss:$8 sps:$4 sm:$0xff]   ;;  %v12033_v55 = vld [vmem:[%s16579_s5 + $0x74] ss:$8 sps:$4 sm:$0xff]   ;;  %v12031_v52 = vld [vmem:[%s16579_s5 + $0x70] ss:$8 sps:$4 sm:$0xff]   ;;  %v8944_v29 = vpop.permute.xlu1 %8943 }
 0x9f0   :  { %v8696_v7 = vmax.f32 %v17352_v44, %v8672_v1  ;;  %v8673_v9 = vmax.f32 %v17353_v12, %v8617_v8  ;;  %v8900_v23 = vpack.c.bf16 %v8885_v20, %v8884_v2 }
 0x9f1   :  { %v8866_v34 = vadd.f32 %v8837_v60, %v8698_v19  ;;  %v8699_v62 = vmax.f32 %v17356_v14, %v8675_v33 }
 0x9f2   :  { %v8864_v22 = vadd.f32 %v8827_v32, %v8696_v7  ;;  %v8697_v16 = vmax.f32 %v17359_v30, %v8673_v9  ;;  %9130 = vmatpush1.bf16.msra.mxu1 %v8900_v23  ;;  %v12010_v32 = vld [vmem:[%s16579_s5] ss:$8 sps:$4 sm:$0xff]   ;;  %v8949_v1 = vpop.permute.xlu0 %8948 }
 0x9f3   :  { %v8867_v50 = vadd.f32 %v8842_v26, %v8699_v62  ;;  %9131 = vmatprep.subr.bf16.mxu1 %v17295_v39  ;;  %v8890_v17 = vmax.f32 %v8866_v34, 0.0  ;;  %v8954_v41 = vpop.permute.xlu1 %8953 }
 0x9f4   :  { %v8865_v37 = vadd.f32 %v8832_v48, %v8697_v16  ;;  %v8888_v3 = vmax.f32 %v8864_v22, 0.0  ;;  %v12028_v48 = vld [vmem:[%s16579_s5 + $0x60] ss:$8 sps:$4 sm:$0xff]  }
 0x9f5   :  { %v8891_v56 = vmax.f32 %v8867_v50, 0.0 }
 0x9f6   :  { %v8889_v61 = vmax.f32 %v8865_v37, 0.0  ;;  %9132 = vmatpush1.bf16.msra.mxu1 %v8901_v40  ;;  %v8959_v18 = vpop.permute.xlu0 %8958 }
 0x9f7   :  { %9133 = vmatprep.subr.bf16.mxu1 %v17295_v39  ;;  %v8903_v58 = vpack.c.bf16 %v8891_v56, %v8890_v17  ;;  %v8964_v12 = vpop.permute.xlu1 %8963 }
 0x9f8   :  { %v8902_v5 = vpack.c.bf16 %v8889_v61, %v8888_v3 }
 0x9fa   :  { %9134 = vmatpush1.bf16.msra.mxu1 %v8902_v5  ;;  %v8969_v62 = vpop.permute.xlu0 %8968 }
 0x9fb   :  { %9135 = vmatprep.subr.bf16.mxu1 %v17295_v39  ;;  %v12018_v39 = vld [vmem:[%s16579_s5 + $0x24] ss:$8 sps:$4 sm:$0xff]   ;;  %v8974_v31 = vpop.permute.xlu1 %8973 }
 0x9fe   :  { %9136 = vmatpush1.bf16.msra.mxu1 %v8903_v58  ;;  %v8979_v3 = vpop.permute.xlu0 %8978 }
 0xa01   :  { %9146 = vmatmul.mubr.bf16.vlgmr.msra.gmra.mrb[32].mxu1 %v12010_v32  ;;  %v8984_v32 = vpop.permute.xlu1 %8983 }
 0xa02   :  { %10170 = vmatprep.mubr.msk.bf16.mxu1 %vm9088_vm0, %v12015_v59 }
 0xa09   :  { %9154 = vmatmul.mubr.bf16.gmra.mrb[36].mxu1 %v12013_v4 }
 0xa0a   :  { %10171 = vmatprep.mubr.msk.bf16.mxu1 %vm9088_vm0, %v12018_v39 }
 0xa11   :  { %9162 = vmatmul.mubr.bf16.gmra.mrb[40].mxu1 %v12016_v54 }
 0xa12   :  { %10172 = vmatprep.mubr.msk.bf16.mxu1 %vm9088_vm0, %v12021_v49 }
 0xa19   :  { %9170 = vmatmul.mubr.bf16.gmra.mrb[44].mxu1 %v12019_v35 }
 0xa1a   :  { %10173 = vmatprep.mubr.msk.bf16.mxu1 %vm9088_vm0, %v12024_v6  ;;  %v8989_v6 = vpop.permute.xlu0 %8988 }
 0xa21   :  { %9178 = vmatmul.mubr.bf16.gmra.mrb[48].mxu1 %v12022_v21 }
 0xa22   :  { %10174 = vmatprep.mubr.msk.bf16.mxu1 %vm9088_vm0, %v12027_v0 }
 0xa29   :  { %9186 = vmatmul.mubr.bf16.gmra.mrb[52].mxu1 %v12025_v43 }
 0xa2a   :  { %10175 = vmatprep.mubr.msk.bf16.mxu1 %vm9088_vm0, %v12030_v38  ;;  %v8994_v38 = vpop.permute.xlu1 %8993 }
 0xa31   :  { %9194 = vmatmul.mubr.bf16.gmra.mrb[56].mxu1 %v12028_v48 }
 0xa32   :  { %10176 = vmatprep.mubr.msk.bf16.mxu1 %vm9088_vm0, %v12033_v55 }
 0xa39   :  { %9202 = vmatmul.mubr.bf16.gmra.mrb[60].mxu1 %v12031_v52 }
 0xa3a   :  { %10377 = vmatprep.mubr.bf16.mxu1 %v12034_v27 }
 0xad4   :  { %v9147_v57 = vpop.f32.mrb[32].mxu1 }
 0xad5   :  { %v9148_v11 = vadd.f32 %v9147_v57, %v8939_v36  ;;  %v9149_v45 = vpop.f32.mrb[33].mxu1 }
 0xad6   :  { %v9150_v53 = vpop.f32.mrb[34].mxu1 }
 0xad7   :  { %v9151_v15 = vadd.f32 %v9150_v53, %v8944_v29  ;;  %v9152_v13 = vpop.f32.mrb[35].mxu1  ;;  %v9210_v2 = vmax.f32 %v9148_v11, 0.0  ;;  %v8999_v11 = vpop.permute.xlu0 %8998 }
 0xad9   :  { %v9211_v20 = vmax.f32 %v9151_v15, 0.0  ;;  %v9004_v15 = vpop.permute.xlu1 %9003 }
 0xadb   :  { %v9226_v42 = vpack.c.bf16 %v9211_v20, %v9210_v2 }
 0xadc   :  { %v9155_v25 = vpop.f32.mrb[36].mxu1 }
 0xadd   :  { %v9156_v8 = vadd.f32 %v9155_v25, %v8949_v1  ;;  %v9157_v28 = vpop.f32.mrb[37].mxu1  ;;  %10361 = vmatprep.subr.bf16.mxu1 %v9226_v42 }
 0xade   :  { %v9158_v46 = vpop.f32.mrb[38].mxu1  ;;  %10362 = vmatpush3.bf16.msra.mxu1 %v9226_v42 }
 0xadf   :  { %v9159_v19 = vadd.f32 %v9158_v46, %v8954_v41  ;;  %v9160_v51 = vpop.f32.mrb[39].mxu1  ;;  %v9212_v33 = vmax.f32 %v9156_v8, 0.0  ;;  %v9009_v8 = vpop.permute.xlu0 %9008 }
 0xae1   :  { %v9213_v40 = vmax.f32 %v9159_v19, 0.0  ;;  %v9014_v19 = vpop.permute.xlu1 %9013 }
 0xae3   :  { %v9227_v60 = vpack.c.bf16 %v9213_v40, %v9212_v33 }
 0xae4   :  { %v9163_v10 = vpop.f32.mrb[40].mxu1 }
 0xae5   :  { %v9164_v44 = vadd.f32 %v9163_v10, %v8959_v18  ;;  %v9165_v7 = vpop.f32.mrb[41].mxu1  ;;  %10363 = vmatprep.subr.bf16.mxu1 %v9227_v60 }
 0xae6   :  { %v9166_v9 = vpop.f32.mrb[42].mxu1  ;;  %10364 = vmatpush3.bf16.msra.mxu1 %v9227_v60  ;;  %v12037_v7 = vmov 0.0  }
 0xae7   :  { %v9167_v23 = vadd.f32 %v9166_v9, %v8964_v12  ;;  %v9168_v34 = vpop.f32.mrb[43].mxu1  ;;  %v9214_v63 = vmax.f32 %v9164_v44, 0.0  ;;  %v12035_v44 = vld [vmem:[%s16580_s7 + $0x8] sm:$0xff]   ;;  %v9245_v12 = vpop.permute.xlu0 %9244 }
 0xae8   :  { %v9250_v9 = vpop.permute.xlu1 %9249 }
 0xae9   :  { %v9215_v24 = vmax.f32 %v9167_v23, 0.0 }
 0xaeb   :  { %v9228_v14 = vpack.c.bf16 %v9215_v24, %v9214_v63  ;;  %v9255_v23 = vpop.permute.xlu0 %9254 }
 0xaec   :  { %v9171_v26 = vpop.f32.mrb[44].mxu1 }
 0xaed   :  { %v9172_v22 = vadd.f32 %v9171_v26, %v8969_v62  ;;  %v9173_v47 = vpop.f32.mrb[45].mxu1  ;;  %10365 = vmatprep.subr.bf16.mxu1 %v9228_v14 }
 0xaee   :  { %v9174_v30 = vpop.f32.mrb[46].mxu1  ;;  %10366 = vmatpush3.bf16.msra.mxu1 %v9228_v14  ;;  %v9260_v14 = vpop.permute.xlu1 %9259 }
 0xaef   :  { %v9175_v16 = vadd.f32 %v9174_v30, %v8974_v31  ;;  %v9176_v50 = vpop.f32.mrb[47].mxu1  ;;  %v9216_v37 = vmax.f32 %v9172_v22, 0.0 }
 0xaf1   :  { %v9217_v17 = vmax.f32 %v9175_v16, 0.0 }
 0xaf3   :  { %v9229_v56 = vpack.c.bf16 %v9217_v17, %v9216_v37 }
 0xaf4   :  { %v9179_v61 = vpop.f32.mrb[48].mxu1 }
 0xaf5   :  { %v9180_v58 = vadd.f32 %v9179_v61, %v8979_v3  ;;  %v9181_v5 = vpop.f32.mrb[49].mxu1  ;;  %10367 = vmatprep.subr.bf16.mxu1 %v9229_v56  ;;  %v9329_v3 = vld [vmem:[%s16581_s9] sm:$0xf]  ;;  %v9334_v61 = vpop.permute.xlu0 %9333 }
 0xaf6   :  { %v9182_v59 = vpop.f32.mrb[50].mxu1  ;;  %10368 = vmatpush3.bf16.msra.mxu1 %v9229_v56 }
 0xaf7   :  { %v9183_v4 = vadd.f32 %v9182_v59, %v8984_v32  ;;  %v9184_v39 = vpop.f32.mrb[51].mxu1  ;;  %v9218_v54 = vmax.f32 %v9180_v58, 0.0 }
 0xaf9   :  { %v9219_v49 = vmax.f32 %v9183_v4, 0.0 }
 0xafb   :  { %v9230_v35 = vpack.c.bf16 %v9219_v49, %v9218_v54 }
 0xafc   :  { %v9187_v21 = vpop.f32.mrb[52].mxu1 }
 0xafd   :  { %v9188_v0 = vadd.f32 %v9187_v21, %v8989_v6  ;;  %v9189_v43 = vpop.f32.mrb[53].mxu1  ;;  %10369 = vmatprep.subr.bf16.mxu1 %v9230_v35 }
 0xafe   :  { %v9190_v48 = vpop.f32.mrb[54].mxu1  ;;  %10370 = vmatpush3.bf16.msra.mxu1 %v9230_v35 }
 0xaff   :  { %v9191_v55 = vadd.f32 %v9190_v48, %v8994_v38  ;;  %v9192_v52 = vpop.f32.mrb[55].mxu1  ;;  %v9220_v27 = vmax.f32 %v9188_v0, 0.0 }
 0xb01   :  { %v9221_v36 = vmax.f32 %v9191_v55, 0.0 }
 0xb03   :  { %v9231_v57 = vpack.c.bf16 %v9221_v36, %v9220_v27 }
 0xb04   :  { %v9195_v45 = vpop.f32.mrb[56].mxu1 }
 0xb05   :  { %v9196_v29 = vadd.f32 %v9195_v45, %v8999_v11  ;;  %v9197_v53 = vpop.f32.mrb[57].mxu1  ;;  %10371 = vmatprep.subr.bf16.mxu1 %v9231_v57 }
 0xb06   :  { %v9198_v13 = vpop.f32.mrb[58].mxu1  ;;  %10372 = vmatpush3.bf16.msra.mxu1 %v9231_v57 }
 0xb07   :  { %v9199_v2 = vadd.f32 %v9198_v13, %v9004_v15  ;;  %v9200_v20 = vpop.f32.mrb[59].mxu1  ;;  %v9222_v42 = vmax.f32 %v9196_v29, 0.0 }
 0xb09   :  { %v9223_v1 = vmax.f32 %v9199_v2, 0.0 }
 0xb0b   :  { %v9232_v25 = vpack.c.bf16 %v9223_v1, %v9222_v42 }
 0xb0c   :  { %v9203_v28 = vpop.f32.mrb[60].mxu1 }
 0xb0d   :  { %v9204_v41 = vadd.f32 %v9203_v28, %v9009_v8  ;;  %v9205_v46 = vpop.f32.mrb[61].mxu1  ;;  %10373 = vmatprep.subr.bf16.mxu1 %v9232_v25 }
 0xb0e   :  { %v9206_v51 = vpop.f32.mrb[62].mxu1  ;;  %10374 = vmatpush3.bf16.msra.mxu1 %v9232_v25 }
 0xb0f   :  { %v9207_v33 = vadd.f32 %v9206_v51, %v9014_v19  ;;  %v9208_v40 = vpop.f32.mrb[63].mxu1  ;;  %v9224_v60 = vmax.f32 %v9204_v41, 0.0 }
 0xb11   :  { %v9225_v18 = vmax.f32 %v9207_v33, 0.0 }
 0xb13   :  { %v9233_v10 = vpack.c.bf16 %v9225_v18, %v9224_v60 }
 0xb15   :  { %10375 = vmatprep.subr.bf16.mxu1 %v9233_v10 }
 0xb16   :  { %10376 = vmatpush3.bf16.msra.mxu1 %v9233_v10 }
 0xb17   :  { %10381 = vmatprep.subr.bf16.mxu1 %v12037_v7 }
 0xb19   :  { %10378 = vmatmul.mubr.bf16.vlgmr.msra.gmra.mrb[64].mxu1 %v12035_v44 }
 0xb1a   :  { %10385 = vmatprep.mubr.msk.bf16.mxu1 %vm12038_vm1, %v12037_v7 }
 0xbec   :  { %v10379_v34 = vpop.f32.mrb[64].mxu1 }
 0xbed   :  { %v9317_v63 = vadd.f32 %v10379_v34, %v9255_v23  ;;  %v9308_v24 = vpop.f32.mrb[65].mxu1 }
 0xbee   :  { %v9309_v62 = vadd.f32 %v9308_v24, %v9245_v12  ;;  %v10380_v26 = vpop.f32.mrb[66].mxu1 }
 0xbef   :  { %v9320_v22 = vadd.f32 %v10380_v26, %v9260_v14  ;;  %v9311_v47 = vpop.f32.mrb[67].mxu1  ;;  %v9325_v30 = vmax.f32 %v9317_v63, 0.0 }
 0xbf0   :  { %v9312_v31 = vadd.f32 %v9311_v47, %v9250_v9  ;;  %v9323_v50 = vmax.f32 %v9309_v62, 0.0 }
 0xbf1   :  { %v9326_v16 = vmax.f32 %v9320_v22, 0.0 }
 0xbf2   :  { %v9324_v37 = vmax.f32 %v9312_v31, 0.0 }
 0xbf3   :  { %v9328_v17 = vpack.c.bf16 %v9326_v16, %v9325_v30 }
 0xbf4   :  { %v9327_v56 = vpack.c.bf16 %v9324_v37, %v9323_v50 }
 0xbf6   :  { %10382 = vmatpush3.bf16.msra.mxu1 %v9327_v56 }
 0xbf7   :  { %10383 = vmatprep.subr.bf16.mxu1 %v12037_v7 }
 0xbfa   :  { %10384 = vmatpush3.bf16.msra.mxu1 %v9328_v17 }
 0xbfd   :  { %10386 = vmatmul.mubr.msk.bf16.vlgmr.msra.gmra.mrb[68].mxu1 %vm9336_vm2, %v9329_v3 }
 0xcd0   :  { %v9374_v58 = vpop.f32.mrb[68].mxu1 }
 0xcd1   :  { %v9375_v5 = vadd.f32 %v9374_v58, %v9334_v61  ;;  %v10387_v32 = vpop.f32.mrb[69].mxu1 }
 0xcd2   :  { %v9377_v59 = vpop.f32.mrb[70].mxu1 }
 0xcd3   :  { %9380 = vst [vmem:[%s16582_s11] sm:$0xff] %v9375_v5  ;;  %v10388_v4 = vpop.f32.mrb[71].mxu1 }

</bundles_post_ra>
